<compile_context>
chip_gen: v7x
topology: tpu7x:2x2x1
jax: 0.10.0
libtpu: 0.0.40
codegen_flags: <defaults>
</compile_context>

<pallas_src>
import math

import numpy as np

import jax
import jax.numpy as jnp
from jax import lax
from jax.experimental import pallas as pl
from jax.experimental.pallas import tpu as pltpu

BN_EPS = 1e-5
C_REAL = 64      # real channel width of every conv layer
C_PAD = 128      # channel width zero-padded to one full 128-lane group


def _encoder_kernel(x_ref, w1b_ref, w234_ref, gb_ref, out_ref,
                    xph_ref, conv1_ref, pad2_ref):
    Nb, H1, W1 = x_ref.shape            # (2, 16, 16)
    Cp = out_ref.shape[-1]              # 128 (padded channel width)
    H2, W2 = H1 // 2, W1 // 2           # 8, 8 (after MaxPool2d(2))
    P1 = Nb * H1 * W1                   # 512 layer-1 pixels
    P2 = Nb * H2 * W2                   # 128 pixels for layers 2-4

    def bn_coeffs(csum, csum2, count, layer):
        # single-pass batch stats: var = E[x^2] - mean^2 (biased, torch train mode)
        mean = csum * (1.0 / count)
        var = jnp.maximum(csum2 * (1.0 / count) - mean * mean, 0.0)
        gamma = gb_ref[2 * layer:2 * layer + 1, :]
        beta = gb_ref[2 * layer + 1:2 * layer + 2, :]
        scale = gamma * lax.rsqrt(var + BN_EPS)
        shift = beta - mean * scale
        return scale, shift

    # ------------- layer 1: conv(1->64) + BN + ReLU + MaxPool2d(2) -------------
    xph_ref[...] = jnp.zeros_like(xph_ref)            # H-padded input (W padding
    xph_ref[:, 1:H1 + 1, :] = x_ref[...]              #  is folded into W1B)
    pad2_ref[...] = jnp.zeros_like(pad2_ref)          # zero halo for layers 2-4

    # banded-matmul LHS: A[(n,h), (dh, j)] = xph[n, h+dh, j]  -> (Nb*H1, 3*W1)
    a_op = jnp.concatenate(
        [xph_ref[:, dh:dh + H1, :].reshape(Nb * H1, W1) for dh in range(3)],
        axis=1)

    # slab[(n,h), (w, co)] = A @ W1B, computed in 128-lane-aligned N chunks with
    # the BN sums accumulated in the epilogue while each tile is still in vregs.
    lane_chunk = 4 * Cp                               # 4 output columns (w) per chunk
    csum = jnp.zeros((1, Cp), jnp.float32)
    csum2 = jnp.zeros((1, Cp), jnp.float32)
    for c0 in range(0, W1 * Cp, lane_chunk):
        s = jnp.dot(a_op, w1b_ref[:, c0:c0 + lane_chunk],
                    preferred_element_type=jnp.float32)          # (Nb*H1, 512)
        conv1_ref[:, c0:c0 + lane_chunk] = s
        ls = jnp.sum(s, axis=0, keepdims=True)                   # (1, 512)
        ls2 = jnp.sum(s * s, axis=0, keepdims=True)
        csum = csum + jnp.sum(ls.reshape(lane_chunk // Cp, Cp),
                              axis=0, keepdims=True)
        csum2 = csum2 + jnp.sum(ls2.reshape(lane_chunk // Cp, Cp),
                                axis=0, keepdims=True)

    scale, shift = bn_coeffs(csum, csum2, float(P1), 0)
    # broadcast per-channel coeffs once to the slab's (w, co) lane layout (hoisted)
    scale_l = jnp.concatenate([scale] * W1, axis=1)   # (1, W1*Cp)
    shift_l = jnp.concatenate([shift] * W1, axis=1)

    # normalize + ReLU + 2x2/2 max-pool, 8 slab rows (one n, half image) at a time;
    # the pooled tile goes straight into pad2's interior (full-128-lane stores).
    for n in range(Nb):
        for hh in range(2):
            r0 = n * H1 + hh * (H1 // 2)
            y = jnp.maximum(conv1_ref[r0:r0 + H1 // 2, :] * scale_l + shift_l, 0.0)
            yr = y.reshape(H1 // 4, 2, W1 * Cp)
            yh = jnp.maximum(yr[:, 0, :], yr[:, 1, :])            # h-pool -> (4, W1*Cp)
            ywr = yh.reshape(H1 // 4, W2, 2, Cp)
            yw = jnp.maximum(ywr[:, :, 0, :], ywr[:, :, 1, :])    # w-pool -> (4, W2, Cp)
            h0 = 1 + hh * (H2 // 2)
            pad2_ref[n:n + 1, h0:h0 + H2 // 2, 1:W2 + 1, :] = (
                yw.reshape(1, H2 // 2, W2, Cp))

    # ------------- layers 2-4: conv(64->64) + BN + ReLU ------------------------
    for li in range(3):
        conv = None
        for k in range(9):                                        # 9 taps, all aligned
            dh, dw = k // 3, k % 3
            tap = pad2_ref[:, dh:dh + H2, dw:dw + W2, :].reshape(P2, Cp)
            part = jnp.dot(tap, w234_ref[li * 9 + k],
                           preferred_element_type=jnp.float32)    # (P2, Cp)
            conv = part if conv is None else conv + part
        s1 = jnp.sum(conv, axis=0, keepdims=True)                 # fused BN stats
        s2 = jnp.sum(conv * conv, axis=0, keepdims=True)
        scale, shift = bn_coeffs(s1, s2, float(P2), li + 1)
        y = jnp.maximum(conv * scale + shift, 0.0)                # (P2, Cp)
        if li < 2:
            pad2_ref[:, 1:H2 + 1, 1:W2 + 1, :] = y.reshape(Nb, H2, W2, Cp)
        else:
            out_ref[...] = y      # lane-dense (P2, 128) -> unmasked full-width store


def cnn_encoder_forward(x_nchw, params):
    """Forward pass matching CNNEncoder.forward. Input/output are NCHW."""
    Nb, Cin, H, W = x_nchw.shape
    assert Cin == 1
    C, Cp = C_REAL, C_PAD
    H2, W2 = H // 2, W // 2

    x = x_nchw.reshape(Nb, H, W).astype(jnp.float32)

    (w1, _b1, g1, t1), (w2, _b2, g2, t2), (w3, _b3, g3, t3), (w4, _b4, g4, t4) = params
    # Conv biases are intentionally dropped: a per-channel constant added before a
    # training-mode BatchNorm cancels exactly in (x - batch_mean).

    # Layer-1 banded weight: slab = A @ W1B with
    #   A[(n,h), (dh,j)]    = x_hpad[n, h+dh, j]
    #   W1B[(dh,j), (w,co)] = w1[dh, j-w+1, 0, co]   (zero outside the 3-tap band)
    band = np.zeros((3, W, W), np.float32)            # band[dw, j, w] = [j == w+dw-1]
    for dw in range(3):
        for wcol in range(W):
            j = wcol + dw - 1
            if 0 <= j < W:
                band[dw, j, wcol] = 1.0
    w1b = jnp.einsum('xjw,dxc->djwc', jnp.asarray(band), w1[:, :, 0, :])   # (3,W,W,C)
    w1b = jnp.pad(w1b, ((0, 0), (0, 0), (0, 0), (0, Cp - C)))
    w1b = w1b.reshape(3 * W, W * Cp)                                        # (48, W*Cp)

    # Layers 2-4: per-tap (Cp, Cp) weight matrices, channels zero-padded to 128.
    def pack_conv(w):
        wp = jnp.pad(w, ((0, 0), (0, 0), (0, Cp - C), (0, Cp - C)))         # (3,3,Cp,Cp)
        return wp.reshape(9, Cp, Cp)                                        # k = dh*3+dw
    w234 = jnp.concatenate([pack_conv(w2), pack_conv(w3), pack_conv(w4)], axis=0)

    # All BN gammas/betas packed into one (8, Cp) table (padded lanes stay zero,
    # which keeps the padded channels exactly zero through every layer).
    gb = jnp.stack([g1[0], t1[0], g2[0], t2[0], g3[0], t3[0], g4[0], t4[0]], axis=0)
    gb = jnp.pad(gb, ((0, 0), (0, Cp - C)))

    vmem = pl.BlockSpec(memory_space=pltpu.MemorySpace.VMEM)
    flops = 2 * (Nb * H * (3 * W) * (W * Cp) + 3 * 9 * Nb * H2 * W2 * Cp * Cp)
    bytes_acc = 4 * (x.size + w1b.size + w234.size + gb.size + Nb * H2 * W2 * Cp)

    out2d = pl.pallas_call(
        _encoder_kernel,
        out_shape=jax.ShapeDtypeStruct((Nb * H2 * W2, Cp), jnp.float32),
        in_specs=[vmem] * 4,
        out_specs=vmem,
        scratch_shapes=[
            pltpu.VMEM((Nb, H + 2, W), jnp.float32),             # xph : H-padded input
            pltpu.VMEM((Nb * H, W * Cp), jnp.float32),           # conv1: layer-1 slab
            pltpu.VMEM((Nb, H2 + 2, W2 + 2, Cp), jnp.float32),   # pad2 : padded acts 2-4
        ],
        cost_estimate=pl.CostEstimate(flops=flops, transcendentals=4 * Cp,
                                      bytes_accessed=bytes_acc),
    )(x, w1b, w234, gb)

    out = out2d.reshape(Nb, H2, W2, Cp)[:, :, :, :C]              # drop padded channels
    return jnp.transpose(out, (0, 3, 1, 2))                       # NHWC -> NCHW


def init_params(key):
    """Deterministic synthetic parameters with the shapes implied by __init__.

    Conv weights are stored HWIO: w[dh, dw, ci, co] == torch_w[co, ci, dh, dw].
    """
    layers = []
    cins = [1, 64, 64, 64]
    cout = 64
    for cin in cins:
        key, k_w, k_b, k_g, k_bt = jax.random.split(key, 5)
        fan_in = cin * 3 * 3
        w = jax.random.normal(k_w, (3, 3, cin, cout), jnp.float32) / math.sqrt(fan_in)
        b = 0.01 * jax.random.normal(k_b, (1, cout), jnp.float32)
        gamma = 1.0 + 0.1 * jax.random.normal(k_g, (1, cout), jnp.float32)
        beta = 0.1 * jax.random.normal(k_bt, (1, cout), jnp.float32)
        layers.append((w, b, gamma, beta))
    return layers


if __name__ == "__main__":
    key = jax.random.PRNGKey(0)
    k_params, k_x = jax.random.split(key)
    params = init_params(k_params)

    # input consistent with the module: batch=2, 1 channel, 16x16 spatial (NCHW)
    x = jax.random.normal(k_x, (2, 1, 16, 16), jnp.float32)

    out = jax.jit(cnn_encoder_forward)(x, params)
    out = jax.block_until_ready(out)

    assert out.shape == (2, 64, 8, 8), out.shape
    assert out.dtype == jnp.float32
    assert bool(jnp.all(jnp.isfinite(out)))
    assert bool(jnp.all(out >= 0.0))  # ReLU output

    print("KERNEL_OK")
</pallas_src>

<mosaic_0001>
module attributes {stable_mosaic.version = 11 : i64} {
  func.func @_encoder_kernel(%arg0: memref<2x16x16xf32, #tpu.memory_space<vmem>>, %arg1: memref<48x2048xf32, #tpu.memory_space<vmem>>, %arg2: memref<27x128x128xf32, #tpu.memory_space<vmem>>, %arg3: memref<8x128xf32, #tpu.memory_space<vmem>>, %arg4: memref<128x128xf32, #tpu.memory_space<vmem>>, %arg5: memref<2x18x16xf32, #tpu.memory_space<vmem>>, %arg6: memref<32x2048xf32, #tpu.memory_space<vmem>>, %arg7: memref<2x10x10x128xf32, #tpu.memory_space<vmem>>) attributes {dimension_semantics = [], scalar_prefetch = 0 : i64, scratch_operands = 3 : i64, tpu.core_type = #tpu.core_type<tc>} {
    %cst = arith.constant 0.000000e+00 : f32
    %0 = vector.broadcast %cst : f32 to vector<2x18x16xf32>
    %c0 = arith.constant 0 : index
    %c0_0 = arith.constant 0 : index
    %c0_1 = arith.constant 0 : index
    %1 = vector.load %arg5[%c0, %c0_0, %c0_1] : memref<2x18x16xf32, #tpu.memory_space<vmem>>, vector<2x18x16xf32>
    tpu.vector_store %arg5[%c0, %c0_0, %c0_1], %0 {strides = array<i32>} : memref<2x18x16xf32, #tpu.memory_space<vmem>>, vector<2x18x16xf32>,
    %c0_2 = arith.constant 0 : index
    %c0_3 = arith.constant 0 : index
    %c0_4 = arith.constant 0 : index
    %2 = vector.load %arg0[%c0_2, %c0_3, %c0_4] : memref<2x16x16xf32, #tpu.memory_space<vmem>>, vector<2x16x16xf32>
    %c0_5 = arith.constant 0 : index
    %c1 = arith.constant 1 : index
    %c0_6 = arith.constant 0 : index
    %3 = vector.load %arg5[%c0_5, %c1, %c0_6] : memref<2x18x16xf32, #tpu.memory_space<vmem>>, vector<2x16x16xf32>
    tpu.vector_store %arg5[%c0_5, %c1, %c0_6], %2 {strides = array<i32>} : memref<2x18x16xf32, #tpu.memory_space<vmem>>, vector<2x16x16xf32>,
    %cst_7 = arith.constant 0.000000e+00 : f32
    %4 = vector.broadcast %cst_7 : f32 to vector<2x10x10x128xf32>
    %c0_8 = arith.constant 0 : index
    %c0_9 = arith.constant 0 : index
    %c0_10 = arith.constant 0 : index
    %c0_11 = arith.constant 0 : index
    %5 = vector.load %arg7[%c0_8, %c0_9, %c0_10, %c0_11] : memref<2x10x10x128xf32, #tpu.memory_space<vmem>>, vector<2x10x10x128xf32>
    tpu.vector_store %arg7[%c0_8, %c0_9, %c0_10, %c0_11], %4 {strides = array<i32>} : memref<2x10x10x128xf32, #tpu.memory_space<vmem>>, vector<2x10x10x128xf32>,
    %c0_12 = arith.constant 0 : index
    %c0_13 = arith.constant 0 : index
    %c0_14 = arith.constant 0 : index
    %6 = vector.load %arg5[%c0_12, %c0_13, %c0_14] : memref<2x18x16xf32, #tpu.memory_space<vmem>>, vector<2x16x16xf32>
    %7 = vector.shape_cast %6 : vector<2x16x16xf32> to vector<32x16xf32>
    %c0_15 = arith.constant 0 : index
    %c1_16 = arith.constant 1 : index
    %c0_17 = arith.constant 0 : index
    %8 = vector.load %arg5[%c0_15, %c1_16, %c0_17] : memref<2x18x16xf32, #tpu.memory_space<vmem>>, vector<2x16x16xf32>
    %9 = vector.shape_cast %8 : vector<2x16x16xf32> to vector<32x16xf32>
    %c0_18 = arith.constant 0 : index
    %c2 = arith.constant 2 : index
    %c0_19 = arith.constant 0 : index
    %10 = vector.load %arg5[%c0_18, %c2, %c0_19] : memref<2x18x16xf32, #tpu.memory_space<vmem>>, vector<2x16x16xf32>
    %11 = vector.shape_cast %10 : vector<2x16x16xf32> to vector<32x16xf32>
    %12 = tpu.concatenate %7, %9, %11 in 1 : vector<32x16xf32>, vector<32x16xf32>, vector<32x16xf32> -> vector<32x48xf32>
    %cst_20 = arith.constant 0.000000e+00 : f32
    %13 = vector.broadcast %cst_20 : f32 to vector<1x128xf32>
    %cst_21 = arith.constant 0.000000e+00 : f32
    %14 = vector.broadcast %cst_21 : f32 to vector<1x128xf32>
    %c0_22 = arith.constant 0 : index
    %c0_23 = arith.constant 0 : index
    %15 = vector.load %arg1[%c0_22, %c0_23] : memref<48x2048xf32, #tpu.memory_space<vmem>>, vector<48x512xf32>
    %cst_24 = arith.constant dense<0.000000e+00> : vector<32x512xf32>
    %16 = tpu.matmul %12, %15, %cst_24 {dimension_numbers = #tpu.dot_dimension_numbers<[1], [0], [0], [1], [0, 0, 1, 1], [], []>} : vector<32x48xf32>, vector<48x512xf32>, vector<32x512xf32> -> vector<32x512xf32>
    %c0_25 = arith.constant 0 : index
    %c0_26 = arith.constant 0 : index
    %17 = vector.load %arg6[%c0_25, %c0_26] : memref<32x2048xf32, #tpu.memory_space<vmem>>, vector<32x512xf32>
    tpu.vector_store %arg6[%c0_25, %c0_26], %16 {strides = array<i32>} : memref<32x2048xf32, #tpu.memory_space<vmem>>, vector<32x512xf32>,
    %cst_27 = arith.constant dense<0.000000e+00> : vector<512xf32>
    %18 = vector.multi_reduction <add>, %16, %cst_27 [0] : vector<32x512xf32> to vector<512xf32>
    %19 = vector.shape_cast %18 : vector<512xf32> to vector<1x512xf32>
    %20 = arith.mulf %16, %16 : vector<32x512xf32>
    %cst_28 = arith.constant dense<0.000000e+00> : vector<512xf32>
    %21 = vector.multi_reduction <add>, %20, %cst_28 [0] : vector<32x512xf32> to vector<512xf32>
    %22 = vector.shape_cast %21 : vector<512xf32> to vector<1x512xf32>
    %23 = vector.shape_cast %19 : vector<1x512xf32> to vector<4x128xf32>
    %cst_29 = arith.constant dense<0.000000e+00> : vector<128xf32>
    %24 = vector.multi_reduction <add>, %23, %cst_29 [0] : vector<4x128xf32> to vector<128xf32>
    %25 = vector.shape_cast %24 : vector<128xf32> to vector<1x128xf32>
    %26 = arith.addf %13, %25 : vector<1x128xf32>
    %27 = vector.shape_cast %22 : vector<1x512xf32> to vector<4x128xf32>
    %cst_30 = arith.constant dense<0.000000e+00> : vector<128xf32>
    %28 = vector.multi_reduction <add>, %27, %cst_30 [0] : vector<4x128xf32> to vector<128xf32>
    %29 = vector.shape_cast %28 : vector<128xf32> to vector<1x128xf32>
    %30 = arith.addf %14, %29 : vector<1x128xf32>
    %c0_31 = arith.constant 0 : index
    %c512 = arith.constant 512 : index
    %31 = vector.load %arg1[%c0_31, %c512] : memref<48x2048xf32, #tpu.memory_space<vmem>>, vector<48x512xf32>
    %cst_32 = arith.constant dense<0.000000e+00> : vector<32x512xf32>
    %32 = tpu.matmul %12, %31, %cst_32 {dimension_numbers = #tpu.dot_dimension_numbers<[1], [0], [0], [1], [0, 0, 1, 1], [], []>} : vector<32x48xf32>, vector<48x512xf32>, vector<32x512xf32> -> vector<32x512xf32>
    %c0_33 = arith.constant 0 : index
    %c512_34 = arith.constant 512 : index
    %33 = vector.load %arg6[%c0_33, %c512_34] : memref<32x2048xf32, #tpu.memory_space<vmem>>, vector<32x512xf32>
    tpu.vector_store %arg6[%c0_33, %c512_34], %32 {strides = array<i32>} : memref<32x2048xf32, #tpu.memory_space<vmem>>, vector<32x512xf32>,
    %cst_35 = arith.constant dense<0.000000e+00> : vector<512xf32>
    %34 = vector.multi_reduction <add>, %32, %cst_35 [0] : vector<32x512xf32> to vector<512xf32>
    %35 = vector.shape_cast %34 : vector<512xf32> to vector<1x512xf32>
    %36 = arith.mulf %32, %32 : vector<32x512xf32>
    %cst_36 = arith.constant dense<0.000000e+00> : vector<512xf32>
    %37 = vector.multi_reduction <add>, %36, %cst_36 [0] : vector<32x512xf32> to vector<512xf32>
    %38 = vector.shape_cast %37 : vector<512xf32> to vector<1x512xf32>
    %39 = vector.shape_cast %35 : vector<1x512xf32> to vector<4x128xf32>
    %cst_37 = arith.constant dense<0.000000e+00> : vector<128xf32>
    %40 = vector.multi_reduction <add>, %39, %cst_37 [0] : vector<4x128xf32> to vector<128xf32>
    %41 = vector.shape_cast %40 : vector<128xf32> to vector<1x128xf32>
    %42 = arith.addf %26, %41 : vector<1x128xf32>
    %43 = vector.shape_cast %38 : vector<1x512xf32> to vector<4x128xf32>
    %cst_38 = arith.constant dense<0.000000e+00> : vector<128xf32>
    %44 = vector.multi_reduction <add>, %43, %cst_38 [0] : vector<4x128xf32> to vector<128xf32>
    %45 = vector.shape_cast %44 : vector<128xf32> to vector<1x128xf32>
    %46 = arith.addf %30, %45 : vector<1x128xf32>
    %c0_39 = arith.constant 0 : index
    %c1024 = arith.constant 1024 : index
    %47 = vector.load %arg1[%c0_39, %c1024] : memref<48x2048xf32, #tpu.memory_space<vmem>>, vector<48x512xf32>
    %cst_40 = arith.constant dense<0.000000e+00> : vector<32x512xf32>
    %48 = tpu.matmul %12, %47, %cst_40 {dimension_numbers = #tpu.dot_dimension_numbers<[1], [0], [0], [1], [0, 0, 1, 1], [], []>} : vector<32x48xf32>, vector<48x512xf32>, vector<32x512xf32> -> vector<32x512xf32>
    %c0_41 = arith.constant 0 : index
    %c1024_42 = arith.constant 1024 : index
    %49 = vector.load %arg6[%c0_41, %c1024_42] : memref<32x2048xf32, #tpu.memory_space<vmem>>, vector<32x512xf32>
    tpu.vector_store %arg6[%c0_41, %c1024_42], %48 {strides = array<i32>} : memref<32x2048xf32, #tpu.memory_space<vmem>>, vector<32x512xf32>,
    %cst_43 = arith.constant dense<0.000000e+00> : vector<512xf32>
    %50 = vector.multi_reduction <add>, %48, %cst_43 [0] : vector<32x512xf32> to vector<512xf32>
    %51 = vector.shape_cast %50 : vector<512xf32> to vector<1x512xf32>
    %52 = arith.mulf %48, %48 : vector<32x512xf32>
    %cst_44 = arith.constant dense<0.000000e+00> : vector<512xf32>
    %53 = vector.multi_reduction <add>, %52, %cst_44 [0] : vector<32x512xf32> to vector<512xf32>
    %54 = vector.shape_cast %53 : vector<512xf32> to vector<1x512xf32>
    %55 = vector.shape_cast %51 : vector<1x512xf32> to vector<4x128xf32>
    %cst_45 = arith.constant dense<0.000000e+00> : vector<128xf32>
    %56 = vector.multi_reduction <add>, %55, %cst_45 [0] : vector<4x128xf32> to vector<128xf32>
    %57 = vector.shape_cast %56 : vector<128xf32> to vector<1x128xf32>
    %58 = arith.addf %42, %57 : vector<1x128xf32>
    %59 = vector.shape_cast %54 : vector<1x512xf32> to vector<4x128xf32>
    %cst_46 = arith.constant dense<0.000000e+00> : vector<128xf32>
    %60 = vector.multi_reduction <add>, %59, %cst_46 [0] : vector<4x128xf32> to vector<128xf32>
    %61 = vector.shape_cast %60 : vector<128xf32> to vector<1x128xf32>
    %62 = arith.addf %46, %61 : vector<1x128xf32>
    %c0_47 = arith.constant 0 : index
    %c1536 = arith.constant 1536 : index
    %63 = vector.load %arg1[%c0_47, %c1536] : memref<48x2048xf32, #tpu.memory_space<vmem>>, vector<48x512xf32>
    %cst_48 = arith.constant dense<0.000000e+00> : vector<32x512xf32>
    %64 = tpu.matmul %12, %63, %cst_48 {dimension_numbers = #tpu.dot_dimension_numbers<[1], [0], [0], [1], [0, 0, 1, 1], [], []>} : vector<32x48xf32>, vector<48x512xf32>, vector<32x512xf32> -> vector<32x512xf32>
    %c0_49 = arith.constant 0 : index
    %c1536_50 = arith.constant 1536 : index
    %65 = vector.load %arg6[%c0_49, %c1536_50] : memref<32x2048xf32, #tpu.memory_space<vmem>>, vector<32x512xf32>
    tpu.vector_store %arg6[%c0_49, %c1536_50], %64 {strides = array<i32>} : memref<32x2048xf32, #tpu.memory_space<vmem>>, vector<32x512xf32>,
    %cst_51 = arith.constant dense<0.000000e+00> : vector<512xf32>
    %66 = vector.multi_reduction <add>, %64, %cst_51 [0] : vector<32x512xf32> to vector<512xf32>
    %67 = vector.shape_cast %66 : vector<512xf32> to vector<1x512xf32>
    %68 = arith.mulf %64, %64 : vector<32x512xf32>
    %cst_52 = arith.constant dense<0.000000e+00> : vector<512xf32>
    %69 = vector.multi_reduction <add>, %68, %cst_52 [0] : vector<32x512xf32> to vector<512xf32>
    %70 = vector.shape_cast %69 : vector<512xf32> to vector<1x512xf32>
    %71 = vector.shape_cast %67 : vector<1x512xf32> to vector<4x128xf32>
    %cst_53 = arith.constant dense<0.000000e+00> : vector<128xf32>
    %72 = vector.multi_reduction <add>, %71, %cst_53 [0] : vector<4x128xf32> to vector<128xf32>
    %73 = vector.shape_cast %72 : vector<128xf32> to vector<1x128xf32>
    %74 = arith.addf %58, %73 : vector<1x128xf32>
    %75 = vector.shape_cast %70 : vector<1x512xf32> to vector<4x128xf32>
    %cst_54 = arith.constant dense<0.000000e+00> : vector<128xf32>
    %76 = vector.multi_reduction <add>, %75, %cst_54 [0] : vector<4x128xf32> to vector<128xf32>
    %77 = vector.shape_cast %76 : vector<128xf32> to vector<1x128xf32>
    %78 = arith.addf %62, %77 : vector<1x128xf32>
    %cst_55 = arith.constant 0.001953125 : f32
    %79 = vector.broadcast %cst_55 : f32 to vector<1x128xf32>
    %80 = arith.mulf %74, %79 : vector<1x128xf32>
    %cst_56 = arith.constant 0.001953125 : f32
    %81 = vector.broadcast %cst_56 : f32 to vector<1x128xf32>
    %82 = arith.mulf %78, %81 : vector<1x128xf32>
    %83 = arith.mulf %80, %80 : vector<1x128xf32>
    %84 = arith.subf %82, %83 : vector<1x128xf32>
    %cst_57 = arith.constant 0.000000e+00 : f32
    %85 = vector.broadcast %cst_57 : f32 to vector<1x128xf32>
    %86 = arith.maximumf %84, %85 : vector<1x128xf32>
    %c0_58 = arith.constant 0 : index
    %c0_59 = arith.constant 0 : index
    %87 = vector.load %arg3[%c0_58, %c0_59] : memref<8x128xf32, #tpu.memory_space<vmem>>, vector<1x128xf32>
    %c1_60 = arith.constant 1 : index
    %c0_61 = arith.constant 0 : index
    %88 = vector.load %arg3[%c1_60, %c0_61] : memref<8x128xf32, #tpu.memory_space<vmem>>, vector<1x128xf32>
    %cst_62 = arith.constant 9.99999974E-6 : f32
    %89 = vector.broadcast %cst_62 : f32 to vector<1x128xf32>
    %90 = arith.addf %86, %89 : vector<1x128xf32>
    %91 = math.rsqrt %90 : vector<1x128xf32>
    %92 = arith.mulf %87, %91 : vector<1x128xf32>
    %93 = arith.mulf %80, %92 : vector<1x128xf32>
    %94 = arith.subf %88, %93 : vector<1x128xf32>
    %95 = tpu.concatenate %92, %92, %92, %92, %92, %92, %92, %92, %92, %92, %92, %92, %92, %92, %92, %92 in 1 : vector<1x128xf32>, vector<1x128xf32>, vector<1x128xf32>, vector<1x128xf32>, vector<1x128xf32>, vector<1x128xf32>, vector<1x128xf32>, vector<1x128xf32>, vector<1x128xf32>, vector<1x128xf32>, vector<1x128xf32>, vector<1x128xf32>, vector<1x128xf32>, vector<1x128xf32>, vector<1x128xf32>, vector<1x128xf32> -> vector<1x2048xf32>
    %96 = tpu.concatenate %94, %94, %94, %94, %94, %94, %94, %94, %94, %94, %94, %94, %94, %94, %94, %94 in 1 : vector<1x128xf32>, vector<1x128xf32>, vector<1x128xf32>, vector<1x128xf32>, vector<1x128xf32>, vector<1x128xf32>, vector<1x128xf32>, vector<1x128xf32>, vector<1x128xf32>, vector<1x128xf32>, vector<1x128xf32>, vector<1x128xf32>, vector<1x128xf32>, vector<1x128xf32>, vector<1x128xf32>, vector<1x128xf32> -> vector<1x2048xf32>
    %c0_63 = arith.constant 0 : index
    %c0_64 = arith.constant 0 : index
    %97 = vector.load %arg6[%c0_63, %c0_64] : memref<32x2048xf32, #tpu.memory_space<vmem>>, vector<8x2048xf32>
    %98 = vector.broadcast %95 : vector<1x2048xf32> to vector<8x2048xf32>
    %99 = arith.mulf %97, %98 : vector<8x2048xf32>
    %100 = vector.broadcast %96 : vector<1x2048xf32> to vector<8x2048xf32>
    %101 = arith.addf %99, %100 : vector<8x2048xf32>
    %cst_65 = arith.constant 0.000000e+00 : f32
    %102 = vector.broadcast %cst_65 : f32 to vector<8x2048xf32>
    %103 = arith.maximumf %101, %102 : vector<8x2048xf32>
    %104 = vector.shape_cast %103 : vector<8x2048xf32> to vector<4x2x2048xf32>
    %105 = vector.extract_strided_slice %104 {offsets = [0, 0, 0], sizes = [4, 1, 2048], strides = [1, 1, 1]} : vector<4x2x2048xf32> to vector<4x1x2048xf32>
    %106 = vector.shape_cast %105 : vector<4x1x2048xf32> to vector<4x2048xf32>
    %107 = vector.extract_strided_slice %104 {offsets = [0, 1, 0], sizes = [4, 1, 2048], strides = [1, 1, 1]} : vector<4x2x2048xf32> to vector<4x1x2048xf32>
    %108 = vector.shape_cast %107 : vector<4x1x2048xf32> to vector<4x2048xf32>
    %109 = arith.maximumf %106, %108 : vector<4x2048xf32>
    %110 = vector.shape_cast %109 : vector<4x2048xf32> to vector<4x8x2x128xf32>
    %111 = vector.extract_strided_slice %110 {offsets = [0, 0, 0, 0], sizes = [4, 8, 1, 128], strides = [1, 1, 1, 1]} : vector<4x8x2x128xf32> to vector<4x8x1x128xf32>
    %112 = vector.shape_cast %111 : vector<4x8x1x128xf32> to vector<4x8x128xf32>
    %113 = vector.extract_strided_slice %110 {offsets = [0, 0, 1, 0], sizes = [4, 8, 1, 128], strides = [1, 1, 1, 1]} : vector<4x8x2x128xf32> to vector<4x8x1x128xf32>
    %114 = vector.shape_cast %113 : vector<4x8x1x128xf32> to vector<4x8x128xf32>
    %115 = arith.maximumf %112, %114 : vector<4x8x128xf32>
    %116 = vector.shape_cast %115 : vector<4x8x128xf32> to vector<1x4x8x128xf32>
    %c0_66 = arith.constant 0 : index
    %c1_67 = arith.constant 1 : index
    %c1_68 = arith.constant 1 : index
    %c0_69 = arith.constant 0 : index
    %117 = vector.load %arg7[%c0_66, %c1_67, %c1_68, %c0_69] : memref<2x10x10x128xf32, #tpu.memory_space<vmem>>, vector<1x4x8x128xf32>
    tpu.vector_store %arg7[%c0_66, %c1_67, %c1_68, %c0_69], %116 {strides = array<i32>} : memref<2x10x10x128xf32, #tpu.memory_space<vmem>>, vector<1x4x8x128xf32>,
    %c8 = arith.constant 8 : index
    %c0_70 = arith.constant 0 : index
    %118 = vector.load %arg6[%c8, %c0_70] : memref<32x2048xf32, #tpu.memory_space<vmem>>, vector<8x2048xf32>
    %119 = vector.broadcast %95 : vector<1x2048xf32> to vector<8x2048xf32>
    %120 = arith.mulf %118, %119 : vector<8x2048xf32>
    %121 = vector.broadcast %96 : vector<1x2048xf32> to vector<8x2048xf32>
    %122 = arith.addf %120, %121 : vector<8x2048xf32>
    %cst_71 = arith.constant 0.000000e+00 : f32
    %123 = vector.broadcast %cst_71 : f32 to vector<8x2048xf32>
    %124 = arith.maximumf %122, %123 : vector<8x2048xf32>
    %125 = vector.shape_cast %124 : vector<8x2048xf32> to vector<4x2x2048xf32>
    %126 = vector.extract_strided_slice %125 {offsets = [0, 0, 0], sizes = [4, 1, 2048], strides = [1, 1, 1]} : vector<4x2x2048xf32> to vector<4x1x2048xf32>
    %127 = vector.shape_cast %126 : vector<4x1x2048xf32> to vector<4x2048xf32>
    %128 = vector.extract_strided_slice %125 {offsets = [0, 1, 0], sizes = [4, 1, 2048], strides = [1, 1, 1]} : vector<4x2x2048xf32> to vector<4x1x2048xf32>
    %129 = vector.shape_cast %128 : vector<4x1x2048xf32> to vector<4x2048xf32>
    %130 = arith.maximumf %127, %129 : vector<4x2048xf32>
    %131 = vector.shape_cast %130 : vector<4x2048xf32> to vector<4x8x2x128xf32>
    %132 = vector.extract_strided_slice %131 {offsets = [0, 0, 0, 0], sizes = [4, 8, 1, 128], strides = [1, 1, 1, 1]} : vector<4x8x2x128xf32> to vector<4x8x1x128xf32>
    %133 = vector.shape_cast %132 : vector<4x8x1x128xf32> to vector<4x8x128xf32>
    %134 = vector.extract_strided_slice %131 {offsets = [0, 0, 1, 0], sizes = [4, 8, 1, 128], strides = [1, 1, 1, 1]} : vector<4x8x2x128xf32> to vector<4x8x1x128xf32>
    %135 = vector.shape_cast %134 : vector<4x8x1x128xf32> to vector<4x8x128xf32>
    %136 = arith.maximumf %133, %135 : vector<4x8x128xf32>
    %137 = vector.shape_cast %136 : vector<4x8x128xf32> to vector<1x4x8x128xf32>
    %c0_72 = arith.constant 0 : index
    %c5 = arith.constant 5 : index
    %c1_73 = arith.constant 1 : index
    %c0_74 = arith.constant 0 : index
    %138 = vector.load %arg7[%c0_72, %c5, %c1_73, %c0_74] : memref<2x10x10x128xf32, #tpu.memory_space<vmem>>, vector<1x4x8x128xf32>
    tpu.vector_store %arg7[%c0_72, %c5, %c1_73, %c0_74], %137 {strides = array<i32>} : memref<2x10x10x128xf32, #tpu.memory_space<vmem>>, vector<1x4x8x128xf32>,
    %c16 = arith.constant 16 : index
    %c0_75 = arith.constant 0 : index
    %139 = vector.load %arg6[%c16, %c0_75] : memref<32x2048xf32, #tpu.memory_space<vmem>>, vector<8x2048xf32>
    %140 = vector.broadcast %95 : vector<1x2048xf32> to vector<8x2048xf32>
    %141 = arith.mulf %139, %140 : vector<8x2048xf32>
    %142 = vector.broadcast %96 : vector<1x2048xf32> to vector<8x2048xf32>
    %143 = arith.addf %141, %142 : vector<8x2048xf32>
    %cst_76 = arith.constant 0.000000e+00 : f32
    %144 = vector.broadcast %cst_76 : f32 to vector<8x2048xf32>
    %145 = arith.maximumf %143, %144 : vector<8x2048xf32>
    %146 = vector.shape_cast %145 : vector<8x2048xf32> to vector<4x2x2048xf32>
    %147 = vector.extract_strided_slice %146 {offsets = [0, 0, 0], sizes = [4, 1, 2048], strides = [1, 1, 1]} : vector<4x2x2048xf32> to vector<4x1x2048xf32>
    %148 = vector.shape_cast %147 : vector<4x1x2048xf32> to vector<4x2048xf32>
    %149 = vector.extract_strided_slice %146 {offsets = [0, 1, 0], sizes = [4, 1, 2048], strides = [1, 1, 1]} : vector<4x2x2048xf32> to vector<4x1x2048xf32>
    %150 = vector.shape_cast %149 : vector<4x1x2048xf32> to vector<4x2048xf32>
    %151 = arith.maximumf %148, %150 : vector<4x2048xf32>
    %152 = vector.shape_cast %151 : vector<4x2048xf32> to vector<4x8x2x128xf32>
    %153 = vector.extract_strided_slice %152 {offsets = [0, 0, 0, 0], sizes = [4, 8, 1, 128], strides = [1, 1, 1, 1]} : vector<4x8x2x128xf32> to vector<4x8x1x128xf32>
    %154 = vector.shape_cast %153 : vector<4x8x1x128xf32> to vector<4x8x128xf32>
    %155 = vector.extract_strided_slice %152 {offsets = [0, 0, 1, 0], sizes = [4, 8, 1, 128], strides = [1, 1, 1, 1]} : vector<4x8x2x128xf32> to vector<4x8x1x128xf32>
    %156 = vector.shape_cast %155 : vector<4x8x1x128xf32> to vector<4x8x128xf32>
    %157 = arith.maximumf %154, %156 : vector<4x8x128xf32>
    %158 = vector.shape_cast %157 : vector<4x8x128xf32> to vector<1x4x8x128xf32>
    %c1_77 = arith.constant 1 : index
    %c1_78 = arith.constant 1 : index
    %c1_79 = arith.constant 1 : index
    %c0_80 = arith.constant 0 : index
    %159 = vector.load %arg7[%c1_77, %c1_78, %c1_79, %c0_80] : memref<2x10x10x128xf32, #tpu.memory_space<vmem>>, vector<1x4x8x128xf32>
    tpu.vector_store %arg7[%c1_77, %c1_78, %c1_79, %c0_80], %158 {strides = array<i32>} : memref<2x10x10x128xf32, #tpu.memory_space<vmem>>, vector<1x4x8x128xf32>,
    %c24 = arith.constant 24 : index
    %c0_81 = arith.constant 0 : index
    %160 = vector.load %arg6[%c24, %c0_81] : memref<32x2048xf32, #tpu.memory_space<vmem>>, vector<8x2048xf32>
    %161 = vector.broadcast %95 : vector<1x2048xf32> to vector<8x2048xf32>
    %162 = arith.mulf %160, %161 : vector<8x2048xf32>
    %163 = vector.broadcast %96 : vector<1x2048xf32> to vector<8x2048xf32>
    %164 = arith.addf %162, %163 : vector<8x2048xf32>
    %cst_82 = arith.constant 0.000000e+00 : f32
    %165 = vector.broadcast %cst_82 : f32 to vector<8x2048xf32>
    %166 = arith.maximumf %164, %165 : vector<8x2048xf32>
    %167 = vector.shape_cast %166 : vector<8x2048xf32> to vector<4x2x2048xf32>
    %168 = vector.extract_strided_slice %167 {offsets = [0, 0, 0], sizes = [4, 1, 2048], strides = [1, 1, 1]} : vector<4x2x2048xf32> to vector<4x1x2048xf32>
    %169 = vector.shape_cast %168 : vector<4x1x2048xf32> to vector<4x2048xf32>
    %170 = vector.extract_strided_slice %167 {offsets = [0, 1, 0], sizes = [4, 1, 2048], strides = [1, 1, 1]} : vector<4x2x2048xf32> to vector<4x1x2048xf32>
    %171 = vector.shape_cast %170 : vector<4x1x2048xf32> to vector<4x2048xf32>
    %172 = arith.maximumf %169, %171 : vector<4x2048xf32>
    %173 = vector.shape_cast %172 : vector<4x2048xf32> to vector<4x8x2x128xf32>
    %174 = vector.extract_strided_slice %173 {offsets = [0, 0, 0, 0], sizes = [4, 8, 1, 128], strides = [1, 1, 1, 1]} : vector<4x8x2x128xf32> to vector<4x8x1x128xf32>
    %175 = vector.shape_cast %174 : vector<4x8x1x128xf32> to vector<4x8x128xf32>
    %176 = vector.extract_strided_slice %173 {offsets = [0, 0, 1, 0], sizes = [4, 8, 1, 128], strides = [1, 1, 1, 1]} : vector<4x8x2x128xf32> to vector<4x8x1x128xf32>
    %177 = vector.shape_cast %176 : vector<4x8x1x128xf32> to vector<4x8x128xf32>
    %178 = arith.maximumf %175, %177 : vector<4x8x128xf32>
    %179 = vector.shape_cast %178 : vector<4x8x128xf32> to vector<1x4x8x128xf32>
    %c1_83 = arith.constant 1 : index
    %c5_84 = arith.constant 5 : index
    %c1_85 = arith.constant 1 : index
    %c0_86 = arith.constant 0 : index
    %180 = vector.load %arg7[%c1_83, %c5_84, %c1_85, %c0_86] : memref<2x10x10x128xf32, #tpu.memory_space<vmem>>, vector<1x4x8x128xf32>
    tpu.vector_store %arg7[%c1_83, %c5_84, %c1_85, %c0_86], %179 {strides = array<i32>} : memref<2x10x10x128xf32, #tpu.memory_space<vmem>>, vector<1x4x8x128xf32>,
    %c0_87 = arith.constant 0 : index
    %c0_88 = arith.constant 0 : index
    %c0_89 = arith.constant 0 : index
    %c0_90 = arith.constant 0 : index
    %181 = vector.load %arg7[%c0_87, %c0_88, %c0_89, %c0_90] : memref<2x10x10x128xf32, #tpu.memory_space<vmem>>, vector<2x8x8x128xf32>
    %182 = vector.shape_cast %181 : vector<2x8x8x128xf32> to vector<128x128xf32>
    %c0_91 = arith.constant 0 : index
    %c0_92 = arith.constant 0 : index
    %c0_93 = arith.constant 0 : index
    %183 = vector.load %arg2[%c0_91, %c0_92, %c0_93] : memref<27x128x128xf32, #tpu.memory_space<vmem>>, vector<1x128x128xf32>
    %184 = vector.shape_cast %183 : vector<1x128x128xf32> to vector<128x128xf32>
    %cst_94 = arith.constant dense<0.000000e+00> : vector<128x128xf32>
    %185 = tpu.matmul %182, %184, %cst_94 {dimension_numbers = #tpu.dot_dimension_numbers<[1], [0], [0], [1], [0, 0, 1, 1], [], []>} : vector<128x128xf32>, vector<128x128xf32>, vector<128x128xf32> -> vector<128x128xf32>
    %c0_95 = arith.constant 0 : index
    %c0_96 = arith.constant 0 : index
    %c1_97 = arith.constant 1 : index
    %c0_98 = arith.constant 0 : index
    %186 = vector.load %arg7[%c0_95, %c0_96, %c1_97, %c0_98] : memref<2x10x10x128xf32, #tpu.memory_space<vmem>>, vector<2x8x8x128xf32>
    %187 = vector.shape_cast %186 : vector<2x8x8x128xf32> to vector<128x128xf32>
    %c1_99 = arith.constant 1 : index
    %c0_100 = arith.constant 0 : index
    %c0_101 = arith.constant 0 : index
    %188 = vector.load %arg2[%c1_99, %c0_100, %c0_101] : memref<27x128x128xf32, #tpu.memory_space<vmem>>, vector<1x128x128xf32>
    %189 = vector.shape_cast %188 : vector<1x128x128xf32> to vector<128x128xf32>
    %cst_102 = arith.constant dense<0.000000e+00> : vector<128x128xf32>
    %190 = tpu.matmul %187, %189, %cst_102 {dimension_numbers = #tpu.dot_dimension_numbers<[1], [0], [0], [1], [0, 0, 1, 1], [], []>} : vector<128x128xf32>, vector<128x128xf32>, vector<128x128xf32> -> vector<128x128xf32>
    %191 = arith.addf %185, %190 : vector<128x128xf32>
    %c0_103 = arith.constant 0 : index
    %c0_104 = arith.constant 0 : index
    %c2_105 = arith.constant 2 : index
    %c0_106 = arith.constant 0 : index
    %192 = vector.load %arg7[%c0_103, %c0_104, %c2_105, %c0_106] : memref<2x10x10x128xf32, #tpu.memory_space<vmem>>, vector<2x8x8x128xf32>
    %193 = vector.shape_cast %192 : vector<2x8x8x128xf32> to vector<128x128xf32>
    %c2_107 = arith.constant 2 : index
    %c0_108 = arith.constant 0 : index
    %c0_109 = arith.constant 0 : index
    %194 = vector.load %arg2[%c2_107, %c0_108, %c0_109] : memref<27x128x128xf32, #tpu.memory_space<vmem>>, vector<1x128x128xf32>
    %195 = vector.shape_cast %194 : vector<1x128x128xf32> to vector<128x128xf32>
    %cst_110 = arith.constant dense<0.000000e+00> : vector<128x128xf32>
    %196 = tpu.matmul %193, %195, %cst_110 {dimension_numbers = #tpu.dot_dimension_numbers<[1], [0], [0], [1], [0, 0, 1, 1], [], []>} : vector<128x128xf32>, vector<128x128xf32>, vector<128x128xf32> -> vector<128x128xf32>
    %197 = arith.addf %191, %196 : vector<128x128xf32>
    %c0_111 = arith.constant 0 : index
    %c1_112 = arith.constant 1 : index
    %c0_113 = arith.constant 0 : index
    %c0_114 = arith.constant 0 : index
    %198 = vector.load %arg7[%c0_111, %c1_112, %c0_113, %c0_114] : memref<2x10x10x128xf32, #tpu.memory_space<vmem>>, vector<2x8x8x128xf32>
    %199 = vector.shape_cast %198 : vector<2x8x8x128xf32> to vector<128x128xf32>
    %c3 = arith.constant 3 : index
    %c0_115 = arith.constant 0 : index
    %c0_116 = arith.constant 0 : index
    %200 = vector.load %arg2[%c3, %c0_115, %c0_116] : memref<27x128x128xf32, #tpu.memory_space<vmem>>, vector<1x128x128xf32>
    %201 = vector.shape_cast %200 : vector<1x128x128xf32> to vector<128x128xf32>
    %cst_117 = arith.constant dense<0.000000e+00> : vector<128x128xf32>
    %202 = tpu.matmul %199, %201, %cst_117 {dimension_numbers = #tpu.dot_dimension_numbers<[1], [0], [0], [1], [0, 0, 1, 1], [], []>} : vector<128x128xf32>, vector<128x128xf32>, vector<128x128xf32> -> vector<128x128xf32>
    %203 = arith.addf %197, %202 : vector<128x128xf32>
    %c0_118 = arith.constant 0 : index
    %c1_119 = arith.constant 1 : index
    %c1_120 = arith.constant 1 : index
    %c0_121 = arith.constant 0 : index
    %204 = vector.load %arg7[%c0_118, %c1_119, %c1_120, %c0_121] : memref<2x10x10x128xf32, #tpu.memory_space<vmem>>, vector<2x8x8x128xf32>
    %205 = vector.shape_cast %204 : vector<2x8x8x128xf32> to vector<128x128xf32>
    %c4 = arith.constant 4 : index
    %c0_122 = arith.constant 0 : index
    %c0_123 = arith.constant 0 : index
    %206 = vector.load %arg2[%c4, %c0_122, %c0_123] : memref<27x128x128xf32, #tpu.memory_space<vmem>>, vector<1x128x128xf32>
    %207 = vector.shape_cast %206 : vector<1x128x128xf32> to vector<128x128xf32>
    %cst_124 = arith.constant dense<0.000000e+00> : vector<128x128xf32>
    %208 = tpu.matmul %205, %207, %cst_124 {dimension_numbers = #tpu.dot_dimension_numbers<[1], [0], [0], [1], [0, 0, 1, 1], [], []>} : vector<128x128xf32>, vector<128x128xf32>, vector<128x128xf32> -> vector<128x128xf32>
    %209 = arith.addf %203, %208 : vector<128x128xf32>
    %c0_125 = arith.constant 0 : index
    %c1_126 = arith.constant 1 : index
    %c2_127 = arith.constant 2 : index
    %c0_128 = arith.constant 0 : index
    %210 = vector.load %arg7[%c0_125, %c1_126, %c2_127, %c0_128] : memref<2x10x10x128xf32, #tpu.memory_space<vmem>>, vector<2x8x8x128xf32>
    %211 = vector.shape_cast %210 : vector<2x8x8x128xf32> to vector<128x128xf32>
    %c5_129 = arith.constant 5 : index
    %c0_130 = arith.constant 0 : index
    %c0_131 = arith.constant 0 : index
    %212 = vector.load %arg2[%c5_129, %c0_130, %c0_131] : memref<27x128x128xf32, #tpu.memory_space<vmem>>, vector<1x128x128xf32>
    %213 = vector.shape_cast %212 : vector<1x128x128xf32> to vector<128x128xf32>
    %cst_132 = arith.constant dense<0.000000e+00> : vector<128x128xf32>
    %214 = tpu.matmul %211, %213, %cst_132 {dimension_numbers = #tpu.dot_dimension_numbers<[1], [0], [0], [1], [0, 0, 1, 1], [], []>} : vector<128x128xf32>, vector<128x128xf32>, vector<128x128xf32> -> vector<128x128xf32>
    %215 = arith.addf %209, %214 : vector<128x128xf32>
    %c0_133 = arith.constant 0 : index
    %c2_134 = arith.constant 2 : index
    %c0_135 = arith.constant 0 : index
    %c0_136 = arith.constant 0 : index
    %216 = vector.load %arg7[%c0_133, %c2_134, %c0_135, %c0_136] : memref<2x10x10x128xf32, #tpu.memory_space<vmem>>, vector<2x8x8x128xf32>
    %217 = vector.shape_cast %216 : vector<2x8x8x128xf32> to vector<128x128xf32>
    %c6 = arith.constant 6 : index
    %c0_137 = arith.constant 0 : index
    %c0_138 = arith.constant 0 : index
    %218 = vector.load %arg2[%c6, %c0_137, %c0_138] : memref<27x128x128xf32, #tpu.memory_space<vmem>>, vector<1x128x128xf32>
    %219 = vector.shape_cast %218 : vector<1x128x128xf32> to vector<128x128xf32>
    %cst_139 = arith.constant dense<0.000000e+00> : vector<128x128xf32>
    %220 = tpu.matmul %217, %219, %cst_139 {dimension_numbers = #tpu.dot_dimension_numbers<[1], [0], [0], [1], [0, 0, 1, 1], [], []>} : vector<128x128xf32>, vector<128x128xf32>, vector<128x128xf32> -> vector<128x128xf32>
    %221 = arith.addf %215, %220 : vector<128x128xf32>
    %c0_140 = arith.constant 0 : index
    %c2_141 = arith.constant 2 : index
    %c1_142 = arith.constant 1 : index
    %c0_143 = arith.constant 0 : index
    %222 = vector.load %arg7[%c0_140, %c2_141, %c1_142, %c0_143] : memref<2x10x10x128xf32, #tpu.memory_space<vmem>>, vector<2x8x8x128xf32>
    %223 = vector.shape_cast %222 : vector<2x8x8x128xf32> to vector<128x128xf32>
    %c7 = arith.constant 7 : index
    %c0_144 = arith.constant 0 : index
    %c0_145 = arith.constant 0 : index
    %224 = vector.load %arg2[%c7, %c0_144, %c0_145] : memref<27x128x128xf32, #tpu.memory_space<vmem>>, vector<1x128x128xf32>
    %225 = vector.shape_cast %224 : vector<1x128x128xf32> to vector<128x128xf32>
    %cst_146 = arith.constant dense<0.000000e+00> : vector<128x128xf32>
    %226 = tpu.matmul %223, %225, %cst_146 {dimension_numbers = #tpu.dot_dimension_numbers<[1], [0], [0], [1], [0, 0, 1, 1], [], []>} : vector<128x128xf32>, vector<128x128xf32>, vector<128x128xf32> -> vector<128x128xf32>
    %227 = arith.addf %221, %226 : vector<128x128xf32>
    %c0_147 = arith.constant 0 : index
    %c2_148 = arith.constant 2 : index
    %c2_149 = arith.constant 2 : index
    %c0_150 = arith.constant 0 : index
    %228 = vector.load %arg7[%c0_147, %c2_148, %c2_149, %c0_150] : memref<2x10x10x128xf32, #tpu.memory_space<vmem>>, vector<2x8x8x128xf32>
    %229 = vector.shape_cast %228 : vector<2x8x8x128xf32> to vector<128x128xf32>
    %c8_151 = arith.constant 8 : index
    %c0_152 = arith.constant 0 : index
    %c0_153 = arith.constant 0 : index
    %230 = vector.load %arg2[%c8_151, %c0_152, %c0_153] : memref<27x128x128xf32, #tpu.memory_space<vmem>>, vector<1x128x128xf32>
    %231 = vector.shape_cast %230 : vector<1x128x128xf32> to vector<128x128xf32>
    %cst_154 = arith.constant dense<0.000000e+00> : vector<128x128xf32>
    %232 = tpu.matmul %229, %231, %cst_154 {dimension_numbers = #tpu.dot_dimension_numbers<[1], [0], [0], [1], [0, 0, 1, 1], [], []>} : vector<128x128xf32>, vector<128x128xf32>, vector<128x128xf32> -> vector<128x128xf32>
    %233 = arith.addf %227, %232 : vector<128x128xf32>
    %cst_155 = arith.constant dense<0.000000e+00> : vector<128xf32>
    %234 = vector.multi_reduction <add>, %233, %cst_155 [0] : vector<128x128xf32> to vector<128xf32>
    %235 = vector.shape_cast %234 : vector<128xf32> to vector<1x128xf32>
    %236 = arith.mulf %233, %233 : vector<128x128xf32>
    %cst_156 = arith.constant dense<0.000000e+00> : vector<128xf32>
    %237 = vector.multi_reduction <add>, %236, %cst_156 [0] : vector<128x128xf32> to vector<128xf32>
    %238 = vector.shape_cast %237 : vector<128xf32> to vector<1x128xf32>
    %cst_157 = arith.constant 7.812500e-03 : f32
    %239 = vector.broadcast %cst_157 : f32 to vector<1x128xf32>
    %240 = arith.mulf %235, %239 : vector<1x128xf32>
    %cst_158 = arith.constant 7.812500e-03 : f32
    %241 = vector.broadcast %cst_158 : f32 to vector<1x128xf32>
    %242 = arith.mulf %238, %241 : vector<1x128xf32>
    %243 = arith.mulf %240, %240 : vector<1x128xf32>
    %244 = arith.subf %242, %243 : vector<1x128xf32>
    %cst_159 = arith.constant 0.000000e+00 : f32
    %245 = vector.broadcast %cst_159 : f32 to vector<1x128xf32>
    %246 = arith.maximumf %244, %245 : vector<1x128xf32>
    %c2_160 = arith.constant 2 : index
    %c0_161 = arith.constant 0 : index
    %247 = vector.load %arg3[%c2_160, %c0_161] : memref<8x128xf32, #tpu.memory_space<vmem>>, vector<1x128xf32>
    %c3_162 = arith.constant 3 : index
    %c0_163 = arith.constant 0 : index
    %248 = vector.load %arg3[%c3_162, %c0_163] : memref<8x128xf32, #tpu.memory_space<vmem>>, vector<1x128xf32>
    %cst_164 = arith.constant 9.99999974E-6 : f32
    %249 = vector.broadcast %cst_164 : f32 to vector<1x128xf32>
    %250 = arith.addf %246, %249 : vector<1x128xf32>
    %251 = math.rsqrt %250 : vector<1x128xf32>
    %252 = arith.mulf %247, %251 : vector<1x128xf32>
    %253 = arith.mulf %240, %252 : vector<1x128xf32>
    %254 = arith.subf %248, %253 : vector<1x128xf32>
    %255 = vector.broadcast %252 : vector<1x128xf32> to vector<128x128xf32>
    %256 = arith.mulf %233, %255 : vector<128x128xf32>
    %257 = vector.broadcast %254 : vector<1x128xf32> to vector<128x128xf32>
    %258 = arith.addf %256, %257 : vector<128x128xf32>
    %cst_165 = arith.constant 0.000000e+00 : f32
    %259 = vector.broadcast %cst_165 : f32 to vector<128x128xf32>
    %260 = arith.maximumf %258, %259 : vector<128x128xf32>
    %261 = vector.shape_cast %260 : vector<128x128xf32> to vector<2x8x8x128xf32>
    %c0_166 = arith.constant 0 : index
    %c1_167 = arith.constant 1 : index
    %c1_168 = arith.constant 1 : index
    %c0_169 = arith.constant 0 : index
    %262 = vector.load %arg7[%c0_166, %c1_167, %c1_168, %c0_169] : memref<2x10x10x128xf32, #tpu.memory_space<vmem>>, vector<2x8x8x128xf32>
    tpu.vector_store %arg7[%c0_166, %c1_167, %c1_168, %c0_169], %261 {strides = array<i32>} : memref<2x10x10x128xf32, #tpu.memory_space<vmem>>, vector<2x8x8x128xf32>,
    %c0_170 = arith.constant 0 : index
    %c0_171 = arith.constant 0 : index
    %c0_172 = arith.constant 0 : index
    %c0_173 = arith.constant 0 : index
    %263 = vector.load %arg7[%c0_170, %c0_171, %c0_172, %c0_173] : memref<2x10x10x128xf32, #tpu.memory_space<vmem>>, vector<2x8x8x128xf32>
    %264 = vector.shape_cast %263 : vector<2x8x8x128xf32> to vector<128x128xf32>
    %c9 = arith.constant 9 : index
    %c0_174 = arith.constant 0 : index
    %c0_175 = arith.constant 0 : index
    %265 = vector.load %arg2[%c9, %c0_174, %c0_175] : memref<27x128x128xf32, #tpu.memory_space<vmem>>, vector<1x128x128xf32>
    %266 = vector.shape_cast %265 : vector<1x128x128xf32> to vector<128x128xf32>
    %cst_176 = arith.constant dense<0.000000e+00> : vector<128x128xf32>
    %267 = tpu.matmul %264, %266, %cst_176 {dimension_numbers = #tpu.dot_dimension_numbers<[1], [0], [0], [1], [0, 0, 1, 1], [], []>} : vector<128x128xf32>, vector<128x128xf32>, vector<128x128xf32> -> vector<128x128xf32>
    %c0_177 = arith.constant 0 : index
    %c0_178 = arith.constant 0 : index
    %c1_179 = arith.constant 1 : index
    %c0_180 = arith.constant 0 : index
    %268 = vector.load %arg7[%c0_177, %c0_178, %c1_179, %c0_180] : memref<2x10x10x128xf32, #tpu.memory_space<vmem>>, vector<2x8x8x128xf32>
    %269 = vector.shape_cast %268 : vector<2x8x8x128xf32> to vector<128x128xf32>
    %c10 = arith.constant 10 : index
    %c0_181 = arith.constant 0 : index
    %c0_182 = arith.constant 0 : index
    %270 = vector.load %arg2[%c10, %c0_181, %c0_182] : memref<27x128x128xf32, #tpu.memory_space<vmem>>, vector<1x128x128xf32>
    %271 = vector.shape_cast %270 : vector<1x128x128xf32> to vector<128x128xf32>
    %cst_183 = arith.constant dense<0.000000e+00> : vector<128x128xf32>
    %272 = tpu.matmul %269, %271, %cst_183 {dimension_numbers = #tpu.dot_dimension_numbers<[1], [0], [0], [1], [0, 0, 1, 1], [], []>} : vector<128x128xf32>, vector<128x128xf32>, vector<128x128xf32> -> vector<128x128xf32>
    %273 = arith.addf %267, %272 : vector<128x128xf32>
    %c0_184 = arith.constant 0 : index
    %c0_185 = arith.constant 0 : index
    %c2_186 = arith.constant 2 : index
    %c0_187 = arith.constant 0 : index
    %274 = vector.load %arg7[%c0_184, %c0_185, %c2_186, %c0_187] : memref<2x10x10x128xf32, #tpu.memory_space<vmem>>, vector<2x8x8x128xf32>
    %275 = vector.shape_cast %274 : vector<2x8x8x128xf32> to vector<128x128xf32>
    %c11 = arith.constant 11 : index
    %c0_188 = arith.constant 0 : index
    %c0_189 = arith.constant 0 : index
    %276 = vector.load %arg2[%c11, %c0_188, %c0_189] : memref<27x128x128xf32, #tpu.memory_space<vmem>>, vector<1x128x128xf32>
    %277 = vector.shape_cast %276 : vector<1x128x128xf32> to vector<128x128xf32>
    %cst_190 = arith.constant dense<0.000000e+00> : vector<128x128xf32>
    %278 = tpu.matmul %275, %277, %cst_190 {dimension_numbers = #tpu.dot_dimension_numbers<[1], [0], [0], [1], [0, 0, 1, 1], [], []>} : vector<128x128xf32>, vector<128x128xf32>, vector<128x128xf32> -> vector<128x128xf32>
    %279 = arith.addf %273, %278 : vector<128x128xf32>
    %c0_191 = arith.constant 0 : index
    %c1_192 = arith.constant 1 : index
    %c0_193 = arith.constant 0 : index
    %c0_194 = arith.constant 0 : index
    %280 = vector.load %arg7[%c0_191, %c1_192, %c0_193, %c0_194] : memref<2x10x10x128xf32, #tpu.memory_space<vmem>>, vector<2x8x8x128xf32>
    %281 = vector.shape_cast %280 : vector<2x8x8x128xf32> to vector<128x128xf32>
    %c12 = arith.constant 12 : index
    %c0_195 = arith.constant 0 : index
    %c0_196 = arith.constant 0 : index
    %282 = vector.load %arg2[%c12, %c0_195, %c0_196] : memref<27x128x128xf32, #tpu.memory_space<vmem>>, vector<1x128x128xf32>
    %283 = vector.shape_cast %282 : vector<1x128x128xf32> to vector<128x128xf32>
    %cst_197 = arith.constant dense<0.000000e+00> : vector<128x128xf32>
    %284 = tpu.matmul %281, %283, %cst_197 {dimension_numbers = #tpu.dot_dimension_numbers<[1], [0], [0], [1], [0, 0, 1, 1], [], []>} : vector<128x128xf32>, vector<128x128xf32>, vector<128x128xf32> -> vector<128x128xf32>
    %285 = arith.addf %279, %284 : vector<128x128xf32>
    %c0_198 = arith.constant 0 : index
    %c1_199 = arith.constant 1 : index
    %c1_200 = arith.constant 1 : index
    %c0_201 = arith.constant 0 : index
    %286 = vector.load %arg7[%c0_198, %c1_199, %c1_200, %c0_201] : memref<2x10x10x128xf32, #tpu.memory_space<vmem>>, vector<2x8x8x128xf32>
    %287 = vector.shape_cast %286 : vector<2x8x8x128xf32> to vector<128x128xf32>
    %c13 = arith.constant 13 : index
    %c0_202 = arith.constant 0 : index
    %c0_203 = arith.constant 0 : index
    %288 = vector.load %arg2[%c13, %c0_202, %c0_203] : memref<27x128x128xf32, #tpu.memory_space<vmem>>, vector<1x128x128xf32>
    %289 = vector.shape_cast %288 : vector<1x128x128xf32> to vector<128x128xf32>
    %cst_204 = arith.constant dense<0.000000e+00> : vector<128x128xf32>
    %290 = tpu.matmul %287, %289, %cst_204 {dimension_numbers = #tpu.dot_dimension_numbers<[1], [0], [0], [1], [0, 0, 1, 1], [], []>} : vector<128x128xf32>, vector<128x128xf32>, vector<128x128xf32> -> vector<128x128xf32>
    %291 = arith.addf %285, %290 : vector<128x128xf32>
    %c0_205 = arith.constant 0 : index
    %c1_206 = arith.constant 1 : index
    %c2_207 = arith.constant 2 : index
    %c0_208 = arith.constant 0 : index
    %292 = vector.load %arg7[%c0_205, %c1_206, %c2_207, %c0_208] : memref<2x10x10x128xf32, #tpu.memory_space<vmem>>, vector<2x8x8x128xf32>
    %293 = vector.shape_cast %292 : vector<2x8x8x128xf32> to vector<128x128xf32>
    %c14 = arith.constant 14 : index
    %c0_209 = arith.constant 0 : index
    %c0_210 = arith.constant 0 : index
    %294 = vector.load %arg2[%c14, %c0_209, %c0_210] : memref<27x128x128xf32, #tpu.memory_space<vmem>>, vector<1x128x128xf32>
    %295 = vector.shape_cast %294 : vector<1x128x128xf32> to vector<128x128xf32>
    %cst_211 = arith.constant dense<0.000000e+00> : vector<128x128xf32>
    %296 = tpu.matmul %293, %295, %cst_211 {dimension_numbers = #tpu.dot_dimension_numbers<[1], [0], [0], [1], [0, 0, 1, 1], [], []>} : vector<128x128xf32>, vector<128x128xf32>, vector<128x128xf32> -> vector<128x128xf32>
    %297 = arith.addf %291, %296 : vector<128x128xf32>
    %c0_212 = arith.constant 0 : index
    %c2_213 = arith.constant 2 : index
    %c0_214 = arith.constant 0 : index
    %c0_215 = arith.constant 0 : index
    %298 = vector.load %arg7[%c0_212, %c2_213, %c0_214, %c0_215] : memref<2x10x10x128xf32, #tpu.memory_space<vmem>>, vector<2x8x8x128xf32>
    %299 = vector.shape_cast %298 : vector<2x8x8x128xf32> to vector<128x128xf32>
    %c15 = arith.constant 15 : index
    %c0_216 = arith.constant 0 : index
    %c0_217 = arith.constant 0 : index
    %300 = vector.load %arg2[%c15, %c0_216, %c0_217] : memref<27x128x128xf32, #tpu.memory_space<vmem>>, vector<1x128x128xf32>
    %301 = vector.shape_cast %300 : vector<1x128x128xf32> to vector<128x128xf32>
    %cst_218 = arith.constant dense<0.000000e+00> : vector<128x128xf32>
    %302 = tpu.matmul %299, %301, %cst_218 {dimension_numbers = #tpu.dot_dimension_numbers<[1], [0], [0], [1], [0, 0, 1, 1], [], []>} : vector<128x128xf32>, vector<128x128xf32>, vector<128x128xf32> -> vector<128x128xf32>
    %303 = arith.addf %297, %302 : vector<128x128xf32>
    %c0_219 = arith.constant 0 : index
    %c2_220 = arith.constant 2 : index
    %c1_221 = arith.constant 1 : index
    %c0_222 = arith.constant 0 : index
    %304 = vector.load %arg7[%c0_219, %c2_220, %c1_221, %c0_222] : memref<2x10x10x128xf32, #tpu.memory_space<vmem>>, vector<2x8x8x128xf32>
    %305 = vector.shape_cast %304 : vector<2x8x8x128xf32> to vector<128x128xf32>
    %c16_223 = arith.constant 16 : index
    %c0_224 = arith.constant 0 : index
    %c0_225 = arith.constant 0 : index
    %306 = vector.load %arg2[%c16_223, %c0_224, %c0_225] : memref<27x128x128xf32, #tpu.memory_space<vmem>>, vector<1x128x128xf32>
    %307 = vector.shape_cast %306 : vector<1x128x128xf32> to vector<128x128xf32>
    %cst_226 = arith.constant dense<0.000000e+00> : vector<128x128xf32>
    %308 = tpu.matmul %305, %307, %cst_226 {dimension_numbers = #tpu.dot_dimension_numbers<[1], [0], [0], [1], [0, 0, 1, 1], [], []>} : vector<128x128xf32>, vector<128x128xf32>, vector<128x128xf32> -> vector<128x128xf32>
    %309 = arith.addf %303, %308 : vector<128x128xf32>
    %c0_227 = arith.constant 0 : index
    %c2_228 = arith.constant 2 : index
    %c2_229 = arith.constant 2 : index
    %c0_230 = arith.constant 0 : index
    %310 = vector.load %arg7[%c0_227, %c2_228, %c2_229, %c0_230] : memref<2x10x10x128xf32, #tpu.memory_space<vmem>>, vector<2x8x8x128xf32>
    %311 = vector.shape_cast %310 : vector<2x8x8x128xf32> to vector<128x128xf32>
    %c17 = arith.constant 17 : index
    %c0_231 = arith.constant 0 : index
    %c0_232 = arith.constant 0 : index
    %312 = vector.load %arg2[%c17, %c0_231, %c0_232] : memref<27x128x128xf32, #tpu.memory_space<vmem>>, vector<1x128x128xf32>
    %313 = vector.shape_cast %312 : vector<1x128x128xf32> to vector<128x128xf32>
    %cst_233 = arith.constant dense<0.000000e+00> : vector<128x128xf32>
    %314 = tpu.matmul %311, %313, %cst_233 {dimension_numbers = #tpu.dot_dimension_numbers<[1], [0], [0], [1], [0, 0, 1, 1], [], []>} : vector<128x128xf32>, vector<128x128xf32>, vector<128x128xf32> -> vector<128x128xf32>
    %315 = arith.addf %309, %314 : vector<128x128xf32>
    %cst_234 = arith.constant dense<0.000000e+00> : vector<128xf32>
    %316 = vector.multi_reduction <add>, %315, %cst_234 [0] : vector<128x128xf32> to vector<128xf32>
    %317 = vector.shape_cast %316 : vector<128xf32> to vector<1x128xf32>
    %318 = arith.mulf %315, %315 : vector<128x128xf32>
    %cst_235 = arith.constant dense<0.000000e+00> : vector<128xf32>
    %319 = vector.multi_reduction <add>, %318, %cst_235 [0] : vector<128x128xf32> to vector<128xf32>
    %320 = vector.shape_cast %319 : vector<128xf32> to vector<1x128xf32>
    %cst_236 = arith.constant 7.812500e-03 : f32
    %321 = vector.broadcast %cst_236 : f32 to vector<1x128xf32>
    %322 = arith.mulf %317, %321 : vector<1x128xf32>
    %cst_237 = arith.constant 7.812500e-03 : f32
    %323 = vector.broadcast %cst_237 : f32 to vector<1x128xf32>
    %324 = arith.mulf %320, %323 : vector<1x128xf32>
    %325 = arith.mulf %322, %322 : vector<1x128xf32>
    %326 = arith.subf %324, %325 : vector<1x128xf32>
    %cst_238 = arith.constant 0.000000e+00 : f32
    %327 = vector.broadcast %cst_238 : f32 to vector<1x128xf32>
    %328 = arith.maximumf %326, %327 : vector<1x128xf32>
    %c4_239 = arith.constant 4 : index
    %c0_240 = arith.constant 0 : index
    %329 = vector.load %arg3[%c4_239, %c0_240] : memref<8x128xf32, #tpu.memory_space<vmem>>, vector<1x128xf32>
    %c5_241 = arith.constant 5 : index
    %c0_242 = arith.constant 0 : index
    %330 = vector.load %arg3[%c5_241, %c0_242] : memref<8x128xf32, #tpu.memory_space<vmem>>, vector<1x128xf32>
    %cst_243 = arith.constant 9.99999974E-6 : f32
    %331 = vector.broadcast %cst_243 : f32 to vector<1x128xf32>
    %332 = arith.addf %328, %331 : vector<1x128xf32>
    %333 = math.rsqrt %332 : vector<1x128xf32>
    %334 = arith.mulf %329, %333 : vector<1x128xf32>
    %335 = arith.mulf %322, %334 : vector<1x128xf32>
    %336 = arith.subf %330, %335 : vector<1x128xf32>
    %337 = vector.broadcast %334 : vector<1x128xf32> to vector<128x128xf32>
    %338 = arith.mulf %315, %337 : vector<128x128xf32>
    %339 = vector.broadcast %336 : vector<1x128xf32> to vector<128x128xf32>
    %340 = arith.addf %338, %339 : vector<128x128xf32>
    %cst_244 = arith.constant 0.000000e+00 : f32
    %341 = vector.broadcast %cst_244 : f32 to vector<128x128xf32>
    %342 = arith.maximumf %340, %341 : vector<128x128xf32>
    %343 = vector.shape_cast %342 : vector<128x128xf32> to vector<2x8x8x128xf32>
    %c0_245 = arith.constant 0 : index
    %c1_246 = arith.constant 1 : index
    %c1_247 = arith.constant 1 : index
    %c0_248 = arith.constant 0 : index
    %344 = vector.load %arg7[%c0_245, %c1_246, %c1_247, %c0_248] : memref<2x10x10x128xf32, #tpu.memory_space<vmem>>, vector<2x8x8x128xf32>
    tpu.vector_store %arg7[%c0_245, %c1_246, %c1_247, %c0_248], %343 {strides = array<i32>} : memref<2x10x10x128xf32, #tpu.memory_space<vmem>>, vector<2x8x8x128xf32>,
    %c0_249 = arith.constant 0 : index
    %c0_250 = arith.constant 0 : index
    %c0_251 = arith.constant 0 : index
    %c0_252 = arith.constant 0 : index
    %345 = vector.load %arg7[%c0_249, %c0_250, %c0_251, %c0_252] : memref<2x10x10x128xf32, #tpu.memory_space<vmem>>, vector<2x8x8x128xf32>
    %346 = vector.shape_cast %345 : vector<2x8x8x128xf32> to vector<128x128xf32>
    %c18 = arith.constant 18 : index
    %c0_253 = arith.constant 0 : index
    %c0_254 = arith.constant 0 : index
    %347 = vector.load %arg2[%c18, %c0_253, %c0_254] : memref<27x128x128xf32, #tpu.memory_space<vmem>>, vector<1x128x128xf32>
    %348 = vector.shape_cast %347 : vector<1x128x128xf32> to vector<128x128xf32>
    %cst_255 = arith.constant dense<0.000000e+00> : vector<128x128xf32>
    %349 = tpu.matmul %346, %348, %cst_255 {dimension_numbers = #tpu.dot_dimension_numbers<[1], [0], [0], [1], [0, 0, 1, 1], [], []>} : vector<128x128xf32>, vector<128x128xf32>, vector<128x128xf32> -> vector<128x128xf32>
    %c0_256 = arith.constant 0 : index
    %c0_257 = arith.constant 0 : index
    %c1_258 = arith.constant 1 : index
    %c0_259 = arith.constant 0 : index
    %350 = vector.load %arg7[%c0_256, %c0_257, %c1_258, %c0_259] : memref<2x10x10x128xf32, #tpu.memory_space<vmem>>, vector<2x8x8x128xf32>
    %351 = vector.shape_cast %350 : vector<2x8x8x128xf32> to vector<128x128xf32>
    %c19 = arith.constant 19 : index
    %c0_260 = arith.constant 0 : index
    %c0_261 = arith.constant 0 : index
    %352 = vector.load %arg2[%c19, %c0_260, %c0_261] : memref<27x128x128xf32, #tpu.memory_space<vmem>>, vector<1x128x128xf32>
    %353 = vector.shape_cast %352 : vector<1x128x128xf32> to vector<128x128xf32>
    %cst_262 = arith.constant dense<0.000000e+00> : vector<128x128xf32>
    %354 = tpu.matmul %351, %353, %cst_262 {dimension_numbers = #tpu.dot_dimension_numbers<[1], [0], [0], [1], [0, 0, 1, 1], [], []>} : vector<128x128xf32>, vector<128x128xf32>, vector<128x128xf32> -> vector<128x128xf32>
    %355 = arith.addf %349, %354 : vector<128x128xf32>
    %c0_263 = arith.constant 0 : index
    %c0_264 = arith.constant 0 : index
    %c2_265 = arith.constant 2 : index
    %c0_266 = arith.constant 0 : index
    %356 = vector.load %arg7[%c0_263, %c0_264, %c2_265, %c0_266] : memref<2x10x10x128xf32, #tpu.memory_space<vmem>>, vector<2x8x8x128xf32>
    %357 = vector.shape_cast %356 : vector<2x8x8x128xf32> to vector<128x128xf32>
    %c20 = arith.constant 20 : index
    %c0_267 = arith.constant 0 : index
    %c0_268 = arith.constant 0 : index
    %358 = vector.load %arg2[%c20, %c0_267, %c0_268] : memref<27x128x128xf32, #tpu.memory_space<vmem>>, vector<1x128x128xf32>
    %359 = vector.shape_cast %358 : vector<1x128x128xf32> to vector<128x128xf32>
    %cst_269 = arith.constant dense<0.000000e+00> : vector<128x128xf32>
    %360 = tpu.matmul %357, %359, %cst_269 {dimension_numbers = #tpu.dot_dimension_numbers<[1], [0], [0], [1], [0, 0, 1, 1], [], []>} : vector<128x128xf32>, vector<128x128xf32>, vector<128x128xf32> -> vector<128x128xf32>
    %361 = arith.addf %355, %360 : vector<128x128xf32>
    %c0_270 = arith.constant 0 : index
    %c1_271 = arith.constant 1 : index
    %c0_272 = arith.constant 0 : index
    %c0_273 = arith.constant 0 : index
    %362 = vector.load %arg7[%c0_270, %c1_271, %c0_272, %c0_273] : memref<2x10x10x128xf32, #tpu.memory_space<vmem>>, vector<2x8x8x128xf32>
    %363 = vector.shape_cast %362 : vector<2x8x8x128xf32> to vector<128x128xf32>
    %c21 = arith.constant 21 : index
    %c0_274 = arith.constant 0 : index
    %c0_275 = arith.constant 0 : index
    %364 = vector.load %arg2[%c21, %c0_274, %c0_275] : memref<27x128x128xf32, #tpu.memory_space<vmem>>, vector<1x128x128xf32>
    %365 = vector.shape_cast %364 : vector<1x128x128xf32> to vector<128x128xf32>
    %cst_276 = arith.constant dense<0.000000e+00> : vector<128x128xf32>
    %366 = tpu.matmul %363, %365, %cst_276 {dimension_numbers = #tpu.dot_dimension_numbers<[1], [0], [0], [1], [0, 0, 1, 1], [], []>} : vector<128x128xf32>, vector<128x128xf32>, vector<128x128xf32> -> vector<128x128xf32>
    %367 = arith.addf %361, %366 : vector<128x128xf32>
    %c0_277 = arith.constant 0 : index
    %c1_278 = arith.constant 1 : index
    %c1_279 = arith.constant 1 : index
    %c0_280 = arith.constant 0 : index
    %368 = vector.load %arg7[%c0_277, %c1_278, %c1_279, %c0_280] : memref<2x10x10x128xf32, #tpu.memory_space<vmem>>, vector<2x8x8x128xf32>
    %369 = vector.shape_cast %368 : vector<2x8x8x128xf32> to vector<128x128xf32>
    %c22 = arith.constant 22 : index
    %c0_281 = arith.constant 0 : index
    %c0_282 = arith.constant 0 : index
    %370 = vector.load %arg2[%c22, %c0_281, %c0_282] : memref<27x128x128xf32, #tpu.memory_space<vmem>>, vector<1x128x128xf32>
    %371 = vector.shape_cast %370 : vector<1x128x128xf32> to vector<128x128xf32>
    %cst_283 = arith.constant dense<0.000000e+00> : vector<128x128xf32>
    %372 = tpu.matmul %369, %371, %cst_283 {dimension_numbers = #tpu.dot_dimension_numbers<[1], [0], [0], [1], [0, 0, 1, 1], [], []>} : vector<128x128xf32>, vector<128x128xf32>, vector<128x128xf32> -> vector<128x128xf32>
    %373 = arith.addf %367, %372 : vector<128x128xf32>
    %c0_284 = arith.constant 0 : index
    %c1_285 = arith.constant 1 : index
    %c2_286 = arith.constant 2 : index
    %c0_287 = arith.constant 0 : index
    %374 = vector.load %arg7[%c0_284, %c1_285, %c2_286, %c0_287] : memref<2x10x10x128xf32, #tpu.memory_space<vmem>>, vector<2x8x8x128xf32>
    %375 = vector.shape_cast %374 : vector<2x8x8x128xf32> to vector<128x128xf32>
    %c23 = arith.constant 23 : index
    %c0_288 = arith.constant 0 : index
    %c0_289 = arith.constant 0 : index
    %376 = vector.load %arg2[%c23, %c0_288, %c0_289] : memref<27x128x128xf32, #tpu.memory_space<vmem>>, vector<1x128x128xf32>
    %377 = vector.shape_cast %376 : vector<1x128x128xf32> to vector<128x128xf32>
    %cst_290 = arith.constant dense<0.000000e+00> : vector<128x128xf32>
    %378 = tpu.matmul %375, %377, %cst_290 {dimension_numbers = #tpu.dot_dimension_numbers<[1], [0], [0], [1], [0, 0, 1, 1], [], []>} : vector<128x128xf32>, vector<128x128xf32>, vector<128x128xf32> -> vector<128x128xf32>
    %379 = arith.addf %373, %378 : vector<128x128xf32>
    %c0_291 = arith.constant 0 : index
    %c2_292 = arith.constant 2 : index
    %c0_293 = arith.constant 0 : index
    %c0_294 = arith.constant 0 : index
    %380 = vector.load %arg7[%c0_291, %c2_292, %c0_293, %c0_294] : memref<2x10x10x128xf32, #tpu.memory_space<vmem>>, vector<2x8x8x128xf32>
    %381 = vector.shape_cast %380 : vector<2x8x8x128xf32> to vector<128x128xf32>
    %c24_295 = arith.constant 24 : index
    %c0_296 = arith.constant 0 : index
    %c0_297 = arith.constant 0 : index
    %382 = vector.load %arg2[%c24_295, %c0_296, %c0_297] : memref<27x128x128xf32, #tpu.memory_space<vmem>>, vector<1x128x128xf32>
    %383 = vector.shape_cast %382 : vector<1x128x128xf32> to vector<128x128xf32>
    %cst_298 = arith.constant dense<0.000000e+00> : vector<128x128xf32>
    %384 = tpu.matmul %381, %383, %cst_298 {dimension_numbers = #tpu.dot_dimension_numbers<[1], [0], [0], [1], [0, 0, 1, 1], [], []>} : vector<128x128xf32>, vector<128x128xf32>, vector<128x128xf32> -> vector<128x128xf32>
    %385 = arith.addf %379, %384 : vector<128x128xf32>
    %c0_299 = arith.constant 0 : index
    %c2_300 = arith.constant 2 : index
    %c1_301 = arith.constant 1 : index
    %c0_302 = arith.constant 0 : index
    %386 = vector.load %arg7[%c0_299, %c2_300, %c1_301, %c0_302] : memref<2x10x10x128xf32, #tpu.memory_space<vmem>>, vector<2x8x8x128xf32>
    %387 = vector.shape_cast %386 : vector<2x8x8x128xf32> to vector<128x128xf32>
    %c25 = arith.constant 25 : index
    %c0_303 = arith.constant 0 : index
    %c0_304 = arith.constant 0 : index
    %388 = vector.load %arg2[%c25, %c0_303, %c0_304] : memref<27x128x128xf32, #tpu.memory_space<vmem>>, vector<1x128x128xf32>
    %389 = vector.shape_cast %388 : vector<1x128x128xf32> to vector<128x128xf32>
    %cst_305 = arith.constant dense<0.000000e+00> : vector<128x128xf32>
    %390 = tpu.matmul %387, %389, %cst_305 {dimension_numbers = #tpu.dot_dimension_numbers<[1], [0], [0], [1], [0, 0, 1, 1], [], []>} : vector<128x128xf32>, vector<128x128xf32>, vector<128x128xf32> -> vector<128x128xf32>
    %391 = arith.addf %385, %390 : vector<128x128xf32>
    %c0_306 = arith.constant 0 : index
    %c2_307 = arith.constant 2 : index
    %c2_308 = arith.constant 2 : index
    %c0_309 = arith.constant 0 : index
    %392 = vector.load %arg7[%c0_306, %c2_307, %c2_308, %c0_309] : memref<2x10x10x128xf32, #tpu.memory_space<vmem>>, vector<2x8x8x128xf32>
    %393 = vector.shape_cast %392 : vector<2x8x8x128xf32> to vector<128x128xf32>
    %c26 = arith.constant 26 : index
    %c0_310 = arith.constant 0 : index
    %c0_311 = arith.constant 0 : index
    %394 = vector.load %arg2[%c26, %c0_310, %c0_311] : memref<27x128x128xf32, #tpu.memory_space<vmem>>, vector<1x128x128xf32>
    %395 = vector.shape_cast %394 : vector<1x128x128xf32> to vector<128x128xf32>
    %cst_312 = arith.constant dense<0.000000e+00> : vector<128x128xf32>
    %396 = tpu.matmul %393, %395, %cst_312 {dimension_numbers = #tpu.dot_dimension_numbers<[1], [0], [0], [1], [0, 0, 1, 1], [], []>} : vector<128x128xf32>, vector<128x128xf32>, vector<128x128xf32> -> vector<128x128xf32>
    %397 = arith.addf %391, %396 : vector<128x128xf32>
    %cst_313 = arith.constant dense<0.000000e+00> : vector<128xf32>
    %398 = vector.multi_reduction <add>, %397, %cst_313 [0] : vector<128x128xf32> to vector<128xf32>
    %399 = vector.shape_cast %398 : vector<128xf32> to vector<1x128xf32>
    %400 = arith.mulf %397, %397 : vector<128x128xf32>
    %cst_314 = arith.constant dense<0.000000e+00> : vector<128xf32>
    %401 = vector.multi_reduction <add>, %400, %cst_314 [0] : vector<128x128xf32> to vector<128xf32>
    %402 = vector.shape_cast %401 : vector<128xf32> to vector<1x128xf32>
    %cst_315 = arith.constant 7.812500e-03 : f32
    %403 = vector.broadcast %cst_315 : f32 to vector<1x128xf32>
    %404 = arith.mulf %399, %403 : vector<1x128xf32>
    %cst_316 = arith.constant 7.812500e-03 : f32
    %405 = vector.broadcast %cst_316 : f32 to vector<1x128xf32>
    %406 = arith.mulf %402, %405 : vector<1x128xf32>
    %407 = arith.mulf %404, %404 : vector<1x128xf32>
    %408 = arith.subf %406, %407 : vector<1x128xf32>
    %cst_317 = arith.constant 0.000000e+00 : f32
    %409 = vector.broadcast %cst_317 : f32 to vector<1x128xf32>
    %410 = arith.maximumf %408, %409 : vector<1x128xf32>
    %c6_318 = arith.constant 6 : index
    %c0_319 = arith.constant 0 : index
    %411 = vector.load %arg3[%c6_318, %c0_319] : memref<8x128xf32, #tpu.memory_space<vmem>>, vector<1x128xf32>
    %c7_320 = arith.constant 7 : index
    %c0_321 = arith.constant 0 : index
    %412 = vector.load %arg3[%c7_320, %c0_321] : memref<8x128xf32, #tpu.memory_space<vmem>>, vector<1x128xf32>
    %cst_322 = arith.constant 9.99999974E-6 : f32
    %413 = vector.broadcast %cst_322 : f32 to vector<1x128xf32>
    %414 = arith.addf %410, %413 : vector<1x128xf32>
    %415 = math.rsqrt %414 : vector<1x128xf32>
    %416 = arith.mulf %411, %415 : vector<1x128xf32>
    %417 = arith.mulf %404, %416 : vector<1x128xf32>
    %418 = arith.subf %412, %417 : vector<1x128xf32>
    %419 = vector.broadcast %416 : vector<1x128xf32> to vector<128x128xf32>
    %420 = arith.mulf %397, %419 : vector<128x128xf32>
    %421 = vector.broadcast %418 : vector<1x128xf32> to vector<128x128xf32>
    %422 = arith.addf %420, %421 : vector<128x128xf32>
    %cst_323 = arith.constant 0.000000e+00 : f32
    %423 = vector.broadcast %cst_323 : f32 to vector<128x128xf32>
    %424 = arith.maximumf %422, %423 : vector<128x128xf32>
    %c0_324 = arith.constant 0 : index
    %c0_325 = arith.constant 0 : index
    %425 = vector.load %arg4[%c0_324, %c0_325] : memref<128x128xf32, #tpu.memory_space<vmem>>, vector<128x128xf32>
    tpu.vector_store %arg4[%c0_324, %c0_325], %424 {strides = array<i32>} : memref<128x128xf32, #tpu.memory_space<vmem>>, vector<128x128xf32>,
    return
  }
}

</mosaic_0001>

<bundles_post_ra>
// kernel: cnn_encoder_forward.1
= control target key start
LH: loop header
LB: loop body
LE: loop exit
PB: predicated region body
PF: predicated region fallthrough
CT: control target
= control target key end

     0   :  { %vm17_vm0 = vcmask 130048   ;;  %vm20_vm1 = vcmask 123904   ;;  %v15417_v0 = vmov 0.0   ;;  %s15418_s9 = smov 16   ;;  %s15419_s20 = smov 32   ;;  %vm121_vm2 = vcmask 261120   ;;  %s21695_s0 = inlined_call_operand.vmem [shape: f32[2,16,16], index: 0, kind: input, shape index: {}]   ;;  %s21696_s1 = inlined_call_operand.vmem [shape: f32[48,2048], index: 1, kind: input, shape index: {}]   ;;  %s21697_s3 = inlined_call_operand.vmem [shape: f32[8,128], index: 3, kind: input, shape index: {}]   ;;  %s21698_s2 = inlined_call_operand.vmem [shape: f32[27,128,128], index: 2, kind: input, shape index: {}]   ;;  %s21699_s4 = inlined_call_operand.vmem [shape: f32[128,128], index: 4, kind: output, shape index: {}]  }
   0x1   :  { %18 = vst.msk [vmem:[#allocation2] sm:$0xff] %vm17_vm0, %v15417_v0  ;;  %19 = vst.msk [vmem:[#allocation2 + $0x8] sm:$0xff] %vm17_vm0, %v15417_v0  ;;  %v25_v1 = vld [vmem:[%s21695_s0] sm:$0xff]  ;;  %v26_v2 = vld [vmem:[%s21695_s0 + $0x8] sm:$0xff]  ;;  %227 = vmatprep.mubr.f32.mxu1 %v15417_v0  ;;  %608 = vmatprep.mubr.f32.mxu0 %v15417_v0  ;;  %vm150_vm3 = vcmask 392192   ;;  %vm474_vm4 = vcmask 1043456  }
   0x2   :  { %22 = vst.msk [vmem:[#allocation2 + $0x18] sm:$0xff] %vm17_vm0, %v15417_v0  ;;  %23 = vst.msk [vmem:[#allocation2 + $0x20] sm:$0xff] %vm17_vm0, %v15417_v0  ;;  %v27_v3 = vld [vmem:[%s21695_s0 + $0x10] sm:$0xff]  ;;  %v28_v4 = vld [vmem:[%s21695_s0 + $0x18] sm:$0xff]  ;;  %vm2256_vm5 = vcmask 1041409   ;;  %vm2258_vm6 = vcmask 1042434  }
   0x3   :  { %33 = vst [vmem:[#allocation4] sm:$0xff] %v15417_v0  ;;  %34 = vst [vmem:[#allocation4 + $0x8] sm:$0x3] %v15417_v0  ;;  %v127_v5 = vld [vmem:[%s21696_s1 + $0x8] sm:$0xff]  ;;  %v126_v8 = vld [vmem:[%s21696_s1] sm:$0xff]  ;;  %vm2260_vm7 = vcmask 1043459  }
   0x4   :  { %35 = vst [vmem:[#allocation4 + $0x10] sm:$0xff] %v15417_v0  ;;  %36 = vst [vmem:[#allocation4 + $0x18] sm:$0x3] %v15417_v0  ;;  %v131_v6 = vld [vmem:[%s21696_s1 + $0x88] sm:$0xff]  ;;  %v130_v9 = vld [vmem:[%s21696_s1 + $0x80] sm:$0xff]  ;;  %vm2323_vm8 = vcmask 1040384  }
   0x5   :  { %37 = vst [vmem:[#allocation4 + $0x20] sm:$0xff] %v15417_v0  ;;  %38 = vst [vmem:[#allocation4 + $0x28] sm:$0x3] %v15417_v0  ;;  %v14056_v7 = vpack.c.bf16 %v131_v6, %v127_v5  ;;  %v521_v10 = vld [vmem:[%s21696_s1 + $0x28] sm:$0xff]  ;;  %v14058_v11 = vpack.c.bf16 %v130_v9, %v126_v8  ;;  %v520_v13 = vld [vmem:[%s21696_s1 + $0x20] sm:$0xff]  ;;  %vm2603_vm9 = vcmask 1044484  }
   0x6   :  { %39 = vst [vmem:[#allocation4 + $0x30] sm:$0xff] %v15417_v0  ;;  %40 = vst [vmem:[#allocation4 + $0x38] sm:$0x3] %v15417_v0  ;;  %v525_v12 = vld [vmem:[%s21696_s1 + $0xa8] sm:$0xff]  ;;  %v524_v14 = vld [vmem:[%s21696_s1 + $0xa0] sm:$0xff]  ;;  %vm2606_vm10 = vcmask 1045509  }
   0x7   :  { %41 = vst [vmem:[#allocation4 + $0x40] sm:$0xff] %v15417_v0  ;;  %42 = vst [vmem:[#allocation4 + $0x48] sm:$0x3] %v15417_v0  ;;  %14057 = vmatprep.subr.bf16.mxu1 %v14056_v7  ;;  %v14080_v15 = vpack.c.bf16 %v525_v12, %v521_v10  ;;  %v14082_v16 = vpack.c.bf16 %v524_v14, %v520_v13  ;;  %v135_v17 = vld [vmem:[%s21696_s1 + $0x108] sm:$0xff]  ;;  %v134_v19 = vld [vmem:[%s21696_s1 + $0x100] sm:$0xff]  ;;  %vm2609_vm11 = vcmask 1046534  }
   0x8   :  { %43 = vst [vmem:[#allocation4 + $0x50] sm:$0xff] %v15417_v0  ;;  %44 = vst [vmem:[#allocation4 + $0x58] sm:$0x3] %v15417_v0  ;;  %v139_v18 = vld [vmem:[%s21696_s1 + $0x188] sm:$0xff]  ;;  %14059 = vmatpush1.bf16.msra.mxu1 %v14058_v11  ;;  %v138_v21 = vld [vmem:[%s21696_s1 + $0x180] sm:$0xff]  ;;  %vm2612_vm12 = vcmask 1047559  }
   0x9   :  { %45 = vst [vmem:[#allocation4 + $0x60] sm:$0xff] %v15417_v0  ;;  %46 = vst [vmem:[#allocation4 + $0x68] sm:$0x3] %v15417_v0  ;;  %v14060_v20 = vpack.c.bf16 %v139_v18, %v135_v17  ;;  %v529_v22 = vld [vmem:[%s21696_s1 + $0x128] sm:$0xff]  ;;  %14081 = vmatprep.subr.bf16.mxu0 %v14080_v15  ;;  %v14062_v24 = vpack.c.bf16 %v138_v21, %v134_v19  ;;  %v528_v26 = vld [vmem:[%s21696_s1 + $0x120] sm:$0xff] }
   0xa   :  { %47 = vst [vmem:[#allocation4 + $0x70] sm:$0xff] %v15417_v0  ;;  %48 = vst [vmem:[#allocation4 + $0x78] sm:$0x3] %v15417_v0  ;;  %v533_v23 = vld [vmem:[%s21696_s1 + $0x1a8] sm:$0xff]  ;;  %v532_v27 = vld [vmem:[%s21696_s1 + $0x1a0] sm:$0xff]  ;;  %14083 = vmatpush1.bf16.msra.mxu0 %v14082_v16 }
   0xb   :  { %49 = vst [vmem:[#allocation4 + $0x80] sm:$0xff] %v15417_v0  ;;  %50 = vst [vmem:[#allocation4 + $0x88] sm:$0x3] %v15417_v0  ;;  %v14084_v25 = vpack.c.bf16 %v533_v23, %v529_v22  ;;  %v143_v28 = vld [vmem:[%s21696_s1 + $0x208] sm:$0xff]  ;;  %14061 = vmatprep.subr.bf16.mxu1 %v14060_v20  ;;  %v14086_v29 = vpack.c.bf16 %v532_v27, %v528_v26  ;;  %v142_v31 = vld [vmem:[%s21696_s1 + $0x200] sm:$0xff] }
   0xc   :  { %51 = vst [vmem:[#allocation4 + $0x90] sm:$0xff] %v15417_v0  ;;  %52 = vst [vmem:[#allocation4 + $0x98] sm:$0x3] %v15417_v0  ;;  %v147_v30 = vld [vmem:[%s21696_s1 + $0x288] sm:$0xff]  ;;  %v146_v32 = vld [vmem:[%s21696_s1 + $0x280] sm:$0xff]  ;;  %14063 = vmatpush1.bf16.msra.mxu1 %v14062_v24 }
   0xd   :  { %53 = vst [vmem:[#allocation4 + $0xa0] sm:$0xff] %v15417_v0  ;;  %54 = vst [vmem:[#allocation4 + $0xa8] sm:$0x3] %v15417_v0  ;;  %14085 = vmatprep.subr.bf16.mxu0 %v14084_v25  ;;  %v14064_v35 = vpack.c.bf16 %v147_v30, %v143_v28  ;;  %v14066_v38 = vpack.c.bf16 %v146_v32, %v142_v31  ;;  %v537_v39 = vld [vmem:[%s21696_s1 + $0x228] sm:$0xff]  ;;  %v536_v42 = vld [vmem:[%s21696_s1 + $0x220] sm:$0xff] }
   0xe   :  { %55 = vst [vmem:[#allocation4 + $0xb0] sm:$0xff] %v15417_v0  ;;  %56 = vst [vmem:[#allocation4 + $0xb8] sm:$0x3] %v15417_v0  ;;  %14087 = vmatpush1.bf16.msra.mxu0 %v14086_v29  ;;  %v541_v40 = vld [vmem:[%s21696_s1 + $0x2a8] sm:$0xff]  ;;  %v540_v43 = vld [vmem:[%s21696_s1 + $0x2a0] sm:$0xff] }
   0xf   :  { %57 = vst [vmem:[#allocation4 + $0xc0] sm:$0xff] %v15417_v0  ;;  %58 = vst [vmem:[#allocation4 + $0xc8] sm:$0x3] %v15417_v0  ;;  %14065 = vmatprep.subr.bf16.mxu1 %v14064_v35  ;;  %v14088_v41 = vpack.c.bf16 %v541_v40, %v537_v39  ;;  %v129_v44 = vld [vmem:[%s21696_s1 + $0x18] sm:$0xff]  ;;  %v14090_v46 = vpack.c.bf16 %v540_v43, %v536_v42  ;;  %v901_v50 = vld [vmem:[%s21696_s1 + $0x48] sm:$0xff] }
  0x10   :  { %59 = vst [vmem:[#allocation4 + $0xd0] sm:$0xff] %v15417_v0  ;;  %60 = vst [vmem:[#allocation4 + $0xd8] sm:$0x3] %v15417_v0  ;;  %v133_v47 = vld [vmem:[%s21696_s1 + $0x98] sm:$0xff]  ;;  %14067 = vmatpush1.bf16.msra.mxu1 %v14066_v38  ;;  %v905_v51 = vld [vmem:[%s21696_s1 + $0xc8] sm:$0xff] }
  0x11   :  { %61 = vst [vmem:[#allocation4 + $0xe0] sm:$0xff] %v15417_v0  ;;  %62 = vst [vmem:[#allocation4 + $0xe8] sm:$0x3] %v15417_v0  ;;  %14089 = vmatprep.subr.bf16.mxu0 %v14088_v41  ;;  %v14068_v49 = vpack.c.bf16 %v133_v47, %v129_v44  ;;  %v14104_v52 = vpack.c.bf16 %v905_v51, %v901_v50  ;;  %v128_v57 = vld [vmem:[%s21696_s1 + $0x10] sm:$0xff]  ;;  %v137_v60 = vld [vmem:[%s21696_s1 + $0x118] sm:$0xff] }
  0x12   :  { %63 = vst [vmem:[#allocation4 + $0xf0] sm:$0xff] %v15417_v0  ;;  %64 = vst [vmem:[#allocation4 + $0xf8] sm:$0x3] %v15417_v0  ;;  %14091 = vmatpush1.bf16.msra.mxu0 %v14090_v46  ;;  %v132_v58 = vld [vmem:[%s21696_s1 + $0x90] sm:$0xff]  ;;  %v141_v61 = vld [vmem:[%s21696_s1 + $0x198] sm:$0xff] }
  0x13   :  { %65 = vst [vmem:[#allocation4 + $0x100] sm:$0xff] %v15417_v0  ;;  %66 = vst [vmem:[#allocation4 + $0x108] sm:$0x3] %v15417_v0  ;;  %14069 = vmatprep.subr.bf16.mxu1 %v14068_v49  ;;  %14105 = vmatprep.subr.bf16.mxu0 %v14104_v52  ;;  %v900_v62 = vld [vmem:[%s21696_s1 + $0x40] sm:$0xff]  ;;  %v14072_v7 = vpack.c.bf16 %v141_v61, %v137_v60  ;;  %v136_v8 = vld [vmem:[%s21696_s1 + $0x110] sm:$0xff] }
  0x14   :  { %67 = vst [vmem:[#allocation4 + $0x110] sm:$0xff] %v15417_v0  ;;  %68 = vst [vmem:[#allocation4 + $0x118] sm:$0x3] %v15417_v0  ;;  %v904_v63 = vld [vmem:[%s21696_s1 + $0xc0] sm:$0xff]  ;;  %v140_v9 = vld [vmem:[%s21696_s1 + $0x190] sm:$0xff] }
  0x15   :  { %69 = vst [vmem:[#allocation4 + $0x120] sm:$0xff] %v15417_v0  ;;  %70 = vst [vmem:[#allocation4 + $0x128] sm:$0x3] %v15417_v0  ;;  %v14106_v11 = vpack.c.bf16 %v904_v63, %v900_v62  ;;  %v909_v12 = vld [vmem:[%s21696_s1 + $0x148] sm:$0xff]  ;;  %v908_v14 = vld [vmem:[%s21696_s1 + $0x140] sm:$0xff]  ;;  %v14074_v19 = vpack.c.bf16 %v140_v9, %v136_v8 }
  0x16   :  { %71 = vst [vmem:[#allocation4 + $0x130] sm:$0xff] %v15417_v0  ;;  %72 = vst [vmem:[#allocation4 + $0x138] sm:$0x3] %v15417_v0  ;;  %v913_v13 = vld [vmem:[%s21696_s1 + $0x1c8] sm:$0xff]  ;;  %v912_v16 = vld [vmem:[%s21696_s1 + $0x1c0] sm:$0xff] }
  0x17   :  { %21 = vst.msk [vmem:[#allocation2 + $0x10] sm:$0x3] %vm20_vm1, %v15417_v0  ;;  %24 = vst.msk [vmem:[#allocation2 + $0x28] sm:$0x3] %vm20_vm1, %v15417_v0  ;;  %v145_v17 = vld [vmem:[%s21696_s1 + $0x218] sm:$0xff]  ;;  %v14108_v22 = vpack.c.bf16 %v913_v13, %v909_v12  ;;  %v144_v24 = vld [vmem:[%s21696_s1 + $0x210] sm:$0xff]  ;;  %v14110_v28 = vpack.c.bf16 %v912_v16, %v908_v14 }
  0x18   :  { %29 = vst.msk [vmem:[#allocation2 + $0x1] sm:$0xff] %vm17_vm0, %v25_v1  ;;  %30 = vst.msk [vmem:[#allocation2 + $0x9] sm:$0xff] %vm17_vm0, %v26_v2  ;;  %v14070_v2 = vpack.c.bf16 %v132_v58, %v128_v57  ;;  %v149_v18 = vld [vmem:[%s21696_s1 + $0x298] sm:$0xff]  ;;  %v148_v25 = vld [vmem:[%s21696_s1 + $0x290] sm:$0xff] }
  0x19   :  { %31 = vst.msk [vmem:[#allocation2 + $0x19] sm:$0xff] %vm17_vm0, %v27_v3  ;;  %32 = vst.msk [vmem:[#allocation2 + $0x21] sm:$0xff] %vm17_vm0, %v28_v4  ;;  %v14076_v29 = vpack.c.bf16 %v149_v18, %v145_v17  ;;  %v917_v30 = vld [vmem:[%s21696_s1 + $0x248] sm:$0xff]  ;;  %v916_v32 = vld [vmem:[%s21696_s1 + $0x240] sm:$0xff] }
  0x1a   :  { %v921_v31 = vld [vmem:[%s21696_s1 + $0x2c8] sm:$0xff]  ;;  %v527_v35 = vld [vmem:[%s21696_s1 + $0xb8] sm:$0xff]  ;;  %v522_v47 = vld [vmem:[%s21696_s1 + $0x30] sm:$0xff] }
  0x1b   :  { %v14112_v40 = vpack.c.bf16 %v921_v31, %v917_v30  ;;  %v1281_v44 = vld [vmem:[%s21696_s1 + $0x68] sm:$0xff]  ;;  %v531_v50 = vld [vmem:[%s21696_s1 + $0x138] sm:$0xff]  ;;  %v1280_v52 = vld [vmem:[%s21696_s1 + $0x60] sm:$0xff] }
  0x1c   :  { %v535_v51 = vld [vmem:[%s21696_s1 + $0x1b8] sm:$0xff]  ;;  %v534_v57 = vld [vmem:[%s21696_s1 + $0x1b0] sm:$0xff]  ;;  %v1293_v60 = vld [vmem:[%s21696_s1 + $0x1e8] sm:$0xff] }
  0x1d   :  { %v1288_v61 = vld [vmem:[%s21696_s1 + $0x160] sm:$0xff]  ;;  %v539_v63 = vld [vmem:[%s21696_s1 + $0x238] sm:$0xff]  ;;  %v1297_v8 = vld [vmem:[%s21696_s1 + $0x268] sm:$0xff] }
  0x1e   :  { %v1292_v62 = vld [vmem:[%s21696_s1 + $0x1e0] sm:$0xff]  ;;  %v1301_v9 = vld [vmem:[%s21696_s1 + $0x2e8] sm:$0xff]  ;;  %v903_v13 = vld [vmem:[%s21696_s1 + $0x58] sm:$0xff] }
  0x1f   :  { %v77_v33 = vld [vmem:[#allocation2 + $0x1] sm:$0xff]  ;;  %v78_v34 = vld [vmem:[#allocation2 + $0x9] sm:$0xff]  ;;  %v907_v14 = vld [vmem:[%s21696_s1 + $0xd8] sm:$0xff]  ;;  %v14136_v16 = vpack.c.bf16 %v1301_v9, %v1297_v8 }
  0x20   :  { %89 = vrot.lane.b32.xlu0 %v77_v33, %s15418_s9  ;;  %91 = vrot.lane.b32.xlu1 %v78_v34, %s15418_s9  ;;  %v81_v36 = vld [vmem:[#allocation2 + $0x2] sm:$0xff]  ;;  %v82_v37 = vld [vmem:[#allocation2 + $0xa] sm:$0xff]  ;;  %v79_v45 = vld [vmem:[#allocation2 + $0x19] sm:$0xff]  ;;  %v14116_v18 = vpack.c.bf16 %v907_v14, %v903_v13  ;;  %v15420_v14 = vmov 1966171168  }
  0x21   :  { %v83_v48 = vld [vmem:[#allocation2 + $0x1a] sm:$0xff]  ;;  %v84_v54 = vld [vmem:[#allocation2 + $0x22] sm:$0xff] }
  0x22   :  { %v80_v53 = vld [vmem:[#allocation2 + $0x21] sm:$0xff]  ;;  %v75_v6 = vld [vmem:[#allocation2 + $0x18] sm:$0xff] }
  0x23   :  { %v73_v59 = vld [vmem:[#allocation2] sm:$0xff]  ;;  %v74_v1 = vld [vmem:[#allocation2 + $0x8] sm:$0xff]  ;;  %v523_v34 = vld [vmem:[%s21696_s1 + $0x38] sm:$0xff] }
  0x24   :  { %105 = vrot.lane.b32.xlu0 %v81_v36, %s15419_s20  ;;  %107 = vrot.lane.b32.xlu1 %v82_v37, %s15419_s20  ;;  %v76_v23 = vld [vmem:[#allocation2 + $0x20] sm:$0xff]  ;;  %v14078_v37 = vpack.c.bf16 %v148_v25, %v144_v24  ;;  %v14092_v43 = vpack.c.bf16 %v527_v35, %v523_v34  ;;  %v910_v25 = vld [vmem:[%s21696_s1 + $0x150] sm:$0xff]  ;;  %v1283_v34 = vld [vmem:[%s21696_s1 + $0x78] sm:$0xff] }
  0x25   :  { %v920_v33 = vld [vmem:[%s21696_s1 + $0x2c0] sm:$0xff]  ;;  %v1287_v35 = vld [vmem:[%s21696_s1 + $0xf8] sm:$0xff] }
  0x26   :  { %v14114_v42 = vpack.c.bf16 %v920_v33, %v916_v32  ;;  %v1300_v12 = vld [vmem:[%s21696_s1 + $0x2e0] sm:$0xff]  ;;  %v918_v32 = vld [vmem:[%s21696_s1 + $0x250] sm:$0xff] }
  0x27   :  { %v922_v33 = vld [vmem:[%s21696_s1 + $0x2d0] sm:$0xff] }
  0x28   :  { %93 = vrot.lane.b32.xlu0 %v79_v45, %s15418_s9  ;;  %109 = vrot.lane.b32.xlu1 %v83_v48, %s15419_s20  ;;  %v1285_v45 = vld [vmem:[%s21696_s1 + $0xe8] sm:$0xff]  ;;  %v526_v48 = vld [vmem:[%s21696_s1 + $0xb0] sm:$0xff] }
  0x29   :  { %v14128_v49 = vpack.c.bf16 %v1285_v45, %v1281_v44  ;;  %v1290_v45 = vld [vmem:[%s21696_s1 + $0x170] sm:$0xff] }
  0x2c   :  { %95 = vrot.lane.b32.xlu0 %v80_v53, %s15418_s9  ;;  %111 = vrot.lane.b32.xlu1 %v84_v54, %s15419_s20  ;;  %v1284_v53 = vld [vmem:[%s21696_s1 + $0xe0] sm:$0xff]  ;;  %v14094_v54 = vpack.c.bf16 %v526_v48, %v522_v47  ;;  %v1294_v47 = vld [vmem:[%s21696_s1 + $0x1f0] sm:$0xff] }
  0x2d   :  { %v14130_v58 = vpack.c.bf16 %v1284_v53, %v1280_v52  ;;  %v1299_v48 = vld [vmem:[%s21696_s1 + $0x278] sm:$0xff]  ;;  %v1298_v52 = vld [vmem:[%s21696_s1 + $0x270] sm:$0xff] }
  0x2e   :  { %v1302_v53 = vld [vmem:[%s21696_s1 + $0x2f0] sm:$0xff] }
  0x92   :  { %v90_v55 = vpop.permute.xlu0 %89  ;;  %v92_v56 = vpop.permute.xlu1 %91 }
  0x93   :  { %v117_v3 = vsel %vm17_vm0, %v73_v59, %v90_v55  ;;  %v118_v15 = vsel %vm17_vm0, %v74_v1, %v92_v56  ;;  %v14096_v55 = vpack.c.bf16 %v535_v51, %v531_v50  ;;  %v530_v56 = vld [vmem:[%s21696_s1 + $0x130] sm:$0xff]  ;;  %v1289_v59 = vld [vmem:[%s21696_s1 + $0x168] sm:$0xff]  ;;  %v543_v1 = vld [vmem:[%s21696_s1 + $0x2b8] sm:$0xff]  ;;  %v14146_v50 = vpack.c.bf16 %v1294_v47, %v1290_v45 }
  0x96   :  { %v106_v4 = vpop.permute.xlu0 %105  ;;  %v108_v5 = vpop.permute.xlu1 %107 }
  0x97   :  { %v15631_v10 = vsel %vm121_vm2, %v117_v3, %v106_v4  ;;  %v15665_v26 = vsel %vm121_vm2, %v118_v15, %v108_v5  ;;  %v14132_v3 = vpack.c.bf16 %v1293_v60, %v1289_v59  ;;  %v538_v4 = vld [vmem:[%s21696_s1 + $0x230] sm:$0xff] }
  0x98   :  { %11168 = vmatmul.mubr.msk.f32.vlgmr.msra.gmra.mrb[0].mxu1 %vm150_vm3, %v15631_v10  ;;  %11176 = vmatmul.mubr.msk.f32.vlgmr.msra.gmra.mrb[0].mxu0 %vm150_vm3, %v15631_v10  ;;  %v542_v5 = vld [vmem:[%s21696_s1 + $0x2b0] sm:$0xff] }
  0x99   :  { %14071 = vmatpush1.bf16.msra.mxu1 %v14070_v2  ;;  %233 = vmatprep.mubr.f32.mxu1 %v15417_v0  ;;  %v14098_v2 = vpack.c.bf16 %v534_v57, %v530_v56  ;;  %v14102_v15 = vpack.c.bf16 %v542_v5, %v538_v4 }
  0x9a   :  { %614 = vmatprep.mubr.f32.mxu0 %v15417_v0  ;;  %v94_v20 = vpop.permute.xlu0 %93  ;;  %14073 = vmatprep.subr.bf16.mxu1 %v14072_v7  ;;  %v110_v21 = vpop.permute.xlu1 %109  ;;  %v14100_v7 = vpack.c.bf16 %v543_v1, %v539_v63 }
  0x9b   :  { %v119_v27 = vsel %vm17_vm0, %v75_v6, %v94_v20  ;;  %14107 = vmatpush1.bf16.msra.mxu0 %v14106_v11  ;;  %v14134_v6 = vpack.c.bf16 %v1292_v62, %v1288_v61  ;;  %v1296_v11 = vld [vmem:[%s21696_s1 + $0x260] sm:$0xff]  ;;  %v906_v20 = vld [vmem:[%s21696_s1 + $0xd0] sm:$0xff] }
  0x9c   :  { %11169 = vmatmul.mubr.msk.f32.gmra.mrb[2].mxu1 %vm150_vm3, %v15665_v26  ;;  %11177 = vmatmul.mubr.msk.f32.gmra.mrb[2].mxu0 %vm150_vm3, %v15665_v26  ;;  %v15691_v36 = vsel %vm121_vm2, %v119_v27, %v110_v21  ;;  %v14138_v17 = vpack.c.bf16 %v1300_v12, %v1296_v11  ;;  %v911_v21 = vld [vmem:[%s21696_s1 + $0x158] sm:$0xff]  ;;  %v914_v27 = vld [vmem:[%s21696_s1 + $0x1d0] sm:$0xff] }
  0x9d   :  { %14075 = vmatpush1.bf16.msra.mxu1 %v14074_v19  ;;  %239 = vmatprep.mubr.f32.mxu1 %v15417_v0  ;;  %v902_v19 = vld [vmem:[%s21696_s1 + $0x50] sm:$0xff]  ;;  %v14122_v30 = vpack.c.bf16 %v914_v27, %v910_v25 }
  0x9e   :  { %620 = vmatprep.mubr.f32.mxu0 %v15417_v0  ;;  %14109 = vmatprep.subr.bf16.mxu0 %v14108_v22  ;;  %v96_v38 = vpop.permute.xlu0 %95  ;;  %v112_v39 = vpop.permute.xlu1 %111  ;;  %v915_v22 = vld [vmem:[%s21696_s1 + $0x1d8] sm:$0xff] }
  0x9f   :  { %v120_v41 = vsel %vm17_vm0, %v76_v23, %v96_v38  ;;  %14111 = vmatpush1.bf16.msra.mxu0 %v14110_v28  ;;  %14077 = vmatprep.subr.bf16.mxu1 %v14076_v29  ;;  %v14118_v23 = vpack.c.bf16 %v906_v20, %v902_v19  ;;  %v14120_v24 = vpack.c.bf16 %v915_v22, %v911_v21  ;;  %v919_v28 = vld [vmem:[%s21696_s1 + $0x258] sm:$0xff] }
  0xa0   :  { %11170 = vmatmul.mubr.msk.f32.gmra.mrb[4].mxu1 %vm150_vm3, %v15691_v36  ;;  %11178 = vmatmul.mubr.msk.f32.gmra.mrb[4].mxu0 %vm150_vm3, %v15691_v36  ;;  %v15707_v46 = vsel %vm121_vm2, %v120_v41, %v112_v39  ;;  %v923_v29 = vld [vmem:[%s21696_s1 + $0x2d8] sm:$0xff]  ;;  %v14140_v38 = vpack.c.bf16 %v1287_v35, %v1283_v34  ;;  %v1282_v39 = vld [vmem:[%s21696_s1 + $0x70] sm:$0xff] }
  0xa1   :  { %245 = vmatprep.mubr.f32.mxu1 %v15417_v0  ;;  %14079 = vmatpush1.bf16.msra.mxu1 %v14078_v37  ;;  %v14124_v31 = vpack.c.bf16 %v923_v29, %v919_v28  ;;  %v14126_v37 = vpack.c.bf16 %v922_v33, %v918_v32  ;;  %v1291_v41 = vld [vmem:[%s21696_s1 + $0x178] sm:$0xff] }
  0xa2   :  { %626 = vmatprep.mubr.f32.mxu0 %v15417_v0  ;;  %14113 = vmatprep.subr.bf16.mxu0 %v14112_v40  ;;  %v1286_v40 = vld [vmem:[%s21696_s1 + $0xf0] sm:$0xff] }
  0xa3   :  { %14115 = vmatpush1.bf16.msra.mxu0 %v14114_v42  ;;  %14093 = vmatprep.subr.bf16.mxu1 %v14092_v43  ;;  %v1295_v42 = vld [vmem:[%s21696_s1 + $0x1f8] sm:$0xff]  ;;  %v14142_v43 = vpack.c.bf16 %v1286_v40, %v1282_v39 }
  0xa4   :  { %11171 = vmatmul.mubr.msk.f32.gmra.mrb[6].mxu1 %vm150_vm3, %v15707_v46  ;;  %11179 = vmatmul.mubr.msk.f32.gmra.mrb[6].mxu0 %vm150_vm3, %v15707_v46  ;;  %v14144_v44 = vpack.c.bf16 %v1295_v42, %v1291_v41 }
  0xa5   :  { %316 = vmatprep.mubr.f32.mxu1 %v15417_v0  ;;  %988 = vmatprep.mubr.f32.mxu0 %v15417_v0 }
  0xa6   :  { %14129 = vmatprep.subr.bf16.mxu0 %v14128_v49  ;;  %v1303_v49 = vld [vmem:[%s21696_s1 + $0x2f8] sm:$0xff] }
  0xa7   :  { %v14148_v51 = vpack.c.bf16 %v1303_v49, %v1299_v48 }
  0xa8   :  { %11172 = vmatmul.mubr.msk.f32.vlgmr.msra.gmra.mrb[8].mxu1 %vm150_vm3, %v15631_v10  ;;  %11184 = vmatmul.mubr.msk.f32.vlgmr.msra.gmra.mrb[8].mxu0 %vm150_vm3, %v15631_v10 }
  0xa9   :  { %14095 = vmatpush1.bf16.msra.mxu1 %v14094_v54  ;;  %322 = vmatprep.mubr.f32.mxu1 %v15417_v0  ;;  %v14150_v54 = vpack.c.bf16 %v1302_v53, %v1298_v52 }
  0xaa   :  { %994 = vmatprep.mubr.f32.mxu0 %v15417_v0  ;;  %14097 = vmatprep.subr.bf16.mxu1 %v14096_v55 }
  0xab   :  { %14131 = vmatpush1.bf16.msra.mxu0 %v14130_v58 }
  0xac   :  { %11173 = vmatmul.mubr.msk.f32.gmra.mrb[10].mxu1 %vm150_vm3, %v15665_v26  ;;  %11185 = vmatmul.mubr.msk.f32.gmra.mrb[10].mxu0 %vm150_vm3, %v15665_v26 }
  0xad   :  { %14099 = vmatpush1.bf16.msra.mxu1 %v14098_v2  ;;  %328 = vmatprep.mubr.f32.mxu1 %v15417_v0 }
  0xae   :  { %1000 = vmatprep.mubr.f32.mxu0 %v15417_v0  ;;  %14133 = vmatprep.subr.bf16.mxu0 %v14132_v3 }
  0xaf   :  { %14135 = vmatpush1.bf16.msra.mxu0 %v14134_v6  ;;  %14101 = vmatprep.subr.bf16.mxu1 %v14100_v7 }
  0xb0   :  { %11174 = vmatmul.mubr.msk.f32.gmra.mrb[12].mxu1 %vm150_vm3, %v15691_v36  ;;  %11186 = vmatmul.mubr.msk.f32.gmra.mrb[12].mxu0 %vm150_vm3, %v15691_v36 }
  0xb1   :  { %334 = vmatprep.mubr.f32.mxu1 %v15417_v0  ;;  %14103 = vmatpush1.bf16.msra.mxu1 %v14102_v15  ;;  %v15963_v15 = vunpack.c.l.s4 %v15420_v14 }
  0xb2   :  { %1006 = vmatprep.mubr.f32.mxu0 %v15417_v0  ;;  %14137 = vmatprep.subr.bf16.mxu0 %v14136_v16  ;;  %v454_v16 = vlaneseq }
  0xb3   :  { %14139 = vmatpush1.bf16.msra.mxu0 %v14138_v17  ;;  %14117 = vmatprep.subr.bf16.mxu1 %v14116_v18  ;;  %v453_v34 = vunpack.c.0.s8 %v15963_v15 }
  0xb4   :  { %11175 = vmatmul.mubr.msk.f32.gmra.mrb[14].mxu1 %vm150_vm3, %v15707_v46  ;;  %11187 = vmatmul.mubr.msk.f32.gmra.mrb[14].mxu0 %vm150_vm3, %v15707_v46  ;;  %v15986_v35 = vshrl.u32 %v454_v16, 7 }
  0xb5   :  { %697 = vmatprep.mubr.f32.mxu1 %v15417_v0  ;;  %1368 = vmatprep.mubr.f32.mxu0 %v15417_v0 }
  0xb8   :  { %11180 = vmatmul.mubr.msk.f32.vlgmr.msra.gmra.mrb[16].mxu1 %vm150_vm3, %v15631_v10  ;;  %11192 = vmatmul.mubr.msk.f32.vlgmr.msra.gmra.mrb[16].mxu0 %vm150_vm3, %v15631_v10 }
  0xb9   :  { %14119 = vmatpush1.bf16.msra.mxu1 %v14118_v23  ;;  %703 = vmatprep.mubr.f32.mxu1 %v15417_v0 }
  0xba   :  { %1374 = vmatprep.mubr.f32.mxu0 %v15417_v0  ;;  %14121 = vmatprep.subr.bf16.mxu1 %v14120_v24 }
  0xbc   :  { %11181 = vmatmul.mubr.msk.f32.gmra.mrb[18].mxu1 %vm150_vm3, %v15665_v26  ;;  %11193 = vmatmul.mubr.msk.f32.gmra.mrb[18].mxu0 %vm150_vm3, %v15665_v26 }
  0xbd   :  { %14123 = vmatpush1.bf16.msra.mxu1 %v14122_v30  ;;  %709 = vmatprep.mubr.f32.mxu1 %v15417_v0 }
  0xbe   :  { %1380 = vmatprep.mubr.f32.mxu0 %v15417_v0  ;;  %14125 = vmatprep.subr.bf16.mxu1 %v14124_v31 }
  0xc0   :  { %11182 = vmatmul.mubr.msk.f32.gmra.mrb[20].mxu1 %vm150_vm3, %v15691_v36  ;;  %11194 = vmatmul.mubr.msk.f32.gmra.mrb[20].mxu0 %vm150_vm3, %v15691_v36 }
  0xc1   :  { %715 = vmatprep.mubr.f32.mxu1 %v15417_v0  ;;  %14127 = vmatpush1.bf16.msra.mxu1 %v14126_v37 }
  0xc2   :  { %1386 = vmatprep.mubr.f32.mxu0 %v15417_v0  ;;  %14141 = vmatprep.subr.bf16.mxu1 %v14140_v38 }
  0xc4   :  { %11183 = vmatmul.mubr.msk.f32.gmra.mrb[22].mxu1 %vm150_vm3, %v15707_v46  ;;  %11195 = vmatmul.mubr.msk.f32.gmra.mrb[22].mxu0 %vm150_vm3, %v15707_v46 }
  0xc5   :  { %1077 = vmatprep.mubr.f32.mxu1 %v15417_v0 }
  0xc8   :  { %11188 = vmatmul.mubr.msk.f32.vlgmr.msra.gmra.mrb[24].mxu1 %vm150_vm3, %v15631_v10 }
  0xc9   :  { %14143 = vmatpush1.bf16.msra.mxu1 %v14142_v43  ;;  %1083 = vmatprep.mubr.f32.mxu1 %v15417_v0 }
  0xca   :  { %14145 = vmatprep.subr.bf16.mxu1 %v14144_v44 }
  0xcc   :  { %11189 = vmatmul.mubr.msk.f32.gmra.mrb[26].mxu1 %vm150_vm3, %v15665_v26 }
  0xcd   :  { %14147 = vmatpush1.bf16.msra.mxu1 %v14146_v50  ;;  %1089 = vmatprep.mubr.f32.mxu1 %v15417_v0 }
  0xce   :  { %14149 = vmatprep.subr.bf16.mxu1 %v14148_v51 }
  0xd0   :  { %11190 = vmatmul.mubr.msk.f32.gmra.mrb[28].mxu1 %vm150_vm3, %v15691_v36 }
  0xd1   :  { %1095 = vmatprep.mubr.f32.mxu1 %v15417_v0  ;;  %14151 = vmatpush1.bf16.msra.mxu1 %v14150_v54 }
  0xd4   :  { %11191 = vmatmul.mubr.msk.f32.gmra.mrb[30].mxu1 %vm150_vm3, %v15707_v46 }
  0xd5   :  { %1457 = vmatprep.mubr.f32.mxu1 %v15417_v0 }
  0xd8   :  { %11196 = vmatmul.mubr.msk.f32.vlgmr.msra.gmra.mrb[32].mxu1 %vm150_vm3, %v15631_v10 }
  0xd9   :  { %1463 = vmatprep.mubr.f32.mxu1 %v15417_v0 }
  0xdc   :  { %11197 = vmatmul.mubr.msk.f32.gmra.mrb[34].mxu1 %vm150_vm3, %v15665_v26 }
  0xdd   :  { %1469 = vmatprep.mubr.f32.mxu1 %v15417_v0 }
  0xe0   :  { %11198 = vmatmul.mubr.msk.f32.gmra.mrb[36].mxu1 %vm150_vm3, %v15691_v36 }
  0xe1   :  { %1475 = vmatprep.mubr.f32.mxu1 %v15417_v0 }
  0xe4   :  { %11199 = vmatmul.mubr.msk.f32.gmra.mrb[38].mxu1 %vm150_vm3, %v15707_v46 }
 0x16b   :  { %v15919_v55 = vpop.f32.mrb[0].mxu1  ;;  %v15921_v56 = vpop.f32.mrb[0].mxu0 }
 0x16c   :  { %21819 = vst [vmem:[#allocation5_spill] sm:$0xff] %v15921_v56  ;;  %v15923_v10 = vpop.f32.mrb[1].mxu1  ;;  %v15925_v57 = vpop.f32.mrb[1].mxu0  ;;  %v393_v26 = vmul.f32 %v15919_v55, %v15919_v55  ;;  %v774_v58 = vmul.f32 %v15921_v56, %v15921_v56 }
 0x16d   :  { %21820 = vst [vmem:[#allocation6_spill] sm:$0xff] %v15923_v10  ;;  %21821 = vst [vmem:[#allocation7_spill] sm:$0xff] %v15925_v57  ;;  %v394_v0 = vmul.f32 %v15923_v10, %v15923_v10  ;;  %v775_v36 = vmul.f32 %v15925_v57, %v15925_v57 }
 0x16f   :  { %v15935_v46 = vpop.f32.mrb[2].mxu1  ;;  %v15937_v59 = vpop.f32.mrb[2].mxu0 }
 0x170   :  { %21822 = vst [vmem:[#allocation8_spill] sm:$0xff] %v15935_v46  ;;  %21823 = vst [vmem:[#allocation9_spill] sm:$0xff] %v15937_v59  ;;  %v357_v60 = vadd.f32 %v15935_v46, %v15919_v55  ;;  %v397_v61 = vmul.f32 %v15935_v46, %v15935_v46  ;;  %v738_v62 = vadd.f32 %v15937_v59, %v15921_v56  ;;  %v15947_v1 = vpop.f32.mrb[3].mxu1  ;;  %v15949_v2 = vpop.f32.mrb[3].mxu0 }
 0x171   :  { %v778_v63 = vmul.f32 %v15937_v59, %v15937_v59  ;;  %21824 = vst [vmem:[#allocation10_spill] sm:$0xff] %v15947_v1  ;;  %21825 = vst [vmem:[#allocation11_spill] sm:$0xff] %v15949_v2  ;;  %v366_v3 = vadd.f32 %v15947_v1, %v15923_v10  ;;  %v398_v4 = vmul.f32 %v15947_v1, %v15947_v1 }
 0x172   :  { %v747_v5 = vadd.f32 %v15949_v2, %v15925_v57  ;;  %v779_v6 = vmul.f32 %v15949_v2, %v15949_v2  ;;  %v409_v7 = vadd.f32 %v397_v61, %v393_v26 }
 0x173   :  { %v790_v8 = vadd.f32 %v778_v63, %v774_v58  ;;  %v418_v9 = vadd.f32 %v398_v4, %v394_v0  ;;  %v15959_v12 = vpop.f32.mrb[4].mxu1  ;;  %v15961_v13 = vpop.f32.mrb[4].mxu0 }
 0x174   :  { %v799_v11 = vadd.f32 %v779_v6, %v775_v36  ;;  %21826 = vst [vmem:[#allocation12_spill] sm:$0xff] %v15959_v12  ;;  %21827 = vst [vmem:[#allocation13_spill] sm:$0xff] %v15961_v13  ;;  %v358_v17 = vadd.f32 %v357_v60, %v15959_v12  ;;  %v401_v18 = vmul.f32 %v15959_v12, %v15959_v12  ;;  %v15971_v21 = vpop.f32.mrb[5].mxu1  ;;  %v15973_v22 = vpop.f32.mrb[5].mxu0 }
 0x175   :  { %v739_v19 = vadd.f32 %v738_v62, %v15961_v13  ;;  %v782_v20 = vmul.f32 %v15961_v13, %v15961_v13  ;;  %21828 = vst [vmem:[#allocation14_spill] sm:$0xff] %v15971_v21  ;;  %21829 = vst [vmem:[#allocation15_spill] sm:$0xff] %v15973_v22  ;;  %v367_v23 = vadd.f32 %v366_v3, %v15971_v21 }
 0x176   :  { %v402_v24 = vmul.f32 %v15971_v21, %v15971_v21  ;;  %v748_v25 = vadd.f32 %v747_v5, %v15973_v22  ;;  %v783_v27 = vmul.f32 %v15973_v22, %v15973_v22  ;;  %v410_v28 = vadd.f32 %v409_v7, %v401_v18 }
 0x177   :  { %v791_v29 = vadd.f32 %v790_v8, %v782_v20  ;;  %v15981_v32 = vpop.f32.mrb[6].mxu1  ;;  %v15983_v33 = vpop.f32.mrb[6].mxu0 }
 0x178   :  { %v419_v30 = vadd.f32 %v418_v9, %v402_v24  ;;  %v800_v31 = vadd.f32 %v799_v11, %v783_v27  ;;  %v359_v37 = vadd.f32 %v358_v17, %v15981_v32  ;;  %v405_v38 = vmul.f32 %v15981_v32, %v15981_v32  ;;  %v15994_v41 = vpop.f32.mrb[7].mxu1  ;;  %v15996_v42 = vpop.f32.mrb[7].mxu0 }
 0x179   :  { %v740_v39 = vadd.f32 %v739_v19, %v15983_v33  ;;  %v786_v40 = vmul.f32 %v15983_v33, %v15983_v33  ;;  %v368_v43 = vadd.f32 %v367_v23, %v15994_v41  ;;  %v406_v44 = vmul.f32 %v15994_v41, %v15994_v41 }
 0x17a   :  { %v749_v45 = vadd.f32 %v748_v25, %v15996_v42  ;;  %v787_v47 = vmul.f32 %v15996_v42, %v15996_v42  ;;  %v360_v48 = vrot.slane %v359_v37, 4  ;;  %v411_v49 = vadd.f32 %v410_v28, %v405_v38 }
 0x17b   :  { %v741_v50 = vrot.slane %v740_v39, 4  ;;  %v792_v51 = vadd.f32 %v791_v29, %v786_v40  ;;  %v369_v52 = vrot.slane %v368_v43, 4  ;;  %v420_v53 = vadd.f32 %v419_v30, %v406_v44  ;;  %v16004_v58 = vpop.f32.mrb[8].mxu1  ;;  %v16006_v0 = vpop.f32.mrb[8].mxu0 }
 0x17c   :  { %v750_v54 = vrot.slane %v749_v45, 4  ;;  %v801_v26 = vadd.f32 %v800_v31, %v787_v47  ;;  %21830 = vst [vmem:[#allocation16_spill] sm:$0xff] %v16004_v58  ;;  %21831 = vst [vmem:[#allocation17_spill] sm:$0xff] %v16006_v0  ;;  %v361_v36 = vadd.f32 %v360_v48, %v359_v37  ;;  %v412_v60 = vrot.slane %v411_v49, 4  ;;  %v16008_v63 = vpop.f32.mrb[9].mxu1  ;;  %v16010_v3 = vpop.f32.mrb[9].mxu0 }
 0x17d   :  { %v742_v61 = vadd.f32 %v741_v50, %v740_v39  ;;  %v793_v62 = vrot.slane %v792_v51, 4  ;;  %21832 = vst [vmem:[#allocation18_spill] sm:$0xff] %v16008_v63  ;;  %21833 = vst [vmem:[#allocation19_spill] sm:$0xff] %v16010_v3  ;;  %v370_v4 = vadd.f32 %v369_v52, %v368_v43  ;;  %v421_v5 = vrot.slane %v420_v53, 4 }
 0x17e   :  { %v751_v6 = vadd.f32 %v750_v54, %v749_v45  ;;  %v802_v7 = vrot.slane %v801_v26, 4  ;;  %v362_v8 = vrot.slane %v361_v36, 2  ;;  %v413_v9 = vadd.f32 %v412_v60, %v411_v49 }
 0x17f   :  { %v743_v11 = vrot.slane %v742_v61, 2  ;;  %v794_v14 = vadd.f32 %v793_v62, %v792_v51  ;;  %v371_v16 = vrot.slane %v370_v4, 2  ;;  %v422_v17 = vadd.f32 %v421_v5, %v420_v53  ;;  %v16012_v20 = vpop.f32.mrb[10].mxu1  ;;  %v16014_v23 = vpop.f32.mrb[10].mxu0 }
 0x180   :  { %v752_v18 = vrot.slane %v751_v6, 2  ;;  %v803_v19 = vadd.f32 %v802_v7, %v801_v26  ;;  %21834 = vst [vmem:[#allocation20_spill] sm:$0xff] %v16012_v20  ;;  %21835 = vst [vmem:[#allocation21_spill] sm:$0xff] %v16014_v23  ;;  %v363_v24 = vadd.f32 %v362_v8, %v361_v36  ;;  %v414_v25 = vrot.slane %v413_v9, 2  ;;  %v16016_v29 = vpop.f32.mrb[11].mxu1  ;;  %v16018_v30 = vpop.f32.mrb[11].mxu0 }
 0x181   :  { %v744_v27 = vadd.f32 %v743_v11, %v742_v61  ;;  %v795_v28 = vrot.slane %v794_v14, 2  ;;  %21836 = vst [vmem:[#allocation22_spill] sm:$0xff] %v16016_v29  ;;  %21837 = vst [vmem:[#allocation23_spill] sm:$0xff] %v16018_v30  ;;  %v372_v31 = vadd.f32 %v371_v16, %v370_v4  ;;  %v423_v37 = vrot.slane %v422_v17, 2 }
 0x182   :  { %v753_v38 = vadd.f32 %v752_v18, %v751_v6  ;;  %v804_v39 = vrot.slane %v803_v19, 2  ;;  %v364_v40 = vrot.slane %v363_v24, 1  ;;  %v415_v43 = vadd.f32 %v414_v25, %v413_v9 }
 0x183   :  { %v745_v44 = vrot.slane %v744_v27, 1  ;;  %v796_v45 = vadd.f32 %v795_v28, %v794_v14  ;;  %v373_v47 = vrot.slane %v372_v31, 1  ;;  %v424_v48 = vadd.f32 %v423_v37, %v422_v17  ;;  %v16020_v51 = vpop.f32.mrb[12].mxu1  ;;  %v16022_v52 = vpop.f32.mrb[12].mxu0 }
 0x184   :  { %v754_v49 = vrot.slane %v753_v38, 1  ;;  %v805_v50 = vadd.f32 %v804_v39, %v803_v19  ;;  %21838 = vst [vmem:[#allocation24_spill] sm:$0xff] %v16020_v51  ;;  %21839 = vst [vmem:[#allocation25_spill] sm:$0xff] %v16022_v52  ;;  %v365_v53 = vadd.f32 %v364_v40, %v363_v24  ;;  %v416_v54 = vrot.slane %v415_v43, 1  ;;  %v16026_v60 = vpop.f32.mrb[13].mxu1  ;;  %v16028_v61 = vpop.f32.mrb[13].mxu0 }
 0x185   :  { %v16024_v26 = vadd.f32 %v745_v44, %v744_v27  ;;  %v797_v36 = vrot.slane %v796_v45, 1  ;;  %21840 = vst [vmem:[#allocation26_spill] sm:$0xff] %v16026_v60  ;;  %21841 = vst [vmem:[#allocation27_spill] sm:$0xff] %v16028_v61  ;;  %v374_v62 = vadd.f32 %v373_v47, %v372_v31  ;;  %v425_v4 = vrot.slane %v424_v48, 1 }
 0x186   :  { %v16030_v5 = vadd.f32 %v754_v49, %v753_v38  ;;  %v806_v6 = vrot.slane %v805_v50, 1  ;;  %v16032_v7 = vadd.f32 %v416_v54, %v415_v43  ;;  %v16039_v9 = vsub.s32 %v453_v34, %v15986_v35 }
 0x187   :  { %v16034_v8 = vadd.f32 %v797_v36, %v796_v45  ;;  %v16041_v11 = vadd.f32 %v425_v4, %v424_v48  ;;  %v449_v14 = vcombine.low %v365_v53, %v374_v62  ;;  %v16047_v18 = vpop.f32.mrb[14].mxu1  ;;  %v16049_v19 = vpop.f32.mrb[14].mxu0  ;;  %v395_v24 = vmul.f32 %v16004_v58, %v16004_v58 }
 0x188   :  { %v16043_v16 = vadd.f32 %v806_v6, %v805_v50  ;;  %v375_v15 = vadd.f32 %v16012_v20, %v16004_v58  ;;  %v399_v34 = vmul.f32 %v16012_v20, %v16012_v20  ;;  %v16057_v25 = vpop.f32.mrb[15].mxu1  ;;  %v16059_v27 = vpop.f32.mrb[15].mxu0  ;;  %v1154_v37 = vmul.f32 %v16006_v0, %v16006_v0 }
 0x189   :  { %v396_v38 = vmul.f32 %v16008_v63, %v16008_v63  ;;  %v1118_v40 = vadd.f32 %v16014_v23, %v16006_v0  ;;  %v1158_v43 = vmul.f32 %v16014_v23, %v16014_v23  ;;  %v384_v44 = vadd.f32 %v16016_v29, %v16008_v63 }
 0x18a   :  { %v427_v39 = vadd.f32 %v399_v34, %v395_v24  ;;  %v16076_v45 = vrot.slane %v449_v14, %v16039_v9  ;;  %v1155_v47 = vmul.f32 %v16010_v3, %v16010_v3  ;;  %v400_v48 = vmul.f32 %v16016_v29, %v16016_v29 }
 0x18b   :  { %v1127_v49 = vadd.f32 %v16018_v30, %v16010_v3  ;;  %v16084_v50 = vpop.f32.mrb[16].mxu1  ;;  %v16086_v53 = vpop.f32.mrb[16].mxu0  ;;  %v1170_v54 = vadd.f32 %v1158_v43, %v1154_v37  ;;  %v1159_v36 = vmul.f32 %v16018_v30, %v16018_v30  ;;  %v376_v62 = vadd.f32 %v375_v15, %v16020_v51 }
 0x18c   :  { %21842 = vst [vmem:[#allocation28_spill] sm:$0xff] %v16086_v53  ;;  %v403_v4 = vmul.f32 %v16020_v51, %v16020_v51  ;;  %v16093_v6 = vpop.f32.mrb[17].mxu1  ;;  %v16095_v14 = vpop.f32.mrb[17].mxu0  ;;  %v436_v24 = vadd.f32 %v400_v48, %v396_v38  ;;  %v1119_v34 = vadd.f32 %v1118_v40, %v16022_v52  ;;  %v1162_v31 = vmul.f32 %v16022_v52, %v16022_v52 }
 0x18d   :  { %21843 = vst [vmem:[#allocation29_spill] sm:$0xff] %v16095_v14  ;;  %v385_v37 = vadd.f32 %v384_v44, %v16026_v60  ;;  %v1179_v43 = vadd.f32 %v1159_v36, %v1155_v47  ;;  %v404_v15 = vmul.f32 %v16026_v60, %v16026_v60  ;;  %v1128_v28 = vadd.f32 %v1127_v49, %v16028_v61 }
 0x18e   :  { %v428_v17 = vadd.f32 %v427_v39, %v403_v4  ;;  %v1171_v22 = vadd.f32 %v1170_v54, %v1162_v31  ;;  %v1163_v13 = vmul.f32 %v16028_v61, %v16028_v61  ;;  %v377_v38 = vadd.f32 %v376_v62, %v16047_v18 }
 0x18f   :  { %v407_v40 = vmul.f32 %v16047_v18, %v16047_v18  ;;  %v16109_v48 = vpop.f32.mrb[18].mxu1  ;;  %v16111_v52 = vpop.f32.mrb[18].mxu0  ;;  %v437_v44 = vadd.f32 %v436_v24, %v404_v15  ;;  %v1120_v39 = vadd.f32 %v1119_v34, %v16049_v19  ;;  %v1166_v47 = vmul.f32 %v16049_v19, %v16049_v19 }
 0x190   :  { %21844 = vst [vmem:[#allocation30_spill] sm:$0xff] %v16109_v48  ;;  %21845 = vst [vmem:[#allocation31_spill] sm:$0xff] %v16111_v52  ;;  %v386_v31 = vadd.f32 %v385_v37, %v16057_v25  ;;  %v16117_v49 = vpop.f32.mrb[19].mxu1  ;;  %v16119_v54 = vpop.f32.mrb[19].mxu0  ;;  %v1180_v36 = vadd.f32 %v1179_v43, %v1163_v13  ;;  %v378_v62 = vrot.slane %v377_v38, 4  ;;  %v408_v61 = vmul.f32 %v16057_v25, %v16057_v25 }
 0x191   :  { %21846 = vst [vmem:[#allocation32_spill] sm:$0xff] %v16117_v49  ;;  %21847 = vst [vmem:[#allocation33_spill] sm:$0xff] %v16119_v54  ;;  %v429_v4 = vadd.f32 %v428_v17, %v407_v40  ;;  %v1121_v60 = vrot.slane %v1120_v39, 4  ;;  %v1172_v51 = vadd.f32 %v1171_v22, %v1166_v47  ;;  %v1129_v34 = vadd.f32 %v1128_v28, %v16059_v27 }
 0x192   :  { %v387_v24 = vrot.slane %v386_v31, 4  ;;  %v379_v15 = vadd.f32 %v378_v62, %v377_v38  ;;  %v438_v12 = vadd.f32 %v437_v44, %v408_v61  ;;  %v1167_v37 = vmul.f32 %v16059_v27, %v16059_v27 }
 0x193   :  { %v430_v21 = vrot.slane %v429_v4, 4  ;;  %v16126_v30 = vpop.f32.mrb[20].mxu1  ;;  %v16128_v23 = vpop.f32.mrb[20].mxu0  ;;  %v1122_v13 = vadd.f32 %v1121_v60, %v1120_v39  ;;  %v1173_v17 = vrot.slane %v1172_v51, 4  ;;  %v1130_v40 = vrot.slane %v1129_v34, 4 }
 0x194   :  { %21848 = vst [vmem:[#allocation34_spill] sm:$0xff] %v16126_v30  ;;  %21849 = vst [vmem:[#allocation35_spill] sm:$0xff] %v16128_v23  ;;  %v388_v43 = vadd.f32 %v387_v24, %v386_v31  ;;  %v16130_v2 = vpop.f32.mrb[21].mxu1  ;;  %v16132_v22 = vpop.f32.mrb[21].mxu0  ;;  %v380_v47 = vrot.slane %v379_v15, 2  ;;  %v439_v38 = vrot.slane %v438_v12, 4  ;;  %v1181_v62 = vadd.f32 %v1180_v36, %v1167_v37 }
 0x195   :  { %21850 = vst [vmem:[#allocation36_spill] sm:$0xff] %v16130_v2  ;;  %21851 = vst [vmem:[#allocation37_spill] sm:$0xff] %v16132_v22  ;;  %v431_v28 = vadd.f32 %v430_v21, %v429_v4  ;;  %v1123_v61 = vrot.slane %v1122_v13, 2  ;;  %v1174_v44 = vadd.f32 %v1173_v17, %v1172_v51  ;;  %v1131_v29 = vadd.f32 %v1130_v40, %v1129_v34 }
 0x196   :  { %v389_v59 = vrot.slane %v388_v43, 2  ;;  %v381_v20 = vadd.f32 %v380_v47, %v379_v15  ;;  %v440_v46 = vadd.f32 %v439_v38, %v438_v12  ;;  %v1182_v3 = vrot.slane %v1181_v62, 4 }
 0x197   :  { %v432_v1 = vrot.slane %v431_v28, 2  ;;  %v16134_v60 = vpop.f32.mrb[22].mxu1  ;;  %v16136_v39 = vpop.f32.mrb[22].mxu0  ;;  %v1124_v31 = vadd.f32 %v1123_v61, %v1122_v13  ;;  %v1175_v24 = vrot.slane %v1174_v44, 2  ;;  %v1132_v57 = vrot.slane %v1131_v29, 2 }
 0x198   :  { %v390_v0 = vadd.f32 %v389_v59, %v388_v43  ;;  %v16138_v56 = vpop.f32.mrb[23].mxu1  ;;  %v16140_v21 = vpop.f32.mrb[23].mxu0  ;;  %v382_v36 = vrot.slane %v381_v20, 1  ;;  %v441_v4 = vrot.slane %v440_v46, 2  ;;  %v1183_v34 = vadd.f32 %v1182_v3, %v1181_v62 }
 0x199   :  { %v433_v51 = vadd.f32 %v432_v1, %v431_v28  ;;  %v1125_v15 = vrot.slane %v1124_v31, 1  ;;  %v1176_v37 = vadd.f32 %v1175_v24, %v1174_v44  ;;  %v1133_v17 = vadd.f32 %v1132_v57, %v1131_v29 }
 0x19a   :  { %v391_v12 = vrot.slane %v390_v0, 1  ;;  %v383_v40 = vadd.f32 %v382_v36, %v381_v20  ;;  %v442_v38 = vadd.f32 %v441_v4, %v440_v46  ;;  %v1184_v13 = vrot.slane %v1183_v34, 2 }
 0x19b   :  { %v434_v47 = vrot.slane %v433_v51, 1  ;;  %v16142_v61 = vpop.f32.mrb[24].mxu1  ;;  %v16144_v59 = vadd.f32 %v1125_v15, %v1124_v31  ;;  %v1177_v43 = vrot.slane %v1176_v37, 1  ;;  %v1134_v58 = vrot.slane %v1133_v17, 1 }
 0x19c   :  { %21852 = vst [vmem:[#allocation38_spill] sm:$0xff] %v16142_v61  ;;  %v392_v63 = vadd.f32 %v391_v12, %v390_v0  ;;  %v16146_v10 = vpop.f32.mrb[25].mxu1  ;;  %v21853_v1 = vcombine.low %v16032_v7, %v16041_v11  ;;  %v443_v20 = vrot.slane %v442_v38, 1  ;;  %v1185_v29 = vadd.f32 %v1184_v13, %v1183_v34 }
 0x19d   :  { %v435_v57 = vadd.f32 %v434_v47, %v433_v51  ;;  %v16152_v46 = vadd.f32 %v1177_v43, %v1176_v37  ;;  %v16154_v62 = vadd.f32 %v1134_v58, %v1133_v17  ;;  %v776_v44 = vmul.f32 %v16084_v50, %v16084_v50 }
 0x19e   :  { %v495_v3 = vrot.slane %v21853_v1, %v16039_v9  ;;  %v450_v28 = vcombine.low %v383_v40, %v392_v63  ;;  %v444_v0 = vadd.f32 %v443_v20, %v442_v38  ;;  %v1186_v31 = vrot.slane %v1185_v29, 1 }
 0x19f   :  { %v1534_v24 = vmul.f32 %v16086_v53, %v16086_v53  ;;  %v777_v7 = vmul.f32 %v16093_v6, %v16093_v6  ;;  %v16162_v11 = vpop.f32.mrb[26].mxu1  ;;  %v756_v58 = vadd.f32 %v16109_v48, %v16084_v50  ;;  %v780_v51 = vmul.f32 %v16109_v48, %v16109_v48 }
 0x1a0   :  { %21854 = vst [vmem:[#allocation39_spill] sm:$0xff] %v16162_v11  ;;  %v464_v36 = vrot.slane %v450_v28, %v16039_v9  ;;  %v16171_v4 = vpop.f32.mrb[27].mxu1  ;;  %v488_v34 = vcombine.low %v435_v57, %v444_v0  ;;  %v16173_v15 = vadd.f32 %v1186_v31, %v1185_v29  ;;  %v1498_v37 = vadd.f32 %v16111_v52, %v16086_v53 }
 0x1a1   :  { %21855 = vst [vmem:[#allocation40_spill] sm:$0xff] %v16171_v4  ;;  %v1538_v12 = vmul.f32 %v16111_v52, %v16111_v52  ;;  %v1535_v40 = vmul.f32 %v16095_v14, %v16095_v14  ;;  %v808_v47 = vadd.f32 %v780_v51, %v776_v44  ;;  %v765_v38 = vadd.f32 %v16117_v49, %v16093_v6 }
 0x1a2   :  { %v465_v17 = vcombine.low %v16076_v45, %v464_v36  ;;  %v502_v13 = vrot.slane %v488_v34, %v16039_v9  ;;  %v781_v57 = vmul.f32 %v16117_v49, %v16117_v49  ;;  %v1507_v29 = vadd.f32 %v16119_v54, %v16095_v14 }
 0x1a3   :  { %v1550_v1 = vadd.f32 %v1538_v12, %v1534_v24  ;;  %v16189_v20 = vpop.f32.mrb[28].mxu1  ;;  %v1539_v28 = vmul.f32 %v16119_v54, %v16119_v54  ;;  %v757_v44 = vadd.f32 %v756_v58, %v16126_v30  ;;  %v21858_v31 = vcombine.low %v16024_v26, %v16030_v5 }
 0x1a4   :  { %21856 = vst [vmem:[#allocation41_spill] sm:$0xff] %v16189_v20  ;;  %v472_v45 = vrot.slane %v465_v17, %v16039_v9  ;;  %v16197_v0 = vpop.f32.mrb[29].mxu1  ;;  %v503_v36 = vcombine.low %v495_v3, %v502_v13  ;;  %v817_v51 = vadd.f32 %v781_v57, %v777_v7  ;;  %v784_v34 = vmul.f32 %v16126_v30, %v16126_v30 }
 0x1a5   :  { %21857 = vst [vmem:[#allocation42_spill] sm:$0xff] %v16197_v0  ;;  %v16203_v24 = vrot.slane %v21858_v31, %v16039_v9  ;;  %v1559_v17 = vadd.f32 %v1539_v28, %v1535_v40  ;;  %v1499_v43 = vadd.f32 %v1498_v37, %v16128_v23  ;;  %v1542_v58 = vmul.f32 %v16128_v23, %v16128_v23 }
 0x1a6   :  { %v475_v12 = vsel %vm474_vm4, %v472_v45, 0.0  ;;  %v510_v54 = vrot.slane %v503_v36, %v16039_v9  ;;  %v809_v52 = vadd.f32 %v808_v47, %v784_v34  ;;  %v766_v26 = vadd.f32 %v765_v38, %v16130_v2 }
 0x1a7   :  { %v476_v63 = vrot.slane %v475_v12, 4  ;;  %v16213_v5 = vpop.f32.mrb[30].mxu1  ;;  %v1551_v3 = vadd.f32 %v1550_v1, %v1542_v58  ;;  %v785_v7 = vmul.f32 %v16130_v2, %v16130_v2  ;;  %v1508_v13 = vadd.f32 %v1507_v29, %v16132_v22 }
 0x1a8   :  { %v1543_v37 = vmul.f32 %v16132_v22, %v16132_v22  ;;  %v16220_v40 = vpop.f32.mrb[31].mxu1  ;;  %v512_v45 = vsel %vm474_vm4, %v510_v54, 0.0  ;;  %v758_v47 = vadd.f32 %v757_v44, %v16134_v60  ;;  %v788_v38 = vmul.f32 %v16134_v60, %v16134_v60 }
 0x1a9   :  { %v477_v57 = vadd.f32 %v476_v63, %v475_v12  ;;  %v513_v28 = vrot.slane %v512_v45, 4  ;;  %v818_v1 = vadd.f32 %v817_v51, %v785_v7  ;;  %v1500_v36 = vadd.f32 %v1499_v43, %v16136_v39 }
 0x1aa   :  { %v16226_v31 = vadd.f32 %v1559_v17, %v1543_v37  ;;  %v759_v34 = vrot.slane %v758_v47, 4  ;;  %v810_v58 = vadd.f32 %v809_v52, %v788_v38  ;;  %v1546_v22 = vmul.f32 %v16136_v39, %v16136_v39 }
 0x1ab   :  { %v478_v29 = vrot.slane %v477_v57, 2  ;;  %v16231_v63 = vpop.f32.mrb[32].mxu1  ;;  %v514_v54 = vadd.f32 %v513_v28, %v512_v45  ;;  %v1501_v12 = vrot.slane %v1500_v36, 4  ;;  %v767_v44 = vadd.f32 %v766_v26, %v16138_v56 }
 0x1ac   :  { %21859 = vst [vmem:[#allocation43_spill] sm:$0xff] %v16231_v63  ;;  %v789_v23 = vmul.f32 %v16138_v56, %v16138_v56  ;;  %v16236_v51 = vpop.f32.mrb[33].mxu1  ;;  %v760_v43 = vadd.f32 %v759_v34, %v758_v47  ;;  %v811_v7 = vrot.slane %v810_v58, 4  ;;  %v1552_v37 = vadd.f32 %v1551_v3, %v1546_v22 }
 0x1ad   :  { %v16238_v17 = vadd.f32 %v478_v29, %v477_v57  ;;  %v515_v52 = vrot.slane %v514_v54, 2  ;;  %v1502_v38 = vadd.f32 %v1501_v12, %v1500_v36  ;;  %v768_v2 = vrot.slane %v767_v44, 4 }
 0x1ae   :  { %v819_v30 = vadd.f32 %v818_v1, %v789_v23  ;;  %v21860_v45 = vcombine.low %v16034_v8, %v16043_v16  ;;  %v761_v26 = vrot.slane %v760_v43, 2  ;;  %v812_v49 = vadd.f32 %v811_v7, %v810_v58 }
 0x1af   :  { %v1553_v48 = vrot.slane %v1552_v37, 4  ;;  %v16246_v14 = vpop.f32.mrb[34].mxu1  ;;  %v16248_v57 = vadd.f32 %v515_v52, %v514_v54  ;;  %v1503_v47 = vrot.slane %v1502_v38, 2  ;;  %v769_v29 = vadd.f32 %v768_v2, %v767_v44 }
 0x1b0   :  { %v16244_v28 = vrot.slane %v21860_v45, %v16039_v9  ;;  %21861 = vst [vmem:[#allocation44_spill] sm:$0xff] %v16246_v14  ;;  %v820_v22 = vrot.slane %v819_v30, 4  ;;  %v16250_v3 = vpop.f32.mrb[35].mxu1  ;;  %v21863_v23 = vcombine.low %v16144_v59, %v16154_v62  ;;  %v762_v8 = vadd.f32 %v761_v26, %v760_v43 }
 0x1b1   :  { %21862 = vst [vmem:[#allocation45_spill] sm:$0xff] %v16250_v3  ;;  %v813_v16 = vrot.slane %v812_v49, 2  ;;  %v1554_v36 = vadd.f32 %v1553_v48, %v1552_v37  ;;  %v1504_v58 = vadd.f32 %v1503_v47, %v1502_v38  ;;  %v770_v12 = vrot.slane %v769_v29, 2 }
 0x1b2   :  { %v16256_v1 = vrot.slane %v21863_v23, %v16039_v9  ;;  %v821_v54 = vadd.f32 %v820_v22, %v819_v30  ;;  %v763_v7 = vrot.slane %v762_v8, 1  ;;  %v1509_v44 = vadd.f32 %v1508_v13, %v16140_v21 }
 0x1b3   :  { %v814_v52 = vadd.f32 %v813_v16, %v812_v49  ;;  %v1555_v2 = vrot.slane %v1554_v36, 2  ;;  %v16260_v45 = vpop.f32.mrb[36].mxu1  ;;  %v1505_v59 = vrot.slane %v1504_v58, 1  ;;  %v771_v62 = vadd.f32 %v770_v12, %v769_v29 }
 0x1b4   :  { %21864 = vst [vmem:[#allocation46_spill] sm:$0xff] %v16260_v45  ;;  %v822_v23 = vrot.slane %v821_v54, 2  ;;  %v16263_v43 = vpop.f32.mrb[37].mxu1  ;;  %v764_v48 = vadd.f32 %v763_v7, %v762_v8  ;;  %v1510_v38 = vrot.slane %v1509_v44, 4  ;;  %v1547_v13 = vmul.f32 %v16140_v21, %v16140_v21 }
 0x1b5   :  { %21865 = vst [vmem:[#allocation47_spill] sm:$0xff] %v16263_v43  ;;  %v815_v37 = vrot.slane %v814_v52, 1  ;;  %v1556_v26 = vadd.f32 %v1555_v2, %v1554_v36  ;;  %v16265_v47 = vadd.f32 %v1505_v59, %v1504_v58  ;;  %v772_v30 = vrot.slane %v771_v62, 1 }
 0x1b6   :  { %v823_v49 = vadd.f32 %v822_v23, %v821_v54  ;;  %v1511_v34 = vadd.f32 %v1510_v38, %v1509_v44  ;;  %v1156_v29 = vmul.f32 %v16142_v61, %v16142_v61  ;;  %v1561_v36 = vadd.f32 %v16226_v31, %v1547_v13 }
 0x1b7   :  { %v816_v22 = vadd.f32 %v815_v37, %v814_v52  ;;  %v1557_v16 = vrot.slane %v1556_v26, 1  ;;  %v16271_v12 = vpop.f32.mrb[38].mxu1  ;;  %v773_v53 = vadd.f32 %v772_v30, %v771_v62  ;;  %v1157_v58 = vmul.f32 %v16146_v10, %v16146_v10 }
 0x1b8   :  { %v824_v8 = vrot.slane %v823_v49, 1  ;;  %v16276_v7 = vpop.f32.mrb[39].mxu1  ;;  %v1512_v2 = vrot.slane %v1511_v34, 2  ;;  %v1136_v52 = vadd.f32 %v16162_v11, %v16142_v61  ;;  %v1160_v44 = vmul.f32 %v16162_v11, %v16162_v11 }
 0x1b9   :  { %v16278_v54 = vadd.f32 %v1557_v16, %v1556_v26  ;;  %v831_v23 = vcombine.low %v764_v48, %v773_v53  ;;  %v1562_v62 = vrot.slane %v1561_v36, 4  ;;  %v1145_v31 = vadd.f32 %v16171_v4, %v16146_v10 }
 0x1ba   :  { %v825_v59 = vadd.f32 %v824_v8, %v823_v49  ;;  %v1513_v37 = vadd.f32 %v1512_v2, %v1511_v34  ;;  %v1188_v38 = vadd.f32 %v1160_v44, %v1156_v29  ;;  %v1161_v30 = vmul.f32 %v16171_v4, %v16171_v4 }
 0x1bb   :  { %v1137_v26 = vadd.f32 %v1136_v52, %v16189_v20  ;;  %v845_v13 = vrot.slane %v831_v23, %v16039_v9  ;;  %v1563_v61 = vadd.f32 %v1562_v62, %v1561_v36  ;;  %v1164_v11 = vmul.f32 %v16189_v20, %v16189_v20 }
 0x1bc   :  { %v868_v16 = vcombine.low %v816_v22, %v825_v59  ;;  %v1514_v49 = vrot.slane %v1513_v37, 1  ;;  %v1197_v53 = vadd.f32 %v1161_v30, %v1157_v58  ;;  %v1146_v48 = vadd.f32 %v1145_v31, %v16197_v0 }
 0x1bd   :  { %v1165_v34 = vmul.f32 %v16197_v0, %v16197_v0  ;;  %v846_v29 = vcombine.low %v16203_v24, %v845_v13  ;;  %v1564_v2 = vrot.slane %v1563_v61, 2  ;;  %v1189_v52 = vadd.f32 %v1188_v38, %v1164_v11 }
 0x1be   :  { %v882_v8 = vrot.slane %v868_v16, %v16039_v9  ;;  %v16297_v44 = vadd.f32 %v1514_v49, %v1513_v37  ;;  %v1138_v36 = vadd.f32 %v1137_v26, %v16213_v5  ;;  %v1168_v59 = vmul.f32 %v16213_v5, %v16213_v5 }
 0x1bf   :  { %v1198_v22 = vadd.f32 %v1197_v53, %v1165_v34  ;;  %v853_v58 = vrot.slane %v846_v29, %v16039_v9  ;;  %v1565_v62 = vadd.f32 %v1564_v2, %v1563_v61  ;;  %v1147_v31 = vadd.f32 %v1146_v48, %v16220_v40 }
 0x1c0   :  { %v883_v23 = vcombine.low %v16244_v28, %v882_v8  ;;  %v1139_v30 = vrot.slane %v1138_v36, 4  ;;  %v1190_v11 = vadd.f32 %v1189_v52, %v1168_v59  ;;  %v1169_v37 = vmul.f32 %v16220_v40, %v16220_v40 }
 0x1c1   :  { %v855_v38 = vsel %vm474_vm4, %v853_v58, 0.0  ;;  %v1566_v13 = vrot.slane %v1565_v62, 1  ;;  %v1148_v16 = vrot.slane %v1147_v31, 4  ;;  %v21866_v28 = vrot.slane %v16238_v17, 1 }
 0x1c2   :  { %v890_v26 = vrot.slane %v883_v23, %v16039_v9  ;;  %v856_v49 = vrot.slane %v855_v38, 4  ;;  %v1140_v53 = vadd.f32 %v1139_v30, %v1138_v36  ;;  %v1191_v48 = vrot.slane %v1190_v11, 4 }
 0x1c3   :  { %v481_v61 = vadd.f32 %v21866_v28, %v16238_v17  ;;  %v16315_v29 = vadd.f32 %v1566_v13, %v1565_v62  ;;  %v1149_v8 = vadd.f32 %v1148_v16, %v1147_v31  ;;  %v1199_v2 = vadd.f32 %v1198_v22, %v1169_v37 }
 0x1c4   :  { %v892_v34 = vsel %vm474_vm4, %v890_v26, 0.0  ;;  %v857_v52 = vadd.f32 %v856_v49, %v855_v38  ;;  %v1141_v58 = vrot.slane %v1140_v53, 2  ;;  %v1192_v24 = vadd.f32 %v1191_v48, %v1190_v11 }
 0x1c5   :  { %v893_v59 = vrot.slane %v892_v34, 4  ;;  %v21867_v23 = vrot.slane %v16248_v57, 1  ;;  %v1150_v28 = vrot.slane %v1149_v8, 2  ;;  %v1200_v36 = vrot.slane %v1199_v2, 4 }
 0x1c6   :  { %v858_v30 = vrot.slane %v857_v52, 2  ;;  %v1142_v26 = vadd.f32 %v1141_v58, %v1140_v53  ;;  %v1193_v62 = vrot.slane %v1192_v24, 2  ;;  %v1536_v22 = vmul.f32 %v16231_v63, %v16231_v63 }
 0x1c7   :  { %v518_v0 = vadd.f32 %v21867_v23, %v16248_v57  ;;  %v894_v20 = vadd.f32 %v893_v59, %v892_v34  ;;  %v1151_v13 = vadd.f32 %v1150_v28, %v1149_v8  ;;  %v1201_v31 = vadd.f32 %v1200_v36, %v1199_v2 }
 0x1c8   :  { %v1537_v11 = vmul.f32 %v16236_v51, %v16236_v51  ;;  %v859_v37 = vadd.f32 %v858_v30, %v857_v52  ;;  %v1143_v57 = vrot.slane %v1142_v26, 1  ;;  %v1194_v16 = vadd.f32 %v1193_v62, %v1192_v24 }
 0x1c9   :  { %v895_v38 = vrot.slane %v894_v20, 2  ;;  %v1152_v49 = vrot.slane %v1151_v13, 1  ;;  %v1202_v48 = vrot.slane %v1201_v31, 2  ;;  %v1516_v23 = vadd.f32 %v16246_v14, %v16231_v63 }
 0x1ca   :  { %v1540_v53 = vmul.f32 %v16246_v14, %v16246_v14  ;;  %v860_v34 = vrot.slane %v859_v37, 1  ;;  %v1144_v2 = vadd.f32 %v1143_v57, %v1142_v26  ;;  %v1195_v59 = vrot.slane %v1194_v16, 1 }
 0x1cb   :  { %v896_v8 = vadd.f32 %v895_v38, %v894_v20  ;;  %v1153_v58 = vadd.f32 %v1152_v49, %v1151_v13  ;;  %v1203_v28 = vadd.f32 %v1202_v48, %v1201_v31  ;;  %v1525_v52 = vadd.f32 %v16250_v3, %v16236_v51 }
 0x1cc   :  { %v1568_v36 = vadd.f32 %v1540_v53, %v1536_v22  ;;  %v861_v30 = vadd.f32 %v860_v34, %v859_v37  ;;  %v1196_v62 = vadd.f32 %v1195_v59, %v1194_v16  ;;  %v1541_v17 = vmul.f32 %v16250_v3, %v16250_v3 }
 0x1cd   :  { %v897_v24 = vrot.slane %v896_v8, 1  ;;  %v1204_v4 = vrot.slane %v1203_v28, 1  ;;  %v1211_v63 = vcombine.low %v1144_v2, %v1153_v58  ;;  %v1517_v14 = vadd.f32 %v1516_v23, %v16260_v45 }
 0x1ce   :  { %v1544_v20 = vmul.f32 %v16260_v45, %v16260_v45  ;;  %v16337_v26 = vadd.f32 %v861_v30, %v481_v61  ;;  %v1577_v31 = vadd.f32 %v1541_v17, %v1537_v11  ;;  %v1526_v22 = vadd.f32 %v1525_v52, %v16263_v43 }
 0x1cf   :  { %v898_v13 = vadd.f32 %v897_v24, %v896_v8  ;;  %v1205_v38 = vadd.f32 %v1204_v4, %v1203_v28  ;;  %v1225_v37 = vrot.slane %v1211_v63, %v16039_v9  ;;  %v1545_v16 = vmul.f32 %v16263_v43, %v16263_v43 }
 0x1d0   :  { %v1569_v57 = vadd.f32 %v1568_v36, %v1544_v20  ;;  %v1518_v48 = vadd.f32 %v1517_v14, %v16271_v12  ;;  %v1548_v23 = vmul.f32 %v16271_v12, %v16271_v12  ;;  %v1527_v61 = vadd.f32 %v1526_v22, %v16276_v7 }
 0x1d1   :  { %v16343_v49 = vadd.f32 %v898_v13, %v518_v0  ;;  %v1226_v17 = vcombine.low %v16256_v1, %v1225_v37  ;;  %v1248_v11 = vcombine.low %v1196_v62, %v1205_v38  ;;  %v1578_v53 = vadd.f32 %v1577_v31, %v1545_v16 }
 0x1d2   :  { %v1549_v4 = vmul.f32 %v16276_v7, %v16276_v7  ;;  %v1519_v63 = vrot.slane %v1518_v48, 4  ;;  %v1570_v34 = vadd.f32 %v1569_v57, %v1548_v23  ;;  %v1528_v8 = vrot.slane %v1527_v61, 4 }
 0x1d3   :  { %v21868_v0 = vcombine.low %v16152_v46, %v16173_v15  ;;  %v1233_v2 = vrot.slane %v1226_v17, %v16039_v9  ;;  %v1262_v59 = vrot.slane %v1248_v11, %v16039_v9 }
 0x1d4   :  { %v1579_v58 = vadd.f32 %v1578_v53, %v1549_v4  ;;  %v1520_v28 = vadd.f32 %v1519_v63, %v1518_v48  ;;  %v1571_v1 = vrot.slane %v1570_v34, 4  ;;  %v1529_v36 = vadd.f32 %v1528_v8, %v1527_v61 }
 0x1d5   :  { %v1255_v14 = vrot.slane %v21868_v0, %v16039_v9  ;;  %v1235_v52 = vsel %vm474_vm4, %v1233_v2, 0.0 }
 0x1d6   :  { %v1580_v24 = vrot.slane %v1579_v58, 4  ;;  %v1236_v62 = vrot.slane %v1235_v52, 4  ;;  %v1521_v20 = vrot.slane %v1520_v28, 2  ;;  %v1572_v13 = vadd.f32 %v1571_v1, %v1570_v34 }
 0x1d7   :  { %v1263_v30 = vcombine.low %v1255_v14, %v1262_v59  ;;  %v1530_v31 = vrot.slane %v1529_v36, 2 }
 0x1d8   :  { %v1581_v46 = vadd.f32 %v1580_v24, %v1579_v58  ;;  %v1237_v15 = vadd.f32 %v1236_v62, %v1235_v52  ;;  %v1522_v38 = vadd.f32 %v1521_v20, %v1520_v28  ;;  %v1573_v37 = vrot.slane %v1572_v13, 2 }
 0x1d9   :  { %v1270_v22 = vrot.slane %v1263_v30, %v16039_v9  ;;  %v1531_v57 = vadd.f32 %v1530_v31, %v1529_v36  ;;  %v21869_v24 = vcombine.low %v16265_v47, %v16297_v44 }
 0x1da   :  { %v1582_v48 = vrot.slane %v1581_v46, 2  ;;  %v1238_v23 = vrot.slane %v1237_v15, 2  ;;  %v1523_v17 = vrot.slane %v1522_v38, 1  ;;  %v1574_v11 = vadd.f32 %v1573_v37, %v1572_v13 }
 0x1db   :  { %v1272_v16 = vsel %vm474_vm4, %v1270_v22, 0.0  ;;  %v1532_v53 = vrot.slane %v1531_v57, 1  ;;  %v1598_v62 = vrot.slane %v21869_v24, %v16039_v9  ;;  %v1665_v24 = vld [vmem:[%s21697_s3] sm:$0x1] }
 0x1dc   :  { %v1273_v61 = vrot.slane %v1272_v16, 4  ;;  %v1583_v4 = vadd.f32 %v1582_v48, %v1581_v46  ;;  %v1239_v63 = vadd.f32 %v1238_v23, %v1237_v15  ;;  %v1524_v34 = vadd.f32 %v1523_v17, %v1522_v38 }
 0x1dd   :  { %v1575_v0 = vrot.slane %v1574_v11, 1  ;;  %v1533_v14 = vadd.f32 %v1532_v53, %v1531_v57  ;;  %v21870_v46 = vcombine.low %v16278_v54, %v16315_v29 }
 0x1de   :  { %v1274_v8 = vadd.f32 %v1273_v61, %v1272_v16  ;;  %v1584_v2 = vrot.slane %v1583_v4, 1  ;;  %v1240_v59 = vrot.slane %v1239_v63, 1 }
 0x1df   :  { %v1576_v28 = vadd.f32 %v1575_v0, %v1574_v11  ;;  %v1591_v36 = vcombine.low %v1524_v34, %v1533_v14  ;;  %v1635_v15 = vrot.slane %v21870_v46, %v16039_v9 }
 0x1e0   :  { %v1275_v58 = vrot.slane %v1274_v8, 2  ;;  %v1585_v1 = vadd.f32 %v1584_v2, %v1583_v4  ;;  %v1241_v52 = vadd.f32 %v1240_v59, %v1239_v63 }
 0x1e1   :  { %v1605_v20 = vrot.slane %v1591_v36, %v16039_v9 }
 0x1e2   :  { %v1276_v30 = vadd.f32 %v1275_v58, %v1274_v8  ;;  %v1628_v13 = vcombine.low %v1576_v28, %v1585_v1  ;;  %v1242_v31 = vadd.f32 %v1241_v52, %v16337_v26  ;;  %v15421_v52 = vmov 1983009808  }
 0x1e3   :  { %v1606_v38 = vcombine.low %v1598_v62, %v1605_v20  ;;  %v16381_v62 = vsub.s32 0, %v15986_v35 }
 0x1e4   :  { %v1277_v22 = vrot.slane %v1276_v30, 1  ;;  %v1642_v37 = vrot.slane %v1628_v13, %v16039_v9 }
 0x1e5   :  { %v1613_v16 = vrot.slane %v1606_v38, %v16039_v9  ;;  %21871 = vst [vmem:[#allocation48_spill] sm:$0xff] %v16381_v62 }
 0x1e6   :  { %v1278_v57 = vadd.f32 %v1277_v22, %v1276_v30  ;;  %v1643_v48 = vcombine.low %v1635_v15, %v1642_v37  ;;  %v1765_v30 = vunpack.c.l.s4 %v15421_v52  ;;  %v1666_v22 = vld [vmem:[%s21697_s3 + $0x1] sm:$0x1]  ;;  %v16393_v37 = vsub.s32 2, %v15986_v35 }
 0x1e7   :  { %v1615_v44 = vsel %vm474_vm4, %v1613_v16, 0.0  ;;  %v16399_v16 = vsub.s32 6, %v15986_v35 }
 0x1e8   :  { %v1279_v47 = vadd.f32 %v1278_v57, %v16343_v49  ;;  %v1650_v23 = vrot.slane %v1643_v48, %v16039_v9  ;;  %v1616_v26 = vrot.slane %v1615_v44, 4  ;;  %v1766_v13 = vunpack.c.0.s8 %v1765_v30  ;;  %21873 = vst [vmem:[#allocation50_spill] sm:$0xff] %v16393_v37 }
 0x1e9   :  { %v16396_v57 = vsub.s32 4, %v15986_v35  ;;  %21875 = vst [vmem:[#allocation52_spill] sm:$0xff] %v16399_v16 }
 0x1ea   :  { %v1652_v61 = vsel %vm474_vm4, %v1650_v23, 0.0  ;;  %v1617_v17 = vadd.f32 %v1616_v26, %v1615_v44  ;;  %v16390_v38 = vsub.s32 %v1766_v13, %v15986_v35 }
 0x1eb   :  { %v1653_v11 = vrot.slane %v1652_v61, 4  ;;  %21874 = vst [vmem:[#allocation51_spill] sm:$0xff] %v16396_v57 }
 0x1ec   :  { %v1618_v54 = vrot.slane %v1617_v17, 2  ;;  %21872 = vst [vmem:[#allocation49_spill] sm:$0xff] %v16390_v38 }
 0x1ed   :  { %v1654_v29 = vadd.f32 %v1653_v11, %v1652_v61 }
 0x1ee   :  { %v1619_v53 = vadd.f32 %v1618_v54, %v1617_v17 }
 0x1ef   :  { %v1655_v4 = vrot.slane %v1654_v29, 2 }
 0x1f0   :  { %v1620_v63 = vrot.slane %v1619_v53, 1 }
 0x1f1   :  { %v1656_v8 = vadd.f32 %v1655_v4, %v1654_v29 }
 0x1f2   :  { %v1621_v34 = vadd.f32 %v1620_v63, %v1619_v53 }
 0x1f3   :  { %v1657_v0 = vrot.slane %v1656_v8, 1 }
 0x1f4   :  { %v1622_v14 = vadd.f32 %v1621_v34, %v1242_v31 }
 0x1f5   :  { %v1658_v2 = vadd.f32 %v1657_v0, %v1656_v8 }
 0x1f6   :  { %v1660_v59 = vmul.f32 0.001953125, %v1622_v14 }
 0x1f7   :  { %v1659_v49 = vadd.f32 %v1658_v2, %v1279_v47 }
 0x1f8   :  { %v1662_v28 = vmul.f32 %v1660_v59, %v1660_v59 }
 0x1f9   :  { %v1661_v58 = vmul.f32 0.001953125, %v1659_v49 }
 0x1fb   :  { %v1663_v9 = vsub.f32 %v1661_v58, %v1662_v28 }
 0x1fd   :  { %v1664_v1 = vmax.f32 %v1663_v9, 0.0 }
 0x1ff   :  { %v1667_v36 = vadd.f32 1e-05, %v1664_v1 }
 0x201   :  { %15405 = vrsqrt.f32 %v1667_v36 }
 0x20b   :  { %v15406_v20 = vpop.eup %15405 }
 0x20c   :  { %v1669_v31 = vmul.f32 %v15406_v20, %v1665_v24 }
 0x20e   :  { %v1670_v46 = vmul.f32 %v1669_v31, %v1660_v59  ;;  %v16387_v15 = vrot.slane %v1669_v31, %v16381_v62 }
 0x210   :  { %v1671_v48 = vsub.f32 %v1666_v22, %v1670_v46  ;;  %v4635_v47 = vmul.f32 %v16387_v15, %v15981_v32  ;;  %v4636_v44 = vmul.f32 %v16387_v15, %v15994_v41  ;;  %v4637_v23 = vmul.f32 %v16387_v15, %v16047_v18 }
 0x211   :  { %v4638_v26 = vmul.f32 %v16387_v15, %v16057_v25  ;;  %v4639_v61 = vmul.f32 %v16387_v15, %v15983_v33  ;;  %v4640_v35 = vmul.f32 %v16387_v15, %v15996_v42  ;;  %v4641_v17 = vmul.f32 %v16387_v15, %v16134_v60 }
 0x212   :  { %v16416_v32 = vrot.slane %v1671_v48, %v16381_v62  ;;  %v4642_v41 = vmul.f32 %v16387_v15, %v16138_v56  ;;  %v4643_v18 = vmul.f32 %v16387_v15, %v16049_v19  ;;  %v4644_v25 = vmul.f32 %v16387_v15, %v16059_v27 }
 0x213   :  { %v4645_v33 = vmul.f32 %v16387_v15, %v16213_v5  ;;  %v4646_v42 = vmul.f32 %v16387_v15, %v16220_v40  ;;  %v4647_v60 = vmul.f32 %v16387_v15, %v16136_v39  ;;  %v4648_v11 = vmul.f32 %v16387_v15, %v16140_v21 }
 0x214   :  { %21876 = vst [vmem:[#allocation53_spill] sm:$0xff] %v16416_v32  ;;  %v4649_v56 = vmul.f32 %v16387_v15, %v16271_v12  ;;  %v4650_v19 = vmul.f32 %v16387_v15, %v16276_v7  ;;  %v4651_v27 = vadd.f32 %v4635_v47, %v16416_v32  ;;  %v4652_v54 = vadd.f32 %v4636_v44, %v16416_v32 }
 0x215   :  { %v4653_v5 = vadd.f32 %v4637_v23, %v16416_v32  ;;  %v4654_v40 = vadd.f32 %v4638_v26, %v16416_v32  ;;  %v4655_v29 = vadd.f32 %v4639_v61, %v16416_v32  ;;  %v4656_v39 = vadd.f32 %v4640_v35, %v16416_v32 }
 0x216   :  { %v4657_v21 = vadd.f32 %v4641_v17, %v16416_v32  ;;  %v4658_v53 = vadd.f32 %v4642_v41, %v16416_v32  ;;  %v4659_v12 = vadd.f32 %v4643_v18, %v16416_v32  ;;  %v4660_v7 = vadd.f32 %v4644_v25, %v16416_v32 }
 0x217   :  { %v4661_v4 = vadd.f32 %v4645_v33, %v16416_v32  ;;  %v4662_v63 = vadd.f32 %v4646_v42, %v16416_v32  ;;  %v4663_v8 = vadd.f32 %v4647_v60, %v16416_v32  ;;  %v4664_v34 = vadd.f32 %v4648_v11, %v16416_v32 }
 0x218   :  { %v4665_v0 = vadd.f32 %v4649_v56, %v16416_v32  ;;  %v4666_v14 = vadd.f32 %v4650_v19, %v16416_v32  ;;  %v4667_v2 = vmax.f32 %v4651_v27, 0.0  ;;  %v4668_v49 = vmax.f32 %v4652_v54, 0.0 }
 0x219   :  { %v4669_v59 = vmax.f32 %v4653_v5, 0.0  ;;  %v4670_v58 = vmax.f32 %v4654_v40, 0.0  ;;  %v4671_v28 = vmax.f32 %v4655_v29, 0.0  ;;  %v4672_v9 = vmax.f32 %v4656_v39, 0.0 }
 0x21a   :  { %v4673_v1 = vmax.f32 %v4657_v21, 0.0  ;;  %v4674_v36 = vmax.f32 %v4658_v53, 0.0  ;;  %v4675_v52 = vmax.f32 %v4659_v12, 0.0  ;;  %v4676_v30 = vmax.f32 %v4660_v7, 0.0 }
 0x21b   :  { %v4677_v24 = vmax.f32 %v4661_v4, 0.0  ;;  %v4678_v20 = vmax.f32 %v4662_v63, 0.0  ;;  %v4679_v13 = vmax.f32 %v4663_v8, 0.0  ;;  %v4680_v31 = vmax.f32 %v4664_v34, 0.0 }
 0x21c   :  { %v4681_v22 = vmax.f32 %v4665_v0, 0.0  ;;  %v4682_v46 = vmax.f32 %v4666_v14, 0.0  ;;  %v4699_v48 = vcombine.low %v4667_v2, %v4668_v49  ;;  %v4700_v47 = vcombine.high %v4667_v2, %v4668_v49 }
 0x21d   :  { %v4701_v44 = vcombine.low %v4669_v59, %v4670_v58  ;;  %v4702_v23 = vcombine.high %v4669_v59, %v4670_v58  ;;  %v4735_v26 = vcombine.low %v4671_v28, %v4672_v9  ;;  %v4736_v61 = vcombine.high %v4671_v28, %v4672_v9 }
 0x21e   :  { %v4709_v35 = vrot.slane %v4699_v48, %v16390_v38  ;;  %v4716_v17 = vrot.slane %v4700_v47, %v16390_v38  ;;  %v4737_v41 = vcombine.low %v4673_v1, %v4674_v36  ;;  %v4738_v18 = vcombine.high %v4673_v1, %v4674_v36 }
 0x21f   :  { %v4723_v25 = vrot.slane %v4701_v44, %v16390_v38  ;;  %v4730_v33 = vrot.slane %v4702_v23, %v16390_v38  ;;  %v4745_v42 = vrot.slane %v4735_v26, %v16390_v38  ;;  %v4752_v60 = vrot.slane %v4736_v61, %v16390_v38 }
 0x220   :  { %v4759_v11 = vrot.slane %v4737_v41, %v16390_v38  ;;  %v4766_v56 = vrot.slane %v4738_v18, %v16390_v38  ;;  %v4771_v19 = vcombine.low %v4675_v52, %v4676_v30  ;;  %v4772_v27 = vcombine.high %v4675_v52, %v4676_v30 }
 0x221   :  { %v4731_v54 = vcombine.low %v4709_v35, %v4723_v25  ;;  %v4732_v5 = vcombine.high %v4709_v35, %v4723_v25  ;;  %v4733_v40 = vcombine.low %v4716_v17, %v4730_v33  ;;  %v4734_v29 = vcombine.high %v4716_v17, %v4730_v33 }
 0x222   :  { %v4767_v39 = vcombine.low %v4745_v42, %v4759_v11  ;;  %v4768_v21 = vcombine.high %v4745_v42, %v4759_v11  ;;  %v4769_v53 = vcombine.low %v4752_v60, %v4766_v56  ;;  %v4770_v12 = vcombine.high %v4752_v60, %v4766_v56 }
 0x223   :  { %v4773_v7 = vcombine.low %v4677_v24, %v4678_v20  ;;  %v4774_v4 = vcombine.high %v4677_v24, %v4678_v20  ;;  %v4781_v63 = vrot.slane %v4771_v19, %v16390_v38  ;;  %v4788_v8 = vrot.slane %v4772_v27, %v16390_v38 }
 0x224   :  { %v4807_v34 = vcombine.low %v4679_v13, %v4680_v31  ;;  %v4808_v0 = vcombine.high %v4679_v13, %v4680_v31  ;;  %v4809_v14 = vcombine.low %v4681_v22, %v4682_v46  ;;  %v4810_v2 = vcombine.high %v4681_v22, %v4682_v46 }
 0x225   :  { %v4795_v49 = vrot.slane %v4773_v7, %v16390_v38  ;;  %v4802_v59 = vrot.slane %v4774_v4, %v16390_v38  ;;  %v11248_v58 = vrot.slane %v4731_v54, 9  ;;  %v11249_v28 = vrot.slane %v4767_v39, 9 }
 0x226   :  { %v4817_v9 = vrot.slane %v4807_v34, %v16390_v38  ;;  %v4824_v1 = vrot.slane %v4808_v0, %v16390_v38  ;;  %v4831_v36 = vrot.slane %v4809_v14, %v16390_v38  ;;  %v4838_v52 = vrot.slane %v4810_v2, %v16390_v38 }
 0x227   :  { %v4803_v30 = vcombine.low %v4781_v63, %v4795_v49  ;;  %v4804_v24 = vcombine.high %v4781_v63, %v4795_v49  ;;  %v4805_v20 = vcombine.low %v4788_v8, %v4802_v59  ;;  %v4806_v13 = vcombine.high %v4788_v8, %v4802_v59 }
 0x228   :  { %v4839_v31 = vcombine.low %v4817_v9, %v4831_v36  ;;  %v4840_v22 = vcombine.high %v4817_v9, %v4831_v36  ;;  %v4841_v46 = vcombine.low %v4824_v1, %v4838_v52  ;;  %v4842_v48 = vcombine.high %v4824_v1, %v4838_v52 }
 0x229   :  { %v11250_v47 = vrot.slane %v4803_v30, 9  ;;  %v11252_v44 = vrot.slane %v4732_v5, 9  ;;  %v11253_v23 = vrot.slane %v4768_v21, 9  ;;  %v11254_v26 = vrot.slane %v4804_v24, 9 }
 0x22a   :  { %v11251_v61 = vrot.slane %v4839_v31, 9  ;;  %v11255_v35 = vrot.slane %v4840_v22, 9  ;;  %v11256_v17 = vrot.slane %v4733_v40, 9  ;;  %v11257_v41 = vrot.slane %v4769_v53, 9 }
 0x22b   :  { %v11258_v18 = vrot.slane %v4805_v20, 9  ;;  %v11259_v25 = vrot.slane %v4841_v46, 9  ;;  %v11260_v33 = vrot.slane %v4734_v29, 9  ;;  %v11261_v42 = vrot.slane %v4770_v12, 9 }
 0x22c   :  { %v11262_v60 = vrot.slane %v4806_v13, 9  ;;  %v11263_v11 = vrot.slane %v4842_v48, 9  ;;  %v16468_v56 = vmax.f32 %v4731_v54, %v11248_v58  ;;  %v16470_v19 = vmax.f32 %v4767_v39, %v11249_v28 }
 0x22d   :  { %v16472_v27 = vmax.f32 %v4803_v30, %v11250_v47  ;;  %v16474_v7 = vmax.f32 %v4839_v31, %v11251_v61  ;;  %v16476_v4 = vmax.f32 %v4732_v5, %v11252_v44  ;;  %v16478_v63 = vmax.f32 %v4768_v21, %v11253_v23 }
 0x22e   :  { %v16480_v8 = vmax.f32 %v4804_v24, %v11254_v26  ;;  %v16482_v34 = vmax.f32 %v4840_v22, %v11255_v35  ;;  %v16484_v0 = vmax.f32 %v4733_v40, %v11256_v17  ;;  %v16486_v14 = vmax.f32 %v4769_v53, %v11257_v41 }
 0x22f   :  { %v16488_v54 = vmax.f32 %v4805_v20, %v11258_v18  ;;  %v16490_v39 = vmax.f32 %v4841_v46, %v11259_v25  ;;  %v16492_v2 = vmax.f32 %v4734_v29, %v11260_v33  ;;  %v16494_v49 = vmax.f32 %v4770_v12, %v11261_v42 }
 0x230   :  { %v16496_v5 = vmax.f32 %v4806_v13, %v11262_v60  ;;  %v16498_v21 = vmax.f32 %v4842_v48, %v11263_v11  ;;  %v4942_v59 = vrot.slane %v16468_v56, %v16381_v62  ;;  %v5006_v22 = vrot.slane %v16476_v4, %v16381_v62 }
 0x231   :  { %v5010_v46 = vrot.slane %v16476_v4, %v16393_v37  ;;  %v5014_v48 = vrot.slane %v16476_v4, %v16396_v57  ;;  %v5018_v47 = vrot.slane %v16476_v4, %v16399_v16  ;;  %v5022_v44 = vrot.slane %v16478_v63, %v16381_v62 }
 0x232   :  { %v5026_v23 = vrot.slane %v16478_v63, %v16393_v37  ;;  %v5030_v26 = vrot.slane %v16478_v63, %v16396_v57  ;;  %v5034_v61 = vrot.slane %v16478_v63, %v16399_v16  ;;  %v5070_v11 = vrot.slane %v16484_v0, %v16381_v62 }
 0x233   :  { %v5074_v4 = vrot.slane %v16484_v0, %v16393_v37  ;;  %v5078_v63 = vrot.slane %v16484_v0, %v16396_v57  ;;  %v5082_v31 = vrot.slane %v16484_v0, %v16399_v16  ;;  %v5086_v13 = vrot.slane %v16486_v14, %v16381_v62 }
 0x234   :  { %v5090_v42 = vrot.slane %v16486_v14, %v16393_v37  ;;  %v5094_v60 = vrot.slane %v16486_v14, %v16396_v57  ;;  %v5098_v33 = vrot.slane %v16486_v14, %v16399_v16  ;;  %v5102_v20 = vrot.slane %v16488_v54, %v16381_v62 }
 0x235   :  { %v5106_v25 = vrot.slane %v16488_v54, %v16393_v37  ;;  %v5110_v0 = vrot.slane %v16488_v54, %v16396_v57  ;;  %v5114_v24 = vrot.slane %v16488_v54, %v16399_v16  ;;  %v5118_v18 = vrot.slane %v16490_v39, %v16381_v62 }
 0x236   :  { %v5122_v30 = vrot.slane %v16490_v39, %v16393_v37  ;;  %v5134_v52 = vrot.slane %v16492_v2, %v16381_v62  ;;  %v5138_v17 = vrot.slane %v16492_v2, %v16393_v37  ;;  %v5142_v54 = vrot.slane %v16492_v2, %v16396_v57 }
 0x237   :  { %v5146_v36 = vrot.slane %v16492_v2, %v16399_v16  ;;  %v5150_v35 = vrot.slane %v16494_v49, %v16381_v62  ;;  %v5154_v14 = vrot.slane %v16494_v49, %v16393_v37  ;;  %v5158_v41 = vrot.slane %v16494_v49, %v16396_v57 }
 0x238   :  { %v5162_v1 = vrot.slane %v16494_v49, %v16399_v16  ;;  %v5166_v9 = vrot.slane %v16496_v5, %v16381_v62  ;;  %v5170_v28 = vrot.slane %v16496_v5, %v16393_v37  ;;  %v5174_v2 = vrot.slane %v16496_v5, %v16396_v57 }
 0x239   :  { %v5178_v12 = vrot.slane %v16496_v5, %v16399_v16  ;;  %v5182_v29 = vrot.slane %v16498_v21, %v16381_v62  ;;  %v5186_v58 = vrot.slane %v16498_v21, %v16393_v37  ;;  %v5190_v49 = vrot.slane %v16498_v21, %v16396_v57 }
 0x23a   :  { %v5194_v53 = vrot.slane %v16498_v21, %v16399_v16  ;;  %v5195_v40 = vsel %vm2256_vm5, %v5006_v22, %v4942_v59  ;;  %v21877_v5 = vrot.slane %v16468_v56, %v16393_v37  ;;  %v21878_v45 = vrot.slane %v16468_v56, %v16396_v57 }
 0x23b   :  { %v5196_v32 = vsel %vm2258_vm6, %v5070_v11, %v5195_v40  ;;  %v21879_v3 = vrot.slane %v16468_v56, %v16399_v16  ;;  %v21884_v56 = vrot.slane %v16470_v19, %v16381_v62 }
 0x23c   :  { %v5198_v38 = vsel %vm2256_vm5, %v5010_v46, %v21877_v5  ;;  %v5201_v21 = vsel %vm2256_vm5, %v5014_v48, %v21878_v45  ;;  %v16647_v22 = vsel %vm2260_vm7, %v5134_v52, %v5196_v32  ;;  %v21885_v32 = vrot.slane %v16470_v19, %v16393_v37 }
 0x23d   :  { %v5199_v43 = vsel %vm2258_vm6, %v5074_v4, %v5198_v38  ;;  %v5204_v59 = vsel %vm2256_vm5, %v5018_v47, %v21879_v3  ;;  %21880 = vst [vmem:[#allocation54_spill] sm:$0xff] %v16647_v22  ;;  %v5202_v40 = vsel %vm2258_vm6, %v5078_v63, %v5201_v21  ;;  %v5207_v3 = vsel %vm2256_vm5, %v5022_v44, %v21884_v56 }
 0x23e   :  { %v16650_v46 = vsel %vm2260_vm7, %v5138_v17, %v5199_v43  ;;  %v5205_v38 = vsel %vm2258_vm6, %v5082_v31, %v5204_v59  ;;  %v16655_v11 = vsel %vm2260_vm7, %v5142_v54, %v5202_v40  ;;  %v5210_v43 = vsel %vm2256_vm5, %v5026_v23, %v21885_v32 }
 0x23f   :  { %21881 = vst [vmem:[#allocation55_spill] sm:$0xff] %v16650_v46  ;;  %21882 = vst [vmem:[#allocation56_spill] sm:$0xff] %v16655_v11  ;;  %v16658_v45 = vsel %vm2260_vm7, %v5146_v36, %v5205_v38  ;;  %v5208_v52 = vsel %vm2258_vm6, %v5086_v13, %v5207_v3  ;;  %v5211_v31 = vsel %vm2258_vm6, %v5090_v42, %v5210_v43 }
 0x240   :  { %21883 = vst [vmem:[#allocation57_spill] sm:$0xff] %v16658_v45  ;;  %v21886_v48 = vrot.slane %v16470_v19, %v16396_v57  ;;  %v21887_v47 = vrot.slane %v16470_v19, %v16399_v16  ;;  %v16679_v44 = vsel %vm2260_vm7, %v5150_v35, %v5208_v52  ;;  %v16682_v4 = vsel %vm2260_vm7, %v5154_v14, %v5211_v31 }
 0x241   :  { %21888 = vst [vmem:[#allocation58_spill] sm:$0xff] %v16679_v44  ;;  %21889 = vst [vmem:[#allocation59_spill] sm:$0xff] %v16682_v4  ;;  %v21892_v19 = vrot.slane %v16472_v27, %v16381_v62  ;;  %v21894_v63 = vrot.slane %v16472_v27, %v16393_v37  ;;  %v21896_v14 = vrot.slane %v16472_v27, %v16396_v57 }
 0x242   :  { %v5213_v36 = vsel %vm2256_vm5, %v5030_v26, %v21886_v48  ;;  %v5216_v17 = vsel %vm2256_vm5, %v5034_v61, %v21887_v47  ;;  %v21893_v61 = vrot.slane %v16480_v8, %v16381_v62  ;;  %v21897_v54 = vrot.slane %v16480_v8, %v16396_v57 }
 0x243   :  { %v5214_v13 = vsel %vm2258_vm6, %v5094_v60, %v5213_v36  ;;  %v5217_v23 = vsel %vm2258_vm6, %v5098_v33, %v5216_v17  ;;  %v21895_v33 = vrot.slane %v16480_v8, %v16393_v37  ;;  %v21898_v21 = vrot.slane %v16472_v27, %v16399_v16 }
 0x244   :  { %v16687_v42 = vsel %vm2260_vm7, %v5158_v41, %v5214_v13  ;;  %v16690_v26 = vsel %vm2260_vm7, %v5162_v1, %v5217_v23  ;;  %v5219_v35 = vsel %vm2256_vm5, %v21893_v61, %v21892_v19  ;;  %v5225_v5 = vsel %vm2256_vm5, %v21897_v54, %v21896_v14 }
 0x245   :  { %21890 = vst [vmem:[#allocation60_spill] sm:$0xff] %v16687_v42  ;;  %21891 = vst [vmem:[#allocation61_spill] sm:$0xff] %v16690_v26  ;;  %v5222_v41 = vsel %vm2256_vm5, %v21895_v33, %v21894_v63  ;;  %v5220_v60 = vsel %vm2258_vm6, %v5102_v20, %v5219_v35  ;;  %v21899_v59 = vrot.slane %v16480_v8, %v16399_v16  ;;  %v5283_v63 = vrot.slane %v16647_v22, 1 }
 0x246   :  { %v5223_v1 = vsel %vm2258_vm6, %v5106_v25, %v5222_v41  ;;  %v16723_v20 = vsel %vm2260_vm7, %v5166_v9, %v5220_v60  ;;  %v5226_v38 = vsel %vm2258_vm6, %v5110_v0, %v5225_v5  ;;  %v21904_v8 = vrot.slane %v16474_v7, %v16381_v62 }
 0x247   :  { %v5228_v40 = vsel %vm2256_vm5, %v21899_v59, %v21898_v21  ;;  %21900 = vst [vmem:[#allocation62_spill] sm:$0xff] %v16723_v20  ;;  %v16726_v25 = vsel %vm2260_vm7, %v5170_v28, %v5223_v1  ;;  %v16731_v3 = vsel %vm2260_vm7, %v5174_v2, %v5226_v38  ;;  %v21905_v9 = vrot.slane %v16482_v34, %v16381_v62 }
 0x248   :  { %21901 = vst [vmem:[#allocation63_spill] sm:$0xff] %v16726_v25  ;;  %v5229_v56 = vsel %vm2258_vm6, %v5114_v24, %v5228_v40  ;;  %21902 = vst [vmem:[#allocation64_spill] sm:$0xff] %v16731_v3  ;;  %v21906_v28 = vrot.slane %v16474_v7, %v16393_v37  ;;  %v21907_v24 = vrot.slane %v16482_v34, %v16393_v37  ;;  %v5286_v33 = vrot.slane %v16655_v11, 1 }
 0x249   :  { %v16734_v27 = vsel %vm2260_vm7, %v5178_v12, %v5229_v56  ;;  %v5231_v32 = vsel %vm2256_vm5, %v21905_v9, %v21904_v8  ;;  %v21908_v43 = vrot.slane %v16474_v7, %v16396_v57  ;;  %v21909_v52 = vrot.slane %v16482_v34, %v16396_v57 }
 0x24a   :  { %21903 = vst [vmem:[#allocation65_spill] sm:$0xff] %v16734_v27  ;;  %v5234_v0 = vsel %vm2256_vm5, %v21907_v24, %v21906_v28  ;;  %v5232_v2 = vsel %vm2258_vm6, %v5118_v18, %v5231_v32  ;;  %v21910_v48 = vrot.slane %v16474_v7, %v16399_v16  ;;  %v21911_v36 = vrot.slane %v16482_v34, %v16399_v16 }
 0x24b   :  { %v5235_v12 = vsel %vm2258_vm6, %v5122_v30, %v5234_v0  ;;  %v5237_v31 = vsel %vm2256_vm5, %v21909_v52, %v21908_v43  ;;  %v5233_v18 = vsel %vm2260_vm7, %v5182_v29, %v5232_v2  ;;  %v21912_v17 = vrot.slane %v16490_v39, %v16396_v57 }
 0x24c   :  { %v5240_v47 = vsel %vm2256_vm5, %v21911_v36, %v21910_v48  ;;  %v5236_v30 = vsel %vm2260_vm7, %v5186_v58, %v5235_v12  ;;  %v21913_v23 = vrot.slane %v16490_v39, %v16399_v16  ;;  %v5277_v61 = vsel %vm2323_vm8, %v5233_v18, 0.0 }
 0x24d   :  { %v5238_v13 = vsel %vm2258_vm6, %v21912_v17, %v5237_v31  ;;  %v5278_v35 = vrot.slane %v5236_v30, 7  ;;  %v5289_v39 = vrot.slane %v16679_v44, 1  ;;  %v5292_v60 = vrot.slane %v16687_v42, 1 }
 0x24e   :  { %v5241_v19 = vsel %vm2258_vm6, %v21913_v23, %v5240_v47  ;;  %v5239_v7 = vsel %vm2260_vm7, %v5190_v49, %v5238_v13  ;;  %v5295_v49 = vrot.slane %v16723_v20, 1  ;;  %v5284_v1 = vsel %vm2323_vm8, %v5283_v63, 0.0 }
 0x24f   :  { %v5242_v34 = vsel %vm2260_vm7, %v5194_v53, %v5241_v19  ;;  %v5280_v29 = vsel %vm2323_vm8, %v5239_v7, 0.0  ;;  %v16783_v41 = vsel %vm2256_vm5, %v5278_v35, %v5277_v61  ;;  %v5287_v14 = vsel %vm2323_vm8, %v5286_v33, 0.0 }
 0x250   :  { %v5281_v58 = vrot.slane %v5242_v34, 7  ;;  %v5298_v54 = vrot.slane %v16731_v3, 1  ;;  %v5285_v5 = vsel %vm2256_vm5, %v16650_v46, %v5284_v1  ;;  %v5288_v21 = vsel %vm2256_vm5, %v16658_v45, %v5287_v14 }
 0x251   :  { %v5290_v59 = vsel %vm2323_vm8, %v5289_v39, 0.0  ;;  %v5293_v40 = vsel %vm2323_vm8, %v5292_v60, 0.0  ;;  %v5296_v8 = vsel %vm2323_vm8, %v5295_v49, 0.0  ;;  %v5301_v24 = vrot.slane %v5233_v18, 1 }
 0x252   :  { %v16789_v53 = vsel %vm2256_vm5, %v5281_v58, %v5280_v29  ;;  %v5291_v38 = vsel %vm2256_vm5, %v16682_v4, %v5290_v59  ;;  %v5294_v56 = vsel %vm2256_vm5, %v16690_v26, %v5293_v40  ;;  %v5299_v9 = vsel %vm2323_vm8, %v5298_v54, 0.0 }
 0x253   :  { %v5297_v32 = vsel %vm2256_vm5, %v16726_v25, %v5296_v8  ;;  %v5300_v28 = vsel %vm2256_vm5, %v16734_v27, %v5299_v9  ;;  %v5304_v0 = vrot.slane %v5239_v7, 1  ;;  %v5331_v2 = vrot.slane %v5233_v18, 2 }
 0x254   :  { %v5333_v12 = vrot.slane %v5236_v30, 1  ;;  %v5335_v43 = vrot.slane %v5239_v7, 2  ;;  %v5337_v52 = vrot.slane %v5242_v34, 1  ;;  %v5302_v31 = vsel %vm2323_vm8, %v5301_v24, 0.0 }
 0x255   :  { %v5305_v48 = vsel %vm2323_vm8, %v5304_v0, 0.0  ;;  %v5363_v36 = vrot.slane %v5233_v18, 3  ;;  %v5365_v47 = vrot.slane %v5236_v30, 2  ;;  %v5303_v17 = vsel %vm2256_vm5, %v5236_v30, %v5302_v31 }
 0x256   :  { %v5306_v13 = vsel %vm2256_vm5, %v5242_v34, %v5305_v48  ;;  %v5332_v23 = vsel %vm2323_vm8, %v5331_v2, 0.0  ;;  %v5336_v19 = vsel %vm2323_vm8, %v5335_v43, 0.0  ;;  %v5367_v58 = vrot.slane %v5239_v7, 3 }
 0x257   :  { %v5334_v61 = vsel %vm2256_vm5, %v5333_v12, %v5332_v23  ;;  %v5338_v35 = vsel %vm2256_vm5, %v5337_v52, %v5336_v19  ;;  %v5364_v29 = vsel %vm2323_vm8, %v5363_v36, 0.0  ;;  %v5369_v33 = vrot.slane %v5242_v34, 2 }
 0x258   :  { %v5366_v63 = vsel %vm2256_vm5, %v5365_v47, %v5364_v29  ;;  %v5368_v18 = vsel %vm2323_vm8, %v5367_v58, 0.0  ;;  %v5412_v39 = vrot.slane %v5288_v21, 1  ;;  %v5413_v30 = vrot.slane %v5291_v38, 1 }
 0x259   :  { %v5370_v60 = vsel %vm2256_vm5, %v5369_v33, %v5368_v18  ;;  %v5414_v49 = vrot.slane %v5294_v56, 1  ;;  %v5415_v1 = vrot.slane %v5297_v32, 1  ;;  %v5411_v14 = vrot.slane %v5285_v5, 1 }
 0x25a   :  { %v5416_v54 = vrot.slane %v5300_v28, 1  ;;  %v5417_v59 = vrot.slane %v5303_v17, 1  ;;  %v5476_v40 = vmax.f32 %v5288_v21, %v5412_v39  ;;  %v5477_v8 = vmax.f32 %v5291_v38, %v5413_v30 }
 0x25b   :  { %v5478_v9 = vmax.f32 %v5294_v56, %v5414_v49  ;;  %v5409_v7 = vrot.slane %v16783_v41, 1  ;;  %v5479_v24 = vmax.f32 %v5297_v32, %v5415_v1  ;;  %v5475_v0 = vmax.f32 %v5285_v5, %v5411_v14  ;;  %v21963_v14 = vld [vmem:[#allocation45_spill] sm:$0xff] }
 0x25c   :  { %v5480_v34 = vmax.f32 %v5300_v28, %v5416_v54  ;;  %v5545_v2 = vrot.slane %v5476_v40, 7  ;;  %v5547_v12 = vrot.slane %v5477_v8, 6  ;;  %v5410_v43 = vrot.slane %v16789_v53, 1  ;;  %v21924_v8 = vld [vmem:[#allocation18_spill] sm:$0xff] }
 0x25d   :  { %v5418_v52 = vrot.slane %v5306_v13, 1  ;;  %v5481_v31 = vmax.f32 %v5303_v17, %v5417_v59  ;;  %v5425_v48 = vrot.slane %v5334_v61, 1  ;;  %v5426_v36 = vrot.slane %v5338_v35, 1  ;;  %v21922_v59 = vld [vmem:[#allocation6_spill] sm:$0xff] }
 0x25e   :  { %v5546_v47 = vsel %vm2256_vm5, %v5545_v2, %v5475_v0  ;;  %v5549_v21 = vrot.slane %v5478_v9, 5  ;;  %v5433_v38 = vrot.slane %v5366_v63, 1  ;;  %v5551_v23 = vrot.slane %v5479_v24, 4  ;;  %v21926_v0 = vld [vmem:[#allocation7_spill] sm:$0xff] }
 0x25f   :  { %v5548_v56 = vsel %vm2258_vm6, %v5547_v12, %v5546_v47  ;;  %v5434_v32 = vrot.slane %v5370_v60, 1  ;;  %v16827_v5 = vmax.f32 %v16783_v41, %v5409_v7  ;;  %v5553_v19 = vrot.slane %v5480_v34, 3  ;;  %v21925_v7 = vld [vmem:[#allocation5_spill] sm:$0xff] }
 0x260   :  { %v5550_v28 = vsel %vm2260_vm7, %v5549_v21, %v5548_v56  ;;  %v16831_v29 = vmax.f32 %v16789_v53, %v5410_v43  ;;  %v16833_v17 = vmax.f32 %v5306_v13, %v5418_v52  ;;  %v5555_v33 = vrot.slane %v5481_v31, 2  ;;  %v21927_v12 = vld [vmem:[#allocation17_spill] sm:$0xff]  ;;  %v21928_v52 = vld [vmem:[#allocation19_spill] sm:$0xff]  ;;  %v21930_v21 = vld [vmem:[#allocation28_spill] sm:$0xff] }
 0x261   :  { %21914 = vst [vmem:[#allocation66_spill] sm:$0xff] %v16827_v5  ;;  %v5552_v58 = vsel %vm2603_vm9, %v5551_v23, %v5550_v28  ;;  %v16836_v18 = vmax.f32 %v5334_v61, %v5425_v48  ;;  %v16838_v39 = vmax.f32 %v5338_v35, %v5426_v36  ;;  %v16844_v49 = vmax.f32 %v5366_v63, %v5433_v38  ;;  %v21923_v63 = vld [vmem:[#allocation16_spill] sm:$0xff]  ;;  %v21929_v48 = vld [vmem:[#allocation38_spill] sm:$0xff]  ;;  %v21931_v56 = vld [vmem:[#allocation29_spill] sm:$0xff] }
 0x262   :  { %21915 = vst [vmem:[#allocation67_spill] sm:$0xff] %v16831_v29  ;;  %21916 = vst [vmem:[#allocation68_spill] sm:$0xff] %v16833_v17  ;;  %v5554_v30 = vsel %vm2606_vm10, %v5553_v19, %v5552_v58  ;;  %v16846_v1 = vmax.f32 %v5370_v60, %v5434_v32  ;;  %v1692_v54 = vmul.f32 %v16387_v15, %v15919_v55  ;;  %v21932_v23 = vld [vmem:[#allocation43_spill] sm:$0xff]  ;;  %v21933_v28 = vld [vmem:[#allocation8_spill] sm:$0xff] }
 0x263   :  { %21917 = vst [vmem:[#allocation69_spill] sm:$0xff] %v16836_v18  ;;  %21918 = vst [vmem:[#allocation70_spill] sm:$0xff] %v16838_v39  ;;  %v16842_v41 = vsel %vm2609_vm11, %v5555_v33, %v5554_v30  ;;  %v1693_v40 = vmul.f32 %v16387_v15, %v21922_v59  ;;  %v1694_v60 = vmul.f32 %v16387_v15, %v21923_v63  ;;  %v21935_v58 = vld [vmem:[#allocation10_spill] sm:$0xff]  ;;  %v21959_v35 = vld [vmem:[#allocation33_spill] sm:$0xff] }
 0x264   :  { %21919 = vst [vmem:[#allocation71_spill] sm:$0xff] %v16842_v41  ;;  %21920 = vst [vmem:[#allocation72_spill] sm:$0xff] %v16844_v49  ;;  %v1695_v9 = vmul.f32 %v16387_v15, %v21924_v8  ;;  %v1696_v24 = vmul.f32 %v16387_v15, %v21925_v7  ;;  %v1697_v34 = vmul.f32 %v16387_v15, %v21926_v0  ;;  %v21939_v59 = vld [vmem:[#allocation22_spill] sm:$0xff]  ;;  %v21941_v8 = vld [vmem:[#allocation9_spill] sm:$0xff] }
 0x265   :  { %21921 = vst [vmem:[#allocation73_spill] sm:$0xff] %v16846_v1  ;;  %v1698_v2 = vmul.f32 %v16387_v15, %v16084_v50  ;;  %v1699_v55 = vmul.f32 %v16387_v15, %v16093_v6  ;;  %v1700_v43 = vmul.f32 %v16387_v15, %v21927_v12  ;;  %v1701_v31 = vmul.f32 %v16387_v15, %v21928_v52  ;;  %v21945_v12 = vld [vmem:[#allocation30_spill] sm:$0xff]  ;;  %v21961_v61 = vld [vmem:[#allocation44_spill] sm:$0xff]  ;;  %v21973_v1 = vld [vmem:[#allocation13_spill] sm:$0xff] }
 0x266   :  { %v1702_v36 = vmul.f32 %v16387_v15, %v21929_v48  ;;  %v1703_v47 = vmul.f32 %v16387_v15, %v16146_v10  ;;  %v1704_v38 = vmul.f32 %v16387_v15, %v21930_v21  ;;  %v1705_v50 = vmul.f32 %v16387_v15, %v21931_v56  ;;  %v21937_v10 = vld [vmem:[#allocation20_spill] sm:$0xff]  ;;  %v21949_v56 = vld [vmem:[#allocation21_spill] sm:$0xff]  ;;  %v21967_v53 = vld [vmem:[#allocation14_spill] sm:$0xff] }
 0x267   :  { %v1706_v6 = vmul.f32 %v16387_v15, %v21932_v23  ;;  %v1707_v32 = vmul.f32 %v16387_v15, %v16236_v51  ;;  %v16887_v19 = vmul.f32 %v16387_v15, %v21933_v28  ;;  %v16891_v33 = vmul.f32 %v16387_v15, %v21935_v58  ;;  %v21943_v51 = vld [vmem:[#allocation11_spill] sm:$0xff]  ;;  %v21947_v48 = vld [vmem:[#allocation32_spill] sm:$0xff]  ;;  %v21971_v18 = vld [vmem:[#allocation26_spill] sm:$0xff] }
 0x268   :  { %v16895_v30 = vmul.f32 %v16387_v15, %v21937_v10  ;;  %v16899_v63 = vmul.f32 %v16387_v15, %v21939_v59  ;;  %v16903_v7 = vmul.f32 %v16387_v15, %v21941_v8  ;;  %v16907_v0 = vmul.f32 %v16387_v15, %v21943_v51  ;;  %v21951_v28 = vld [vmem:[#allocation23_spill] sm:$0xff]  ;;  %v21955_v8 = vld [vmem:[#allocation40_spill] sm:$0xff]  ;;  %v21977_v41 = vld [vmem:[#allocation34_spill] sm:$0xff] }
 0x269   :  { %21934 = vst [vmem:[#allocation6_spill] sm:$0xff] %v16887_v19  ;;  %21936 = vst [vmem:[#allocation16_spill] sm:$0xff] %v16891_v33  ;;  %v16911_v52 = vmul.f32 %v16387_v15, %v21945_v12  ;;  %v16915_v21 = vmul.f32 %v16387_v15, %v21947_v48  ;;  %v16919_v23 = vmul.f32 %v16387_v15, %v21949_v56  ;;  %v21953_v10 = vld [vmem:[#allocation39_spill] sm:$0xff]  ;;  %v21965_v13 = vld [vmem:[#allocation12_spill] sm:$0xff] }
 0x26a   :  { %21938 = vst [vmem:[#allocation18_spill] sm:$0xff] %v16895_v30  ;;  %21940 = vst [vmem:[#allocation5_spill] sm:$0xff] %v16899_v63  ;;  %v16923_v58 = vmul.f32 %v16387_v15, %v21951_v28  ;;  %v16927_v59 = vmul.f32 %v16387_v15, %v21953_v10  ;;  %v16931_v51 = vmul.f32 %v16387_v15, %v21955_v8  ;;  %v21957_v12 = vld [vmem:[#allocation31_spill] sm:$0xff]  ;;  %v21969_v39 = vld [vmem:[#allocation24_spill] sm:$0xff] }
 0x26b   :  { %21942 = vst [vmem:[#allocation7_spill] sm:$0xff] %v16903_v7  ;;  %21944 = vst [vmem:[#allocation17_spill] sm:$0xff] %v16907_v0  ;;  %v16935_v48 = vmul.f32 %v16387_v15, %v21957_v12  ;;  %v16939_v56 = vmul.f32 %v16387_v15, %v21959_v35  ;;  %v16943_v28 = vmul.f32 %v16387_v15, %v21961_v61  ;;  %v21975_v17 = vld [vmem:[#allocation15_spill] sm:$0xff]  ;;  %v21979_v49 = vld [vmem:[#allocation36_spill] sm:$0xff] }
 0x26c   :  { %21946 = vst [vmem:[#allocation19_spill] sm:$0xff] %v16911_v52  ;;  %21948 = vst [vmem:[#allocation38_spill] sm:$0xff] %v16915_v21  ;;  %v16947_v10 = vmul.f32 %v16387_v15, %v21963_v14  ;;  %v16951_v8 = vmul.f32 %v16387_v15, %v21965_v13  ;;  %v16955_v12 = vmul.f32 %v16387_v15, %v21967_v53  ;;  %v21981_v29 = vld [vmem:[#allocation25_spill] sm:$0xff]  ;;  %v21983_v5 = vld [vmem:[#allocation27_spill] sm:$0xff] }
 0x26d   :  { %21950 = vst [vmem:[#allocation28_spill] sm:$0xff] %v16919_v23  ;;  %21952 = vst [vmem:[#allocation29_spill] sm:$0xff] %v16923_v58  ;;  %v16959_v35 = vmul.f32 %v16387_v15, %v21969_v39  ;;  %v16963_v61 = vmul.f32 %v16387_v15, %v21971_v18  ;;  %v16967_v14 = vmul.f32 %v16387_v15, %v21973_v1 }
 0x26e   :  { %21954 = vst [vmem:[#allocation43_spill] sm:$0xff] %v16927_v59  ;;  %21956 = vst [vmem:[#allocation8_spill] sm:$0xff] %v16931_v51  ;;  %v16971_v13 = vmul.f32 %v16387_v15, %v21975_v17  ;;  %v16975_v53 = vmul.f32 %v16387_v15, %v21977_v41  ;;  %v16979_v39 = vmul.f32 %v16387_v15, %v21979_v49 }
 0x26f   :  { %21958 = vst [vmem:[#allocation10_spill] sm:$0xff] %v16935_v48  ;;  %21960 = vst [vmem:[#allocation20_spill] sm:$0xff] %v16939_v56  ;;  %v16983_v18 = vmul.f32 %v16387_v15, %v21981_v29  ;;  %v16987_v1 = vmul.f32 %v16387_v15, %v21983_v5 }
 0x270   :  { %21962 = vst [vmem:[#allocation22_spill] sm:$0xff] %v16943_v28  ;;  %21964 = vst [vmem:[#allocation9_spill] sm:$0xff] %v16947_v10 }
 0x271   :  { %21966 = vst [vmem:[#allocation11_spill] sm:$0xff] %v16951_v8  ;;  %21968 = vst [vmem:[#allocation30_spill] sm:$0xff] %v16955_v12 }
 0x272   :  { %21970 = vst [vmem:[#allocation32_spill] sm:$0xff] %v16959_v35  ;;  %21972 = vst [vmem:[#allocation21_spill] sm:$0xff] %v16963_v61 }
 0x273   :  { %21974 = vst [vmem:[#allocation23_spill] sm:$0xff] %v16967_v14  ;;  %21976 = vst [vmem:[#allocation39_spill] sm:$0xff] %v16971_v13  ;;  %v21985_v14 = vld [vmem:[#allocation41_spill] sm:$0xff]  ;;  %v21987_v13 = vld [vmem:[#allocation42_spill] sm:$0xff] }
 0x274   :  { %21978 = vst [vmem:[#allocation40_spill] sm:$0xff] %v16975_v53  ;;  %21980 = vst [vmem:[#allocation31_spill] sm:$0xff] %v16979_v39  ;;  %v16991_v17 = vmul.f32 %v16387_v15, %v21985_v14  ;;  %v16995_v41 = vmul.f32 %v16387_v15, %v21987_v13  ;;  %v21989_v53 = vld [vmem:[#allocation35_spill] sm:$0xff]  ;;  %v21991_v39 = vld [vmem:[#allocation37_spill] sm:$0xff]  ;;  %v17015_v13 = vsel %vm2323_vm8, %v16647_v22, 0.0 }
 0x275   :  { %21982 = vst [vmem:[#allocation33_spill] sm:$0xff] %v16983_v18  ;;  %21984 = vst [vmem:[#allocation44_spill] sm:$0xff] %v16987_v1  ;;  %v16999_v49 = vmul.f32 %v16387_v15, %v21989_v53  ;;  %v17003_v29 = vmul.f32 %v16387_v15, %v21991_v39  ;;  %v21993_v18 = vld [vmem:[#allocation46_spill] sm:$0xff]  ;;  %v21995_v1 = vld [vmem:[#allocation47_spill] sm:$0xff]  ;;  %v17020_v53 = vsel %vm2323_vm8, %v16655_v11, 0.0  ;;  %v17040_v39 = vsel %vm2323_vm8, %v16731_v3, 0.0 }
 0x276   :  { %21986 = vst [vmem:[#allocation45_spill] sm:$0xff] %v16991_v17  ;;  %21988 = vst [vmem:[#allocation12_spill] sm:$0xff] %v16995_v41  ;;  %v17007_v5 = vmul.f32 %v16387_v15, %v21993_v18  ;;  %v17011_v14 = vmul.f32 %v16387_v15, %v21995_v1  ;;  %v17025_v18 = vsel %vm2323_vm8, %v16679_v44, 0.0  ;;  %v17030_v15 = vsel %vm2323_vm8, %v16687_v42, 0.0 }
 0x277   :  { %21990 = vst [vmem:[#allocation14_spill] sm:$0xff] %v16999_v49  ;;  %21992 = vst [vmem:[#allocation24_spill] sm:$0xff] %v17003_v29  ;;  %v17035_v41 = vsel %vm2323_vm8, %v16723_v20, 0.0 }
 0x278   :  { %21994 = vst [vmem:[#allocation26_spill] sm:$0xff] %v17007_v5  ;;  %21996 = vst [vmem:[#allocation13_spill] sm:$0xff] %v17011_v14 }
 0x279   :  { %21997 = vst [vmem:[#allocation15_spill] sm:$0xff] %v17015_v13  ;;  %21998 = vst [vmem:[#allocation34_spill] sm:$0xff] %v17020_v53  ;;  %v22003_v13 = vld [vmem:[#allocation53_spill] sm:$0xff] }
 0x27a   :  { %21999 = vst [vmem:[#allocation36_spill] sm:$0xff] %v17025_v18  ;;  %22000 = vst [vmem:[#allocation25_spill] sm:$0xff] %v17030_v15  ;;  %v1712_v14 = vadd.f32 %v22003_v13, %v1692_v54  ;;  %v1713_v15 = vadd.f32 %v22003_v13, %v1693_v40  ;;  %v1714_v1 = vadd.f32 %v22003_v13, %v1694_v60 }
 0x27b   :  { %22001 = vst [vmem:[#allocation27_spill] sm:$0xff] %v17035_v41  ;;  %22002 = vst [vmem:[#allocation41_spill] sm:$0xff] %v17040_v39  ;;  %v1715_v29 = vadd.f32 %v22003_v13, %v1695_v9  ;;  %v1716_v41 = vadd.f32 %v22003_v13, %v1696_v24  ;;  %v1717_v53 = vadd.f32 %v22003_v13, %v1697_v34 }
 0x27c   :  { %v1718_v49 = vadd.f32 %v22003_v13, %v1698_v2  ;;  %v1719_v39 = vadd.f32 %v22003_v13, %v1699_v55  ;;  %v1720_v18 = vadd.f32 %v22003_v13, %v1700_v43  ;;  %v1721_v5 = vadd.f32 %v22003_v13, %v1701_v31 }
 0x27d   :  { %v1722_v54 = vadd.f32 %v22003_v13, %v1702_v36  ;;  %v1723_v40 = vadd.f32 %v22003_v13, %v1703_v47  ;;  %v1724_v60 = vadd.f32 %v22003_v13, %v1704_v38  ;;  %v1725_v9 = vadd.f32 %v22003_v13, %v1705_v50 }
 0x27e   :  { %v1726_v24 = vadd.f32 %v22003_v13, %v1706_v6  ;;  %v1727_v34 = vadd.f32 %v22003_v13, %v1707_v32  ;;  %v1728_v17 = vmax.f32 %v1712_v14, 0.0  ;;  %v1729_v2 = vmax.f32 %v1713_v15, 0.0  ;;  %v22004_v15 = vld [vmem:[#allocation49_spill] sm:$0xff] }
 0x27f   :  { %v1730_v61 = vmax.f32 %v1714_v1, 0.0  ;;  %v1731_v55 = vmax.f32 %v1715_v29, 0.0  ;;  %v1732_v35 = vmax.f32 %v1716_v41, 0.0  ;;  %v1733_v43 = vmax.f32 %v1717_v53, 0.0 }
 0x280   :  { %v1734_v12 = vmax.f32 %v1718_v49, 0.0  ;;  %v1735_v31 = vmax.f32 %v1719_v39, 0.0  ;;  %v1736_v8 = vmax.f32 %v1720_v18, 0.0  ;;  %v1737_v36 = vmax.f32 %v1721_v5, 0.0 }
 0x281   :  { %v1738_v10 = vmax.f32 %v1722_v54, 0.0  ;;  %v1739_v47 = vmax.f32 %v1723_v40, 0.0  ;;  %v1740_v28 = vmax.f32 %v1724_v60, 0.0  ;;  %v1741_v38 = vmax.f32 %v1725_v9, 0.0 }
 0x282   :  { %v1742_v56 = vmax.f32 %v1726_v24, 0.0  ;;  %v1743_v50 = vmax.f32 %v1727_v34, 0.0  ;;  %v1760_v48 = vcombine.low %v1728_v17, %v1729_v2  ;;  %v1761_v6 = vcombine.high %v1728_v17, %v1729_v2 }
 0x283   :  { %v1762_v51 = vcombine.low %v1730_v61, %v1731_v55  ;;  %v1763_v32 = vcombine.high %v1730_v61, %v1731_v55  ;;  %v1796_v14 = vcombine.low %v1732_v35, %v1733_v43  ;;  %v1797_v29 = vcombine.high %v1732_v35, %v1733_v43 }
 0x284   :  { %v1770_v1 = vrot.slane %v1760_v48, %v22004_v15  ;;  %v1798_v41 = vcombine.low %v1734_v12, %v1735_v31  ;;  %v1799_v53 = vcombine.high %v1734_v12, %v1735_v31  ;;  %v1777_v49 = vrot.slane %v1761_v6, %v22004_v15 }
 0x285   :  { %v1784_v5 = vrot.slane %v1762_v51, %v22004_v15  ;;  %v1791_v39 = vrot.slane %v1763_v32, %v22004_v15  ;;  %v1806_v18 = vrot.slane %v1796_v14, %v22004_v15  ;;  %v1813_v54 = vrot.slane %v1797_v29, %v22004_v15 }
 0x286   :  { %v1820_v17 = vrot.slane %v1798_v41, %v22004_v15  ;;  %v1827_v61 = vrot.slane %v1799_v53, %v22004_v15  ;;  %v1832_v40 = vcombine.low %v1736_v8, %v1737_v36  ;;  %v1833_v51 = vcombine.high %v1736_v8, %v1737_v36 }
 0x287   :  { %v1792_v60 = vcombine.low %v1770_v1, %v1784_v5  ;;  %v1793_v48 = vcombine.high %v1770_v1, %v1784_v5  ;;  %v1794_v35 = vcombine.low %v1777_v49, %v1791_v39  ;;  %v1795_v9 = vcombine.high %v1777_v49, %v1791_v39 }
 0x288   :  { %v1828_v12 = vcombine.low %v1806_v18, %v1820_v17  ;;  %v1829_v24 = vcombine.high %v1806_v18, %v1820_v17  ;;  %v1830_v34 = vcombine.low %v1813_v54, %v1827_v61  ;;  %v1831_v2 = vcombine.high %v1813_v54, %v1827_v61 }
 0x289   :  { %v1834_v55 = vcombine.low %v1738_v10, %v1739_v47  ;;  %v1835_v43 = vcombine.high %v1738_v10, %v1739_v47  ;;  %v1842_v31 = vrot.slane %v1832_v40, %v22004_v15  ;;  %v1868_v6 = vcombine.low %v1740_v28, %v1741_v38 }
 0x28a   :  { %v1869_v32 = vcombine.high %v1740_v28, %v1741_v38  ;;  %v1870_v14 = vcombine.low %v1742_v56, %v1743_v50  ;;  %v1871_v29 = vcombine.high %v1742_v56, %v1743_v50  ;;  %v1849_v41 = vrot.slane %v1833_v51, %v22004_v15 }
 0x28b   :  { %v1856_v53 = vrot.slane %v1834_v55, %v22004_v15  ;;  %v1863_v1 = vrot.slane %v1835_v43, %v22004_v15  ;;  %v11200_v49 = vrot.slane %v1792_v60, 9  ;;  %v1878_v5 = vrot.slane %v1868_v6, %v22004_v15 }
 0x28c   :  { %v1885_v39 = vrot.slane %v1869_v32, %v22004_v15  ;;  %v1892_v8 = vrot.slane %v1870_v14, %v22004_v15  ;;  %v1899_v10 = vrot.slane %v1871_v29, %v22004_v15  ;;  %v11201_v17 = vrot.slane %v1828_v12, 9 }
 0x28d   :  { %v1864_v36 = vcombine.low %v1842_v31, %v1856_v53  ;;  %v1865_v47 = vcombine.high %v1842_v31, %v1856_v53  ;;  %v1866_v28 = vcombine.low %v1849_v41, %v1863_v1  ;;  %v1867_v38 = vcombine.high %v1849_v41, %v1863_v1 }
 0x28e   :  { %v1900_v56 = vcombine.low %v1878_v5, %v1892_v8  ;;  %v1901_v50 = vcombine.high %v1878_v5, %v1892_v8  ;;  %v1902_v18 = vcombine.low %v1885_v39, %v1899_v10  ;;  %v1903_v54 = vcombine.high %v1885_v39, %v1899_v10 }
 0x28f   :  { %v11202_v61 = vrot.slane %v1864_v36, 9  ;;  %v11204_v40 = vrot.slane %v1793_v48, 9  ;;  %v11205_v51 = vrot.slane %v1829_v24, 9  ;;  %v11206_v43 = vrot.slane %v1865_v47, 9 }
 0x290   :  { %v11203_v55 = vrot.slane %v1900_v56, 9  ;;  %v11207_v6 = vrot.slane %v1901_v50, 9  ;;  %v11208_v32 = vrot.slane %v1794_v35, 9  ;;  %v11209_v59 = vrot.slane %v1830_v34, 9 }
 0x291   :  { %v11210_v14 = vrot.slane %v1866_v28, 9  ;;  %v11211_v58 = vrot.slane %v1902_v18, 9  ;;  %v11212_v29 = vrot.slane %v1795_v9, 9  ;;  %v11213_v15 = vrot.slane %v1831_v2, 9 }
 0x292   :  { %v11214_v31 = vrot.slane %v1867_v38, 9  ;;  %v11215_v53 = vrot.slane %v1903_v54, 9  ;;  %v17076_v41 = vmax.f32 %v1792_v60, %v11200_v49  ;;  %v17078_v1 = vmax.f32 %v1828_v12, %v11201_v17 }
 0x293   :  { %v17080_v5 = vmax.f32 %v1864_v36, %v11202_v61  ;;  %v17082_v39 = vmax.f32 %v1900_v56, %v11203_v55  ;;  %v17084_v8 = vmax.f32 %v1793_v48, %v11204_v40  ;;  %v17086_v10 = vmax.f32 %v1829_v24, %v11205_v51 }
 0x294   :  { %v17088_v23 = vmax.f32 %v1865_v47, %v11206_v43  ;;  %v17090_v21 = vmax.f32 %v1901_v50, %v11207_v6  ;;  %v17092_v52 = vmax.f32 %v1794_v35, %v11208_v32  ;;  %v17094_v0 = vmax.f32 %v1830_v34, %v11209_v59 }
 0x295   :  { %v17096_v60 = vmax.f32 %v1866_v28, %v11210_v14  ;;  %v17098_v12 = vmax.f32 %v1902_v18, %v11211_v58  ;;  %v17100_v49 = vmax.f32 %v1795_v9, %v11212_v29  ;;  %v17102_v36 = vmax.f32 %v1831_v2, %v11213_v15 }
 0x296   :  { %v17104_v48 = vmax.f32 %v1867_v38, %v11214_v31  ;;  %v17106_v24 = vmax.f32 %v1903_v54, %v11215_v53  ;;  %v2067_v40 = vrot.slane %v17084_v8, %v16381_v62  ;;  %v2071_v51 = vrot.slane %v17084_v8, %v16393_v37 }
 0x297   :  { %v2075_v55 = vrot.slane %v17084_v8, %v16396_v57  ;;  %v2079_v43 = vrot.slane %v17084_v8, %v16399_v16  ;;  %v2083_v6 = vrot.slane %v17086_v10, %v16381_v62  ;;  %v2087_v32 = vrot.slane %v17086_v10, %v16393_v37 }
 0x298   :  { %v2091_v14 = vrot.slane %v17086_v10, %v16396_v57  ;;  %v2095_v29 = vrot.slane %v17086_v10, %v16399_v16  ;;  %v2131_v50 = vrot.slane %v17092_v52, %v16381_v62  ;;  %v2135_v8 = vrot.slane %v17092_v52, %v16393_v37 }
 0x299   :  { %v2139_v61 = vrot.slane %v17092_v52, %v16396_v57  ;;  %v2143_v17 = vrot.slane %v17092_v52, %v16399_v16  ;;  %v2147_v54 = vrot.slane %v17094_v0, %v16381_v62  ;;  %v2151_v10 = vrot.slane %v17094_v0, %v16393_v37 }
 0x29a   :  { %v2155_v18 = vrot.slane %v17094_v0, %v16396_v57  ;;  %v2159_v56 = vrot.slane %v17094_v0, %v16399_v16  ;;  %v2163_v53 = vrot.slane %v17096_v60, %v16381_v62  ;;  %v2167_v38 = vrot.slane %v17096_v60, %v16393_v37 }
 0x29b   :  { %v2171_v52 = vrot.slane %v17096_v60, %v16396_v57  ;;  %v2175_v31 = vrot.slane %v17096_v60, %v16399_v16  ;;  %v2179_v28 = vrot.slane %v17098_v12, %v16381_v62  ;;  %v2183_v2 = vrot.slane %v17098_v12, %v16393_v37 }
 0x29c   :  { %v2187_v0 = vrot.slane %v17098_v12, %v16396_v57  ;;  %v2191_v34 = vrot.slane %v17098_v12, %v16399_v16  ;;  %v2195_v9 = vrot.slane %v17100_v49, %v16381_v62  ;;  %v2199_v15 = vrot.slane %v17100_v49, %v16393_v37 }
 0x29d   :  { %v2203_v60 = vrot.slane %v17100_v49, %v16396_v57  ;;  %v2207_v58 = vrot.slane %v17100_v49, %v16399_v16  ;;  %v2211_v59 = vrot.slane %v17102_v36, %v16381_v62  ;;  %v2215_v35 = vrot.slane %v17102_v36, %v16393_v37 }
 0x29e   :  { %v2219_v12 = vrot.slane %v17102_v36, %v16396_v57  ;;  %v2223_v47 = vrot.slane %v17102_v36, %v16399_v16  ;;  %v2227_v7 = vrot.slane %v17104_v48, %v16381_v62  ;;  %v2231_v63 = vrot.slane %v17104_v48, %v16393_v37 }
 0x29f   :  { %v2235_v49 = vrot.slane %v17104_v48, %v16396_v57  ;;  %v2239_v30 = vrot.slane %v17104_v48, %v16399_v16  ;;  %v2243_v33 = vrot.slane %v17106_v24, %v16381_v62  ;;  %v2247_v19 = vrot.slane %v17106_v24, %v16393_v37 }
 0x2a0   :  { %v2251_v36 = vrot.slane %v17106_v24, %v16396_v57  ;;  %v2255_v13 = vrot.slane %v17106_v24, %v16399_v16  ;;  %v22005_v22 = vrot.slane %v17076_v41, %v16381_v62  ;;  %v22006_v48 = vrot.slane %v17076_v41, %v16393_v37 }
 0x2a1   :  { %v22007_v20 = vrot.slane %v17076_v41, %v16396_v57  ;;  %v22008_v24 = vrot.slane %v17076_v41, %v16399_v16  ;;  %v22009_v41 = vrot.slane %v17078_v1, %v16381_v62 }
 0x2a2   :  { %v2257_v27 = vsel %vm2256_vm5, %v2067_v40, %v22005_v22  ;;  %v2262_v25 = vsel %vm2256_vm5, %v2071_v51, %v22006_v48 }
 0x2a3   :  { %v2259_v3 = vsel %vm2258_vm6, %v2131_v50, %v2257_v27  ;;  %v2265_v26 = vsel %vm2256_vm5, %v2075_v55, %v22007_v20  ;;  %v2268_v42 = vsel %vm2256_vm5, %v2079_v43, %v22008_v24  ;;  %v2263_v22 = vsel %vm2258_vm6, %v2135_v8, %v2262_v25 }
 0x2a4   :  { %v17254_v4 = vsel %vm2260_vm7, %v2195_v9, %v2259_v3  ;;  %v2266_v27 = vsel %vm2258_vm6, %v2139_v61, %v2265_v26  ;;  %v2269_v50 = vsel %vm2258_vm6, %v2143_v17, %v2268_v42  ;;  %v17260_v40 = vsel %vm2260_vm7, %v2199_v15, %v2263_v22 }
 0x2a5   :  { %v17263_v51 = vsel %vm2260_vm7, %v2203_v60, %v2266_v27  ;;  %v17266_v20 = vsel %vm2260_vm7, %v2207_v58, %v2269_v50  ;;  %v2271_v3 = vsel %vm2256_vm5, %v2083_v6, %v22009_v41  ;;  %v22010_v26 = vrot.slane %v17078_v1, %v16393_v37 }
 0x2a6   :  { %v2272_v25 = vsel %vm2258_vm6, %v2147_v54, %v2271_v3  ;;  %v22011_v15 = vrot.slane %v17078_v1, %v16396_v57  ;;  %v22012_v58 = vrot.slane %v17078_v1, %v16399_v16  ;;  %v22013_v1 = vrot.slane %v17080_v5, %v16381_v62 }
 0x2a7   :  { %v2274_v42 = vsel %vm2256_vm5, %v2087_v32, %v22010_v26  ;;  %v17286_v61 = vsel %vm2260_vm7, %v2211_v59, %v2272_v25  ;;  %v22014_v59 = vrot.slane %v17088_v23, %v16381_v62  ;;  %v22026_v25 = vrot.slane %v17090_v21, %v16396_v57 }
 0x2a8   :  { %v2277_v9 = vsel %vm2256_vm5, %v2091_v14, %v22011_v15  ;;  %v2280_v17 = vsel %vm2256_vm5, %v2095_v29, %v22012_v58  ;;  %v2275_v54 = vsel %vm2258_vm6, %v2151_v10, %v2274_v42  ;;  %v22018_v10 = vrot.slane %v17088_v23, %v16396_v57 }
 0x2a9   :  { %v2278_v55 = vsel %vm2258_vm6, %v2155_v18, %v2277_v9  ;;  %v2281_v43 = vsel %vm2258_vm6, %v2159_v56, %v2280_v17  ;;  %v17292_v6 = vsel %vm2260_vm7, %v2215_v35, %v2275_v54  ;;  %v2283_v29 = vsel %vm2256_vm5, %v22014_v59, %v22013_v1 }
 0x2aa   :  { %v17295_v32 = vsel %vm2260_vm7, %v2219_v12, %v2278_v55  ;;  %v17298_v14 = vsel %vm2260_vm7, %v2223_v47, %v2281_v43  ;;  %v2284_v18 = vsel %vm2258_vm6, %v2163_v53, %v2283_v29  ;;  %v22015_v35 = vrot.slane %v17080_v5, %v16393_v37 }
 0x2ab   :  { %v22016_v56 = vrot.slane %v17088_v23, %v16393_v37  ;;  %v22017_v47 = vrot.slane %v17080_v5, %v16396_v57  ;;  %v22019_v12 = vrot.slane %v17080_v5, %v16399_v16  ;;  %v22020_v53 = vrot.slane %v17088_v23, %v16399_v16 }
 0x2ac   :  { %v17330_v24 = vsel %vm2260_vm7, %v2227_v7, %v2284_v18  ;;  %v22021_v23 = vrot.slane %v17082_v39, %v16381_v62  ;;  %v22022_v7 = vrot.slane %v17090_v21, %v16381_v62  ;;  %v22027_v42 = vrot.slane %v17082_v39, %v16399_v16 }
 0x2ad   :  { %v2286_v8 = vsel %vm2256_vm5, %v22016_v56, %v22015_v35  ;;  %v2289_v60 = vsel %vm2256_vm5, %v22018_v10, %v22017_v47  ;;  %v2292_v48 = vsel %vm2256_vm5, %v22020_v53, %v22019_v12  ;;  %v2336_v1 = vsel %vm2323_vm8, %v17330_v24, 0.0 }
 0x2ae   :  { %v2287_v22 = vsel %vm2258_vm6, %v2167_v38, %v2286_v8  ;;  %v2290_v27 = vsel %vm2258_vm6, %v2171_v52, %v2289_v60  ;;  %v2293_v50 = vsel %vm2258_vm6, %v2175_v31, %v2292_v48  ;;  %v2295_v38 = vsel %vm2256_vm5, %v22022_v7, %v22021_v23 }
 0x2af   :  { %v17336_v41 = vsel %vm2260_vm7, %v2231_v63, %v2287_v22  ;;  %v17339_v3 = vsel %vm2260_vm7, %v2235_v49, %v2290_v27  ;;  %v17342_v5 = vsel %vm2260_vm7, %v2239_v30, %v2293_v50  ;;  %v2296_v52 = vsel %vm2258_vm6, %v2179_v28, %v2295_v38 }
 0x2b0   :  { %v22023_v63 = vrot.slane %v17082_v39, %v16393_v37  ;;  %v22024_v31 = vrot.slane %v17090_v21, %v16393_v37  ;;  %v22025_v30 = vrot.slane %v17082_v39, %v16396_v57  ;;  %v22028_v28 = vrot.slane %v17090_v21, %v16399_v16 }
 0x2b1   :  { %v17374_v9 = vsel %vm2260_vm7, %v2243_v33, %v2296_v52  ;;  %v2324_v21 = vsel %vm2323_vm8, %v17254_v4, 0.0  ;;  %v2325_v33 = vrot.slane %v17260_v40, 7  ;;  %v2337_v18 = vrot.slane %v17336_v41, 7 }
 0x2b2   :  { %v2298_v49 = vsel %vm2256_vm5, %v22024_v31, %v22023_v63  ;;  %v2301_v26 = vsel %vm2256_vm5, %v22026_v25, %v22025_v30  ;;  %v2304_v15 = vsel %vm2256_vm5, %v22028_v28, %v22027_v42  ;;  %v2339_v35 = vsel %vm2323_vm8, %v17339_v3, 0.0 }
 0x2b3   :  { %v2299_v58 = vsel %vm2258_vm6, %v2183_v2, %v2298_v49  ;;  %v2302_v17 = vsel %vm2258_vm6, %v2187_v0, %v2301_v26  ;;  %v2305_v54 = vsel %vm2258_vm6, %v2191_v34, %v2304_v15  ;;  %v2327_v2 = vsel %vm2323_vm8, %v17263_v51, 0.0 }
 0x2b4   :  { %v17380_v55 = vsel %vm2260_vm7, %v2247_v19, %v2299_v58  ;;  %v17383_v43 = vsel %vm2260_vm7, %v2251_v36, %v2302_v17  ;;  %v17386_v39 = vsel %vm2260_vm7, %v2255_v13, %v2305_v54  ;;  %v2328_v0 = vrot.slane %v17266_v20, 7 }
 0x2b5   :  { %v2330_v19 = vsel %vm2323_vm8, %v17286_v61, 0.0  ;;  %v2331_v34 = vrot.slane %v17292_v6, 7  ;;  %v2333_v36 = vsel %vm2323_vm8, %v17295_v32, 0.0  ;;  %v2334_v13 = vrot.slane %v17298_v14, 7 }
 0x2b6   :  { %v17403_v59 = vsel %vm2256_vm5, %v2325_v33, %v2324_v21  ;;  %v17406_v29 = vsel %vm2256_vm5, %v2328_v0, %v2327_v2  ;;  %v2340_v47 = vrot.slane %v17342_v5, 7  ;;  %v2342_v10 = vsel %vm2323_vm8, %v17374_v9, 0.0 }
 0x2b7   :  { %v17412_v56 = vsel %vm2256_vm5, %v2331_v34, %v2330_v19  ;;  %v17415_v8 = vsel %vm2256_vm5, %v2334_v13, %v2333_v36  ;;  %v17421_v60 = vsel %vm2256_vm5, %v2337_v18, %v2336_v1  ;;  %v2343_v12 = vrot.slane %v17380_v55, 7 }
 0x2b8   :  { %v2345_v53 = vsel %vm2323_vm8, %v17383_v43, 0.0  ;;  %v2346_v48 = vrot.slane %v17386_v39, 7  ;;  %v17428_v22 = vsel %vm2256_vm5, %v2340_v47, %v2339_v35  ;;  %v2348_v27 = vrot.slane %v17254_v4, 1 }
 0x2b9   :  { %v2351_v50 = vrot.slane %v17263_v51, 1  ;;  %v2354_v23 = vrot.slane %v17286_v61, 1  ;;  %v17434_v7 = vsel %vm2256_vm5, %v2343_v12, %v2342_v10  ;;  %v2357_v52 = vrot.slane %v17295_v32, 1 }
 0x2ba   :  { %v17437_v38 = vsel %vm2256_vm5, %v2346_v48, %v2345_v53  ;;  %v2360_v63 = vrot.slane %v17330_v24, 1  ;;  %v2349_v31 = vsel %vm2323_vm8, %v2348_v27, 0.0  ;;  %v2363_v25 = vrot.slane %v17339_v3, 1 }
 0x2bb   :  { %v2352_v49 = vsel %vm2323_vm8, %v2351_v50, 0.0  ;;  %v2355_v30 = vsel %vm2323_vm8, %v2354_v23, 0.0  ;;  %v17447_v26 = vsel %vm2256_vm5, %v17260_v40, %v2349_v31  ;;  %v2358_v15 = vsel %vm2323_vm8, %v2357_v52, 0.0 }
 0x2bc   :  { %v17451_v42 = vsel %vm2256_vm5, %v17266_v20, %v2352_v49  ;;  %v17455_v28 = vsel %vm2256_vm5, %v17292_v6, %v2355_v30  ;;  %v17460_v58 = vsel %vm2256_vm5, %v17298_v14, %v2358_v15  ;;  %v2361_v17 = vsel %vm2323_vm8, %v2360_v63, 0.0 }
 0x2bd   :  { %v2364_v54 = vsel %vm2323_vm8, %v2363_v25, 0.0  ;;  %v2366_v21 = vrot.slane %v17374_v9, 1  ;;  %v17467_v33 = vsel %vm2256_vm5, %v17336_v41, %v2361_v17  ;;  %v2369_v0 = vrot.slane %v17383_v43, 1 }
 0x2be   :  { %v17471_v2 = vsel %vm2256_vm5, %v17342_v5, %v2364_v54  ;;  %v2372_v19 = vrot.slane %v17254_v4, 2  ;;  %v2374_v36 = vrot.slane %v17260_v40, 1  ;;  %v2376_v13 = vrot.slane %v17263_v51, 2 }
 0x2bf   :  { %v2367_v34 = vsel %vm2323_vm8, %v2366_v21, 0.0  ;;  %v2378_v1 = vrot.slane %v17266_v20, 1  ;;  %v2370_v35 = vsel %vm2323_vm8, %v2369_v0, 0.0  ;;  %v2380_v10 = vrot.slane %v17286_v61, 2 }
 0x2c0   :  { %v17481_v18 = vsel %vm2256_vm5, %v17380_v55, %v2367_v34  ;;  %v2373_v47 = vsel %vm2323_vm8, %v2372_v19, 0.0  ;;  %v17488_v12 = vsel %vm2256_vm5, %v17386_v39, %v2370_v35  ;;  %v2377_v48 = vsel %vm2323_vm8, %v2376_v13, 0.0 }
 0x2c1   :  { %v17491_v53 = vsel %vm2256_vm5, %v2374_v36, %v2373_v47  ;;  %v2382_v27 = vrot.slane %v17292_v6, 1  ;;  %v17496_v50 = vsel %vm2256_vm5, %v2378_v1, %v2377_v48  ;;  %v2381_v23 = vsel %vm2323_vm8, %v2380_v10, 0.0 }
 0x2c2   :  { %v2384_v52 = vrot.slane %v17295_v32, 2  ;;  %v2386_v63 = vrot.slane %v17298_v14, 1  ;;  %v2388_v49 = vrot.slane %v17330_v24, 2  ;;  %v2390_v30 = vrot.slane %v17336_v41, 1 }
 0x2c3   :  { %v17502_v31 = vsel %vm2256_vm5, %v2382_v27, %v2381_v23  ;;  %v2392_v25 = vrot.slane %v17339_v3, 2  ;;  %v2394_v17 = vrot.slane %v17342_v5, 1  ;;  %v2396_v54 = vrot.slane %v17374_v9, 2 }
 0x2c4   :  { %v2385_v15 = vsel %vm2323_vm8, %v2384_v52, 0.0  ;;  %v2398_v21 = vrot.slane %v17380_v55, 1  ;;  %v2389_v19 = vsel %vm2323_vm8, %v2388_v49, 0.0  ;;  %v2400_v36 = vrot.slane %v17383_v43, 2 }
 0x2c5   :  { %v17512_v0 = vsel %vm2256_vm5, %v2386_v63, %v2385_v15  ;;  %v2393_v34 = vsel %vm2323_vm8, %v2392_v25, 0.0  ;;  %v17518_v13 = vsel %vm2256_vm5, %v2390_v30, %v2389_v19  ;;  %v2397_v35 = vsel %vm2323_vm8, %v2396_v54, 0.0 }
 0x2c6   :  { %v17521_v1 = vsel %vm2256_vm5, %v2394_v17, %v2393_v34  ;;  %v2402_v47 = vrot.slane %v17386_v39, 1  ;;  %v17526_v10 = vsel %vm2256_vm5, %v2398_v21, %v2397_v35  ;;  %v2401_v48 = vsel %vm2323_vm8, %v2400_v36, 0.0 }
 0x2c7   :  { %v2404_v27 = vrot.slane %v17254_v4, 3  ;;  %v2406_v23 = vrot.slane %v17260_v40, 2  ;;  %v2408_v63 = vrot.slane %v17263_v51, 3  ;;  %v2410_v49 = vrot.slane %v17266_v20, 2 }
 0x2c8   :  { %v17532_v52 = vsel %vm2256_vm5, %v2402_v47, %v2401_v48  ;;  %v2412_v30 = vrot.slane %v17286_v61, 3  ;;  %v2414_v15 = vrot.slane %v17292_v6, 2  ;;  %v2416_v17 = vrot.slane %v17295_v32, 3 }
 0x2c9   :  { %v2405_v25 = vsel %vm2323_vm8, %v2404_v27, 0.0  ;;  %v2418_v54 = vrot.slane %v17298_v14, 2  ;;  %v2409_v40 = vsel %vm2323_vm8, %v2408_v63, 0.0  ;;  %v2420_v51 = vrot.slane %v17330_v24, 3 }
 0x2ca   :  { %v17542_v4 = vsel %vm2256_vm5, %v2406_v23, %v2405_v25  ;;  %v2413_v21 = vsel %vm2323_vm8, %v2412_v30, 0.0  ;;  %v17548_v20 = vsel %vm2256_vm5, %v2410_v49, %v2409_v40  ;;  %v2417_v6 = vsel %vm2323_vm8, %v2416_v17, 0.0 }
 0x2cb   :  { %v17551_v61 = vsel %vm2256_vm5, %v2414_v15, %v2413_v21  ;;  %v2422_v32 = vrot.slane %v17336_v41, 2  ;;  %v17556_v14 = vsel %vm2256_vm5, %v2418_v54, %v2417_v6  ;;  %v2421_v19 = vsel %vm2323_vm8, %v2420_v51, 0.0 }
 0x2cc   :  { %v2424_v34 = vrot.slane %v17339_v3, 3  ;;  %v2426_v36 = vrot.slane %v17342_v5, 2  ;;  %v2428_v35 = vrot.slane %v17374_v9, 3  ;;  %v2430_v47 = vrot.slane %v17380_v55, 2 }
 0x2cd   :  { %v17562_v24 = vsel %vm2256_vm5, %v2422_v32, %v2421_v19  ;;  %v2432_v48 = vrot.slane %v17383_v43, 3  ;;  %v2434_v63 = vrot.slane %v17386_v39, 2  ;;  %v2468_v51 = vrot.slane %v17403_v59, 1 }
 0x2ce   :  { %v2425_v23 = vsel %vm2323_vm8, %v2424_v34, 0.0  ;;  %v2429_v49 = vsel %vm2323_vm8, %v2428_v35, 0.0  ;;  %v2469_v32 = vrot.slane %v17406_v29, 1  ;;  %v2470_v34 = vrot.slane %v17412_v56, 1 }
 0x2cf   :  { %v17573_v5 = vsel %vm2256_vm5, %v2426_v36, %v2425_v23  ;;  %v2433_v9 = vsel %vm2323_vm8, %v2432_v48, 0.0  ;;  %v17580_v25 = vsel %vm2256_vm5, %v2430_v47, %v2429_v49  ;;  %v2471_v35 = vrot.slane %v17415_v8, 1 }
 0x2d0   :  { %22029 = vst [vmem:[#allocation42_spill] sm:$0xff] %v17573_v5  ;;  %22031 = vst [vmem:[#allocation35_spill] sm:$0xff] %v17580_v25  ;;  %v17583_v15 = vsel %vm2256_vm5, %v2434_v63, %v2433_v9  ;;  %v2472_v23 = vrot.slane %v17421_v60, 1  ;;  %v2473_v47 = vrot.slane %v17428_v22, 1  ;;  %v2474_v49 = vrot.slane %v17434_v7, 1 }
 0x2d1   :  { %22032 = vst [vmem:[#allocation37_spill] sm:$0xff] %v17583_v15  ;;  %v2475_v63 = vrot.slane %v17437_v38, 1  ;;  %v2476_v9 = vrot.slane %v17447_v26, 1  ;;  %v2477_v40 = vrot.slane %v17451_v42, 1  ;;  %v2478_v17 = vrot.slane %v17455_v28, 1 }
 0x2d2   :  { %v2479_v30 = vrot.slane %v17460_v58, 1  ;;  %v2480_v3 = vrot.slane %v17467_v33, 1  ;;  %v2481_v55 = vrot.slane %v17471_v2, 1  ;;  %v2482_v27 = vrot.slane %v17481_v18, 1 }
 0x2d3   :  { %v2484_v41 = vrot.slane %v17491_v53, 1  ;;  %v2485_v44 = vrot.slane %v17496_v50, 1  ;;  %v2486_v11 = vrot.slane %v17502_v31, 1  ;;  %v2487_v48 = vrot.slane %v17512_v0, 1 }
 0x2d4   :  { %v2488_v43 = vrot.slane %v17518_v13, 1  ;;  %v2493_v46 = vrot.slane %v17548_v20, 1  ;;  %v2494_v36 = vrot.slane %v17551_v61, 1  ;;  %v2495_v19 = vrot.slane %v17556_v14, 1 }
 0x2d5   :  { %v2496_v6 = vrot.slane %v17562_v24, 1  ;;  %v2532_v21 = vmax.f32 %v17403_v59, %v2468_v51  ;;  %v2533_v54 = vmax.f32 %v17406_v29, %v2469_v32  ;;  %v2534_v39 = vmax.f32 %v17412_v56, %v2470_v34 }
 0x2d6   :  { %v2535_v15 = vmax.f32 %v17415_v8, %v2471_v35  ;;  %v2536_v25 = vmax.f32 %v17421_v60, %v2472_v23  ;;  %v2537_v45 = vmax.f32 %v17428_v22, %v2473_v47  ;;  %v2538_v5 = vmax.f32 %v17434_v7, %v2474_v49 }
 0x2d7   :  { %v2539_v16 = vmax.f32 %v17437_v38, %v2475_v63  ;;  %v2540_v57 = vmax.f32 %v17447_v26, %v2476_v9  ;;  %v2541_v37 = vmax.f32 %v17451_v42, %v2477_v40  ;;  %v2542_v59 = vmax.f32 %v17455_v28, %v2478_v17 }
 0x2d8   :  { %v2543_v29 = vmax.f32 %v17460_v58, %v2479_v30  ;;  %v2544_v56 = vmax.f32 %v17467_v33, %v2480_v3  ;;  %v2545_v8 = vmax.f32 %v17471_v2, %v2481_v55  ;;  %v2546_v60 = vmax.f32 %v17481_v18, %v2482_v27 }
 0x2d9   :  { %v2548_v22 = vmax.f32 %v17491_v53, %v2484_v41  ;;  %v2549_v7 = vmax.f32 %v17496_v50, %v2485_v44  ;;  %v2550_v38 = vmax.f32 %v17502_v31, %v2486_v11  ;;  %v2551_v26 = vmax.f32 %v17512_v0, %v2487_v48 }
 0x2da   :  { %v2552_v42 = vmax.f32 %v17518_v13, %v2488_v43  ;;  %v2557_v28 = vmax.f32 %v17548_v20, %v2493_v46  ;;  %v2558_v58 = vmax.f32 %v17551_v61, %v2494_v36  ;;  %v2596_v30 = vrot.slane %v2533_v54, 7 }
 0x2db   :  { %v2559_v33 = vmax.f32 %v17556_v14, %v2495_v19  ;;  %v2560_v2 = vmax.f32 %v17562_v24, %v2496_v6  ;;  %v2598_v18 = vrot.slane %v2534_v39, 6  ;;  %v2600_v27 = vrot.slane %v2535_v15, 5 }
 0x2dc   :  { %v2597_v53 = vsel %vm2256_vm5, %v2596_v30, %v2532_v21  ;;  %v2602_v44 = vrot.slane %v2536_v25, 4  ;;  %v2605_v50 = vrot.slane %v2537_v45, 3  ;;  %v2614_v11 = vrot.slane %v2541_v37, 7  ;;  %v22049_v30 = vld [vmem:[#allocation17_spill] sm:$0xff] }
 0x2dd   :  { %v2599_v31 = vsel %vm2258_vm6, %v2598_v18, %v2597_v53  ;;  %v2608_v0 = vrot.slane %v2538_v5, 2  ;;  %v2611_v13 = vrot.slane %v2539_v16, 1  ;;  %v2616_v41 = vrot.slane %v2542_v59, 6  ;;  %v22050_v18 = vld [vmem:[#allocation19_spill] sm:$0xff]  ;;  %v22051_v53 = vld [vmem:[#allocation38_spill] sm:$0xff] }
 0x2de   :  { %v2601_v46 = vsel %vm2260_vm7, %v2600_v27, %v2599_v31  ;;  %v2615_v20 = vsel %vm2256_vm5, %v2614_v11, %v2540_v57  ;;  %v2618_v61 = vrot.slane %v2543_v29, 5  ;;  %v2620_v14 = vrot.slane %v2544_v56, 4  ;;  %v22043_v29 = vld [vmem:[#allocation53_spill] sm:$0xff]  ;;  %v22044_v56 = vld [vmem:[#allocation6_spill] sm:$0xff] }
 0x2df   :  { %v2604_v24 = vsel %vm2603_vm9, %v2602_v44, %v2601_v46  ;;  %v2617_v3 = vsel %vm2258_vm6, %v2616_v41, %v2615_v20  ;;  %v2622_v55 = vrot.slane %v2545_v8, 3  ;;  %v2628_v43 = vrot.slane %v2549_v7, 7  ;;  %v22055_v41 = vld [vmem:[#allocation43_spill] sm:$0xff]  ;;  %v22056_v20 = vld [vmem:[#allocation8_spill] sm:$0xff] }
 0x2e0   :  { %v2607_v45 = vsel %vm2606_vm10, %v2605_v50, %v2604_v24  ;;  %v2619_v37 = vsel %vm2260_vm7, %v2618_v61, %v2617_v3  ;;  %v2624_v25 = vrot.slane %v2546_v60, 2  ;;  %v2630_v5 = vrot.slane %v2550_v38, 6  ;;  %v22045_v60 = vld [vmem:[#allocation16_spill] sm:$0xff] }
 0x2e1   :  { %v2610_v16 = vsel %vm2609_vm11, %v2608_v0, %v2607_v45  ;;  %v2621_v15 = vsel %vm2603_vm9, %v2620_v14, %v2619_v37  ;;  %v2629_v57 = vsel %vm2256_vm5, %v2628_v43, %v2548_v22  ;;  %v2632_v39 = vrot.slane %v2551_v26, 5  ;;  %v22047_v26 = vld [vmem:[#allocation5_spill] sm:$0xff]  ;;  %v22052_v50 = vld [vmem:[#allocation28_spill] sm:$0xff]  ;;  %v22057_v14 = vld [vmem:[#allocation10_spill] sm:$0xff] }
 0x2e2   :  { %v2613_v17 = vsel %vm2612_vm12, %v2611_v13, %v2610_v16  ;;  %v2623_v54 = vsel %vm2606_vm10, %v2622_v55, %v2621_v15  ;;  %v2631_v40 = vsel %vm2258_vm6, %v2630_v5, %v2629_v57  ;;  %v2634_v21 = vrot.slane %v2552_v42, 4  ;;  %v22054_v0 = vld [vmem:[#allocation29_spill] sm:$0xff]  ;;  %v22058_v3 = vld [vmem:[#allocation20_spill] sm:$0xff]  ;;  %v22059_v43 = vld [vmem:[#allocation22_spill] sm:$0xff] }
 0x2e3   :  { %v17663_v32 = vsel %vm2609_vm11, %v2624_v25, %v2623_v54  ;;  %v2633_v19 = vsel %vm2260_vm7, %v2632_v39, %v2631_v40  ;;  %2661 = vst [vmem:[#allocation4 + $0x11] sm:$0xff] %v2613_v17  ;;  %12800 = vmatprep.mubr.f32.mxu0 %v2613_v17  ;;  %v22041_v34 = vrot.slane %v17542_v4, 1  ;;  %v2642_v48 = vrot.slane %v2557_v28, 7  ;;  %v22048_v28 = vld [vmem:[#allocation7_spill] sm:$0xff]  ;;  %v22060_v37 = vld [vmem:[#allocation9_spill] sm:$0xff] }
 0x2e4   :  { %22040 = vst [vmem:[#allocation46_spill] sm:$0xff] %v17663_v32  ;;  %v17670_v35 = vsel %vm2603_vm9, %v2634_v21, %v2633_v19  ;;  %v2644_v23 = vrot.slane %v2558_v58, 6  ;;  %v2646_v63 = vrot.slane %v2559_v33, 5  ;;  %v2648_v9 = vrot.slane %v2560_v2, 4 }
 0x2e5   :  { %v2556_v36 = vmax.f32 %v17542_v4, %v22041_v34  ;;  %22042 = vst [vmem:[#allocation47_spill] sm:$0xff] %v17670_v35  ;;  %v2697_v8 = vadd.f32 %v22044_v56, %v22043_v29  ;;  %v2698_v22 = vadd.f32 %v22045_v60, %v22043_v29  ;;  %v22046_v4 = vld [vmem:[#allocation18_spill] sm:$0xff]  ;;  %v2700_v42 = vadd.f32 %v22047_v26, %v22043_v29  ;;  %v22061_v26 = vld [vmem:[#allocation49_spill] sm:$0xff] }
 0x2e6   :  { %v2699_v7 = vadd.f32 %v22046_v4, %v22043_v29  ;;  %v2701_v58 = vadd.f32 %v22048_v28, %v22043_v29  ;;  %v2702_v33 = vadd.f32 %v22049_v30, %v22043_v29  ;;  %v2703_v27 = vadd.f32 %v22050_v18, %v22043_v29 }
 0x2e7   :  { %v2643_v59 = vsel %vm2256_vm5, %v2642_v48, %v2556_v36  ;;  %v2704_v44 = vadd.f32 %v22051_v53, %v22043_v29  ;;  %v2705_v11 = vadd.f32 %v22052_v50, %v22043_v29  ;;  %v2706_v13 = vadd.f32 %v22054_v0, %v22043_v29 }
 0x2e8   :  { %v2645_v38 = vsel %vm2258_vm6, %v2644_v23, %v2643_v59  ;;  %v2707_v46 = vadd.f32 %v22055_v41, %v22043_v29  ;;  %v2708_v61 = vadd.f32 %v22056_v20, %v22043_v29  ;;  %v2709_v24 = vadd.f32 %v22057_v14, %v22043_v29 }
 0x2e9   :  { %v2647_v2 = vsel %vm2260_vm7, %v2646_v63, %v2645_v38  ;;  %v2710_v55 = vadd.f32 %v22058_v3, %v22043_v29  ;;  %v2711_v45 = vadd.f32 %v22059_v43, %v22043_v29  ;;  %v2712_v25 = vadd.f32 %v22060_v37, %v22043_v29 }
 0x2ea   :  { %v17696_v31 = vsel %vm2603_vm9, %v2648_v9, %v2647_v2  ;;  %v2713_v5 = vmax.f32 %v2697_v8, 0.0  ;;  %v2714_v16 = vmax.f32 %v2698_v22, 0.0  ;;  %v2715_v15 = vmax.f32 %v2699_v7, 0.0 }
 0x2eb   :  { %22053 = vst [vmem:[#allocation6_spill] sm:$0xff] %v17696_v31  ;;  %v2716_v57 = vmax.f32 %v2700_v42, 0.0  ;;  %v2717_v39 = vmax.f32 %v2701_v58, 0.0  ;;  %v2718_v17 = vmax.f32 %v2702_v33, 0.0  ;;  %v2719_v54 = vmax.f32 %v2703_v27, 0.0 }
 0x2ec   :  { %v2720_v40 = vmax.f32 %v2704_v44, 0.0  ;;  %v2721_v21 = vmax.f32 %v2705_v11, 0.0  ;;  %v2722_v19 = vmax.f32 %v2706_v13, 0.0  ;;  %v2723_v34 = vmax.f32 %v2707_v46, 0.0 }
 0x2ed   :  { %v2724_v36 = vmax.f32 %v2708_v61, 0.0  ;;  %v2725_v48 = vmax.f32 %v2709_v24, 0.0  ;;  %v2726_v23 = vmax.f32 %v2710_v55, 0.0  ;;  %v2727_v63 = vmax.f32 %v2711_v45, 0.0 }
 0x2ee   :  { %v2728_v9 = vmax.f32 %v2712_v25, 0.0  ;;  %v2745_v59 = vcombine.low %v2713_v5, %v2714_v16  ;;  %v2746_v56 = vcombine.high %v2713_v5, %v2714_v16  ;;  %v2747_v60 = vcombine.low %v2715_v15, %v2716_v57 }
 0x2ef   :  { %v2748_v4 = vcombine.high %v2715_v15, %v2716_v57  ;;  %v2781_v8 = vcombine.low %v2717_v39, %v2718_v17  ;;  %v2782_v22 = vcombine.high %v2717_v39, %v2718_v17  ;;  %v2783_v7 = vcombine.low %v2719_v54, %v2720_v40 }
 0x2f0   :  { %v2784_v38 = vcombine.high %v2719_v54, %v2720_v40  ;;  %v2755_v42 = vrot.slane %v2745_v59, %v22061_v26  ;;  %v2762_v28 = vrot.slane %v2746_v56, %v22061_v26  ;;  %v2769_v58 = vrot.slane %v2747_v60, %v22061_v26 }
 0x2f1   :  { %v2776_v30 = vrot.slane %v2748_v4, %v22061_v26  ;;  %v2791_v33 = vrot.slane %v2781_v8, %v22061_v26  ;;  %v2798_v2 = vrot.slane %v2782_v22, %v22061_v26  ;;  %v2805_v18 = vrot.slane %v2783_v7, %v22061_v26 }
 0x2f2   :  { %v2812_v27 = vrot.slane %v2784_v38, %v22061_v26  ;;  %v2777_v53 = vcombine.low %v2755_v42, %v2769_v58  ;;  %v2778_v44 = vcombine.high %v2755_v42, %v2769_v58  ;;  %v2817_v20 = vcombine.low %v2721_v21, %v2722_v19 }
 0x2f3   :  { %v2779_v50 = vcombine.low %v2762_v28, %v2776_v30  ;;  %v2780_v11 = vcombine.high %v2762_v28, %v2776_v30  ;;  %v2813_v0 = vcombine.low %v2791_v33, %v2805_v18  ;;  %v2814_v13 = vcombine.high %v2791_v33, %v2805_v18 }
 0x2f4   :  { %v2815_v41 = vcombine.low %v2798_v2, %v2812_v27  ;;  %v2816_v46 = vcombine.high %v2798_v2, %v2812_v27  ;;  %v2818_v61 = vcombine.high %v2721_v21, %v2722_v19  ;;  %v2819_v14 = vcombine.low %v2723_v34, %v2724_v36 }
 0x2f5   :  { %v2820_v24 = vcombine.high %v2723_v34, %v2724_v36  ;;  %v2853_v3 = vcombine.low %v2725_v48, %v2726_v23  ;;  %v2854_v55 = vcombine.high %v2725_v48, %v2726_v23  ;;  %v2855_v43 = vcombine.low %v2727_v63, %v2728_v9 }
 0x2f6   :  { %v2856_v45 = vcombine.high %v2727_v63, %v2728_v9  ;;  %v2827_v37 = vrot.slane %v2817_v20, %v22061_v26  ;;  %v2834_v25 = vrot.slane %v2818_v61, %v22061_v26  ;;  %v2841_v5 = vrot.slane %v2819_v14, %v22061_v26 }
 0x2f7   :  { %v2848_v16 = vrot.slane %v2820_v24, %v22061_v26  ;;  %v2863_v15 = vrot.slane %v2853_v3, %v22061_v26  ;;  %v2870_v57 = vrot.slane %v2854_v55, %v22061_v26  ;;  %v2877_v39 = vrot.slane %v2855_v43, %v22061_v26 }
 0x2f8   :  { %v2884_v17 = vrot.slane %v2856_v45, %v22061_v26  ;;  %v2849_v54 = vcombine.low %v2827_v37, %v2841_v5  ;;  %v2850_v40 = vcombine.high %v2827_v37, %v2841_v5  ;;  %v11216_v63 = vrot.slane %v2777_v53, 9 }
 0x2f9   :  { %v2851_v21 = vcombine.low %v2834_v25, %v2848_v16  ;;  %v2852_v19 = vcombine.high %v2834_v25, %v2848_v16  ;;  %v2885_v34 = vcombine.low %v2863_v15, %v2877_v39  ;;  %v2886_v36 = vcombine.high %v2863_v15, %v2877_v39  ;;  %v22062_v16 = vld [vmem:[#allocation50_spill] sm:$0xff] }
 0x2fa   :  { %v2887_v48 = vcombine.low %v2870_v57, %v2884_v17  ;;  %v2888_v23 = vcombine.high %v2870_v57, %v2884_v17  ;;  %v11217_v9 = vrot.slane %v2813_v0, 9  ;;  %v11218_v59 = vrot.slane %v2849_v54, 9  ;;  %v22064_v57 = vld [vmem:[#allocation52_spill] sm:$0xff] }
 0x2fb   :  { %v11220_v56 = vrot.slane %v2778_v44, 9  ;;  %v11219_v60 = vrot.slane %v2885_v34, 9  ;;  %v11221_v4 = vrot.slane %v2814_v13, 9  ;;  %v11222_v8 = vrot.slane %v2850_v40, 9 }
 0x2fc   :  { %v11223_v22 = vrot.slane %v2886_v36, 9  ;;  %v11224_v7 = vrot.slane %v2779_v50, 9  ;;  %v11225_v38 = vrot.slane %v2815_v41, 9  ;;  %v11226_v42 = vrot.slane %v2851_v21, 9 }
 0x2fd   :  { %v11227_v28 = vrot.slane %v2887_v48, 9  ;;  %v11228_v58 = vrot.slane %v2780_v11, 9  ;;  %v11229_v30 = vrot.slane %v2816_v46, 9  ;;  %v11230_v33 = vrot.slane %v2852_v19, 9 }
 0x2fe   :  { %v11231_v2 = vrot.slane %v2888_v23, 9  ;;  %v17728_v18 = vmax.f32 %v2777_v53, %v11216_v63  ;;  %v17730_v27 = vmax.f32 %v2813_v0, %v11217_v9  ;;  %v17732_v20 = vmax.f32 %v2849_v54, %v11218_v59 }
 0x2ff   :  { %v17734_v61 = vmax.f32 %v2885_v34, %v11219_v60  ;;  %v17736_v14 = vmax.f32 %v2778_v44, %v11220_v56  ;;  %v17738_v24 = vmax.f32 %v2814_v13, %v11221_v4  ;;  %v17740_v3 = vmax.f32 %v2850_v40, %v11222_v8 }
 0x300   :  { %v17742_v55 = vmax.f32 %v2886_v36, %v11223_v22  ;;  %v17744_v43 = vmax.f32 %v2779_v50, %v11224_v7  ;;  %v17746_v45 = vmax.f32 %v2815_v41, %v11225_v38  ;;  %v17748_v53 = vmax.f32 %v2851_v21, %v11226_v42  ;;  %v22063_v41 = vld [vmem:[#allocation51_spill] sm:$0xff] }
 0x301   :  { %v17750_v0 = vmax.f32 %v2887_v48, %v11227_v28  ;;  %v17752_v37 = vmax.f32 %v2780_v11, %v11228_v58  ;;  %v17754_v25 = vmax.f32 %v2816_v46, %v11229_v30  ;;  %v17756_v44 = vmax.f32 %v2852_v19, %v11230_v33 }
 0x302   :  { %v17758_v13 = vmax.f32 %v2888_v23, %v11231_v2  ;;  %v2988_v5 = vrot.slane %v17728_v18, %v16381_v62  ;;  %v2992_v50 = vrot.slane %v17728_v18, %v22062_v16  ;;  %v3052_v9 = vrot.slane %v17736_v14, %v16381_v62 }
 0x303   :  { %v3056_v59 = vrot.slane %v17736_v14, %v22062_v16  ;;  %v3060_v56 = vrot.slane %v17736_v14, %v22063_v41  ;;  %v3064_v60 = vrot.slane %v17736_v14, %v22064_v57  ;;  %v3068_v4 = vrot.slane %v17738_v24, %v16381_v62 }
 0x304   :  { %v3072_v8 = vrot.slane %v17738_v24, %v22062_v16  ;;  %v3076_v22 = vrot.slane %v17738_v24, %v22063_v41  ;;  %v3080_v7 = vrot.slane %v17738_v24, %v22064_v57  ;;  %v3116_v24 = vrot.slane %v17744_v43, %v16381_v62 }
 0x305   :  { %v3120_v49 = vrot.slane %v17744_v43, %v22062_v16  ;;  %v3124_v47 = vrot.slane %v17744_v43, %v22063_v41  ;;  %v3128_v6 = vrot.slane %v17744_v43, %v22064_v57  ;;  %v3132_v51 = vrot.slane %v17746_v45, %v16381_v62 }
 0x306   :  { %v3136_v63 = vrot.slane %v17746_v45, %v22062_v16  ;;  %v3140_v14 = vrot.slane %v17746_v45, %v22063_v41  ;;  %v3144_v2 = vrot.slane %v17746_v45, %v22064_v57  ;;  %v3148_v23 = vrot.slane %v17748_v53, %v16381_v62 }
 0x307   :  { %v3152_v33 = vrot.slane %v17748_v53, %v22062_v16  ;;  %v3156_v43 = vrot.slane %v17748_v53, %v22063_v41  ;;  %v3160_v48 = vrot.slane %v17748_v53, %v22064_v57  ;;  %v3164_v30 = vrot.slane %v17750_v0, %v16381_v62 }
 0x308   :  { %v3168_v36 = vrot.slane %v17750_v0, %v22062_v16  ;;  %v3172_v45 = vrot.slane %v17750_v0, %v22063_v41  ;;  %v3176_v58 = vrot.slane %v17750_v0, %v22064_v57  ;;  %v3180_v34 = vrot.slane %v17752_v37, %v16381_v62 }
 0x309   :  { %v3184_v28 = vrot.slane %v17752_v37, %v22062_v16  ;;  %v3188_v53 = vrot.slane %v17752_v37, %v22063_v41  ;;  %v3192_v19 = vrot.slane %v17752_v37, %v22064_v57  ;;  %v3196_v42 = vrot.slane %v17754_v25, %v16381_v62 }
 0x30a   :  { %v3200_v21 = vrot.slane %v17754_v25, %v22062_v16  ;;  %v3204_v0 = vrot.slane %v17754_v25, %v22063_v41  ;;  %v3208_v38 = vrot.slane %v17754_v25, %v22064_v57  ;;  %v3212_v40 = vrot.slane %v17756_v44, %v16381_v62 }
 0x30b   :  { %v3216_v54 = vrot.slane %v17756_v44, %v22062_v16  ;;  %v3220_v37 = vrot.slane %v17756_v44, %v22063_v41  ;;  %v3224_v17 = vrot.slane %v17756_v44, %v22064_v57  ;;  %v3228_v46 = vrot.slane %v17758_v13, %v16381_v62 }
 0x30c   :  { %v3232_v11 = vrot.slane %v17758_v13, %v22062_v16  ;;  %v3236_v25 = vrot.slane %v17758_v13, %v22063_v41  ;;  %v3240_v39 = vrot.slane %v17758_v13, %v22064_v57  ;;  %v3241_v15 = vsel %vm2256_vm5, %v3052_v9, %v2988_v5 }
 0x30d   :  { %v3244_v44 = vsel %vm2256_vm5, %v3056_v59, %v2992_v50  ;;  %v22065_v31 = vrot.slane %v17728_v18, %v22063_v41  ;;  %v22066_v32 = vrot.slane %v17728_v18, %v22064_v57  ;;  %v3242_v26 = vsel %vm2258_vm6, %v3116_v24, %v3241_v15 }
 0x30e   :  { %v3245_v29 = vsel %vm2258_vm6, %v3120_v49, %v3244_v44  ;;  %v17909_v50 = vsel %vm2260_vm7, %v3180_v34, %v3242_v26  ;;  %v22070_v26 = vrot.slane %v17730_v27, %v22064_v57  ;;  %v22077_v24 = vrot.slane %v17732_v20, %v22064_v57 }
 0x30f   :  { %v3247_v35 = vsel %vm2256_vm5, %v3060_v56, %v22065_v31  ;;  %v3250_v13 = vsel %vm2256_vm5, %v3064_v60, %v22066_v32  ;;  %v17912_v59 = vsel %vm2260_vm7, %v3184_v28, %v3245_v29  ;;  %v22067_v32 = vrot.slane %v17730_v27, %v16381_v62 }
 0x310   :  { %v3248_v5 = vsel %vm2258_vm6, %v3124_v47, %v3247_v35  ;;  %v3251_v9 = vsel %vm2258_vm6, %v3128_v6, %v3250_v13  ;;  %v22068_v6 = vrot.slane %v17730_v27, %v22062_v16  ;;  %v22069_v47 = vrot.slane %v17730_v27, %v22063_v41 }
 0x311   :  { %v17915_v31 = vsel %vm2260_vm7, %v3188_v53, %v3248_v5  ;;  %v17918_v18 = vsel %vm2260_vm7, %v3192_v19, %v3251_v9  ;;  %v3253_v49 = vsel %vm2256_vm5, %v3068_v4, %v22067_v32  ;;  %v3262_v15 = vsel %vm2256_vm5, %v3080_v7, %v22070_v26 }
 0x312   :  { %v3256_v35 = vsel %vm2256_vm5, %v3072_v8, %v22068_v6  ;;  %v3259_v29 = vsel %vm2256_vm5, %v3076_v22, %v22069_v47  ;;  %v3254_v19 = vsel %vm2258_vm6, %v3132_v51, %v3253_v49  ;;  %v3263_v60 = vsel %vm2258_vm6, %v3144_v2, %v3262_v15 }
 0x313   :  { %v3257_v34 = vsel %vm2258_vm6, %v3136_v63, %v3256_v35  ;;  %v3260_v56 = vsel %vm2258_vm6, %v3140_v14, %v3259_v29  ;;  %v17941_v4 = vsel %vm2260_vm7, %v3196_v42, %v3254_v19  ;;  %v17950_v27 = vsel %vm2260_vm7, %v3208_v38, %v3263_v60 }
 0x314   :  { %v17944_v8 = vsel %vm2260_vm7, %v3200_v21, %v3257_v34  ;;  %v17947_v22 = vsel %vm2260_vm7, %v3204_v0, %v3260_v56  ;;  %v22071_v51 = vrot.slane %v17732_v20, %v16381_v62  ;;  %v22072_v63 = vrot.slane %v17740_v3, %v16381_v62 }
 0x315   :  { %v22073_v42 = vrot.slane %v17732_v20, %v22062_v16  ;;  %v22074_v21 = vrot.slane %v17740_v3, %v22062_v16  ;;  %v22075_v38 = vrot.slane %v17732_v20, %v22063_v41  ;;  %v22076_v2 = vrot.slane %v17740_v3, %v22063_v41 }
 0x316   :  { %v3265_v7 = vsel %vm2256_vm5, %v22072_v63, %v22071_v51  ;;  %v22078_v53 = vrot.slane %v17740_v3, %v22064_v57  ;;  %v22085_v35 = vrot.slane %v17734_v61, %v22064_v57  ;;  %v22086_v47 = vrot.slane %v17742_v55, %v22064_v57 }
 0x317   :  { %v3268_v28 = vsel %vm2256_vm5, %v22074_v21, %v22073_v42  ;;  %v3271_v14 = vsel %vm2256_vm5, %v22076_v2, %v22075_v38  ;;  %v3266_v44 = vsel %vm2258_vm6, %v3148_v23, %v3265_v7  ;;  %v22079_v23 = vrot.slane %v17734_v61, %v16381_v62 }
 0x318   :  { %v3274_v0 = vsel %vm2256_vm5, %v22078_v53, %v22077_v24  ;;  %v3269_v13 = vsel %vm2258_vm6, %v3152_v33, %v3268_v28  ;;  %v3272_v5 = vsel %vm2258_vm6, %v3156_v43, %v3271_v14  ;;  %v17985_v32 = vsel %vm2260_vm7, %v3212_v40, %v3266_v44 }
 0x319   :  { %v3275_v9 = vsel %vm2258_vm6, %v3160_v48, %v3274_v0  ;;  %v17988_v49 = vsel %vm2260_vm7, %v3216_v54, %v3269_v13  ;;  %v17991_v20 = vsel %vm2260_vm7, %v3220_v37, %v3272_v5  ;;  %v22080_v33 = vrot.slane %v17742_v55, %v16381_v62 }
 0x31a   :  { %v17994_v3 = vsel %vm2260_vm7, %v3224_v17, %v3275_v9  ;;  %v22081_v40 = vrot.slane %v17734_v61, %v22062_v16  ;;  %v22082_v54 = vrot.slane %v17742_v55, %v22062_v16  ;;  %v22083_v17 = vrot.slane %v17734_v61, %v22063_v41 }
 0x31b   :  { %v3277_v48 = vsel %vm2256_vm5, %v22080_v33, %v22079_v23  ;;  %v22084_v37 = vrot.slane %v17742_v55, %v22063_v41  ;;  %v3286_v29 = vsel %vm2256_vm5, %v22086_v47, %v22085_v35  ;;  %v3317_v7 = vsel %vm2323_vm8, %v17985_v32, 0.0 }
 0x31c   :  { %v3280_v43 = vsel %vm2256_vm5, %v22082_v54, %v22081_v40  ;;  %v3278_v26 = vsel %vm2258_vm6, %v3164_v30, %v3277_v48  ;;  %v3287_v34 = vsel %vm2258_vm6, %v3176_v58, %v3286_v29  ;;  %v3305_v30 = vsel %vm2323_vm8, %v17909_v50, 0.0 }
 0x31d   :  { %v3283_v6 = vsel %vm2256_vm5, %v22084_v37, %v22083_v17  ;;  %v3281_v15 = vsel %vm2258_vm6, %v3168_v36, %v3280_v43  ;;  %v18029_v56 = vsel %vm2260_vm7, %v3228_v46, %v3278_v26  ;;  %v18038_v55 = vsel %vm2260_vm7, %v3240_v39, %v3287_v34 }
 0x31e   :  { %v3284_v19 = vsel %vm2258_vm6, %v3172_v45, %v3283_v6  ;;  %v18032_v60 = vsel %vm2260_vm7, %v3232_v11, %v3281_v15  ;;  %v3306_v36 = vrot.slane %v17912_v59, 7  ;;  %v3308_v58 = vsel %vm2323_vm8, %v17915_v31, 0.0 }
 0x31f   :  { %v18035_v61 = vsel %vm2260_vm7, %v3236_v25, %v3284_v19  ;;  %v3309_v46 = vrot.slane %v17918_v18, 7  ;;  %v3311_v11 = vsel %vm2323_vm8, %v17941_v4, 0.0  ;;  %v3312_v45 = vrot.slane %v17944_v8, 7 }
 0x320   :  { %v3314_v25 = vsel %vm2323_vm8, %v17947_v22, 0.0  ;;  %v3315_v39 = vrot.slane %v17950_v27, 7  ;;  %v18053_v51 = vsel %vm2256_vm5, %v3306_v36, %v3305_v30  ;;  %v3318_v42 = vrot.slane %v17988_v49, 7 }
 0x321   :  { %v18056_v63 = vsel %vm2256_vm5, %v3309_v46, %v3308_v58  ;;  %v18062_v21 = vsel %vm2256_vm5, %v3312_v45, %v3311_v11  ;;  %v3320_v38 = vsel %vm2323_vm8, %v17991_v20, 0.0  ;;  %v3321_v2 = vrot.slane %v17994_v3, 7 }
 0x322   :  { %v18065_v28 = vsel %vm2256_vm5, %v3315_v39, %v3314_v25  ;;  %v18071_v14 = vsel %vm2256_vm5, %v3318_v42, %v3317_v7  ;;  %v3323_v24 = vsel %vm2323_vm8, %v18029_v56, 0.0  ;;  %v3324_v53 = vrot.slane %v18032_v60, 7 }
 0x323   :  { %v3326_v0 = vsel %vm2323_vm8, %v18035_v61, 0.0  ;;  %v18079_v44 = vsel %vm2256_vm5, %v3321_v2, %v3320_v38  ;;  %v3327_v13 = vrot.slane %v18038_v55, 7  ;;  %v3329_v5 = vrot.slane %v17909_v50, 1 }
 0x324   :  { %v3332_v9 = vrot.slane %v17915_v31, 1  ;;  %v18085_v23 = vsel %vm2256_vm5, %v3324_v53, %v3323_v24  ;;  %v3335_v33 = vrot.slane %v17941_v4, 1  ;;  %v3338_v48 = vrot.slane %v17947_v22, 1 }
 0x325   :  { %22087 = vst [vmem:[#allocation16_spill] sm:$0xff] %v18085_v23  ;;  %v3341_v40 = vrot.slane %v17985_v32, 1  ;;  %v18091_v54 = vsel %vm2256_vm5, %v3327_v13, %v3326_v0  ;;  %v3330_v43 = vsel %vm2323_vm8, %v3329_v5, 0.0  ;;  %v3344_v37 = vrot.slane %v17991_v20, 1 }
 0x326   :  { %22088 = vst [vmem:[#allocation18_spill] sm:$0xff] %v18091_v54  ;;  %v3333_v17 = vsel %vm2323_vm8, %v3332_v9, 0.0  ;;  %v18098_v6 = vsel %vm2256_vm5, %v17912_v59, %v3330_v43  ;;  %v3336_v47 = vsel %vm2323_vm8, %v3335_v33, 0.0  ;;  %v3339_v29 = vsel %vm2323_vm8, %v3338_v48, 0.0 }
 0x327   :  { %v18102_v35 = vsel %vm2256_vm5, %v17918_v18, %v3333_v17  ;;  %v18108_v26 = vsel %vm2256_vm5, %v17944_v8, %v3336_v47  ;;  %v18112_v15 = vsel %vm2256_vm5, %v17950_v27, %v3339_v29  ;;  %v3342_v19 = vsel %vm2323_vm8, %v3341_v40, 0.0 }
 0x328   :  { %v3345_v34 = vsel %vm2323_vm8, %v3344_v37, 0.0  ;;  %v18118_v30 = vsel %vm2256_vm5, %v17988_v49, %v3342_v19  ;;  %v3347_v58 = vrot.slane %v18029_v56, 1  ;;  %v3350_v46 = vrot.slane %v18035_v61, 1 }
 0x329   :  { %v18122_v36 = vsel %vm2256_vm5, %v17994_v3, %v3345_v34  ;;  %v3353_v11 = vrot.slane %v17909_v50, 2  ;;  %v3355_v45 = vrot.slane %v17912_v59, 1  ;;  %v3357_v25 = vrot.slane %v17915_v31, 2 }
 0x32a   :  { %v3359_v39 = vrot.slane %v17918_v18, 1  ;;  %v3348_v7 = vsel %vm2323_vm8, %v3347_v58, 0.0  ;;  %v3351_v42 = vsel %vm2323_vm8, %v3350_v46, 0.0  ;;  %v3361_v38 = vrot.slane %v17941_v4, 2 }
 0x32b   :  { %v3363_v2 = vrot.slane %v17944_v8, 1  ;;  %v18136_v24 = vsel %vm2256_vm5, %v18032_v60, %v3348_v7  ;;  %v18140_v53 = vsel %vm2256_vm5, %v18038_v55, %v3351_v42  ;;  %v3354_v0 = vsel %vm2323_vm8, %v3353_v11, 0.0 }
 0x32c   :  { %22089 = vst [vmem:[#allocation5_spill] sm:$0xff] %v18140_v53  ;;  %v3358_v13 = vsel %vm2323_vm8, %v3357_v25, 0.0  ;;  %v18145_v5 = vsel %vm2256_vm5, %v3355_v45, %v3354_v0  ;;  %v3362_v33 = vsel %vm2323_vm8, %v3361_v38, 0.0  ;;  %v3365_v48 = vrot.slane %v17947_v22, 2 }
 0x32d   :  { %v18148_v9 = vsel %vm2256_vm5, %v3359_v39, %v3358_v13  ;;  %v18153_v40 = vsel %vm2256_vm5, %v3363_v2, %v3362_v33  ;;  %v3367_v43 = vrot.slane %v17950_v27, 1  ;;  %v3369_v17 = vrot.slane %v17985_v32, 2 }
 0x32e   :  { %v3371_v37 = vrot.slane %v17988_v49, 1  ;;  %v3366_v47 = vsel %vm2323_vm8, %v3365_v48, 0.0  ;;  %v3373_v29 = vrot.slane %v17991_v20, 2  ;;  %v3375_v19 = vrot.slane %v17994_v3, 1 }
 0x32f   :  { %v3377_v34 = vrot.slane %v18029_v56, 2  ;;  %v18163_v58 = vsel %vm2256_vm5, %v3367_v43, %v3366_v47  ;;  %v3370_v46 = vsel %vm2323_vm8, %v3369_v17, 0.0  ;;  %v3379_v11 = vrot.slane %v18032_v60, 1 }
 0x330   :  { %v3381_v45 = vrot.slane %v18035_v61, 2  ;;  %v18169_v25 = vsel %vm2256_vm5, %v3371_v37, %v3370_v46  ;;  %v3374_v39 = vsel %vm2323_vm8, %v3373_v29, 0.0  ;;  %v3383_v42 = vrot.slane %v18038_v55, 1 }
 0x331   :  { %v3378_v7 = vsel %vm2323_vm8, %v3377_v34, 0.0  ;;  %v18175_v38 = vsel %vm2256_vm5, %v3375_v19, %v3374_v39  ;;  %v3385_v13 = vrot.slane %v17909_v50, 3  ;;  %v3387_v48 = vrot.slane %v17912_v59, 2 }
 0x332   :  { %22090 = vst [vmem:[#allocation7_spill] sm:$0xff] %v18175_v38  ;;  %v18178_v2 = vsel %vm2256_vm5, %v3379_v11, %v3378_v7  ;;  %v3382_v0 = vsel %vm2323_vm8, %v3381_v45, 0.0  ;;  %v3389_v43 = vrot.slane %v17915_v31, 3  ;;  %v3391_v17 = vrot.slane %v17918_v18, 2 }
 0x333   :  { %22091 = vst [vmem:[#allocation17_spill] sm:$0xff] %v18178_v2  ;;  %v18183_v33 = vsel %vm2256_vm5, %v3383_v42, %v3382_v0  ;;  %v3386_v37 = vsel %vm2323_vm8, %v3385_v13, 0.0  ;;  %v3393_v47 = vrot.slane %v17941_v4, 3  ;;  %v3395_v29 = vrot.slane %v17944_v8, 2 }
 0x334   :  { %v3397_v19 = vrot.slane %v17947_v22, 3  ;;  %v18193_v34 = vsel %vm2256_vm5, %v3387_v48, %v3386_v37  ;;  %v3390_v50 = vsel %vm2323_vm8, %v3389_v43, 0.0  ;;  %v3399_v46 = vrot.slane %v17950_v27, 2 }
 0x335   :  { %v3401_v59 = vrot.slane %v17985_v32, 3  ;;  %v18199_v31 = vsel %vm2256_vm5, %v3391_v17, %v3390_v50  ;;  %v3394_v18 = vsel %vm2323_vm8, %v3393_v47, 0.0  ;;  %v3403_v8 = vrot.slane %v17988_v49, 2  ;;  %v22092_v49 = vld [vmem:[#allocation42_spill] sm:$0xff]  ;;  %v22093_v17 = vld [vmem:[#allocation35_spill] sm:$0xff] }
 0x336   :  { %v3398_v4 = vsel %vm2323_vm8, %v3397_v19, 0.0  ;;  %v18205_v22 = vsel %vm2256_vm5, %v3395_v29, %v3394_v18  ;;  %v3405_v27 = vrot.slane %v17991_v20, 3  ;;  %v3407_v39 = vrot.slane %v17994_v3, 2  ;;  %v22094_v20 = vld [vmem:[#allocation37_spill] sm:$0xff] }
 0x337   :  { %v18208_v11 = vsel %vm2256_vm5, %v3399_v46, %v3398_v4  ;;  %v3402_v45 = vsel %vm2323_vm8, %v3401_v59, 0.0  ;;  %v3409_v7 = vrot.slane %v18029_v56, 3  ;;  %v3411_v42 = vrot.slane %v18032_v60, 2 }
 0x338   :  { %v18213_v32 = vsel %vm2256_vm5, %v3403_v8, %v3402_v45  ;;  %v2497_v0 = vrot.slane %v22092_v49, 1  ;;  %v3406_v13 = vsel %vm2323_vm8, %v3405_v27, 0.0  ;;  %v3413_v48 = vrot.slane %v18035_v61, 3 }
 0x339   :  { %v3415_v43 = vrot.slane %v18038_v55, 2  ;;  %v2498_v37 = vrot.slane %v22093_v17, 1  ;;  %v2499_v47 = vrot.slane %v22094_v20, 1  ;;  %v18225_v29 = vsel %vm2256_vm5, %v3407_v39, %v3406_v13 }
 0x33a   :  { %v3410_v3 = vsel %vm2323_vm8, %v3409_v7, 0.0  ;;  %v22095_v56 = vrot.slane %v17488_v12, 1  ;;  %v22097_v19 = vrot.slane %v17521_v1, 1  ;;  %v3414_v50 = vsel %vm2323_vm8, %v3413_v48, 0.0 }
 0x33b   :  { %v18239_v55 = vsel %vm2256_vm5, %v3411_v42, %v3410_v3  ;;  %v18246_v27 = vsel %vm2256_vm5, %v3415_v43, %v3414_v50  ;;  %v22105_v42 = vrot.slane %v17526_v10, 1  ;;  %v22107_v48 = vrot.slane %v17532_v52, 1 }
 0x33c   :  { %v18231_v60 = vmax.f32 %v17488_v12, %v22095_v56  ;;  %v18236_v61 = vmax.f32 %v17521_v1, %v22097_v19  ;;  %v18262_v4 = vmax.f32 %v22092_v49, %v2497_v0  ;;  %v18265_v43 = vmax.f32 %v22093_v17, %v2498_v37 }
 0x33d   :  { %v18254_v3 = vmax.f32 %v17526_v10, %v22105_v42  ;;  %v18259_v19 = vmax.f32 %v17532_v52, %v22107_v48  ;;  %v18268_v50 = vmax.f32 %v22094_v20, %v2499_v47  ;;  %v3449_v10 = vrot.slane %v18053_v51, 1 }
 0x33e   :  { %22096 = vst [vmem:[#allocation19_spill] sm:$0xff] %v18231_v60  ;;  %22098 = vst [vmem:[#allocation38_spill] sm:$0xff] %v18236_v61  ;;  %v3450_v42 = vrot.slane %v18056_v63, 1  ;;  %v3451_v52 = vrot.slane %v18062_v21, 1  ;;  %v3452_v48 = vrot.slane %v18065_v28, 1  ;;  %v3453_v49 = vrot.slane %v18071_v14, 1 }
 0x33f   :  { %22106 = vst [vmem:[#allocation28_spill] sm:$0xff] %v18254_v3  ;;  %22108 = vst [vmem:[#allocation29_spill] sm:$0xff] %v18259_v19  ;;  %v3454_v0 = vrot.slane %v18079_v44, 1  ;;  %v3457_v20 = vrot.slane %v18098_v6, 1  ;;  %v3458_v47 = vrot.slane %v18102_v35, 1  ;;  %v3459_v13 = vrot.slane %v18108_v26, 1 }
 0x340   :  { %22109 = vst [vmem:[#allocation43_spill] sm:$0xff] %v18262_v4  ;;  %22110 = vst [vmem:[#allocation8_spill] sm:$0xff] %v18265_v43  ;;  %v3460_v56 = vrot.slane %v18112_v15, 1  ;;  %v3461_v39 = vrot.slane %v18118_v30, 1  ;;  %v3462_v45 = vrot.slane %v18122_v36, 1  ;;  %v3463_v59 = vrot.slane %v18136_v24, 1 }
 0x341   :  { %22111 = vst [vmem:[#allocation10_spill] sm:$0xff] %v18268_v50  ;;  %v3465_v17 = vrot.slane %v18145_v5, 1  ;;  %v3466_v37 = vrot.slane %v18148_v9, 1  ;;  %v3467_v60 = vrot.slane %v18153_v40, 1  ;;  %v3468_v7 = vrot.slane %v18163_v58, 1 }
 0x342   :  { %v3469_v8 = vrot.slane %v18169_v25, 1  ;;  %v3473_v12 = vrot.slane %v18193_v34, 1  ;;  %v3474_v18 = vrot.slane %v18199_v31, 1  ;;  %v3475_v61 = vrot.slane %v18205_v22, 1 }
 0x343   :  { %v3476_v50 = vrot.slane %v18208_v11, 1  ;;  %v3477_v43 = vrot.slane %v18213_v32, 1  ;;  %v3513_v4 = vmax.f32 %v18053_v51, %v3449_v10  ;;  %v3514_v19 = vmax.f32 %v18056_v63, %v3450_v42 }
 0x344   :  { %v3515_v3 = vmax.f32 %v18062_v21, %v3451_v52  ;;  %v3516_v46 = vmax.f32 %v18065_v28, %v3452_v48  ;;  %v3517_v1 = vmax.f32 %v18071_v14, %v3453_v49  ;;  %v3518_v2 = vmax.f32 %v18079_v44, %v3454_v0 }
 0x345   :  { %v3521_v38 = vmax.f32 %v18098_v6, %v3457_v20  ;;  %v3522_v53 = vmax.f32 %v18102_v35, %v3458_v47  ;;  %v3523_v54 = vmax.f32 %v18108_v26, %v3459_v13  ;;  %v3524_v23 = vmax.f32 %v18112_v15, %v3460_v56  ;;  %v22116_v20 = vld [vmem:[#allocation11_spill] sm:$0xff] }
 0x346   :  { %v3525_v51 = vmax.f32 %v18118_v30, %v3461_v39  ;;  %v3526_v63 = vmax.f32 %v18122_v36, %v3462_v45  ;;  %v3527_v21 = vmax.f32 %v18136_v24, %v3463_v59  ;;  %v3529_v28 = vmax.f32 %v18145_v5, %v3465_v17 }
 0x347   :  { %v3530_v14 = vmax.f32 %v18148_v9, %v3466_v37  ;;  %v3531_v44 = vmax.f32 %v18153_v40, %v3467_v60  ;;  %v3532_v6 = vmax.f32 %v18163_v58, %v3468_v7  ;;  %v3533_v35 = vmax.f32 %v18169_v25, %v3469_v8  ;;  %v22115_v37 = vld [vmem:[#allocation53_spill] sm:$0xff] }
 0x348   :  { %v3538_v26 = vmax.f32 %v18199_v31, %v3474_v18  ;;  %v3539_v15 = vmax.f32 %v18205_v22, %v3475_v61  ;;  %v3577_v13 = vrot.slane %v3514_v19, 7  ;;  %v3579_v30 = vrot.slane %v3515_v3, 6 }
 0x349   :  { %v3540_v36 = vmax.f32 %v18208_v11, %v3476_v50  ;;  %v3541_v24 = vmax.f32 %v18213_v32, %v3477_v43  ;;  %v3581_v59 = vrot.slane %v3516_v46, 5  ;;  %v3591_v5 = vrot.slane %v3522_v53, 7 }
 0x34a   :  { %v3578_v9 = vsel %vm2256_vm5, %v3577_v13, %v3513_v4  ;;  %v3583_v45 = vrot.slane %v3517_v1, 4  ;;  %v3585_v40 = vrot.slane %v3518_v2, 3  ;;  %v3593_v60 = vrot.slane %v3523_v54, 6 }
 0x34b   :  { %v3580_v58 = vsel %vm2258_vm6, %v3579_v30, %v3578_v9  ;;  %v3592_v25 = vsel %vm2256_vm5, %v3591_v5, %v3521_v38  ;;  %v3595_v31 = vrot.slane %v3524_v23, 5  ;;  %v3597_v18 = vrot.slane %v3525_v51, 4  ;;  %v22117_v51 = vld [vmem:[#allocation30_spill] sm:$0xff]  ;;  %v22125_v9 = vld [vmem:[#allocation33_spill] sm:$0xff] }
 0x34c   :  { %v3582_v22 = vsel %vm2260_vm7, %v3581_v59, %v3580_v58  ;;  %v3594_v61 = vsel %vm2258_vm6, %v3593_v60, %v3592_v25  ;;  %v3599_v11 = vrot.slane %v3526_v63, 3  ;;  %v3605_v8 = vrot.slane %v3530_v14, 7  ;;  %v22124_v59 = vld [vmem:[#allocation31_spill] sm:$0xff]  ;;  %v22127_v58 = vld [vmem:[#allocation45_spill] sm:$0xff] }
 0x34d   :  { %v3584_v32 = vsel %vm2603_vm9, %v3583_v45, %v3582_v22  ;;  %v3596_v53 = vsel %vm2260_vm7, %v3595_v31, %v3594_v61  ;;  %v3601_v46 = vrot.slane %v3527_v21, 2  ;;  %v3607_v4 = vrot.slane %v3531_v44, 6  ;;  %v22118_v21 = vld [vmem:[#allocation32_spill] sm:$0xff]  ;;  %v22119_v44 = vld [vmem:[#allocation21_spill] sm:$0xff]  ;;  %v22129_v22 = vld [vmem:[#allocation14_spill] sm:$0xff] }
 0x34e   :  { %v18330_v54 = vsel %vm2606_vm10, %v3585_v40, %v3584_v32  ;;  %v3598_v2 = vsel %vm2603_vm9, %v3597_v18, %v3596_v53  ;;  %v3606_v23 = vsel %vm2256_vm5, %v3605_v8, %v3529_v28  ;;  %v3609_v38 = vrot.slane %v3532_v6, 5  ;;  %v22126_v40 = vld [vmem:[#allocation44_spill] sm:$0xff]  ;;  %v22131_v32 = vld [vmem:[#allocation26_spill] sm:$0xff] }
 0x34f   :  { %22112 = vst [vmem:[#allocation20_spill] sm:$0xff] %v18330_v54  ;;  %v3600_v7 = vsel %vm2606_vm10, %v3599_v11, %v3598_v2  ;;  %v3608_v1 = vsel %vm2258_vm6, %v3607_v4, %v3606_v23  ;;  %v3611_v56 = vrot.slane %v3533_v35, 4  ;;  %v3537_v3 = vmax.f32 %v18193_v34, %v3473_v12  ;;  %v22120_v35 = vld [vmem:[#allocation23_spill] sm:$0xff]  ;;  %v22128_v31 = vld [vmem:[#allocation12_spill] sm:$0xff] }
 0x350   :  { %v18339_v19 = vsel %vm2609_vm11, %v3601_v46, %v3600_v7  ;;  %v3610_v43 = vsel %vm2260_vm7, %v3609_v38, %v3608_v1  ;;  %v3619_v50 = vrot.slane %v3538_v26, 7  ;;  %v3621_v48 = vrot.slane %v3539_v15, 6  ;;  %v22121_v15 = vld [vmem:[#allocation39_spill] sm:$0xff]  ;;  %v22130_v11 = vld [vmem:[#allocation24_spill] sm:$0xff]  ;;  %v22132_v46 = vld [vmem:[#allocation13_spill] sm:$0xff] }
 0x351   :  { %22113 = vst [vmem:[#allocation22_spill] sm:$0xff] %v18339_v19  ;;  %v18345_v52 = vsel %vm2603_vm9, %v3611_v56, %v3610_v43  ;;  %v3623_v17 = vrot.slane %v3540_v36, 5  ;;  %v3625_v34 = vrot.slane %v3541_v24, 4  ;;  %v3674_v47 = vadd.f32 %v22116_v20, %v22115_v37  ;;  %v22123_v36 = vld [vmem:[#allocation40_spill] sm:$0xff] }
 0x352   :  { %22114 = vst [vmem:[#allocation9_spill] sm:$0xff] %v18345_v52  ;;  %v3620_v0 = vsel %vm2256_vm5, %v3619_v50, %v3537_v3  ;;  %v3675_v63 = vadd.f32 %v22117_v51, %v22115_v37  ;;  %v3676_v28 = vadd.f32 %v22118_v21, %v22115_v37  ;;  %v3677_v6 = vadd.f32 %v22119_v44, %v22115_v37 }
 0x353   :  { %v3622_v12 = vsel %vm2258_vm6, %v3621_v48, %v3620_v0  ;;  %v3678_v26 = vadd.f32 %v22120_v35, %v22115_v37  ;;  %v3679_v13 = vadd.f32 %v22121_v15, %v22115_v37  ;;  %v3680_v24 = vadd.f32 %v22123_v36, %v22115_v37 }
 0x354   :  { %v3624_v14 = vsel %vm2260_vm7, %v3623_v17, %v3622_v12  ;;  %v3681_v5 = vadd.f32 %v22124_v59, %v22115_v37  ;;  %v3682_v45 = vadd.f32 %v22125_v9, %v22115_v37  ;;  %v3683_v60 = vadd.f32 %v22126_v40, %v22115_v37 }
 0x355   :  { %v18364_v30 = vsel %vm2603_vm9, %v3625_v34, %v3624_v14  ;;  %v3684_v25 = vadd.f32 %v22127_v58, %v22115_v37  ;;  %v3685_v18 = vadd.f32 %v22128_v31, %v22115_v37  ;;  %v3686_v61 = vadd.f32 %v22129_v22, %v22115_v37 }
 0x356   :  { %22122 = vst [vmem:[#allocation50_spill] sm:$0xff] %v18364_v30  ;;  %v3687_v8 = vadd.f32 %v22130_v11, %v22115_v37  ;;  %v3688_v53 = vadd.f32 %v22131_v32, %v22115_v37  ;;  %v3689_v4 = vadd.f32 %v22132_v46, %v22115_v37  ;;  %v3690_v2 = vmax.f32 %v3674_v47, 0.0 }
 0x357   :  { %v3691_v23 = vmax.f32 %v3675_v63, 0.0  ;;  %v3692_v38 = vmax.f32 %v3676_v28, 0.0  ;;  %v3693_v7 = vmax.f32 %v3677_v6, 0.0  ;;  %v3694_v1 = vmax.f32 %v3678_v26, 0.0  ;;  %v22133_v63 = vld [vmem:[#allocation49_spill] sm:$0xff] }
 0x358   :  { %v3695_v56 = vmax.f32 %v3679_v13, 0.0  ;;  %v3696_v3 = vmax.f32 %v3680_v24, 0.0  ;;  %v3697_v43 = vmax.f32 %v3681_v5, 0.0  ;;  %v3698_v50 = vmax.f32 %v3682_v45, 0.0 }
 0x359   :  { %v3699_v48 = vmax.f32 %v3683_v60, 0.0  ;;  %v3700_v0 = vmax.f32 %v3684_v25, 0.0  ;;  %v3701_v17 = vmax.f32 %v3685_v18, 0.0  ;;  %v3702_v34 = vmax.f32 %v3686_v61, 0.0 }
 0x35a   :  { %v3703_v12 = vmax.f32 %v3687_v8, 0.0  ;;  %v3704_v20 = vmax.f32 %v3688_v53, 0.0  ;;  %v3705_v51 = vmax.f32 %v3689_v4, 0.0  ;;  %v3722_v21 = vcombine.low %v3690_v2, %v3691_v23 }
 0x35b   :  { %v3723_v14 = vcombine.high %v3690_v2, %v3691_v23  ;;  %v3724_v44 = vcombine.low %v3692_v38, %v3693_v7  ;;  %v3725_v37 = vcombine.high %v3692_v38, %v3693_v7  ;;  %v3758_v47 = vcombine.low %v3694_v1, %v3695_v56 }
 0x35c   :  { %v3732_v28 = vrot.slane %v3722_v21, %v22133_v63  ;;  %v3759_v6 = vcombine.high %v3694_v1, %v3695_v56  ;;  %v3760_v35 = vcombine.low %v3696_v3, %v3697_v43  ;;  %v3761_v26 = vcombine.high %v3696_v3, %v3697_v43 }
 0x35d   :  { %v3739_v15 = vrot.slane %v3723_v14, %v22133_v63  ;;  %v3746_v13 = vrot.slane %v3724_v44, %v22133_v63  ;;  %v3753_v36 = vrot.slane %v3725_v37, %v22133_v63  ;;  %v3768_v24 = vrot.slane %v3758_v47, %v22133_v63 }
 0x35e   :  { %v3775_v59 = vrot.slane %v3759_v6, %v22133_v63  ;;  %v3782_v5 = vrot.slane %v3760_v35, %v22133_v63  ;;  %v3789_v9 = vrot.slane %v3761_v26, %v22133_v63  ;;  %v3794_v45 = vcombine.low %v3698_v50, %v3699_v48 }
 0x35f   :  { %v3754_v40 = vcombine.low %v3732_v28, %v3746_v13  ;;  %v3755_v60 = vcombine.high %v3732_v28, %v3746_v13  ;;  %v3756_v58 = vcombine.low %v3739_v15, %v3753_v36  ;;  %v3757_v25 = vcombine.high %v3739_v15, %v3753_v36 }
 0x360   :  { %v3790_v31 = vcombine.low %v3768_v24, %v3782_v5  ;;  %v3791_v18 = vcombine.high %v3768_v24, %v3782_v5  ;;  %v3792_v22 = vcombine.low %v3775_v59, %v3789_v9  ;;  %v3793_v61 = vcombine.high %v3775_v59, %v3789_v9 }
 0x361   :  { %v3795_v11 = vcombine.high %v3698_v50, %v3699_v48  ;;  %v3796_v8 = vcombine.low %v3700_v0, %v3701_v17  ;;  %v3797_v32 = vcombine.high %v3700_v0, %v3701_v17  ;;  %v3804_v53 = vrot.slane %v3794_v45, %v22133_v63 }
 0x362   :  { %v3830_v46 = vcombine.low %v3702_v34, %v3703_v12  ;;  %v3831_v4 = vcombine.high %v3702_v34, %v3703_v12  ;;  %v3832_v2 = vcombine.low %v3704_v20, %v3705_v51  ;;  %v3833_v23 = vcombine.high %v3704_v20, %v3705_v51 }
 0x363   :  { %v3811_v38 = vrot.slane %v3795_v11, %v22133_v63  ;;  %v3818_v7 = vrot.slane %v3796_v8, %v22133_v63  ;;  %v3825_v1 = vrot.slane %v3797_v32, %v22133_v63  ;;  %v11232_v56 = vrot.slane %v3754_v40, 9 }
 0x364   :  { %v3840_v3 = vrot.slane %v3830_v46, %v22133_v63  ;;  %v3847_v43 = vrot.slane %v3831_v4, %v22133_v63  ;;  %v3854_v50 = vrot.slane %v3832_v2, %v22133_v63  ;;  %v3861_v48 = vrot.slane %v3833_v23, %v22133_v63 }
 0x365   :  { %v3826_v0 = vcombine.low %v3804_v53, %v3818_v7  ;;  %v3827_v17 = vcombine.high %v3804_v53, %v3818_v7  ;;  %v3828_v34 = vcombine.low %v3811_v38, %v3825_v1  ;;  %v3829_v12 = vcombine.high %v3811_v38, %v3825_v1 }
 0x366   :  { %v3862_v20 = vcombine.low %v3840_v3, %v3854_v50  ;;  %v3863_v51 = vcombine.high %v3840_v3, %v3854_v50  ;;  %v3864_v21 = vcombine.low %v3847_v43, %v3861_v48  ;;  %v3865_v14 = vcombine.high %v3847_v43, %v3861_v48 }
 0x367   :  { %v11233_v44 = vrot.slane %v3790_v31, 9  ;;  %v11234_v37 = vrot.slane %v3826_v0, 9  ;;  %v11236_v47 = vrot.slane %v3755_v60, 9  ;;  %v11237_v28 = vrot.slane %v3791_v18, 9 }
 0x368   :  { %v11235_v6 = vrot.slane %v3862_v20, 9  ;;  %v11238_v35 = vrot.slane %v3827_v17, 9  ;;  %v11239_v26 = vrot.slane %v3863_v51, 9  ;;  %v11240_v15 = vrot.slane %v3756_v58, 9 }
 0x369   :  { %v11241_v13 = vrot.slane %v3792_v22, 9  ;;  %v11242_v36 = vrot.slane %v3828_v34, 9  ;;  %v11243_v24 = vrot.slane %v3864_v21, 9  ;;  %v11244_v63 = vrot.slane %v3757_v25, 9 }
 0x36a   :  { %v11245_v59 = vrot.slane %v3793_v61, 9  ;;  %v11246_v5 = vrot.slane %v3829_v12, 9  ;;  %v11247_v9 = vrot.slane %v3865_v14, 9  ;;  %v18402_v45 = vmax.f32 %v3754_v40, %v11232_v56 }
 0x36b   :  { %v18404_v11 = vmax.f32 %v3790_v31, %v11233_v44  ;;  %v18406_v8 = vmax.f32 %v3826_v0, %v11234_v37  ;;  %v18408_v32 = vmax.f32 %v3862_v20, %v11235_v6  ;;  %v18410_v53 = vmax.f32 %v3755_v60, %v11236_v47 }
 0x36c   :  { %v18412_v46 = vmax.f32 %v3791_v18, %v11237_v28  ;;  %v18414_v4 = vmax.f32 %v3827_v17, %v11238_v35  ;;  %v18416_v2 = vmax.f32 %v3863_v51, %v11239_v26  ;;  %v18418_v23 = vmax.f32 %v3756_v58, %v11240_v15 }
 0x36d   :  { %v18420_v38 = vmax.f32 %v3792_v22, %v11241_v13  ;;  %v18422_v40 = vmax.f32 %v3828_v34, %v11242_v36  ;;  %v18424_v31 = vmax.f32 %v3864_v21, %v11243_v24  ;;  %v18426_v7 = vmax.f32 %v3757_v25, %v11244_v63  ;;  %v5628_v63 = vld [vmem:[#allocation4 + $0x1] sm:$0xff] }
 0x36e   :  { %v18428_v1 = vmax.f32 %v3793_v61, %v11245_v59  ;;  %v18430_v60 = vmax.f32 %v3829_v12, %v11246_v5  ;;  %v18432_v18 = vmax.f32 %v3865_v14, %v11247_v9  ;;  %v3965_v56 = vrot.slane %v18402_v45, %v16381_v62  ;;  %12576 = vmatprep.mubr.f32.mxu1 %v5628_v63 }
 0x36f   :  { %v3969_v58 = vrot.slane %v18402_v45, %v22062_v16  ;;  %v3973_v22 = vrot.slane %v18402_v45, %v22063_v41  ;;  %v4029_v14 = vrot.slane %v18410_v53, %v16381_v62  ;;  %v4033_v44 = vrot.slane %v18410_v53, %v22062_v16 }
 0x370   :  { %v4037_v37 = vrot.slane %v18410_v53, %v22063_v41  ;;  %v4041_v47 = vrot.slane %v18410_v53, %v22064_v57  ;;  %v4045_v28 = vrot.slane %v18412_v46, %v16381_v62  ;;  %v4049_v6 = vrot.slane %v18412_v46, %v22062_v16 }
 0x371   :  { %v4053_v35 = vrot.slane %v18412_v46, %v22063_v41  ;;  %v4057_v26 = vrot.slane %v18412_v46, %v22064_v57  ;;  %v4093_v53 = vrot.slane %v18418_v23, %v16381_v62  ;;  %v4097_v46 = vrot.slane %v18418_v23, %v22062_v16 }
 0x372   :  { %v4101_v49 = vrot.slane %v18418_v23, %v22063_v41  ;;  %v4105_v42 = vrot.slane %v18418_v23, %v22064_v57  ;;  %v4109_v10 = vrot.slane %v18420_v38, %v16381_v62  ;;  %v4113_v39 = vrot.slane %v18420_v38, %v22062_v16 }
 0x373   :  { %v4117_v9 = vrot.slane %v18420_v38, %v22063_v41  ;;  %v4121_v21 = vrot.slane %v18420_v38, %v22064_v57  ;;  %v4125_v5 = vrot.slane %v18422_v40, %v16381_v62  ;;  %v4129_v51 = vrot.slane %v18422_v40, %v22062_v16 }
 0x374   :  { %v4133_v23 = vrot.slane %v18422_v40, %v22063_v41  ;;  %v4137_v59 = vrot.slane %v18422_v40, %v22064_v57  ;;  %v4141_v20 = vrot.slane %v18424_v31, %v16381_v62  ;;  %v4157_v34 = vrot.slane %v18426_v7, %v16381_v62 }
 0x375   :  { %v4161_v40 = vrot.slane %v18426_v7, %v22062_v16  ;;  %v4165_v36 = vrot.slane %v18426_v7, %v22063_v41  ;;  %v4169_v17 = vrot.slane %v18426_v7, %v22064_v57  ;;  %v4173_v12 = vrot.slane %v18428_v1, %v16381_v62 }
 0x376   :  { %v4177_v38 = vrot.slane %v18428_v1, %v22062_v16  ;;  %v4181_v24 = vrot.slane %v18428_v1, %v22063_v41  ;;  %v4185_v63 = vrot.slane %v18428_v1, %v22064_v57  ;;  %v4189_v13 = vrot.slane %v18430_v60, %v16381_v62 }
 0x377   :  { %v4193_v0 = vrot.slane %v18430_v60, %v22062_v16  ;;  %v4197_v7 = vrot.slane %v18430_v60, %v22063_v41  ;;  %v4201_v15 = vrot.slane %v18430_v60, %v22064_v57  ;;  %v4205_v48 = vrot.slane %v18432_v18, %v16381_v62 }
 0x378   :  { %v4209_v50 = vrot.slane %v18432_v18, %v22062_v16  ;;  %v4213_v1 = vrot.slane %v18432_v18, %v22063_v41  ;;  %v4217_v43 = vrot.slane %v18432_v18, %v22064_v57  ;;  %v4218_v61 = vsel %vm2256_vm5, %v4029_v14, %v3965_v56 }
 0x379   :  { %v4219_v25 = vsel %vm2258_vm6, %v4093_v53, %v4218_v61  ;;  %v4221_v60 = vsel %vm2256_vm5, %v4033_v44, %v3969_v58  ;;  %v4224_v3 = vsel %vm2256_vm5, %v4037_v37, %v3973_v22  ;;  %v22134_v18 = vrot.slane %v18402_v45, %v22064_v57 }
 0x37a   :  { %v18580_v52 = vsel %vm2260_vm7, %v4157_v34, %v4219_v25  ;;  %v4222_v56 = vsel %vm2258_vm6, %v4097_v46, %v4221_v60  ;;  %v4225_v61 = vsel %vm2258_vm6, %v4101_v49, %v4224_v3  ;;  %v22135_v45 = vrot.slane %v18404_v11, %v16381_v62 }
 0x37b   :  { %v4227_v30 = vsel %vm2256_vm5, %v4041_v47, %v22134_v18  ;;  %v18586_v58 = vsel %vm2260_vm7, %v4161_v40, %v4222_v56  ;;  %v18589_v44 = vsel %vm2260_vm7, %v4165_v36, %v4225_v61  ;;  %v22136_v49 = vrot.slane %v18404_v11, %v22062_v16 }
 0x37c   :  { %v4228_v14 = vsel %vm2258_vm6, %v4105_v42, %v4227_v30  ;;  %v4230_v25 = vsel %vm2256_vm5, %v4045_v28, %v22135_v45  ;;  %v22137_v30 = vrot.slane %v18404_v11, %v22063_v41  ;;  %v22143_v46 = vrot.slane %v18406_v8, %v22063_v41 }
 0x37d   :  { %v18592_v22 = vsel %vm2260_vm7, %v4169_v17, %v4228_v14  ;;  %v4231_v34 = vsel %vm2258_vm6, %v4109_v10, %v4230_v25  ;;  %v4233_v42 = vsel %vm2256_vm5, %v4049_v6, %v22136_v49  ;;  %v22138_v17 = vrot.slane %v18404_v11, %v22064_v57 }
 0x37e   :  { %v4236_v3 = vsel %vm2256_vm5, %v4053_v35, %v22137_v30  ;;  %v18612_v47 = vsel %vm2260_vm7, %v4173_v12, %v4231_v34  ;;  %v4234_v10 = vsel %vm2258_vm6, %v4113_v39, %v4233_v42  ;;  %v22139_v11 = vrot.slane %v18406_v8, %v16381_v62 }
 0x37f   :  { %v4239_v37 = vsel %vm2256_vm5, %v4057_v26, %v22138_v17  ;;  %v4237_v28 = vsel %vm2258_vm6, %v4117_v9, %v4236_v3  ;;  %v18618_v6 = vsel %vm2260_vm7, %v4177_v38, %v4234_v10  ;;  %v22140_v12 = vrot.slane %v18414_v4, %v16381_v62 }
 0x380   :  { %v4240_v36 = vsel %vm2258_vm6, %v4121_v21, %v4239_v37  ;;  %v18621_v53 = vsel %vm2260_vm7, %v4181_v24, %v4237_v28  ;;  %v22141_v21 = vrot.slane %v18406_v8, %v22062_v16  ;;  %v22142_v24 = vrot.slane %v18414_v4, %v22062_v16 }
 0x381   :  { %v18624_v35 = vsel %vm2260_vm7, %v4185_v63, %v4240_v36  ;;  %v4242_v39 = vsel %vm2256_vm5, %v22140_v12, %v22139_v11  ;;  %v22144_v38 = vrot.slane %v18414_v4, %v22063_v41  ;;  %v22145_v63 = vrot.slane %v18406_v8, %v22064_v57 }
 0x382   :  { %v4243_v26 = vsel %vm2258_vm6, %v4125_v5, %v4242_v39  ;;  %v4245_v9 = vsel %vm2256_vm5, %v22142_v24, %v22141_v21  ;;  %v22146_v5 = vrot.slane %v18414_v4, %v22064_v57  ;;  %v22147_v4 = vrot.slane %v18408_v32, %v16381_v62 }
 0x383   :  { %v4248_v40 = vsel %vm2256_vm5, %v22144_v38, %v22143_v46  ;;  %v18656_v18 = vsel %vm2260_vm7, %v4189_v13, %v4243_v26  ;;  %v4246_v56 = vsel %vm2258_vm6, %v4129_v51, %v4245_v9  ;;  %v22148_v13 = vrot.slane %v18416_v2, %v16381_v62 }
 0x384   :  { %v4251_v60 = vsel %vm2256_vm5, %v22146_v5, %v22145_v63  ;;  %v4249_v61 = vsel %vm2258_vm6, %v4133_v23, %v4248_v40  ;;  %v18662_v45 = vsel %vm2260_vm7, %v4193_v0, %v4246_v56  ;;  %v22149_v0 = vrot.slane %v18408_v32, %v22062_v16 }
 0x385   :  { %v4252_v14 = vsel %vm2258_vm6, %v4137_v59, %v4251_v60  ;;  %v18665_v25 = vsel %vm2260_vm7, %v4197_v7, %v4249_v61  ;;  %v4254_v51 = vsel %vm2256_vm5, %v22148_v13, %v22147_v4  ;;  %v22150_v59 = vrot.slane %v18416_v2, %v22062_v16 }
 0x386   :  { %v18668_v8 = vsel %vm2260_vm7, %v4201_v15, %v4252_v14  ;;  %v4255_v23 = vsel %vm2258_vm6, %v4141_v20, %v4254_v51  ;;  %v22151_v15 = vrot.slane %v18408_v32, %v22063_v41  ;;  %v22152_v34 = vrot.slane %v18416_v2, %v22063_v41 }
 0x387   :  { %v4257_v7 = vsel %vm2256_vm5, %v22150_v59, %v22149_v0  ;;  %v22153_v42 = vrot.slane %v18408_v32, %v22064_v57  ;;  %v22154_v20 = vrot.slane %v18416_v2, %v22064_v57  ;;  %v18700_v3 = vsel %vm2260_vm7, %v4205_v48, %v4255_v23 }
 0x388   :  { %v4260_v49 = vsel %vm2256_vm5, %v22152_v34, %v22151_v15  ;;  %v22155_v17 = vrot.slane %v18424_v31, %v22062_v16  ;;  %v22156_v10 = vrot.slane %v18424_v31, %v22063_v41  ;;  %v22157_v32 = vrot.slane %v18424_v31, %v22064_v57 }
 0x389   :  { %v4263_v30 = vsel %vm2256_vm5, %v22154_v20, %v22153_v42  ;;  %v4282_v11 = vsel %vm2323_vm8, %v18580_v52, 0.0  ;;  %v4283_v41 = vrot.slane %v18586_v58, 7  ;;  %v4285_v12 = vsel %vm2323_vm8, %v18589_v44, 0.0 }
 0x38a   :  { %v4258_v37 = vsel %vm2258_vm6, %v22155_v17, %v4257_v7  ;;  %v4261_v28 = vsel %vm2258_vm6, %v22156_v10, %v4260_v49  ;;  %v4264_v2 = vsel %vm2258_vm6, %v22157_v32, %v4263_v30  ;;  %v4286_v57 = vrot.slane %v18592_v22, 7 }
 0x38b   :  { %v18715_v36 = vsel %vm2260_vm7, %v4209_v50, %v4258_v37  ;;  %v18718_v48 = vsel %vm2260_vm7, %v4213_v1, %v4261_v28  ;;  %v18721_v16 = vsel %vm2260_vm7, %v4217_v43, %v4264_v2  ;;  %v4288_v31 = vsel %vm2323_vm8, %v18612_v47, 0.0 }
 0x38c   :  { %v4289_v50 = vrot.slane %v18618_v6, 7  ;;  %v4291_v1 = vsel %vm2323_vm8, %v18621_v53, 0.0  ;;  %v4292_v43 = vrot.slane %v18624_v35, 7  ;;  %v4294_v39 = vsel %vm2323_vm8, %v18656_v18, 0.0 }
 0x38d   :  { %v18738_v26 = vsel %vm2256_vm5, %v4283_v41, %v4282_v11  ;;  %v18741_v21 = vsel %vm2256_vm5, %v4286_v57, %v4285_v12  ;;  %v4295_v24 = vrot.slane %v18662_v45, 7  ;;  %v4297_v9 = vsel %vm2323_vm8, %v18665_v25, 0.0 }
 0x38e   :  { %v18747_v46 = vsel %vm2256_vm5, %v4289_v50, %v4288_v31  ;;  %v18750_v38 = vsel %vm2256_vm5, %v4292_v43, %v4291_v1  ;;  %v4298_v40 = vrot.slane %v18668_v8, 7  ;;  %v4300_v63 = vsel %vm2323_vm8, %v18700_v3, 0.0 }
 0x38f   :  { %v18756_v5 = vsel %vm2256_vm5, %v4295_v24, %v4294_v39  ;;  %v4301_v60 = vrot.slane %v18715_v36, 7  ;;  %v4303_v56 = vsel %vm2323_vm8, %v18718_v48, 0.0  ;;  %v4304_v61 = vrot.slane %v18721_v16, 7 }
 0x390   :  { %v18763_v14 = vsel %vm2256_vm5, %v4298_v40, %v4297_v9  ;;  %v4306_v4 = vrot.slane %v18580_v52, 1  ;;  %v4309_v13 = vrot.slane %v18589_v44, 1  ;;  %v4312_v51 = vrot.slane %v18612_v47, 1 }
 0x391   :  { %v18769_v23 = vsel %vm2256_vm5, %v4301_v60, %v4300_v63  ;;  %v18772_v0 = vsel %vm2256_vm5, %v4304_v61, %v4303_v56  ;;  %v4315_v59 = vrot.slane %v18621_v53, 1  ;;  %v4318_v7 = vrot.slane %v18656_v18, 1 }
 0x392   :  { %v4307_v15 = vsel %vm2323_vm8, %v4306_v4, 0.0  ;;  %v4310_v34 = vsel %vm2323_vm8, %v4309_v13, 0.0  ;;  %v4313_v49 = vsel %vm2323_vm8, %v4312_v51, 0.0  ;;  %v4321_v42 = vrot.slane %v18665_v25, 1 }
 0x393   :  { %v18782_v20 = vsel %vm2256_vm5, %v18586_v58, %v4307_v15  ;;  %v18786_v30 = vsel %vm2256_vm5, %v18592_v22, %v4310_v34  ;;  %v18790_v17 = vsel %vm2256_vm5, %v18618_v6, %v4313_v49  ;;  %v4316_v37 = vsel %vm2323_vm8, %v4315_v59, 0.0 }
 0x394   :  { %v18795_v10 = vsel %vm2256_vm5, %v18624_v35, %v4316_v37  ;;  %v4319_v28 = vsel %vm2323_vm8, %v4318_v7, 0.0  ;;  %v4322_v32 = vsel %vm2323_vm8, %v4321_v42, 0.0  ;;  %v4324_v2 = vrot.slane %v18700_v3, 1 }
 0x395   :  { %v18802_v11 = vsel %vm2256_vm5, %v18662_v45, %v4319_v28  ;;  %v18806_v41 = vsel %vm2256_vm5, %v18668_v8, %v4322_v32  ;;  %v4327_v12 = vrot.slane %v18718_v48, 1  ;;  %v4330_v57 = vrot.slane %v18580_v52, 2 }
 0x396   :  { %v4325_v31 = vsel %vm2323_vm8, %v4324_v2, 0.0  ;;  %v4332_v50 = vrot.slane %v18586_v58, 1  ;;  %v4334_v1 = vrot.slane %v18589_v44, 2  ;;  %v4336_v43 = vrot.slane %v18592_v22, 1 }
 0x397   :  { %v18816_v39 = vsel %vm2256_vm5, %v18715_v36, %v4325_v31  ;;  %v4328_v24 = vsel %vm2323_vm8, %v4327_v12, 0.0  ;;  %v4331_v9 = vsel %vm2323_vm8, %v4330_v57, 0.0  ;;  %v4338_v40 = vrot.slane %v18612_v47, 2 }
 0x398   :  { %v18823_v63 = vsel %vm2256_vm5, %v18721_v16, %v4328_v24  ;;  %v18826_v60 = vsel %vm2256_vm5, %v4332_v50, %v4331_v9  ;;  %v4335_v56 = vsel %vm2323_vm8, %v4334_v1, 0.0  ;;  %v4340_v61 = vrot.slane %v18618_v6, 1 }
 0x399   :  { %v18831_v4 = vsel %vm2256_vm5, %v4336_v43, %v4335_v56  ;;  %v4339_v13 = vsel %vm2323_vm8, %v4338_v40, 0.0  ;;  %v4342_v51 = vrot.slane %v18621_v53, 2  ;;  %v4344_v59 = vrot.slane %v18624_v35, 1 }
 0x39a   :  { %v18837_v7 = vsel %vm2256_vm5, %v4340_v61, %v4339_v13  ;;  %v4346_v15 = vrot.slane %v18656_v18, 2  ;;  %v4348_v34 = vrot.slane %v18662_v45, 1  ;;  %v4350_v49 = vrot.slane %v18665_v25, 2 }
 0x39b   :  { %v4343_v42 = vsel %vm2323_vm8, %v4342_v51, 0.0  ;;  %v4352_v37 = vrot.slane %v18668_v8, 1  ;;  %v4354_v28 = vrot.slane %v18700_v3, 2  ;;  %v4356_v32 = vrot.slane %v18715_v36, 1 }
 0x39c   :  { %v18847_v2 = vsel %vm2256_vm5, %v4344_v59, %v4343_v42  ;;  %v4347_v12 = vsel %vm2323_vm8, %v4346_v15, 0.0  ;;  %v4351_v57 = vsel %vm2323_vm8, %v4350_v49, 0.0  ;;  %v4358_v31 = vrot.slane %v18718_v48, 2 }
 0x39d   :  { %v18853_v50 = vsel %vm2256_vm5, %v4348_v34, %v4347_v12  ;;  %v18856_v1 = vsel %vm2256_vm5, %v4352_v37, %v4351_v57  ;;  %v4355_v43 = vsel %vm2323_vm8, %v4354_v28, 0.0  ;;  %v4360_v24 = vrot.slane %v18721_v16, 1 }
 0x39e   :  { %v18861_v9 = vsel %vm2256_vm5, %v4356_v32, %v4355_v43  ;;  %v4359_v40 = vsel %vm2323_vm8, %v4358_v31, 0.0  ;;  %v4362_v56 = vrot.slane %v18580_v52, 3  ;;  %v4364_v61 = vrot.slane %v18586_v58, 2 }
 0x39f   :  { %22158 = vst [vmem:[#allocation51_spill] sm:$0xff] %v18861_v9  ;;  %v18867_v13 = vsel %vm2256_vm5, %v4360_v24, %v4359_v40  ;;  %v4366_v51 = vrot.slane %v18589_v44, 3  ;;  %v4368_v59 = vrot.slane %v18592_v22, 2  ;;  %v4370_v15 = vrot.slane %v18612_v47, 3  ;;  %v22159_v40 = vld [vmem:[#allocation16_spill] sm:$0xff] }
 0x3a0   :  { %v4363_v34 = vsel %vm2323_vm8, %v4362_v56, 0.0  ;;  %v4372_v49 = vrot.slane %v18618_v6, 2  ;;  %v4374_v42 = vrot.slane %v18621_v53, 3  ;;  %v4376_v37 = vrot.slane %v18624_v35, 2 }
 0x3a1   :  { %v18877_v52 = vsel %vm2256_vm5, %v4364_v61, %v4363_v34  ;;  %v4367_v58 = vsel %vm2323_vm8, %v4366_v51, 0.0  ;;  %v4371_v28 = vsel %vm2323_vm8, %v4370_v15, 0.0  ;;  %v4378_v44 = vrot.slane %v18656_v18, 3  ;;  %v22162_v61 = vld [vmem:[#allocation18_spill] sm:$0xff]  ;;  %v22165_v15 = vld [vmem:[#allocation5_spill] sm:$0xff] }
 0x3a2   :  { %v18883_v22 = vsel %vm2256_vm5, %v4368_v59, %v4367_v58  ;;  %v18886_v47 = vsel %vm2256_vm5, %v4372_v49, %v4371_v28  ;;  %v4375_v6 = vsel %vm2323_vm8, %v4374_v42, 0.0  ;;  %v4380_v53 = vrot.slane %v18662_v45, 2  ;;  %v22168_v42 = vld [vmem:[#allocation7_spill] sm:$0xff]  ;;  %v22171_v28 = vld [vmem:[#allocation17_spill] sm:$0xff] }
 0x3a3   :  { %v18891_v35 = vsel %vm2256_vm5, %v4376_v37, %v4375_v6  ;;  %v4379_v32 = vsel %vm2323_vm8, %v4378_v44, 0.0  ;;  %v4382_v12 = vrot.slane %v18665_v25, 3  ;;  %v4384_v57 = vrot.slane %v18668_v8, 2 }
 0x3a4   :  { %v18897_v18 = vsel %vm2256_vm5, %v4380_v53, %v4379_v32  ;;  %v4386_v31 = vrot.slane %v18700_v3, 3  ;;  %v4388_v43 = vrot.slane %v18715_v36, 2  ;;  %v4390_v24 = vrot.slane %v18718_v48, 3 }
 0x3a5   :  { %v22160_v45 = vrot.slane %v22159_v40, 1  ;;  %v22163_v51 = vrot.slane %v22162_v61, 1  ;;  %v4383_v8 = vsel %vm2323_vm8, %v4382_v12, 0.0  ;;  %v4392_v59 = vrot.slane %v18721_v16, 2 }
 0x3a6   :  { %v22166_v3 = vrot.slane %v22165_v15, 1  ;;  %v18920_v48 = vsel %vm2256_vm5, %v4384_v57, %v4383_v8  ;;  %v4387_v34 = vsel %vm2323_vm8, %v4386_v31, 0.0  ;;  %v4391_v49 = vsel %vm2323_vm8, %v4390_v24, 0.0 }
 0x3a7   :  { %v18905_v56 = vmax.f32 %v22159_v40, %v22160_v45  ;;  %v18910_v25 = vmax.f32 %v22162_v61, %v22163_v51  ;;  %v22169_v37 = vrot.slane %v22168_v42, 1  ;;  %v22172_v44 = vrot.slane %v22171_v28, 1 }
 0x3a8   :  { %v18917_v36 = vmax.f32 %v22165_v15, %v22166_v3  ;;  %v18935_v6 = vsel %vm2256_vm5, %v4388_v43, %v4387_v34  ;;  %v18938_v53 = vsel %vm2256_vm5, %v4392_v59, %v4391_v49  ;;  %v22179_v15 = vrot.slane %v18183_v33, 1 }
 0x3a9   :  { %22161 = vst [vmem:[#allocation52_spill] sm:$0xff] %v18905_v56  ;;  %22164 = vst [vmem:[#allocation42_spill] sm:$0xff] %v18910_v25  ;;  %v18927_v58 = vmax.f32 %v22168_v42, %v22169_v37  ;;  %v18932_v16 = vmax.f32 %v22171_v28, %v22172_v44  ;;  %v22181_v43 = vrot.slane %v18225_v29, 1  ;;  %v22183_v34 = vrot.slane %v18239_v55, 1 }
 0x3aa   :  { %22167 = vst [vmem:[#allocation35_spill] sm:$0xff] %v18917_v36  ;;  %v18948_v3 = vmax.f32 %v18183_v33, %v22179_v15  ;;  %v22185_v42 = vrot.slane %v18246_v27, 1  ;;  %v4429_v8 = vrot.slane %v18750_v38, 1  ;;  %v4434_v15 = vrot.slane %v18782_v20, 1 }
 0x3ab   :  { %22170 = vst [vmem:[#allocation37_spill] sm:$0xff] %v18927_v58  ;;  %22173 = vst [vmem:[#allocation53_spill] sm:$0xff] %v18932_v16  ;;  %v18953_v59 = vmax.f32 %v18225_v29, %v22181_v43  ;;  %v18958_v49 = vmax.f32 %v18239_v55, %v22183_v34  ;;  %v4426_v43 = vrot.slane %v18738_v26, 1  ;;  %v4427_v55 = vrot.slane %v18741_v21, 1 }
 0x3ac   :  { %22180 = vst [vmem:[#allocation11_spill] sm:$0xff] %v18948_v3  ;;  %v18963_v37 = vmax.f32 %v18246_v27, %v22185_v42  ;;  %v4428_v34 = vrot.slane %v18747_v46, 1  ;;  %v4430_v27 = vrot.slane %v18756_v5, 1  ;;  %v4431_v42 = vrot.slane %v18763_v14, 1 }
 0x3ad   :  { %22182 = vst [vmem:[#allocation30_spill] sm:$0xff] %v18953_v59  ;;  %22184 = vst [vmem:[#allocation32_spill] sm:$0xff] %v18958_v49  ;;  %v4435_v29 = vrot.slane %v18786_v30, 1  ;;  %v4436_v61 = vrot.slane %v18790_v17, 1  ;;  %v4437_v31 = vrot.slane %v18795_v10, 1  ;;  %v4438_v28 = vrot.slane %v18802_v11, 1 }
 0x3ae   :  { %22186 = vst [vmem:[#allocation21_spill] sm:$0xff] %v18963_v37  ;;  %v4439_v40 = vrot.slane %v18806_v41, 1  ;;  %v4440_v12 = vrot.slane %v18816_v39, 1  ;;  %v4442_v33 = vrot.slane %v18826_v60, 1  ;;  %v4443_v44 = vrot.slane %v18831_v4, 1 }
 0x3af   :  { %v4444_v16 = vrot.slane %v18837_v7, 1  ;;  %v4445_v58 = vrot.slane %v18847_v2, 1  ;;  %v4446_v36 = vrot.slane %v18853_v50, 1  ;;  %v4450_v25 = vrot.slane %v18877_v52, 1 }
 0x3b0   :  { %v4451_v45 = vrot.slane %v18883_v22, 1  ;;  %v4452_v62 = vrot.slane %v18886_v47, 1  ;;  %v4453_v57 = vrot.slane %v18891_v35, 1  ;;  %v4454_v56 = vrot.slane %v18897_v18, 1 }
 0x3b1   :  { %v4490_v54 = vmax.f32 %v18738_v26, %v4426_v43  ;;  %v4491_v24 = vmax.f32 %v18741_v21, %v4427_v55  ;;  %v4492_v32 = vmax.f32 %v18747_v46, %v4428_v34  ;;  %v4493_v19 = vmax.f32 %v18750_v38, %v4429_v8  ;;  %v22189_v43 = vld [vmem:[#allocation15_spill] sm:$0xff] }
 0x3b2   :  { %v4494_v51 = vmax.f32 %v18756_v5, %v4430_v27  ;;  %v4495_v37 = vmax.f32 %v18763_v14, %v4431_v42  ;;  %v4498_v49 = vmax.f32 %v18782_v20, %v4434_v15  ;;  %v4499_v59 = vmax.f32 %v18786_v30, %v4435_v29  ;;  %v22190_v55 = vld [vmem:[#allocation55_spill] sm:$0xff] }
 0x3b3   :  { %v4500_v3 = vmax.f32 %v18790_v17, %v4436_v61  ;;  %v4501_v9 = vmax.f32 %v18795_v10, %v4437_v31  ;;  %v4502_v26 = vmax.f32 %v18802_v11, %v4438_v28  ;;  %v4503_v21 = vmax.f32 %v18806_v41, %v4439_v40 }
 0x3b4   :  { %v4504_v46 = vmax.f32 %v18816_v39, %v4440_v12  ;;  %v4506_v38 = vmax.f32 %v18826_v60, %v4442_v33  ;;  %v4507_v5 = vmax.f32 %v18831_v4, %v4443_v44  ;;  %v4508_v14 = vmax.f32 %v18837_v7, %v4444_v16 }
 0x3b5   :  { %v4509_v20 = vmax.f32 %v18847_v2, %v4445_v58  ;;  %v4554_v8 = vrot.slane %v4491_v24, 7  ;;  %v4510_v30 = vmax.f32 %v18853_v50, %v4446_v36  ;;  %v4515_v17 = vmax.f32 %v18883_v22, %v4451_v45 }
 0x3b6   :  { %v4516_v10 = vmax.f32 %v18886_v47, %v4452_v62  ;;  %v4556_v11 = vrot.slane %v4492_v32, 6  ;;  %v4517_v41 = vmax.f32 %v18891_v35, %v4453_v57  ;;  %v4558_v12 = vrot.slane %v4493_v19, 5 }
 0x3b7   :  { %v4555_v39 = vsel %vm2256_vm5, %v4554_v8, %v4490_v54  ;;  %v4568_v60 = vrot.slane %v4499_v59, 7  ;;  %v4518_v4 = vmax.f32 %v18897_v18, %v4454_v56  ;;  %v4560_v16 = vrot.slane %v4494_v51, 4 }
 0x3b8   :  { %v4557_v7 = vsel %vm2258_vm6, %v4556_v11, %v4555_v39  ;;  %v4570_v2 = vrot.slane %v4500_v3, 6  ;;  %v4562_v50 = vrot.slane %v4495_v37, 3  ;;  %v4572_v36 = vrot.slane %v4501_v9, 5  ;;  %v22201_v39 = vld [vmem:[#allocation27_spill] sm:$0xff] }
 0x3b9   :  { %v4559_v58 = vsel %vm2260_vm7, %v4558_v12, %v4557_v7  ;;  %v4569_v22 = vsel %vm2256_vm5, %v4568_v60, %v4498_v49  ;;  %v4574_v35 = vrot.slane %v4502_v26, 4  ;;  %v4582_v54 = vrot.slane %v4507_v5, 7  ;;  %v22192_v26 = vld [vmem:[#allocation34_spill] sm:$0xff]  ;;  %v22195_v5 = vld [vmem:[#allocation36_spill] sm:$0xff]  ;;  %v22202_v12 = vld [vmem:[#allocation63_spill] sm:$0xff] }
 0x3ba   :  { %v4561_v62 = vsel %vm2603_vm9, %v4560_v16, %v4559_v58  ;;  %v4571_v47 = vsel %vm2258_vm6, %v4570_v2, %v4569_v22  ;;  %v4576_v56 = vrot.slane %v4503_v21, 3  ;;  %v4584_v32 = vrot.slane %v4508_v14, 6  ;;  %v22193_v21 = vld [vmem:[#allocation57_spill] sm:$0xff]  ;;  %v22196_v14 = vld [vmem:[#allocation59_spill] sm:$0xff] }
 0x3bb   :  { %v19027_v19 = vsel %vm2606_vm10, %v4562_v50, %v4561_v62  ;;  %v4573_v18 = vsel %vm2260_vm7, %v4572_v36, %v4571_v47  ;;  %v4578_v31 = vrot.slane %v4504_v46, 2  ;;  %v4583_v24 = vsel %vm2256_vm5, %v4582_v54, %v4506_v38  ;;  %v22204_v7 = vld [vmem:[#allocation41_spill] sm:$0xff]  ;;  %v22207_v50 = vld [vmem:[#allocation54_spill] sm:$0xff]  ;;  %v22211_v54 = vld [vmem:[#allocation56_spill] sm:$0xff] }
 0x3bc   :  { %v4575_v57 = vsel %vm2603_vm9, %v4574_v35, %v4573_v18  ;;  %v4586_v40 = vrot.slane %v4509_v20, 5  ;;  %v4514_v9 = vmax.f32 %v18877_v52, %v4450_v25  ;;  %v4585_v61 = vsel %vm2258_vm6, %v4584_v32, %v4583_v24  ;;  %v22205_v16 = vld [vmem:[#allocation65_spill] sm:$0xff]  ;;  %v22213_v32 = vld [vmem:[#allocation58_spill] sm:$0xff] }
 0x3bd   :  { %v4577_v45 = vsel %vm2606_vm10, %v4576_v56, %v4575_v57  ;;  %v4588_v51 = vrot.slane %v4510_v30, 4  ;;  %v4596_v49 = vrot.slane %v4515_v17, 7  ;;  %v4598_v37 = vrot.slane %v4516_v10, 6  ;;  %v22198_v30 = vld [vmem:[#allocation25_spill] sm:$0xff] }
 0x3be   :  { %v19036_v3 = vsel %vm2609_vm11, %v4578_v31, %v4577_v45  ;;  %v4587_v59 = vsel %vm2260_vm7, %v4586_v40, %v4585_v61  ;;  %v4600_v15 = vrot.slane %v4517_v41, 5  ;;  %v4602_v29 = vrot.slane %v4518_v4, 4  ;;  %v22199_v17 = vld [vmem:[#allocation61_spill] sm:$0xff]  ;;  %v22217_v61 = vld [vmem:[#allocation60_spill] sm:$0xff] }
 0x3bf   :  { %22187 = vst [vmem:[#allocation23_spill] sm:$0xff] %v19036_v3  ;;  %v19043_v52 = vsel %vm2603_vm9, %v4588_v51, %v4587_v59  ;;  %v4597_v25 = vsel %vm2256_vm5, %v4596_v49, %v4514_v9  ;;  %v22191_v34 = vrot.slane %v22190_v55, 7  ;;  %v22194_v46 = vrot.slane %v22193_v21, 7  ;;  %v22219_v49 = vld [vmem:[#allocation62_spill] sm:$0xff] }
 0x3c0   :  { %22188 = vst [vmem:[#allocation39_spill] sm:$0xff] %v19043_v52  ;;  %v4599_v42 = vsel %vm2258_vm6, %v4598_v37, %v4597_v25  ;;  %v22197_v20 = vrot.slane %v22196_v14, 7  ;;  %v22200_v10 = vrot.slane %v22199_v17, 7  ;;  %v22203_v60 = vrot.slane %v22202_v12, 7 }
 0x3c1   :  { %v5261_v27 = vsel %vm2256_vm5, %v22191_v34, %v22189_v43  ;;  %v5264_v38 = vsel %vm2256_vm5, %v22194_v46, %v22192_v26  ;;  %v4601_v41 = vsel %vm2260_vm7, %v4600_v15, %v4599_v42  ;;  %v22206_v2 = vrot.slane %v22205_v16, 7  ;;  %v22223_v42 = vld [vmem:[#allocation64_spill] sm:$0xff] }
 0x3c2   :  { %v5267_v8 = vsel %vm2256_vm5, %v22197_v20, %v22195_v5  ;;  %v5270_v11 = vsel %vm2256_vm5, %v22200_v10, %v22198_v30  ;;  %v5273_v4 = vsel %vm2256_vm5, %v22203_v60, %v22201_v39  ;;  %v22208_v22 = vrot.slane %v22207_v50, 2 }
 0x3c3   :  { %v5276_v58 = vsel %vm2256_vm5, %v22206_v2, %v22204_v7  ;;  %v19076_v62 = vsel %vm2603_vm9, %v4602_v29, %v4601_v41  ;;  %v22210_v47 = vrot.slane %v22190_v55, 1  ;;  %v22212_v18 = vrot.slane %v22211_v54, 2 }
 0x3c4   :  { %v5308_v36 = vsel %vm2323_vm8, %v22208_v22, 0.0  ;;  %22209 = vst [vmem:[#allocation40_spill] sm:$0xff] %v19076_v62  ;;  %v22214_v57 = vrot.slane %v22213_v32, 2  ;;  %v22215_v24 = vrot.slane %v22193_v21, 1  ;;  %v22216_v9 = vrot.slane %v22196_v14, 1 }
 0x3c5   :  { %v5310_v35 = vsel %vm2256_vm5, %v22210_v47, %v5308_v36  ;;  %v5312_v56 = vsel %vm2323_vm8, %v22212_v18, 0.0  ;;  %v22218_v51 = vrot.slane %v22217_v61, 2  ;;  %v22220_v37 = vrot.slane %v22219_v49, 2 }
 0x3c6   :  { %v5316_v31 = vsel %vm2323_vm8, %v22214_v57, 0.0  ;;  %v5314_v40 = vsel %vm2256_vm5, %v22215_v24, %v5312_v56  ;;  %v22221_v15 = vrot.slane %v22199_v17, 1  ;;  %v22222_v43 = vrot.slane %v22202_v12, 1 }
 0x3c7   :  { %v5318_v45 = vsel %vm2256_vm5, %v22216_v9, %v5316_v31  ;;  %v5320_v59 = vsel %vm2323_vm8, %v22218_v51, 0.0  ;;  %v5324_v25 = vsel %vm2323_vm8, %v22220_v37, 0.0  ;;  %v22224_v26 = vrot.slane %v22223_v42, 2 }
 0x3c8   :  { %v5322_v29 = vsel %vm2256_vm5, %v22221_v15, %v5320_v59  ;;  %v5326_v34 = vsel %vm2256_vm5, %v22222_v43, %v5324_v25  ;;  %v22225_v5 = vrot.slane %v22207_v50, 3  ;;  %v22226_v30 = vrot.slane %v22205_v16, 1 }
 0x3c9   :  { %v5328_v46 = vsel %vm2323_vm8, %v22224_v26, 0.0  ;;  %v22227_v41 = vrot.slane %v22190_v55, 2  ;;  %v22228_v60 = vrot.slane %v22211_v54, 3  ;;  %v22229_v2 = vrot.slane %v22213_v32, 3 }
 0x3ca   :  { %v5340_v20 = vsel %vm2323_vm8, %v22225_v5, 0.0  ;;  %v19114_v10 = vsel %vm2256_vm5, %v22226_v30, %v5328_v46  ;;  %v22230_v50 = vrot.slane %v22193_v21, 2  ;;  %v22231_v47 = vrot.slane %v22196_v14, 2 }
 0x3cb   :  { %v5342_v39 = vsel %vm2256_vm5, %v22227_v41, %v5340_v20  ;;  %v5344_v7 = vsel %vm2323_vm8, %v22228_v60, 0.0  ;;  %v5348_v22 = vsel %vm2323_vm8, %v22229_v2, 0.0  ;;  %v22232_v55 = vrot.slane %v22217_v61, 3 }
 0x3cc   :  { %v5346_v36 = vsel %vm2256_vm5, %v22230_v50, %v5344_v7  ;;  %v5350_v18 = vsel %vm2256_vm5, %v22231_v47, %v5348_v22  ;;  %v22233_v54 = vrot.slane %v22219_v49, 3  ;;  %v22234_v31 = vrot.slane %v22199_v17, 2 }
 0x3cd   :  { %v5352_v56 = vsel %vm2323_vm8, %v22232_v55, 0.0  ;;  %v22235_v24 = vrot.slane %v22202_v12, 2  ;;  %v22236_v9 = vrot.slane %v22223_v42, 3  ;;  %v22237_v51 = vrot.slane %v18769_v23, 1  ;;  %v22242_v42 = vld [vmem:[#allocation51_spill] sm:$0xff] }
 0x3ce   :  { %v5356_v57 = vsel %vm2323_vm8, %v22233_v54, 0.0  ;;  %v5354_v21 = vsel %vm2256_vm5, %v22234_v31, %v5352_v56  ;;  %v22238_v49 = vrot.slane %v18772_v0, 1  ;;  %v22239_v17 = vrot.slane %v18823_v63, 1 }
 0x3cf   :  { %v5358_v14 = vsel %vm2256_vm5, %v22235_v24, %v5356_v57  ;;  %v5360_v61 = vsel %vm2323_vm8, %v22236_v9, 0.0  ;;  %v19150_v59 = vmax.f32 %v18769_v23, %v22237_v51  ;;  %v22240_v25 = vrot.slane %v22205_v16, 2 }
 0x3d0   :  { %v19155_v37 = vmax.f32 %v18772_v0, %v22238_v49  ;;  %v19160_v12 = vmax.f32 %v18823_v63, %v22239_v17  ;;  %v22241_v43 = vrot.slane %v18856_v1, 1  ;;  %v22243_v26 = vrot.slane %v22242_v42, 1 }
 0x3d1   :  { %v19165_v15 = vsel %vm2256_vm5, %v22240_v25, %v5360_v61  ;;  %v5404_v46 = vrot.slane %v5264_v38, 1  ;;  %v5405_v5 = vrot.slane %v5267_v8, 1  ;;  %v5406_v20 = vrot.slane %v5270_v11, 1 }
 0x3d2   :  { %v19170_v23 = vmax.f32 %v18856_v1, %v22241_v43  ;;  %v19175_v0 = vmax.f32 %v22242_v42, %v22243_v26  ;;  %v5407_v63 = vrot.slane %v5273_v4, 1  ;;  %v5420_v30 = vrot.slane %v5314_v40, 1 }
 0x3d3   :  { %v5421_v41 = vrot.slane %v5318_v45, 1  ;;  %v5403_v16 = vrot.slane %v5261_v27, 1  ;;  %v5408_v60 = vrot.slane %v5276_v58, 1  ;;  %v5422_v7 = vrot.slane %v5322_v29, 1 }
 0x3d4   :  { %v5428_v2 = vrot.slane %v5346_v36, 1  ;;  %v5419_v22 = vrot.slane %v5310_v35, 1  ;;  %v5423_v50 = vrot.slane %v5326_v34, 1  ;;  %v5427_v47 = vrot.slane %v5342_v39, 1 }
 0x3d5   :  { %v5429_v1 = vrot.slane %v5350_v18, 1  ;;  %v5430_v55 = vrot.slane %v5354_v21, 1  ;;  %v5431_v56 = vrot.slane %v5358_v14, 1  ;;  %v5468_v54 = vmax.f32 %v5264_v38, %v5404_v46 }
 0x3d6   :  { %v5469_v57 = vmax.f32 %v5267_v8, %v5405_v5  ;;  %v5470_v31 = vmax.f32 %v5270_v11, %v5406_v20  ;;  %v5471_v24 = vmax.f32 %v5273_v4, %v5407_v63  ;;  %v5484_v9 = vmax.f32 %v5314_v40, %v5420_v30  ;;  %v11314_v5 = vld [vmem:[%s21698_s2 + $0x210] sm:$0xff]  ;;  %v11315_v20 = vld [vmem:[%s21698_s2 + $0x218] sm:$0xff] }
 0x3d7   :  { %v5485_v61 = vmax.f32 %v5318_v45, %v5421_v41  ;;  %v5467_v51 = vmax.f32 %v5261_v27, %v5403_v16  ;;  %v5472_v49 = vmax.f32 %v5276_v58, %v5408_v60  ;;  %v5486_v17 = vmax.f32 %v5322_v29, %v5422_v7  ;;  %v11264_v58 = vld [vmem:[%s21698_s2 + $0x80] sm:$0xff] }
 0x3d8   :  { %v5492_v25 = vmax.f32 %v5346_v36, %v5428_v2  ;;  %v5483_v43 = vmax.f32 %v5310_v35, %v5419_v22  ;;  %v5487_v42 = vmax.f32 %v5326_v34, %v5423_v50  ;;  %v5491_v26 = vmax.f32 %v5342_v39, %v5427_v47  ;;  %v11265_v35 = vld [vmem:[%s21698_s2 + $0x88] sm:$0xff]  ;;  %v11268_v47 = vld [vmem:[%s21698_s2 + $0xa0] sm:$0xff] }
 0x3d9   :  { %v5493_v32 = vmax.f32 %v5350_v18, %v5429_v1  ;;  %v5494_v44 = vmax.f32 %v5354_v21, %v5430_v55  ;;  %v5495_v33 = vmax.f32 %v5358_v14, %v5431_v56  ;;  %v5531_v28 = vrot.slane %v5468_v54, 7  ;;  %v11313_v36 = vld [vmem:[%s21698_s2 + $0x208] sm:$0xff]  ;;  %v11266_v18 = vld [vmem:[%s21698_s2 + $0x90] sm:$0xff]  ;;  %v22244_v1 = vld [vmem:[#allocation11_spill] sm:$0xff] }
 0x3da   :  { %v5533_v62 = vrot.slane %v5469_v57, 6  ;;  %v5535_v52 = vrot.slane %v5470_v31, 5  ;;  %v5537_v3 = vrot.slane %v5471_v24, 4  ;;  %v5559_v38 = vrot.slane %v5484_v9, 7  ;;  %v22245_v56 = vld [vmem:[#allocation30_spill] sm:$0xff]  ;;  %v22246_v57 = vld [vmem:[#allocation32_spill] sm:$0xff] }
 0x3db   :  { %v5561_v8 = vrot.slane %v5485_v61, 6  ;;  %v5532_v11 = vsel %vm2256_vm5, %v5531_v28, %v5467_v51  ;;  %v5539_v4 = vrot.slane %v5472_v49, 3  ;;  %v5563_v40 = vrot.slane %v5486_v17, 5  ;;  %v11312_v28 = vld [vmem:[%s21698_s2 + $0x200] sm:$0xff]  ;;  %v11317_v61 = vld [vmem:[%s21698_s2 + $0x228] sm:$0xff]  ;;  %v22247_v51 = vld [vmem:[#allocation21_spill] sm:$0xff] }
 0x3dc   :  { %v5573_v27 = vrot.slane %v5492_v25, 7  ;;  %v5534_v45 = vsel %vm2258_vm6, %v5533_v62, %v5532_v11  ;;  %v5560_v29 = vsel %vm2256_vm5, %v5559_v38, %v5483_v43  ;;  %v5565_v34 = vrot.slane %v5487_v42, 4  ;;  %v11316_v9 = vld [vmem:[%s21698_s2 + $0x220] sm:$0xff] }
 0x3dd   :  { %v5575_v39 = vrot.slane %v5493_v32, 6  ;;  %v5536_v21 = vsel %vm2260_vm7, %v5535_v52, %v5534_v45  ;;  %v5562_v62 = vsel %vm2258_vm6, %v5561_v8, %v5560_v29  ;;  %v5577_v46 = vrot.slane %v5494_v44, 5  ;;  %v11267_v32 = vld [vmem:[%s21698_s2 + $0x98] sm:$0xff]  ;;  %v11318_v45 = vld [vmem:[%s21698_s2 + $0x230] sm:$0xff] }
 0x3de   :  { %v5574_v14 = vsel %vm2256_vm5, %v5573_v27, %v5491_v26  ;;  %v5538_v63 = vsel %vm2603_vm9, %v5537_v3, %v5536_v21  ;;  %v5564_v52 = vsel %vm2260_vm7, %v5563_v40, %v5562_v62  ;;  %v5579_v41 = vrot.slane %v5495_v33, 4  ;;  %v11269_v33 = vld [vmem:[%s21698_s2 + $0xa8] sm:$0xff]  ;;  %v11270_v40 = vld [vmem:[%s21698_s2 + $0xb0] sm:$0xff]  ;;  %v11319_v29 = vld [vmem:[%s21698_s2 + $0x238] sm:$0xff] }
 0x3df   :  { %v5576_v30 = vsel %vm2258_vm6, %v5575_v39, %v5574_v14  ;;  %v19211_v44 = vsel %vm2606_vm10, %v5539_v4, %v5538_v63  ;;  %v19214_v16 = vsel %vm2603_vm9, %v5565_v34, %v5564_v52  ;;  %v14152_v7 = vpack.c.bf16 %v11265_v35, %v11264_v58  ;;  %v22253_v34 = vld [vmem:[#allocation19_spill] sm:$0xff]  ;;  %v22258_v62 = vld [vmem:[#allocation28_spill] sm:$0xff] }
 0x3e0   :  { %v5578_v60 = vsel %vm2260_vm7, %v5577_v46, %v5576_v30  ;;  %v14280_v22 = vpack.c.bf16 %v11313_v36, %v11312_v28  ;;  %v14156_v50 = vpack.c.bf16 %v11267_v32, %v11266_v18  ;;  %v14284_v3 = vpack.c.bf16 %v11315_v20, %v11314_v5  ;;  %v22255_v28 = vld [vmem:[#allocation47_spill] sm:$0xff]  ;;  %v22256_v36 = vld [vmem:[#allocation38_spill] sm:$0xff]  ;;  %v22263_v52 = vld [vmem:[#allocation20_spill] sm:$0xff] }
 0x3e1   :  { %v19218_v2 = vsel %vm2603_vm9, %v5579_v41, %v5578_v60  ;;  %v3617_v55 = vrot.slane %v22244_v1, 1  ;;  %v3627_v54 = vrot.slane %v22245_v56, 3  ;;  %v3629_v31 = vrot.slane %v22246_v57, 2  ;;  %14153 = vmatprep.subr.bf16.mxu1 %v14152_v7  ;;  %v22260_v32 = vld [vmem:[#allocation6_spill] sm:$0xff]  ;;  %v22261_v5 = vld [vmem:[#allocation43_spill] sm:$0xff]  ;;  %v22264_v30 = vld [vmem:[#allocation52_spill] sm:$0xff] }
 0x3e2   :  { %v5424_v24 = vrot.slane %v19114_v10, 1  ;;  %v3631_v49 = vrot.slane %v22247_v51, 1  ;;  %v22248_v17 = vrot.slane %v18867_v13, 1  ;;  %v22249_v43 = vrot.slane %v18920_v48, 1  ;;  %14281 = vmatprep.subr.bf16.mxu0 %v14280_v22  ;;  %14155 = vmatpush3.bf16.msra.mxu1 %v14152_v7  ;;  %v11275_v1 = vld [vmem:[%s21698_s2 + $0xd8] sm:$0xff] }
 0x3e3   :  { %v22250_v26 = vrot.slane %v18935_v6, 1  ;;  %v22251_v8 = vrot.slane %v18938_v53, 1  ;;  %v4566_v4 = vrot.slane %v19155_v37, 1  ;;  %14283 = vmatpush3.bf16.msra.mxu0 %v14280_v22  ;;  %14157 = vmatprep.subr.bf16.mxu1 %v14156_v50  ;;  %v4580_v27 = vrot.slane %v19160_v12, 1  ;;  %v22252_v12 = vld [vmem:[#allocation46_spill] sm:$0xff]  ;;  %v22266_v22 = vld [vmem:[#allocation29_spill] sm:$0xff] }
 0x3e4   :  { %v19240_v25 = vmax.f32 %v18867_v13, %v22248_v17  ;;  %v19245_v42 = vmax.f32 %v18920_v48, %v22249_v43  ;;  %v4564_v13 = vrot.slane %v19150_v59, 2  ;;  %v14160_v48 = vpack.c.bf16 %v11269_v33, %v11268_v47  ;;  %14285 = vmatprep.subr.bf16.mxu0 %v14284_v3  ;;  %v22268_v33 = vld [vmem:[#allocation8_spill] sm:$0xff] }
 0x3e5   :  { %v19250_v38 = vmax.f32 %v18935_v6, %v22250_v26  ;;  %v19255_v11 = vmax.f32 %v18938_v53, %v22251_v8  ;;  %v11271_v6 = vld [vmem:[%s21698_s2 + $0xb8] sm:$0xff]  ;;  %v4590_v53 = vrot.slane %v19170_v23, 3  ;;  %v4592_v58 = vrot.slane %v19175_v0, 2 }
 0x3e6   :  { %v14288_v59 = vpack.c.bf16 %v11317_v61, %v11316_v9  ;;  %v5432_v37 = vrot.slane %v19165_v15, 1  ;;  %v19270_v35 = vmax.f32 %v19114_v10, %v5424_v24  ;;  %v22254_v23 = vrot.slane %v22253_v34, 1  ;;  %14159 = vmatpush3.bf16.msra.mxu1 %v14156_v50  ;;  %v22270_v9 = vld [vmem:[#allocation42_spill] sm:$0xff]  ;;  %v22277_v34 = vld [vmem:[#allocation9_spill] sm:$0xff] }
 0x3e7   :  { %v22257_v18 = vrot.slane %v22256_v36, 3  ;;  %v14164_v21 = vpack.c.bf16 %v11271_v6, %v11270_v40  ;;  %v22259_v14 = vrot.slane %v22258_v62, 2  ;;  %v22262_v20 = vrot.slane %v22261_v5, 3  ;;  %14287 = vmatpush3.bf16.msra.mxu0 %v14284_v3  ;;  %14161 = vmatprep.subr.bf16.mxu1 %v14160_v48  ;;  %v11272_v3 = vld [vmem:[%s21698_s2 + $0xc0] sm:$0xff]  ;;  %v22272_v26 = vld [vmem:[#allocation10_spill] sm:$0xff] }
 0x3e8   :  { %v19282_v39 = vsel %vm2612_vm12, %v22254_v23, %v22252_v12  ;;  %v22265_v41 = vrot.slane %v22264_v30, 2  ;;  %v4594_v7 = vrot.slane %v19240_v25, 1  ;;  %v22267_v50 = vrot.slane %v22266_v22, 1  ;;  %14289 = vmatprep.subr.bf16.mxu0 %v14288_v59  ;;  %v11273_v25 = vld [vmem:[%s21698_s2 + $0xc8] sm:$0xff]  ;;  %v22274_v6 = vld [vmem:[#allocation22_spill] sm:$0xff]  ;;  %v22275_v12 = vld [vmem:[#allocation35_spill] sm:$0xff] }
 0x3e9   :  { %v2637_v10 = vsel %vm2606_vm10, %v22257_v18, %v22255_v28  ;;  %2662 = vst [vmem:[#allocation4 + $0x21] sm:$0xff] %v19282_v39  ;;  %v2651_v63 = vsel %vm2606_vm10, %v22262_v20, %v22260_v32  ;;  %v22269_v56 = vrot.slane %v22268_v33, 2  ;;  %v22271_v61 = vrot.slane %v22270_v9, 1  ;;  %v22278_v23 = vld [vmem:[#allocation37_spill] sm:$0xff]  ;;  %v11320_v62 = vld [vmem:[%s21698_s2 + $0x240] sm:$0xff]  ;;  %v22282_v20 = vld [vmem:[#allocation50_spill] sm:$0xff] }
 0x3ea   :  { %v2639_v46 = vsel %vm2609_vm11, %v22259_v14, %v2637_v10  ;;  %v3588_v60 = vsel %vm2609_vm11, %v22265_v41, %v22263_v52  ;;  %v14292_v43 = vpack.c.bf16 %v11319_v29, %v11318_v45  ;;  %v22273_v8 = vrot.slane %v22272_v26, 1  ;;  %v11321_v14 = vld [vmem:[%s21698_s2 + $0x248] sm:$0xff]  ;;  %14163 = vmatpush3.bf16.msra.mxu1 %v14160_v48  ;;  %v22284_v48 = vld [vmem:[#allocation39_spill] sm:$0xff] }
 0x3eb   :  { %v19304_v47 = vsel %vm2612_vm12, %v22267_v50, %v2639_v46  ;;  %v2653_v24 = vsel %vm2609_vm11, %v22269_v56, %v2651_v63  ;;  %v19312_v17 = vsel %vm2612_vm12, %v22271_v61, %v3588_v60  ;;  %v22276_v45 = vrot.slane %v22275_v12, 1  ;;  %v22280_v46 = vld [vmem:[#allocation53_spill] sm:$0xff]  ;;  %14291 = vmatpush3.bf16.msra.mxu0 %v14288_v59  ;;  %14165 = vmatprep.subr.bf16.mxu1 %v14164_v21  ;;  %v11323_v59 = vld [vmem:[%s21698_s2 + $0x258] sm:$0xff]  ;;  %v11276_v12 = vld [vmem:[%s21698_s2 + $0xe0] sm:$0xff] }
 0x3ec   :  { %2663 = vst [vmem:[#allocation4 + $0x31] sm:$0xff] %v19304_v47  ;;  %v19324_v40 = vsel %vm2612_vm12, %v22273_v8, %v2653_v24  ;;  %3638 = vst [vmem:[#allocation4 + $0x51] sm:$0xff] %v19312_v17  ;;  %v22279_v28 = vrot.slane %v22278_v23, 3  ;;  %v4604_v18 = vrot.slane %v19245_v42, 3  ;;  %v5496_v10 = vmax.f32 %v19165_v15, %v5432_v37  ;;  %14293 = vmatprep.subr.bf16.mxu0 %v14292_v43  ;;  %v22288_v24 = vld [vmem:[#allocation67_spill] sm:$0xff]  ;;  %v22294_v8 = vld [vmem:[#allocation73_spill] sm:$0xff] }
 0x3ed   :  { %v19331_v29 = vsel %vm2612_vm12, %v22276_v45, %v22274_v6  ;;  %2664 = vst [vmem:[#allocation4 + $0x41] sm:$0xff] %v19324_v40  ;;  %v22281_v32 = vrot.slane %v22280_v46, 2  ;;  %v3628_v42 = vsel %vm2606_vm10, %v3627_v54, %v22282_v20  ;;  %v4606_v15 = vrot.slane %v19250_v38, 2  ;;  %v11274_v38 = vld [vmem:[%s21698_s2 + $0xd0] sm:$0xff]  ;;  %v11277_v45 = vld [vmem:[%s21698_s2 + $0xe8] sm:$0xff] }
 0x3ee   :  { %v3614_v36 = vsel %vm2606_vm10, %v22279_v28, %v22277_v34  ;;  %3639 = vst [vmem:[#allocation4 + $0x61] sm:$0xff] %v19331_v29  ;;  %v3630_v63 = vsel %vm2609_vm11, %v3629_v31, %v3628_v42  ;;  %v4565_v52 = vsel %vm2609_vm11, %v4564_v13, %v19027_v19  ;;  %v4608_v30 = vrot.slane %v19255_v11, 1  ;;  %v22283_v11 = vld [vmem:[#allocation23_spill] sm:$0xff]  ;;  %14167 = vmatpush3.bf16.msra.mxu1 %v14164_v21  ;;  %v22295_v34 = vld [vmem:[#allocation69_spill] sm:$0xff]  ;;  %v11279_v42 = vld [vmem:[%s21698_s2 + $0xf8] sm:$0xff] }
 0x3ef   :  { %v3616_v5 = vsel %vm2609_vm11, %v22281_v32, %v3614_v36  ;;  %v14168_v54 = vpack.c.bf16 %v11273_v25, %v11272_v3  ;;  %v19377_v19 = vsel %vm2612_vm12, %v4566_v4, %v4565_v52  ;;  %v5567_v57 = vrot.slane %v19270_v35, 3  ;;  %v11322_v4 = vld [vmem:[%s21698_s2 + $0x250] sm:$0xff]  ;;  %14295 = vmatpush3.bf16.msra.mxu0 %v14292_v43  ;;  %v22291_v21 = vld [vmem:[#allocation71_spill] sm:$0xff] }
 0x3f0   :  { %v19356_v37 = vsel %vm2612_vm12, %v3617_v55, %v3616_v5  ;;  %v19374_v55 = vsel %vm2612_vm12, %v3631_v49, %v3630_v63  ;;  %v14296_v31 = vpack.c.bf16 %v11321_v14, %v11320_v62  ;;  %4615 = vst [vmem:[#allocation4 + $0xb1] sm:$0xff] %v19377_v19  ;;  %v19384_v13 = vsel %vm2612_vm12, %v4580_v27, %v22283_v11  ;;  %v22285_v27 = vld [vmem:[#allocation40_spill] sm:$0xff]  ;;  %v11324_v36 = vld [vmem:[%s21698_s2 + $0x260] sm:$0xff]  ;;  %v11278_v20 = vld [vmem:[%s21698_s2 + $0xf0] sm:$0xff] }
 0x3f1   :  { %3640 = vst [vmem:[#allocation4 + $0x71] sm:$0xff] %v19356_v37  ;;  %3641 = vst [vmem:[#allocation4 + $0x81] sm:$0xff] %v19374_v55  ;;  %v4591_v51 = vsel %vm2606_vm10, %v4590_v53, %v22284_v48  ;;  %v5581_v49 = vrot.slane %v5496_v10, 3  ;;  %v4605_v41 = vsel %vm2606_vm10, %v4604_v18, %v22285_v27  ;;  %v22286_v53 = vld [vmem:[#allocation66_spill] sm:$0xff]  ;;  %v14172_v50 = vpack.c.bf16 %v11275_v1, %v11274_v38  ;;  %v11325_v18 = vld [vmem:[%s21698_s2 + $0x268] sm:$0xff] }
 0x3f2   :  { %4616 = vst [vmem:[#allocation4 + $0xc1] sm:$0xff] %v19384_v13  ;;  %v4593_v35 = vsel %vm2609_vm11, %v4592_v58, %v4591_v51  ;;  %v22287_v60 = vrot.slane %v22286_v53, 2  ;;  %v4607_v56 = vsel %vm2609_vm11, %v4606_v15, %v4605_v41  ;;  %v22289_v9 = vrot.slane %v22288_v24, 1  ;;  %v22290_v58 = vld [vmem:[#allocation72_spill] sm:$0xff]  ;;  %14169 = vmatprep.subr.bf16.mxu1 %v14168_v54  ;;  %14297 = vmatprep.subr.bf16.mxu0 %v14296_v31  ;;  %v22297_v10 = vld [vmem:[#allocation70_spill] sm:$0xff]  ;;  %v11326_v15 = vld [vmem:[%s21698_s2 + $0x270] sm:$0xff] }
 0x3f3   :  { %v19405_v33 = vsel %vm2612_vm12, %v4594_v7, %v4593_v35  ;;  %v5583_v61 = vrot.slane %v22290_v58, 2  ;;  %v22292_v7 = vld [vmem:[#allocation68_spill] sm:$0xff]  ;;  %v5568_v26 = vsel %vm2606_vm10, %v5567_v57, %v19214_v16  ;;  %v5585_v6 = vrot.slane %v22294_v8, 1  ;;  %14171 = vmatpush3.bf16.msra.mxu1 %v14168_v54  ;;  %14299 = vmatpush3.bf16.msra.mxu0 %v14296_v31  ;;  %v11327_v63 = vld [vmem:[%s21698_s2 + $0x278] sm:$0xff]  ;;  %v5612_v54 = vld [vmem:[%s21698_s2] sm:$0xff] }
 0x3f4   :  { %v5542_v22 = vsel %vm2609_vm11, %v22287_v60, %v19211_v44  ;;  %4617 = vst [vmem:[#allocation4 + $0xd1] sm:$0xff] %v19405_v33  ;;  %v19416_v44 = vsel %vm2612_vm12, %v4608_v30, %v4607_v56  ;;  %v22293_v3 = vrot.slane %v22292_v7, 1  ;;  %v14300_v43 = vpack.c.bf16 %v11323_v59, %v11322_v4  ;;  %14173 = vmatprep.subr.bf16.mxu1 %v14172_v50  ;;  %v5613_v38 = vld [vmem:[%s21698_s2 + $0x8] sm:$0xff]  ;;  %v11328_v1 = vld [vmem:[%s21698_s2 + $0x280] sm:$0xff]  ;;  %v5614_v48 = vld [vmem:[%s21698_s2 + $0x10] sm:$0xff] }
 0x3f5   :  { %v19411_v0 = vsel %vm2612_vm12, %v22289_v9, %v5542_v22  ;;  %4618 = vst [vmem:[#allocation4 + $0xe1] sm:$0xff] %v19416_v44  ;;  %v22296_v23 = vrot.slane %v22295_v34, 2  ;;  %v5582_v28 = vsel %vm2606_vm10, %v5581_v49, %v19218_v2  ;;  %v22298_v62 = vrot.slane %v22297_v10, 1  ;;  %v11329_v57 = vld [vmem:[%s21698_s2 + $0x288] sm:$0xff]  ;;  %v5615_v51 = vld [vmem:[%s21698_s2 + $0x18] sm:$0xff]  ;;  %v11330_v49 = vld [vmem:[%s21698_s2 + $0x290] sm:$0xff] }
 0x3f6   :  { %5592 = vst [vmem:[#allocation4 + $0xf1] sm:$0xff] %v19411_v0  ;;  %v19423_v25 = vsel %vm2612_vm12, %v22293_v3, %v22291_v21  ;;  %v5584_v46 = vsel %vm2609_vm11, %v5583_v61, %v5582_v28  ;;  %v14176_v32 = vpack.c.bf16 %v11277_v45, %v11276_v12  ;;  %14301 = vmatprep.subr.bf16.mxu0 %v14300_v43  ;;  %v11331_v4 = vld [vmem:[%s21698_s2 + $0x298] sm:$0xff]  ;;  %v5616_v35 = vld [vmem:[%s21698_s2 + $0x20] sm:$0xff]  ;;  %v5617_v27 = vld [vmem:[%s21698_s2 + $0x28] sm:$0xff] }
 0x3f7   :  { %5593 = vst [vmem:[#allocation4 + $0x101] sm:$0xff] %v19423_v25  ;;  %v5570_v16 = vsel %vm2609_vm11, %v22296_v23, %v5568_v26  ;;  %v19455_v2 = vsel %vm2612_vm12, %v5585_v6, %v5584_v46  ;;  %v14304_v5 = vpack.c.bf16 %v11325_v18, %v11324_v36  ;;  %14175 = vmatpush3.bf16.msra.mxu1 %v14172_v50  ;;  %v15413_v41 = vld [vmem:[#allocation4 + $0x11] sm:$0xff]  ;;  %v5618_v56 = vld [vmem:[%s21698_s2 + $0x30] sm:$0xff]  ;;  %v5619_v24 = vld [vmem:[%s21698_s2 + $0x38] sm:$0xff] }
 0x3f8   :  { %v19450_v14 = vsel %vm2612_vm12, %v22298_v62, %v5570_v16  ;;  %5595 = vst [vmem:[#allocation4 + $0x121] sm:$0xff] %v19455_v2  ;;  %14303 = vmatpush3.bf16.msra.mxu0 %v14300_v43  ;;  %14177 = vmatprep.subr.bf16.mxu1 %v14176_v32  ;;  %v14180_v52 = vpack.c.bf16 %v11279_v42, %v11278_v20  ;;  %v11332_v60 = vld [vmem:[%s21698_s2 + $0x2a0] sm:$0xff]  ;;  %v11333_v22 = vld [vmem:[%s21698_s2 + $0x2a8] sm:$0xff]  ;;  %v11334_v58 = vld [vmem:[%s21698_s2 + $0x2b0] sm:$0xff] }
 0x3f9   :  { %5594 = vst [vmem:[#allocation4 + $0x111] sm:$0xff] %v19450_v14  ;;  %14305 = vmatprep.subr.bf16.mxu0 %v14304_v5  ;;  %v14308_v30 = vpack.c.bf16 %v11327_v63, %v11326_v15  ;;  %v14184_v31 = vpack.c.bf16 %v5613_v38, %v5612_v54  ;;  %v14312_v11 = vpack.c.bf16 %v11329_v57, %v11328_v1  ;;  %v11335_v61 = vld [vmem:[%s21698_s2 + $0x2b8] sm:$0xff]  ;;  %v5620_v7 = vld [vmem:[%s21698_s2 + $0x40] sm:$0xff]  ;;  %v5621_v3 = vld [vmem:[%s21698_s2 + $0x48] sm:$0xff] }
 0x3fa   :  { %v14188_v59 = vpack.c.bf16 %v5615_v51, %v5614_v48  ;;  %v14316_v53 = vpack.c.bf16 %v11331_v4, %v11330_v49  ;;  %v14192_v50 = vpack.c.bf16 %v5617_v27, %v5616_v35  ;;  %v14320_v9 = vpack.c.bf16 %v11333_v22, %v11332_v60  ;;  %v11336_v8 = vld [vmem:[%s21698_s2 + $0x2c0] sm:$0xff]  ;;  %v11337_v6 = vld [vmem:[%s21698_s2 + $0x2c8] sm:$0xff]  ;;  %v5636_v43 = vld [vmem:[#allocation4 + $0xa1] sm:$0xff] }
 0x3fb   :  { %14179 = vmatpush3.bf16.msra.mxu1 %v14176_v32  ;;  %v14196_v21 = vpack.c.bf16 %v5619_v24, %v5618_v56  ;;  %v14324_v26 = vpack.c.bf16 %v11335_v61, %v11334_v58  ;;  %v14200_v12 = vpack.c.bf16 %v5621_v3, %v5620_v7  ;;  %v5622_v45 = vld [vmem:[%s21698_s2 + $0x50] sm:$0xff]  ;;  %v5623_v34 = vld [vmem:[%s21698_s2 + $0x58] sm:$0xff]  ;;  %v14328_v23 = vpack.c.bf16 %v11337_v6, %v11336_v8  ;;  %v5624_v18 = vld [vmem:[%s21698_s2 + $0x60] sm:$0xff] }
 0x3fc   :  { %14307 = vmatpush3.bf16.msra.mxu0 %v14304_v5  ;;  %14181 = vmatprep.subr.bf16.mxu1 %v14180_v52  ;;  %v11338_v16 = vld [vmem:[%s21698_s2 + $0x2d0] sm:$0xff]  ;;  %v11339_v28 = vld [vmem:[%s21698_s2 + $0x2d8] sm:$0xff]  ;;  %v14204_v36 = vpack.c.bf16 %v5623_v34, %v5622_v45  ;;  %v5625_v10 = vld [vmem:[%s21698_s2 + $0x68] sm:$0xff] }
 0x3fd   :  { %14309 = vmatprep.subr.bf16.mxu0 %v14308_v30  ;;  %v14332_v62 = vpack.c.bf16 %v11339_v28, %v11338_v16  ;;  %v11340_v46 = vld [vmem:[%s21698_s2 + $0x2e0] sm:$0xff]  ;;  %v11341_v32 = vld [vmem:[%s21698_s2 + $0x2e8] sm:$0xff]  ;;  %v14208_v5 = vpack.c.bf16 %v5625_v10, %v5624_v18  ;;  %v5627_v20 = vld [vmem:[%s21698_s2 + $0x78] sm:$0xff] }
 0x3fe   :  { %v14336_v42 = vpack.c.bf16 %v11341_v32, %v11340_v46  ;;  %v11342_v15 = vld [vmem:[%s21698_s2 + $0x2f0] sm:$0xff]  ;;  %v11343_v63 = vld [vmem:[%s21698_s2 + $0x2f8] sm:$0xff]  ;;  %v11281_v54 = vld [vmem:[%s21698_s2 + $0x108] sm:$0xff] }
 0x3ff   :  { %14183 = vmatpush3.bf16.msra.mxu1 %v14180_v52  ;;  %v14340_v38 = vpack.c.bf16 %v11343_v63, %v11342_v15  ;;  %v11344_v1 = vld [vmem:[%s21698_s2 + $0x300] sm:$0xff]  ;;  %v11345_v57 = vld [vmem:[%s21698_s2 + $0x308] sm:$0xff]  ;;  %v11283_v48 = vld [vmem:[%s21698_s2 + $0x118] sm:$0xff] }
 0x400   :  { %14311 = vmatpush3.bf16.msra.mxu0 %v14308_v30  ;;  %14185 = vmatprep.subr.bf16.mxu1 %v14184_v31  ;;  %v11280_v30 = vld [vmem:[%s21698_s2 + $0x100] sm:$0xff]  ;;  %v14344_v51 = vpack.c.bf16 %v11345_v57, %v11344_v1  ;;  %v19611_v49 = vld [vmem:[#allocation4] sm:$0xff]  ;;  %v11285_v60 = vld [vmem:[%s21698_s2 + $0x128] sm:$0xff] }
 0x401   :  { %14313 = vmatprep.subr.bf16.mxu0 %v14312_v11  ;;  %v11346_v4 = vld [vmem:[%s21698_s2 + $0x310] sm:$0xff]  ;;  %v19621_v35 = vld [vmem:[#allocation4 + $0x12] sm:$0xff]  ;;  %v11287_v3 = vld [vmem:[%s21698_s2 + $0x138] sm:$0xff] }
 0x402   :  { %12577 = vmatmul.mubr.f32.vlgmr.msra.gmra.mrb[40].mxu1 %v15413_v41  ;;  %v19624_v41 = vld [vmem:[#allocation4 + $0x10] sm:$0xff]  ;;  %v19633_v22 = vld [vmem:[#allocation4 + $0x20] sm:$0xff]  ;;  %v11289_v28 = vld [vmem:[%s21698_s2 + $0x148] sm:$0xff] }
 0x403   :  { %12579 = vmatprep.mubr.f32.mxu1 %v19282_v39  ;;  %14187 = vmatpush3.bf16.msra.mxu1 %v14184_v31  ;;  %v14216_v31 = vpack.c.bf16 %v11281_v54, %v11280_v30  ;;  %v19636_v56 = vld [vmem:[#allocation4 + $0x22] sm:$0xff]  ;;  %v11348_v24 = vld [vmem:[%s21698_s2 + $0x320] sm:$0xff]  ;;  %v11353_v46 = vld [vmem:[%s21698_s2 + $0x348] sm:$0xff] }
 0x404   :  { %12801 = vmatmul.mubr.f32.vlgmr.msra.gmra.mrb[24].mxu0 %v19282_v39  ;;  %14189 = vmatprep.subr.bf16.mxu1 %v14188_v59  ;;  %v19645_v58 = vld [vmem:[#allocation4 + $0x32] sm:$0xff]  ;;  %v11286_v7 = vld [vmem:[%s21698_s2 + $0x130] sm:$0xff]  ;;  %v11355_v30 = vld [vmem:[%s21698_s2 + $0x358] sm:$0xff] }
 0x405   :  { %14315 = vmatpush3.bf16.msra.mxu0 %v14312_v11  ;;  %12803 = vmatprep.mubr.f32.mxu0 %v19304_v47  ;;  %v11282_v11 = vld [vmem:[%s21698_s2 + $0x110] sm:$0xff]  ;;  %v19669_v45 = vld [vmem:[#allocation4 + $0x52] sm:$0xff]  ;;  %v14228_v34 = vpack.c.bf16 %v11287_v3, %v11286_v7 }
 0x406   :  { %12580 = vmatmul.mubr.f32.gmra.mrb[42].mxu1 %v19304_v47  ;;  %14317 = vmatprep.subr.bf16.mxu0 %v14316_v53  ;;  %v14220_v27 = vpack.c.bf16 %v11283_v48, %v11282_v11  ;;  %v19660_v6 = vld [vmem:[#allocation4 + $0x42] sm:$0xff]  ;;  %v11288_v16 = vld [vmem:[%s21698_s2 + $0x140] sm:$0xff] }
 0x407   :  { %12582 = vmatprep.mubr.f32.mxu1 %v19324_v40  ;;  %14191 = vmatpush3.bf16.msra.mxu1 %v14188_v59  ;;  %v11347_v59 = vld [vmem:[%s21698_s2 + $0x318] sm:$0xff]  ;;  %v19693_v32 = vld [vmem:[#allocation4 + $0x72] sm:$0xff]  ;;  %v19727_v11 = vld [vmem:[#allocation4 + $0xc0] sm:$0xff] }
 0x408   :  { %12804 = vmatmul.mubr.f32.gmra.mrb[26].mxu0 %v19324_v40  ;;  %14193 = vmatprep.subr.bf16.mxu1 %v14192_v50  ;;  %v19684_v10 = vld [vmem:[#allocation4 + $0x62] sm:$0xff]  ;;  %v19715_v54 = vld [vmem:[#allocation4 + $0xb2] sm:$0xff] }
 0x409   :  { %14319 = vmatpush3.bf16.msra.mxu0 %v14316_v53  ;;  %12806 = vmatprep.mubr.f32.mxu0 %v19312_v17  ;;  %v11284_v53 = vld [vmem:[%s21698_s2 + $0x120] sm:$0xff]  ;;  %v19705_v63 = vld [vmem:[#allocation4 + $0x82] sm:$0xff] }
 0x40a   :  { %12583 = vmatmul.mubr.f32.gmra.mrb[44].mxu1 %v19312_v17  ;;  %14321 = vmatprep.subr.bf16.mxu0 %v14320_v9  ;;  %v14224_v61 = vpack.c.bf16 %v11285_v60, %v11284_v53  ;;  %v19718_v1 = vld [vmem:[#allocation4 + $0xb0] sm:$0xff]  ;;  %v19754_v7 = vld [vmem:[#allocation4 + $0xe2] sm:$0xff] }
 0x40b   :  { %12585 = vmatprep.mubr.f32.mxu1 %v19331_v29  ;;  %14195 = vmatpush3.bf16.msra.mxu1 %v14192_v50  ;;  %v14348_v50 = vpack.c.bf16 %v11347_v59, %v11346_v4  ;;  %v11292_v57 = vld [vmem:[%s21698_s2 + $0x160] sm:$0xff]  ;;  %v11357_v59 = vld [vmem:[%s21698_s2 + $0x368] sm:$0xff]  ;;  %v11358_v3 = vld [vmem:[%s21698_s2 + $0x370] sm:$0xff] }
 0x40c   :  { %12807 = vmatmul.mubr.f32.gmra.mrb[28].mxu0 %v19331_v29  ;;  %14197 = vmatprep.subr.bf16.mxu1 %v14196_v21  ;;  %v11356_v4 = vld [vmem:[%s21698_s2 + $0x360] sm:$0xff] }
 0x40d   :  { %14323 = vmatpush3.bf16.msra.mxu0 %v14320_v9  ;;  %12809 = vmatprep.mubr.f32.mxu0 %v19356_v37  ;;  %v11349_v9 = vld [vmem:[%s21698_s2 + $0x328] sm:$0xff]  ;;  %v19742_v60 = vld [vmem:[#allocation4 + $0xd0] sm:$0xff] }
 0x40e   :  { %12586 = vmatmul.mubr.f32.gmra.mrb[46].mxu1 %v19356_v37  ;;  %14325 = vmatprep.subr.bf16.mxu0 %v14324_v26  ;;  %v14352_v8 = vpack.c.bf16 %v11349_v9, %v11348_v24  ;;  %v11295_v24 = vld [vmem:[%s21698_s2 + $0x178] sm:$0xff]  ;;  %v19751_v9 = vld [vmem:[#allocation4 + $0xe0] sm:$0xff] }
 0x40f   :  { %14199 = vmatpush3.bf16.msra.mxu1 %v14196_v21  ;;  %12588 = vmatprep.mubr.f32.mxu1 %v5636_v43  ;;  %v19648_v21 = vld [vmem:[#allocation4 + $0x30] sm:$0xff]  ;;  %v11350_v43 = vld [vmem:[%s21698_s2 + $0x330] sm:$0xff] }
 0x410   :  { %12810 = vmatmul.mubr.f32.gmra.mrb[30].mxu0 %v19374_v55  ;;  %14201 = vmatprep.subr.bf16.mxu1 %v14200_v12 }
 0x411   :  { %14327 = vmatpush3.bf16.msra.mxu0 %v14324_v26  ;;  %12812 = vmatprep.mubr.f32.mxu0 %v19377_v19  ;;  %v19657_v26 = vld [vmem:[#allocation4 + $0x40] sm:$0xff] }
 0x412   :  { %12589 = vmatmul.mubr.f32.gmra.mrb[48].mxu1 %v19377_v19  ;;  %14329 = vmatprep.subr.bf16.mxu0 %v14328_v23  ;;  %v5626_v19 = vld [vmem:[%s21698_s2 + $0x70] sm:$0xff] }
 0x413   :  { %12591 = vmatprep.mubr.f32.mxu1 %v19384_v13  ;;  %14203 = vmatpush3.bf16.msra.mxu1 %v14200_v12  ;;  %v14212_v52 = vpack.c.bf16 %v5627_v20, %v5626_v19  ;;  %v11351_v12 = vld [vmem:[%s21698_s2 + $0x338] sm:$0xff]  ;;  %v19696_v19 = vld [vmem:[#allocation4 + $0x70] sm:$0xff]  ;;  %v11290_v20 = vld [vmem:[%s21698_s2 + $0x150] sm:$0xff] }
 0x414   :  { %12813 = vmatmul.mubr.f32.gmra.mrb[32].mxu0 %v19384_v13  ;;  %14205 = vmatprep.subr.bf16.mxu1 %v14204_v36  ;;  %v14356_v18 = vpack.c.bf16 %v11351_v12, %v11350_v43  ;;  %v19763_v43 = vld [vmem:[#allocation4 + $0xf2] sm:$0xff] }
 0x415   :  { %14331 = vmatpush3.bf16.msra.mxu0 %v14328_v23  ;;  %12815 = vmatprep.mubr.f32.mxu0 %v19405_v33  ;;  %v19672_v23 = vld [vmem:[#allocation4 + $0x50] sm:$0xff] }
 0x416   :  { %12592 = vmatmul.mubr.f32.gmra.mrb[50].mxu1 %v19405_v33  ;;  %14333 = vmatprep.subr.bf16.mxu0 %v14332_v62 }
 0x417   :  { %12594 = vmatprep.mubr.f32.mxu1 %v19416_v44  ;;  %14207 = vmatpush3.bf16.msra.mxu1 %v14204_v36  ;;  %v19681_v36 = vld [vmem:[#allocation4 + $0x60] sm:$0xff] }
 0x418   :  { %12816 = vmatmul.mubr.f32.gmra.mrb[34].mxu0 %v19416_v44  ;;  %14209 = vmatprep.subr.bf16.mxu1 %v14208_v5 }
 0x419   :  { %14335 = vmatpush3.bf16.msra.mxu0 %v14332_v62  ;;  %12818 = vmatprep.mubr.f32.mxu0 %v19411_v0  ;;  %v11352_v62 = vld [vmem:[%s21698_s2 + $0x340] sm:$0xff] }
 0x41a   :  { %12595 = vmatmul.mubr.f32.gmra.mrb[52].mxu1 %v19411_v0  ;;  %14337 = vmatprep.subr.bf16.mxu0 %v14336_v42  ;;  %v14360_v15 = vpack.c.bf16 %v11353_v46, %v11352_v62  ;;  %v19778_v46 = vld [vmem:[#allocation4 + $0x102] sm:$0xff] }
 0x41b   :  { %12597 = vmatprep.mubr.f32.mxu1 %v19423_v25  ;;  %14211 = vmatpush3.bf16.msra.mxu1 %v14208_v5  ;;  %v14232_v5 = vpack.c.bf16 %v11289_v28, %v11288_v16  ;;  %v11296_v16 = vld [vmem:[%s21698_s2 + $0x180] sm:$0xff]  ;;  %v11297_v28 = vld [vmem:[%s21698_s2 + $0x188] sm:$0xff] }
 0x41c   :  { %12819 = vmatmul.mubr.f32.gmra.mrb[36].mxu0 %v19423_v25  ;;  %14213 = vmatprep.subr.bf16.mxu1 %v14212_v52 }
 0x41d   :  { %14339 = vmatpush3.bf16.msra.mxu0 %v14336_v42  ;;  %12821 = vmatprep.mubr.f32.mxu0 %v19450_v14  ;;  %v11291_v42 = vld [vmem:[%s21698_s2 + $0x158] sm:$0xff] }
 0x41e   :  { %12598 = vmatmul.mubr.f32.gmra.mrb[54].mxu1 %v19450_v14  ;;  %14341 = vmatprep.subr.bf16.mxu0 %v14340_v38 }
 0x41f   :  { %14215 = vmatpush3.bf16.msra.mxu1 %v14212_v52  ;;  %12632 = vmatprep.mubr.f32.mxu1 %v19611_v49  ;;  %v11354_v52 = vld [vmem:[%s21698_s2 + $0x350] sm:$0xff] }
 0x420   :  { %12822 = vmatmul.mubr.f32.gmra.mrb[38].mxu0 %v19455_v2  ;;  %14217 = vmatprep.subr.bf16.mxu1 %v14216_v31  ;;  %v14364_v48 = vpack.c.bf16 %v11355_v30, %v11354_v52  ;;  %v14248_v52 = vpack.c.bf16 %v11297_v28, %v11296_v16  ;;  %v19790_v30 = vld [vmem:[#allocation4 + $0x110] sm:$0xff]  ;;  %v11303_v16 = vld [vmem:[%s21698_s2 + $0x1b8] sm:$0xff] }
 0x421   :  { %14343 = vmatpush3.bf16.msra.mxu0 %v14340_v38  ;;  %12856 = vmatprep.mubr.f32.mxu0 %v19621_v35  ;;  %v14236_v38 = vpack.c.bf16 %v11291_v42, %v11290_v20  ;;  %v11361_v20 = vld [vmem:[%s21698_s2 + $0x388] sm:$0xff] }
 0x422   :  { %12633 = vmatmul.mubr.f32.vlgmr.msra.gmra.mrb[40].mxu1 %v19624_v41  ;;  %14345 = vmatprep.subr.bf16.mxu0 %v14344_v51  ;;  %v19787_v42 = vld [vmem:[#allocation4 + $0x112] sm:$0xff] }
 0x423   :  { %12635 = vmatprep.mubr.f32.mxu1 %v19633_v22  ;;  %14219 = vmatpush3.bf16.msra.mxu1 %v14216_v31  ;;  %v11293_v31 = vld [vmem:[%s21698_s2 + $0x168] sm:$0xff] }
 0x424   :  { %12857 = vmatmul.mubr.f32.vlgmr.msra.gmra.mrb[24].mxu0 %v19636_v56  ;;  %14221 = vmatprep.subr.bf16.mxu1 %v14220_v27  ;;  %v14240_v53 = vpack.c.bf16 %v11293_v31, %v11292_v57  ;;  %v11299_v57 = vld [vmem:[%s21698_s2 + $0x198] sm:$0xff] }
 0x425   :  { %14347 = vmatpush3.bf16.msra.mxu0 %v14344_v51  ;;  %12859 = vmatprep.mubr.f32.mxu0 %v19645_v58  ;;  %v19730_v51 = vld [vmem:[#allocation4 + $0xc2] sm:$0xff] }
 0x426   :  { %12636 = vmatmul.mubr.f32.gmra.mrb[42].mxu1 %v19648_v21  ;;  %14349 = vmatprep.subr.bf16.mxu0 %v14348_v50 }
 0x427   :  { %12638 = vmatprep.mubr.f32.mxu1 %v19657_v26  ;;  %14223 = vmatpush3.bf16.msra.mxu1 %v14220_v27  ;;  %v19739_v27 = vld [vmem:[#allocation4 + $0xd2] sm:$0xff] }
 0x428   :  { %12860 = vmatmul.mubr.f32.gmra.mrb[26].mxu0 %v19660_v6  ;;  %14225 = vmatprep.subr.bf16.mxu1 %v14224_v61 }
 0x429   :  { %14351 = vmatpush3.bf16.msra.mxu0 %v14348_v50  ;;  %12862 = vmatprep.mubr.f32.mxu0 %v19669_v45  ;;  %v11294_v50 = vld [vmem:[%s21698_s2 + $0x170] sm:$0xff] }
 0x42a   :  { %12639 = vmatmul.mubr.f32.gmra.mrb[44].mxu1 %v19672_v23  ;;  %14353 = vmatprep.subr.bf16.mxu0 %v14352_v8  ;;  %v14244_v12 = vpack.c.bf16 %v11295_v24, %v11294_v50  ;;  %v11300_v50 = vld [vmem:[%s21698_s2 + $0x1a0] sm:$0xff]  ;;  %v11301_v24 = vld [vmem:[%s21698_s2 + $0x1a8] sm:$0xff] }
 0x42b   :  { %12641 = vmatprep.mubr.f32.mxu1 %v19681_v36  ;;  %14227 = vmatpush3.bf16.msra.mxu1 %v14224_v61  ;;  %v14368_v61 = vpack.c.bf16 %v11357_v59, %v11356_v4  ;;  %v11362_v4 = vld [vmem:[%s21698_s2 + $0x390] sm:$0xff]  ;;  %v11363_v59 = vld [vmem:[%s21698_s2 + $0x398] sm:$0xff] }
 0x42c   :  { %12863 = vmatmul.mubr.f32.gmra.mrb[28].mxu0 %v19684_v10  ;;  %14229 = vmatprep.subr.bf16.mxu1 %v14228_v34 }
 0x42d   :  { %14355 = vmatpush3.bf16.msra.mxu0 %v14352_v8  ;;  %12865 = vmatprep.mubr.f32.mxu0 %v19693_v32  ;;  %v11359_v8 = vld [vmem:[%s21698_s2 + $0x378] sm:$0xff] }
 0x42e   :  { %12642 = vmatmul.mubr.f32.gmra.mrb[46].mxu1 %v19696_v19  ;;  %14357 = vmatprep.subr.bf16.mxu0 %v14356_v18  ;;  %v14372_v62 = vpack.c.bf16 %v11359_v8, %v11358_v3  ;;  %v11364_v3 = vld [vmem:[%s21698_s2 + $0x3a0] sm:$0xff]  ;;  %v11365_v8 = vld [vmem:[%s21698_s2 + $0x3a8] sm:$0xff] }
 0x42f   :  { %14231 = vmatpush3.bf16.msra.mxu1 %v14228_v34  ;;  %12644 = vmatprep.mubr.f32.mxu1 %v19611_v49  ;;  %v19766_v34 = vld [vmem:[#allocation4 + $0xf0] sm:$0xff]  ;;  %v14384_v28 = vpack.c.bf16 %v11365_v8, %v11364_v3  ;;  %v11370_v3 = vld [vmem:[%s21698_s2 + $0x3d0] sm:$0xff]  ;;  %v11371_v8 = vld [vmem:[%s21698_s2 + $0x3d8] sm:$0xff] }
 0x430   :  { %12866 = vmatmul.mubr.f32.gmra.mrb[30].mxu0 %v19705_v63  ;;  %14233 = vmatprep.subr.bf16.mxu1 %v14232_v5 }
 0x431   :  { %14359 = vmatpush3.bf16.msra.mxu0 %v14356_v18  ;;  %12868 = vmatprep.mubr.f32.mxu0 %v19715_v54  ;;  %v19775_v18 = vld [vmem:[#allocation4 + $0x100] sm:$0xff] }
 0x432   :  { %12645 = vmatmul.mubr.f32.gmra.mrb[48].mxu1 %v19718_v1  ;;  %14361 = vmatprep.subr.bf16.mxu0 %v14360_v15 }
 0x433   :  { %12647 = vmatprep.mubr.f32.mxu1 %v19727_v11  ;;  %14235 = vmatpush3.bf16.msra.mxu1 %v14232_v5  ;;  %v11360_v5 = vld [vmem:[%s21698_s2 + $0x380] sm:$0xff] }
 0x434   :  { %12869 = vmatmul.mubr.f32.gmra.mrb[32].mxu0 %v19730_v51  ;;  %14237 = vmatprep.subr.bf16.mxu1 %v14236_v38  ;;  %v14376_v31 = vpack.c.bf16 %v11361_v20, %v11360_v5  ;;  %v11367_v5 = vld [vmem:[%s21698_s2 + $0x3b8] sm:$0xff] }
 0x435   :  { %14363 = vmatpush3.bf16.msra.mxu0 %v14360_v15  ;;  %12871 = vmatprep.mubr.f32.mxu0 %v19739_v27  ;;  %v5951_v15 = vld [vmem:[#allocation4 + $0x2] sm:$0xff] }
 0x436   :  { %12648 = vmatmul.mubr.f32.gmra.mrb[50].mxu1 %v19742_v60  ;;  %14365 = vmatprep.subr.bf16.mxu0 %v14364_v48 }
 0x437   :  { %12650 = vmatprep.mubr.f32.mxu1 %v19751_v9  ;;  %14239 = vmatpush3.bf16.msra.mxu1 %v14236_v38  ;;  %v11298_v38 = vld [vmem:[%s21698_s2 + $0x190] sm:$0xff] }
 0x438   :  { %12872 = vmatmul.mubr.f32.gmra.mrb[34].mxu0 %v19754_v7  ;;  %14241 = vmatprep.subr.bf16.mxu1 %v14240_v53 }
 0x439   :  { %14367 = vmatpush3.bf16.msra.mxu0 %v14364_v48  ;;  %12874 = vmatprep.mubr.f32.mxu0 %v19763_v43  ;;  %v19799_v48 = vld [vmem:[#allocation4 + $0x122] sm:$0xff] }
 0x43a   :  { %12651 = vmatmul.mubr.f32.gmra.mrb[52].mxu1 %v19766_v34  ;;  %14369 = vmatprep.subr.bf16.mxu0 %v14368_v61 }
 0x43b   :  { %12653 = vmatprep.mubr.f32.mxu1 %v19775_v18  ;;  %14243 = vmatpush3.bf16.msra.mxu1 %v14240_v53  ;;  %v14252_v53 = vpack.c.bf16 %v11299_v57, %v11298_v38  ;;  %v11368_v57 = vld [vmem:[%s21698_s2 + $0x3c0] sm:$0xff] }
 0x43c   :  { %12875 = vmatmul.mubr.f32.gmra.mrb[36].mxu0 %v19778_v46  ;;  %14245 = vmatprep.subr.bf16.mxu1 %v14244_v12 }
 0x43d   :  { %14371 = vmatpush3.bf16.msra.mxu0 %v14368_v61  ;;  %12877 = vmatprep.mubr.f32.mxu0 %v19787_v42  ;;  %v14380_v61 = vpack.c.bf16 %v11363_v59, %v11362_v4  ;;  %v19856_v4 = vld [vmem:[#allocation4 + $0x80] sm:$0xff] }
 0x43e   :  { %12654 = vmatmul.mubr.f32.gmra.mrb[54].mxu1 %v19790_v30  ;;  %14373 = vmatprep.subr.bf16.mxu0 %v14372_v62  ;;  %v5959_v59 = vld [vmem:[#allocation4 + $0xa2] sm:$0xff] }
 0x43f   :  { %14247 = vmatpush3.bf16.msra.mxu1 %v14244_v12  ;;  %12688 = vmatprep.mubr.f32.mxu1 %v5951_v15  ;;  %v14256_v12 = vpack.c.bf16 %v11301_v24, %v11300_v50  ;;  %v11304_v15 = vld [vmem:[%s21698_s2 + $0x1c0] sm:$0xff]  ;;  %v11306_v50 = vld [vmem:[%s21698_s2 + $0x1d0] sm:$0xff]  ;;  %v11307_v24 = vld [vmem:[%s21698_s2 + $0x1d8] sm:$0xff] }
 0x440   :  { %12878 = vmatmul.mubr.f32.gmra.mrb[38].mxu0 %v19799_v48  ;;  %14249 = vmatprep.subr.bf16.mxu1 %v14248_v52 }
 0x441   :  { %14375 = vmatpush3.bf16.msra.mxu0 %v14372_v62  ;;  %12912 = vmatprep.mubr.f32.mxu0 %v19633_v22  ;;  %v11366_v62 = vld [vmem:[%s21698_s2 + $0x3b0] sm:$0xff] }
 0x442   :  { %12689 = vmatmul.mubr.f32.vlgmr.msra.gmra.mrb[40].mxu1 %v19621_v35  ;;  %14377 = vmatprep.subr.bf16.mxu0 %v14376_v31  ;;  %v11302_v35 = vld [vmem:[%s21698_s2 + $0x1b0] sm:$0xff]  ;;  %v14388_v38 = vpack.c.bf16 %v11367_v5, %v11366_v62  ;;  %v11372_v62 = vld [vmem:[%s21698_s2 + $0x3e0] sm:$0xff]  ;;  %v11373_v5 = vld [vmem:[%s21698_s2 + $0x3e8] sm:$0xff] }
 0x443   :  { %12691 = vmatprep.mubr.f32.mxu1 %v19636_v56  ;;  %14251 = vmatpush3.bf16.msra.mxu1 %v14248_v52  ;;  %v14260_v20 = vpack.c.bf16 %v11303_v16, %v11302_v35  ;;  %v11305_v52 = vld [vmem:[%s21698_s2 + $0x1c8] sm:$0xff]  ;;  %v11308_v35 = vld [vmem:[%s21698_s2 + $0x1e0] sm:$0xff] }
 0x444   :  { %12913 = vmatmul.mubr.f32.vlgmr.msra.gmra.mrb[24].mxu0 %v19648_v21  ;;  %14253 = vmatprep.subr.bf16.mxu1 %v14252_v53  ;;  %v11309_v16 = vld [vmem:[%s21698_s2 + $0x1e8] sm:$0xff] }
 0x445   :  { %14379 = vmatpush3.bf16.msra.mxu0 %v14376_v31  ;;  %12915 = vmatprep.mubr.f32.mxu0 %v19657_v26  ;;  %v11369_v31 = vld [vmem:[%s21698_s2 + $0x3c8] sm:$0xff] }
 0x446   :  { %12692 = vmatmul.mubr.f32.gmra.mrb[42].mxu1 %v19645_v58  ;;  %14381 = vmatprep.subr.bf16.mxu0 %v14380_v61 }
 0x447   :  { %12694 = vmatprep.mubr.f32.mxu1 %v19660_v6  ;;  %14255 = vmatpush3.bf16.msra.mxu1 %v14252_v53  ;;  %v14264_v53 = vpack.c.bf16 %v11305_v52, %v11304_v15  ;;  %v11311_v15 = vld [vmem:[%s21698_s2 + $0x1f8] sm:$0xff]  ;;  %v14400_v52 = vpack.c.bf16 %v11373_v5, %v11372_v62  ;;  %v11393_v62 = vld [vmem:[%s21698_s2 + $0x488] sm:$0xff] }
 0x448   :  { %12916 = vmatmul.mubr.f32.gmra.mrb[26].mxu0 %v19672_v23  ;;  %14257 = vmatprep.subr.bf16.mxu1 %v14256_v12  ;;  %v7485_v5 = vld [vmem:[#allocation4 + $0x1] sm:$0xff] }
 0x449   :  { %14383 = vmatpush3.bf16.msra.mxu0 %v14380_v61  ;;  %12918 = vmatprep.mubr.f32.mxu0 %v19681_v36  ;;  %v14392_v61 = vpack.c.bf16 %v11369_v31, %v11368_v57  ;;  %v11375_v57 = vld [vmem:[%s21698_s2 + $0x3f8] sm:$0xff] }
 0x44a   :  { %12695 = vmatmul.mubr.f32.gmra.mrb[44].mxu1 %v19669_v45  ;;  %14385 = vmatprep.subr.bf16.mxu0 %v14384_v28 }
 0x44b   :  { %12697 = vmatprep.mubr.f32.mxu1 %v19684_v10  ;;  %14259 = vmatpush3.bf16.msra.mxu1 %v14256_v12  ;;  %v14268_v12 = vpack.c.bf16 %v11307_v24, %v11306_v50  ;;  %v11377_v50 = vld [vmem:[%s21698_s2 + $0x408] sm:$0xff]  ;;  %v19915_v24 = vld [vmem:[#allocation4 + $0x120] sm:$0xff] }
 0x44c   :  { %12919 = vmatmul.mubr.f32.gmra.mrb[28].mxu0 %v19696_v19  ;;  %14261 = vmatprep.subr.bf16.mxu1 %v14260_v20 }
 0x44d   :  { %14387 = vmatpush3.bf16.msra.mxu0 %v14384_v28  ;;  %12921 = vmatprep.mubr.f32.mxu0 %v19856_v4  ;;  %v14396_v28 = vpack.c.bf16 %v11371_v8, %v11370_v3  ;;  %v11378_v3 = vld [vmem:[%s21698_s2 + $0x410] sm:$0xff]  ;;  %v11379_v8 = vld [vmem:[%s21698_s2 + $0x418] sm:$0xff] }
 0x44e   :  { %12698 = vmatmul.mubr.f32.gmra.mrb[46].mxu1 %v19693_v32  ;;  %14389 = vmatprep.subr.bf16.mxu0 %v14388_v38 }
 0x44f   :  { %14263 = vmatpush3.bf16.msra.mxu1 %v14260_v20  ;;  %12700 = vmatprep.mubr.f32.mxu1 %v5959_v59  ;;  %v14272_v20 = vpack.c.bf16 %v11309_v16, %v11308_v35  ;;  %v11381_v35 = vld [vmem:[%s21698_s2 + $0x428] sm:$0xff] }
 0x450   :  { %12922 = vmatmul.mubr.f32.gmra.mrb[30].mxu0 %v19611_v49  ;;  %14265 = vmatprep.subr.bf16.mxu1 %v14264_v53 }
 0x451   :  { %14391 = vmatpush3.bf16.msra.mxu0 %v14388_v38  ;;  %12924 = vmatprep.mubr.f32.mxu0 %v19727_v11  ;;  %v11374_v38 = vld [vmem:[%s21698_s2 + $0x3f0] sm:$0xff] }
 0x452   :  { %12701 = vmatmul.mubr.f32.gmra.mrb[48].mxu1 %v19715_v54  ;;  %14393 = vmatprep.subr.bf16.mxu0 %v14392_v61  ;;  %v11310_v54 = vld [vmem:[%s21698_s2 + $0x1f0] sm:$0xff]  ;;  %v14404_v59 = vpack.c.bf16 %v11375_v57, %v11374_v38 }
 0x453   :  { %12703 = vmatprep.mubr.f32.mxu1 %v19730_v51  ;;  %14267 = vmatpush3.bf16.msra.mxu1 %v14264_v53  ;;  %v14276_v31 = vpack.c.bf16 %v11311_v15, %v11310_v54  ;;  %v11376_v53 = vld [vmem:[%s21698_s2 + $0x400] sm:$0xff] }
 0x454   :  { %12925 = vmatmul.mubr.f32.gmra.mrb[32].mxu0 %v19742_v60  ;;  %14269 = vmatprep.subr.bf16.mxu1 %v14268_v12 }
 0x455   :  { %14395 = vmatpush3.bf16.msra.mxu0 %v14392_v61  ;;  %12927 = vmatprep.mubr.f32.mxu0 %v19751_v9  ;;  %v14408_v61 = vpack.c.bf16 %v11377_v50, %v11376_v53 }
 0x456   :  { %12704 = vmatmul.mubr.f32.gmra.mrb[50].mxu1 %v19739_v27  ;;  %14397 = vmatprep.subr.bf16.mxu0 %v14396_v28 }
 0x457   :  { %12706 = vmatprep.mubr.f32.mxu1 %v19754_v7  ;;  %14271 = vmatpush3.bf16.msra.mxu1 %v14268_v12  ;;  %v14412_v12 = vpack.c.bf16 %v11379_v8, %v11378_v3 }
 0x458   :  { %12928 = vmatmul.mubr.f32.gmra.mrb[34].mxu0 %v19766_v34  ;;  %14273 = vmatprep.subr.bf16.mxu1 %v14272_v20 }
 0x459   :  { %14399 = vmatpush3.bf16.msra.mxu0 %v14396_v28  ;;  %12930 = vmatprep.mubr.f32.mxu0 %v19775_v18  ;;  %v11392_v28 = vld [vmem:[%s21698_s2 + $0x480] sm:$0xff] }
 0x45a   :  { %12707 = vmatmul.mubr.f32.gmra.mrb[52].mxu1 %v19763_v43  ;;  %14401 = vmatprep.subr.bf16.mxu0 %v14400_v52 }
 0x45b   :  { %12709 = vmatprep.mubr.f32.mxu1 %v19778_v46  ;;  %14275 = vmatpush3.bf16.msra.mxu1 %v14272_v20  ;;  %v20060_v20 = vpack.c.bf16 %v11393_v62, %v11392_v28 }
 0x45c   :  { %12931 = vmatmul.mubr.f32.gmra.mrb[36].mxu0 %v19790_v30  ;;  %14277 = vmatprep.subr.bf16.mxu1 %v14276_v31 }
 0x45d   :  { %14403 = vmatpush3.bf16.msra.mxu0 %v14400_v52  ;;  %12933 = vmatprep.mubr.f32.mxu0 %v19915_v24 }
 0x45e   :  { %12710 = vmatmul.mubr.f32.gmra.mrb[54].mxu1 %v19787_v42  ;;  %14405 = vmatprep.subr.bf16.mxu0 %v14404_v59 }
 0x45f   :  { %14279 = vmatpush3.bf16.msra.mxu1 %v14276_v31  ;;  %12744 = vmatprep.mubr.f32.mxu1 %v19624_v41  ;;  %v11380_v41 = vld [vmem:[%s21698_s2 + $0x420] sm:$0xff] }
 0x460   :  { %12934 = vmatmul.mubr.f32.gmra.mrb[38].mxu0 %v19611_v49  ;;  %v11382_v49 = vld [vmem:[%s21698_s2 + $0x430] sm:$0xff] }
 0x461   :  { %14407 = vmatpush3.bf16.msra.mxu0 %v14404_v59  ;;  %12968 = vmatprep.mubr.f32.mxu0 %v19282_v39  ;;  %v14416_v39 = vpack.c.bf16 %v11381_v35, %v11380_v41 }
 0x462   :  { %12745 = vmatmul.mubr.f32.vlgmr.msra.gmra.mrb[40].mxu1 %v19633_v22  ;;  %14409 = vmatprep.subr.bf16.mxu0 %v14408_v61  ;;  %v11383_v22 = vld [vmem:[%s21698_s2 + $0x438] sm:$0xff] }
 0x463   :  { %12747 = vmatprep.mubr.f32.mxu1 %v19648_v21  ;;  %v11385_v21 = vld [vmem:[%s21698_s2 + $0x448] sm:$0xff] }
 0x464   :  { %12969 = vmatmul.mubr.f32.vlgmr.msra.gmra.mrb[24].mxu0 %v19304_v47  ;;  %v14420_v47 = vpack.c.bf16 %v11383_v22, %v11382_v49 }
 0x465   :  { %14411 = vmatpush3.bf16.msra.mxu0 %v14408_v61  ;;  %12971 = vmatprep.mubr.f32.mxu0 %v19324_v40  ;;  %v11384_v40 = vld [vmem:[%s21698_s2 + $0x440] sm:$0xff] }
 0x466   :  { %12748 = vmatmul.mubr.f32.gmra.mrb[42].mxu1 %v19657_v26  ;;  %14413 = vmatprep.subr.bf16.mxu0 %v14412_v12  ;;  %v11386_v26 = vld [vmem:[%s21698_s2 + $0x450] sm:$0xff] }
 0x467   :  { %12750 = vmatprep.mubr.f32.mxu1 %v19672_v23  ;;  %v11387_v23 = vld [vmem:[%s21698_s2 + $0x458] sm:$0xff] }
 0x468   :  { %12972 = vmatmul.mubr.f32.gmra.mrb[26].mxu0 %v19312_v17  ;;  %v6929_v17 = vld [vmem:[#allocation4 + $0x91] sm:$0xff] }
 0x469   :  { %14415 = vmatpush3.bf16.msra.mxu0 %v14412_v12  ;;  %12974 = vmatprep.mubr.f32.mxu0 %v19331_v29  ;;  %v14424_v29 = vpack.c.bf16 %v11385_v21, %v11384_v40 }
 0x46a   :  { %12751 = vmatmul.mubr.f32.gmra.mrb[44].mxu1 %v19681_v36  ;;  %14417 = vmatprep.subr.bf16.mxu0 %v14416_v39  ;;  %v11389_v36 = vld [vmem:[%s21698_s2 + $0x468] sm:$0xff] }
 0x46b   :  { %12753 = vmatprep.mubr.f32.mxu1 %v19696_v19  ;;  %v11390_v19 = vld [vmem:[%s21698_s2 + $0x470] sm:$0xff] }
 0x46c   :  { %12975 = vmatmul.mubr.f32.gmra.mrb[28].mxu0 %v19356_v37  ;;  %v14428_v37 = vpack.c.bf16 %v11387_v23, %v11386_v26 }
 0x46d   :  { %14419 = vmatpush3.bf16.msra.mxu0 %v14416_v39  ;;  %12977 = vmatprep.mubr.f32.mxu0 %v19374_v55  ;;  %v11388_v55 = vld [vmem:[%s21698_s2 + $0x460] sm:$0xff] }
 0x46e   :  { %12754 = vmatmul.mubr.f32.gmra.mrb[46].mxu1 %v19856_v4  ;;  %14421 = vmatprep.subr.bf16.mxu0 %v14420_v47  ;;  %v11423_v4 = vld [vmem:[%s21698_s2 + $0x578] sm:$0xff] }
 0x46f   :  { %12756 = vmatprep.mubr.f32.mxu1 %v19718_v1  ;;  %v11391_v1 = vld [vmem:[%s21698_s2 + $0x478] sm:$0xff] }
 0x470   :  { %12978 = vmatmul.mubr.f32.gmra.mrb[30].mxu0 %v6929_v17 }
 0x471   :  { %14423 = vmatpush3.bf16.msra.mxu0 %v14420_v47  ;;  %12980 = vmatprep.mubr.f32.mxu0 %v19384_v13  ;;  %v14432_v13 = vpack.c.bf16 %v11389_v36, %v11388_v55 }
 0x472   :  { %12757 = vmatmul.mubr.f32.gmra.mrb[48].mxu1 %v19727_v11  ;;  %14425 = vmatprep.subr.bf16.mxu0 %v14424_v29  ;;  %v11414_v11 = vld [vmem:[%s21698_s2 + $0x530] sm:$0xff] }
 0x473   :  { %12759 = vmatprep.mubr.f32.mxu1 %v19742_v60  ;;  %v11416_v60 = vld [vmem:[%s21698_s2 + $0x540] sm:$0xff] }
 0x474   :  { %12981 = vmatmul.mubr.f32.gmra.mrb[32].mxu0 %v19405_v33  ;;  %v14436_v33 = vpack.c.bf16 %v11391_v1, %v11390_v19 }
 0x475   :  { %14427 = vmatpush3.bf16.msra.mxu0 %v14424_v29  ;;  %12983 = vmatprep.mubr.f32.mxu0 %v19416_v44  ;;  %v6937_v44 = vld [vmem:[#allocation4 + $0x131] sm:$0xff] }
 0x476   :  { %12760 = vmatmul.mubr.f32.gmra.mrb[50].mxu1 %v19751_v9  ;;  %14429 = vmatprep.subr.bf16.mxu0 %v14428_v37  ;;  %v11417_v9 = vld [vmem:[%s21698_s2 + $0x548] sm:$0xff] }
 0x477   :  { %12762 = vmatprep.mubr.f32.mxu1 %v19766_v34  ;;  %v11419_v34 = vld [vmem:[%s21698_s2 + $0x558] sm:$0xff] }
 0x478   :  { %12984 = vmatmul.mubr.f32.gmra.mrb[34].mxu0 %v19411_v0  ;;  %v7123_v0 = vld [vmem:[#allocation4 + $0x92] sm:$0xff] }
 0x479   :  { %14431 = vmatpush3.bf16.msra.mxu0 %v14428_v37  ;;  %12986 = vmatprep.mubr.f32.mxu0 %v19423_v25  ;;  %v7131_v25 = vld [vmem:[#allocation4 + $0x132] sm:$0xff] }
 0x47a   :  { %12763 = vmatmul.mubr.f32.gmra.mrb[52].mxu1 %v19775_v18  ;;  %14433 = vmatprep.subr.bf16.mxu0 %v14432_v13 }
 0x47b   :  { %12765 = vmatprep.mubr.f32.mxu1 %v19790_v30 }
 0x47c   :  { %12987 = vmatmul.mubr.f32.gmra.mrb[36].mxu0 %v19450_v14  ;;  %v11408_v14 = vld [vmem:[%s21698_s2 + $0x500] sm:$0xff] }
 0x47d   :  { %14435 = vmatpush3.bf16.msra.mxu0 %v14432_v13  ;;  %12989 = vmatprep.mubr.f32.mxu0 %v19455_v2  ;;  %v11409_v2 = vld [vmem:[%s21698_s2 + $0x508] sm:$0xff] }
 0x47e   :  { %12766 = vmatmul.mubr.f32.gmra.mrb[54].mxu1 %v19915_v24  ;;  %14437 = vmatprep.subr.bf16.mxu0 %v14436_v33 }
 0x47f   :  { %13080 = vmatprep.mubr.f32.mxu1 %v7485_v5 }
 0x480   :  { %12990 = vmatmul.mubr.f32.gmra.mrb[38].mxu0 %v6937_v44 }
 0x481   :  { %14439 = vmatpush3.bf16.msra.mxu0 %v14436_v33  ;;  %13024 = vmatprep.mubr.f32.mxu0 %v19636_v56  ;;  %v14440_v56 = vpack.c.bf16 %v11409_v2, %v11408_v14 }
 0x483   :  { %14441 = vmatprep.subr.bf16.mxu1 %v14440_v56 }
 0x484   :  { %13025 = vmatmul.mubr.f32.vlgmr.msra.gmra.mrb[24].mxu0 %v19645_v58  ;;  %14443 = vmatpush3.bf16.msra.mxu1 %v14440_v56  ;;  %v11410_v58 = vld [vmem:[%s21698_s2 + $0x510] sm:$0xff] }
 0x485   :  { %13027 = vmatprep.mubr.f32.mxu0 %v19660_v6  ;;  %v11411_v6 = vld [vmem:[%s21698_s2 + $0x518] sm:$0xff] }
 0x488   :  { %13028 = vmatmul.mubr.f32.gmra.mrb[26].mxu0 %v19669_v45  ;;  %v14444_v45 = vpack.c.bf16 %v11411_v6, %v11410_v58 }
 0x489   :  { %13030 = vmatprep.mubr.f32.mxu0 %v19684_v10  ;;  %v11412_v10 = vld [vmem:[%s21698_s2 + $0x520] sm:$0xff] }
 0x48a   :  { %14445 = vmatprep.subr.bf16.mxu1 %v14444_v45 }
 0x48b   :  { %14447 = vmatpush3.bf16.msra.mxu1 %v14444_v45 }
 0x48c   :  { %13031 = vmatmul.mubr.f32.gmra.mrb[28].mxu0 %v19693_v32  ;;  %v11413_v32 = vld [vmem:[%s21698_s2 + $0x528] sm:$0xff] }
 0x48d   :  { %13033 = vmatprep.mubr.f32.mxu0 %v19705_v63  ;;  %v14448_v63 = vpack.c.bf16 %v11413_v32, %v11412_v10 }
 0x48f   :  { %14449 = vmatprep.subr.bf16.mxu1 %v14448_v63 }
 0x490   :  { %13034 = vmatmul.mubr.f32.gmra.mrb[30].mxu0 %v7123_v0  ;;  %14451 = vmatpush3.bf16.msra.mxu1 %v14448_v63 }
 0x491   :  { %13036 = vmatprep.mubr.f32.mxu0 %v19730_v51  ;;  %v11415_v51 = vld [vmem:[%s21698_s2 + $0x538] sm:$0xff] }
 0x494   :  { %13037 = vmatmul.mubr.f32.gmra.mrb[32].mxu0 %v19739_v27  ;;  %v14452_v27 = vpack.c.bf16 %v11415_v51, %v11414_v11 }
 0x495   :  { %13039 = vmatprep.mubr.f32.mxu0 %v19754_v7  ;;  %v14456_v7 = vpack.c.bf16 %v11417_v9, %v11416_v60 }
 0x496   :  { %14453 = vmatprep.subr.bf16.mxu1 %v14452_v27 }
 0x497   :  { %14455 = vmatpush3.bf16.msra.mxu1 %v14452_v27 }
 0x498   :  { %13040 = vmatmul.mubr.f32.gmra.mrb[34].mxu0 %v19763_v43  ;;  %14457 = vmatprep.subr.bf16.mxu1 %v14456_v7  ;;  %v11418_v43 = vld [vmem:[%s21698_s2 + $0x550] sm:$0xff] }
 0x499   :  { %13042 = vmatprep.mubr.f32.mxu0 %v19778_v46  ;;  %v14460_v18 = vpack.c.bf16 %v11419_v34, %v11418_v43  ;;  %v11420_v46 = vld [vmem:[%s21698_s2 + $0x560] sm:$0xff] }
 0x49b   :  { %14459 = vmatpush3.bf16.msra.mxu1 %v14456_v7 }
 0x49c   :  { %13043 = vmatmul.mubr.f32.gmra.mrb[36].mxu0 %v19787_v42  ;;  %14461 = vmatprep.subr.bf16.mxu1 %v14460_v18  ;;  %v11421_v42 = vld [vmem:[%s21698_s2 + $0x568] sm:$0xff] }
 0x49d   :  { %13045 = vmatprep.mubr.f32.mxu0 %v19799_v48  ;;  %v14464_v30 = vpack.c.bf16 %v11421_v42, %v11420_v46  ;;  %v11422_v48 = vld [vmem:[%s21698_s2 + $0x570] sm:$0xff] }
 0x49e   :  { %v14468_v16 = vpack.c.bf16 %v11423_v4, %v11422_v48 }
 0x49f   :  { %14463 = vmatpush3.bf16.msra.mxu1 %v14460_v18 }
 0x4a0   :  { %13046 = vmatmul.mubr.f32.gmra.mrb[38].mxu0 %v7131_v25  ;;  %14465 = vmatprep.subr.bf16.mxu1 %v14464_v30 }
 0x4a3   :  { %14467 = vmatpush3.bf16.msra.mxu1 %v14464_v30 }
 0x4a4   :  { %14469 = vmatprep.subr.bf16.mxu1 %v14468_v16 }
 0x4a7   :  { %14471 = vmatpush3.bf16.msra.mxu1 %v14468_v16 }
 0x4a8   :  { %14473 = vmatprep.subr.bf16.mxu1 %v20060_v20 }
 0x535   :  { %v12746_v54 = vpop.f32.mrb[40].mxu1 }
 0x536   :  { %v6244_v15 = vpop.f32.mrb[41].mxu1 }
 0x539   :  { %v12749_v52 = vpop.f32.mrb[42].mxu1 }
 0x53a   :  { %v6254_v38 = vpop.f32.mrb[43].mxu1 }
 0x53d   :  { %v12752_v57 = vpop.f32.mrb[44].mxu1 }
 0x53e   :  { %v6264_v31 = vpop.f32.mrb[45].mxu1 }
 0x541   :  { %v12755_v59 = vpop.f32.mrb[46].mxu1 }
 0x542   :  { %v6274_v53 = vpop.f32.mrb[47].mxu1 }
 0x545   :  { %v12758_v50 = vpop.f32.mrb[48].mxu1 }
 0x546   :  { %v6284_v24 = vpop.f32.mrb[49].mxu1 }
 0x549   :  { %v12761_v61 = vpop.f32.mrb[50].mxu1 }
 0x54a   :  { %v6294_v3 = vpop.f32.mrb[51].mxu1 }
 0x54d   :  { %v12764_v8 = vpop.f32.mrb[52].mxu1 }
 0x54e   :  { %v6304_v12 = vpop.f32.mrb[53].mxu1 }
 0x551   :  { %v20063_v41 = vpop.f32.mrb[54].mxu1 }
 0x552   :  { %v20065_v35 = vpop.f32.mrb[55].mxu1 }
 0x557   :  { %v13026_v39 = vpop.f32.mrb[24].mxu0 }
 0x558   :  { %v20067_v49 = vadd.f32 %v13026_v39, %v12746_v54  ;;  %v7215_v22 = vpop.f32.mrb[25].mxu0 }
 0x559   :  { %v20069_v47 = vadd.f32 %v7215_v22, %v6244_v15 }
 0x55a   :  { %v7332_v40 = vmul.f32 %v20067_v49, %v20067_v49 }
 0x55b   :  { %v7331_v21 = vmul.f32 %v20069_v47, %v20069_v47  ;;  %v13029_v17 = vpop.f32.mrb[26].mxu0  ;;  %v7310_v23 = vadd.f32 %v20069_v47, %v20067_v49 }
 0x55c   :  { %v20075_v29 = vadd.f32 %v13029_v17, %v12749_v52  ;;  %v7225_v26 = vpop.f32.mrb[27].mxu0 }
 0x55d   :  { %v20079_v37 = vadd.f32 %v7225_v26, %v6254_v38  ;;  %v7347_v55 = vadd.f32 %v7332_v40, %v7331_v21 }
 0x55e   :  { %v7334_v44 = vmul.f32 %v20075_v29, %v20075_v29 }
 0x55f   :  { %v7311_v36 = vadd.f32 %v20079_v37, %v7310_v23  ;;  %v7333_v13 = vmul.f32 %v20079_v37, %v20079_v37  ;;  %v13032_v19 = vpop.f32.mrb[28].mxu0 }
 0x560   :  { %v20084_v1 = vadd.f32 %v13032_v19, %v12752_v57  ;;  %v7235_v33 = vpop.f32.mrb[29].mxu0 }
 0x561   :  { %v7348_v0 = vadd.f32 %v7347_v55, %v7333_v13  ;;  %v20088_v25 = vadd.f32 %v7235_v33, %v6264_v31  ;;  %v7312_v14 = vadd.f32 %v20075_v29, %v7311_v36 }
 0x562   :  { %v7336_v32 = vmul.f32 %v20084_v1, %v20084_v1 }
 0x563   :  { %v7313_v2 = vadd.f32 %v20088_v25, %v7312_v14  ;;  %v7335_v56 = vmul.f32 %v20088_v25, %v20088_v25  ;;  %v7349_v58 = vadd.f32 %v7348_v0, %v7334_v44  ;;  %v13035_v6 = vpop.f32.mrb[30].mxu0 }
 0x564   :  { %v20094_v45 = vadd.f32 %v13035_v6, %v12755_v59  ;;  %v7245_v10 = vpop.f32.mrb[31].mxu0 }
 0x565   :  { %v7350_v63 = vadd.f32 %v7349_v58, %v7335_v56  ;;  %v20098_v11 = vadd.f32 %v7245_v10, %v6274_v53  ;;  %v7314_v51 = vadd.f32 %v20084_v1, %v7313_v2 }
 0x566   :  { %v7338_v18 = vmul.f32 %v20094_v45, %v20094_v45 }
 0x567   :  { %v7315_v27 = vadd.f32 %v20098_v11, %v7314_v51  ;;  %v7337_v60 = vmul.f32 %v20098_v11, %v20098_v11  ;;  %v7351_v9 = vadd.f32 %v7350_v63, %v7336_v32  ;;  %v13038_v7 = vpop.f32.mrb[32].mxu0 }
 0x568   :  { %v20104_v43 = vadd.f32 %v13038_v7, %v12758_v50  ;;  %v7255_v34 = vpop.f32.mrb[33].mxu0 }
 0x569   :  { %v7352_v46 = vadd.f32 %v7351_v9, %v7337_v60  ;;  %v20108_v42 = vadd.f32 %v7255_v34, %v6284_v24  ;;  %v7316_v30 = vadd.f32 %v20094_v45, %v7315_v27 }
 0x56a   :  { %v7340_v54 = vmul.f32 %v20104_v43, %v20104_v43 }
 0x56b   :  { %v7317_v48 = vadd.f32 %v20108_v42, %v7316_v30  ;;  %v7339_v4 = vmul.f32 %v20108_v42, %v20108_v42  ;;  %v7353_v16 = vadd.f32 %v7352_v46, %v7338_v18  ;;  %v13041_v28 = vpop.f32.mrb[34].mxu0 }
 0x56c   :  { %v20114_v62 = vadd.f32 %v13041_v28, %v12761_v61  ;;  %v7265_v5 = vpop.f32.mrb[35].mxu0 }
 0x56d   :  { %v7354_v15 = vadd.f32 %v7353_v16, %v7339_v4  ;;  %v20118_v52 = vadd.f32 %v7265_v5, %v6294_v3  ;;  %v7318_v38 = vadd.f32 %v20104_v43, %v7317_v48  ;;  %v7373_v16 = vld [vmem:[%s21697_s3 + $0x2] sm:$0x1]  ;;  %v11394_v5 = vld [vmem:[%s21698_s2 + $0x490] sm:$0xff] }
 0x56e   :  { %v7342_v61 = vmul.f32 %v20114_v62, %v20114_v62 }
 0x56f   :  { %v7319_v57 = vadd.f32 %v20118_v52, %v7318_v38  ;;  %v7341_v31 = vmul.f32 %v20118_v52, %v20118_v52  ;;  %v7355_v59 = vadd.f32 %v7354_v15, %v7340_v54  ;;  %v13044_v53 = vpop.f32.mrb[36].mxu0  ;;  %v11395_v15 = vld [vmem:[%s21698_s2 + $0x498] sm:$0xff]  ;;  %v11396_v38 = vld [vmem:[%s21698_s2 + $0x4a0] sm:$0xff] }
 0x570   :  { %v20124_v50 = vadd.f32 %v13044_v53, %v12764_v8  ;;  %v7275_v24 = vpop.f32.mrb[37].mxu0  ;;  %v22299_v53 = vld [vmem:[#allocation48_spill] sm:$0xff] }
 0x571   :  { %v7356_v39 = vadd.f32 %v7355_v59, %v7341_v31  ;;  %v20128_v22 = vadd.f32 %v7275_v24, %v6304_v12  ;;  %v7320_v3 = vadd.f32 %v20114_v62, %v7319_v57  ;;  %v11397_v57 = vld [vmem:[%s21698_s2 + $0x4a8] sm:$0xff]  ;;  %v7374_v31 = vld [vmem:[%s21697_s3 + $0x3] sm:$0x1] }
 0x572   :  { %v7344_v55 = vmul.f32 %v20124_v50, %v20124_v50 }
 0x573   :  { %v7321_v40 = vadd.f32 %v20128_v22, %v7320_v3  ;;  %v7343_v21 = vmul.f32 %v20128_v22, %v20128_v22  ;;  %v7357_v17 = vadd.f32 %v7356_v39, %v7342_v61  ;;  %v13047_v26 = vpop.f32.mrb[38].mxu0  ;;  %v20165_v61 = vpack.c.bf16 %v11395_v15, %v11394_v5  ;;  %v11400_v5 = vld [vmem:[%s21698_s2 + $0x4c0] sm:$0xff]  ;;  %v7493_v15 = vld [vmem:[#allocation4 + $0xa1] sm:$0xff] }
 0x574   :  { %v20135_v23 = vadd.f32 %v13047_v26, %v20063_v41  ;;  %v7285_v8 = vpop.f32.mrb[39].mxu0  ;;  %v20167_v39 = vpack.c.bf16 %v11397_v57, %v11396_v38  ;;  %v11402_v57 = vld [vmem:[%s21698_s2 + $0x4d0] sm:$0xff] }
 0x575   :  { %v7358_v36 = vadd.f32 %v7357_v17, %v7343_v21  ;;  %v15031_v12 = vadd.f32 %v7285_v8, %v20065_v35  ;;  %v7322_v13 = vadd.f32 %v20124_v50, %v7321_v40 }
 0x576   :  { %v7346_v0 = vmul.f32 %v20135_v23, %v20135_v23 }
 0x577   :  { %v7323_v19 = vadd.f32 %v15031_v12, %v7322_v13  ;;  %v7345_v33 = vmul.f32 %v15031_v12, %v15031_v12  ;;  %v7359_v44 = vadd.f32 %v7358_v36, %v7344_v55 }
 0x579   :  { %v7324_v14 = vadd.f32 %v20135_v23, %v7323_v19  ;;  %v7360_v2 = vadd.f32 %v7359_v44, %v7345_v33 }
 0x57b   :  { %v7325_v41 = vrot.slane %v7324_v14, 4  ;;  %v7361_v56 = vadd.f32 %v7360_v2, %v7346_v0 }
 0x57d   :  { %v7326_v58 = vadd.f32 %v7325_v41, %v7324_v14  ;;  %v7362_v6 = vrot.slane %v7361_v56, 4 }
 0x57f   :  { %v7327_v10 = vrot.slane %v7326_v58, 2  ;;  %v7363_v32 = vadd.f32 %v7362_v6, %v7361_v56 }
 0x581   :  { %v7328_v63 = vadd.f32 %v7327_v10, %v7326_v58  ;;  %v7364_v51 = vrot.slane %v7363_v32, 2 }
 0x583   :  { %v7329_v35 = vrot.slane %v7328_v63, 1  ;;  %v7365_v27 = vadd.f32 %v7364_v51, %v7363_v32 }
 0x585   :  { %v7330_v60 = vadd.f32 %v7329_v35, %v7328_v63  ;;  %v7366_v9 = vrot.slane %v7365_v27, 1 }
 0x587   :  { %v7367_v7 = vadd.f32 %v7366_v9, %v7365_v27  ;;  %v7368_v34 = vmul.f32 0.0078125, %v7330_v60 }
 0x589   :  { %v7369_v18 = vmul.f32 0.0078125, %v7367_v7  ;;  %v7370_v46 = vmul.f32 %v7368_v34, %v7368_v34 }
 0x58b   :  { %v7371_v30 = vsub.f32 %v7369_v18, %v7370_v46  ;;  %v11399_v18 = vld [vmem:[%s21698_s2 + $0x4b8] sm:$0xff] }
 0x58d   :  { %v7372_v48 = vmax.f32 %v7371_v30, 0.0 }
 0x58f   :  { %v7375_v4 = vadd.f32 1e-05, %v7372_v48 }
 0x591   :  { %15407 = vrsqrt.f32 %v7375_v4 }
 0x59b   :  { %v15408_v28 = vpop.eup %15407 }
 0x59c   :  { %v7377_v54 = vmul.f32 %v15408_v28, %v7373_v16 }
 0x59e   :  { %v7378_v59 = vmul.f32 %v7377_v54, %v7368_v34  ;;  %v20163_v24 = vrot.slane %v7377_v54, %v22299_v53  ;;  %v11398_v34 = vld [vmem:[%s21698_s2 + $0x4b0] sm:$0xff] }
 0x59f   :  { %v14484_v16 = vpack.c.bf16 %v11399_v18, %v11398_v34  ;;  %v11437_v34 = vld [vmem:[%s21698_s2 + $0x5e8] sm:$0xff] }
 0x5a0   :  { %v7379_v3 = vsub.f32 %v7374_v31, %v7378_v59  ;;  %v7398_v40 = vmul.f32 %v15031_v12, %v20163_v24  ;;  %v7384_v21 = vmul.f32 %v20069_v47, %v20163_v24  ;;  %v7385_v17 = vmul.f32 %v20067_v49, %v20163_v24  ;;  %v11403_v31 = vld [vmem:[%s21698_s2 + $0x4d8] sm:$0xff] }
 0x5a1   :  { %v7386_v26 = vmul.f32 %v20079_v37, %v20163_v24  ;;  %v7387_v8 = vmul.f32 %v20075_v29, %v20163_v24  ;;  %v7388_v55 = vmul.f32 %v20088_v25, %v20163_v24  ;;  %v7389_v36 = vmul.f32 %v20084_v1, %v20163_v24 }
 0x5a2   :  { %v20183_v12 = vrot.slane %v7379_v3, %v22299_v53  ;;  %v7390_v47 = vmul.f32 %v20098_v11, %v20163_v24  ;;  %v7392_v49 = vmul.f32 %v20108_v42, %v20163_v24  ;;  %v7393_v37 = vmul.f32 %v20104_v43, %v20163_v24  ;;  %v11406_v3 = vld [vmem:[%s21698_s2 + $0x4f0] sm:$0xff] }
 0x5a3   :  { %v7394_v29 = vmul.f32 %v20118_v52, %v20163_v24  ;;  %v7395_v25 = vmul.f32 %v20114_v62, %v20163_v24  ;;  %v7396_v1 = vmul.f32 %v20128_v22, %v20163_v24  ;;  %v7397_v13 = vmul.f32 %v20124_v50, %v20163_v24 }
 0x5a4   :  { %v7418_v11 = vadd.f32 %v20183_v12, %v7398_v40  ;;  %v7404_v19 = vadd.f32 %v20183_v12, %v7384_v21  ;;  %v7405_v42 = vadd.f32 %v20183_v12, %v7385_v17  ;;  %v7406_v43 = vadd.f32 %v20183_v12, %v7386_v26  ;;  %v11407_v40 = vld [vmem:[%s21698_s2 + $0x4f8] sm:$0xff]  ;;  %v11424_v17 = vld [vmem:[%s21698_s2 + $0x580] sm:$0xff]  ;;  %v11425_v26 = vld [vmem:[%s21698_s2 + $0x588] sm:$0xff] }
 0x5a5   :  { %v7407_v33 = vadd.f32 %v20183_v12, %v7387_v8  ;;  %v7408_v52 = vadd.f32 %v20183_v12, %v7388_v55  ;;  %v7409_v62 = vadd.f32 %v20183_v12, %v7389_v36  ;;  %v7410_v44 = vadd.f32 %v20183_v12, %v7390_v47  ;;  %v11426_v55 = vld [vmem:[%s21698_s2 + $0x590] sm:$0xff]  ;;  %v11427_v36 = vld [vmem:[%s21698_s2 + $0x598] sm:$0xff] }
 0x5a6   :  { %v20207_v22 = vmax.f32 %v7418_v11, 0.0  ;;  %v20209_v0 = vmax.f32 %v7404_v19, 0.0  ;;  %v20211_v50 = vmax.f32 %v7405_v42, 0.0  ;;  %v20213_v14 = vmax.f32 %v7406_v43, 0.0  ;;  %v11430_v11 = vld [vmem:[%s21698_s2 + $0x5b0] sm:$0xff]  ;;  %v11431_v19 = vld [vmem:[%s21698_s2 + $0x5b8] sm:$0xff] }
 0x5a7   :  { %v20215_v2 = vmax.f32 %v7407_v33, 0.0  ;;  %v20217_v41 = vmax.f32 %v7408_v52, 0.0  ;;  %v20219_v56 = vmax.f32 %v7409_v62, 0.0  ;;  %v20221_v58 = vmax.f32 %v7410_v44, 0.0  ;;  %v11432_v52 = vld [vmem:[%s21698_s2 + $0x5c0] sm:$0xff]  ;;  %v11433_v62 = vld [vmem:[%s21698_s2 + $0x5c8] sm:$0xff] }
 0x5a8   :  { %7450 = vst [vmem:[#allocation4 + $0x111] sm:$0xff] %v20207_v22  ;;  %7436 = vst [vmem:[#allocation4 + $0x11] sm:$0xff] %v20209_v0  ;;  %13081 = vmatmul.mubr.f32.vlgmr.msra.gmra.mrb[56].mxu1 %v20209_v0  ;;  %v7412_v6 = vadd.f32 %v20183_v12, %v7392_v49  ;;  %v7413_v10 = vadd.f32 %v20183_v12, %v7393_v37  ;;  %v7414_v32 = vadd.f32 %v20183_v12, %v7394_v29  ;;  %v11428_v37 = vld [vmem:[%s21698_s2 + $0x5a0] sm:$0xff]  ;;  %v11429_v29 = vld [vmem:[%s21698_s2 + $0x5a8] sm:$0xff] }
 0x5a9   :  { %7437 = vst [vmem:[#allocation4 + $0x21] sm:$0xff] %v20211_v50  ;;  %7438 = vst [vmem:[#allocation4 + $0x31] sm:$0xff] %v20213_v14  ;;  %v7415_v63 = vadd.f32 %v20183_v12, %v7395_v25  ;;  %14475 = vmatpush3.bf16.msra.mxu1 %v20060_v20  ;;  %13083 = vmatprep.mubr.f32.mxu1 %v20211_v50  ;;  %v7416_v51 = vadd.f32 %v20183_v12, %v7396_v1 }
 0x5aa   :  { %7439 = vst [vmem:[#allocation4 + $0x41] sm:$0xff] %v20215_v2  ;;  %7440 = vst [vmem:[#allocation4 + $0x51] sm:$0xff] %v20217_v41  ;;  %v7417_v35 = vadd.f32 %v20183_v12, %v7397_v13  ;;  %v7391_v27 = vmul.f32 %v20094_v45, %v20163_v24  ;;  %14477 = vmatprep.subr.bf16.mxu1 %v20165_v61  ;;  %v20243_v20 = vmax.f32 %v7412_v6, 0.0  ;;  %v20245_v60 = vmax.f32 %v7413_v10, 0.0 }
 0x5ab   :  { %7441 = vst [vmem:[#allocation4 + $0x61] sm:$0xff] %v20219_v56  ;;  %7442 = vst [vmem:[#allocation4 + $0x71] sm:$0xff] %v20221_v58  ;;  %v20247_v9 = vmax.f32 %v7414_v32, 0.0  ;;  %v20249_v7 = vmax.f32 %v7415_v63, 0.0  ;;  %v20257_v46 = vmax.f32 %v7416_v51, 0.0  ;;  %v7399_v48 = vmul.f32 %v20135_v23, %v20163_v24  ;;  %v11401_v23 = vld [vmem:[%s21698_s2 + $0x4c8] sm:$0xff] }
 0x5ac   :  { %v20259_v45 = vmax.f32 %v7417_v35, 0.0  ;;  %v7411_v30 = vadd.f32 %v20183_v12, %v7391_v27  ;;  %13084 = vmatmul.mubr.f32.gmra.mrb[58].mxu1 %v20213_v14  ;;  %7444 = vst [vmem:[#allocation4 + $0xb1] sm:$0xff] %v20243_v20  ;;  %7445 = vst [vmem:[#allocation4 + $0xc1] sm:$0xff] %v20245_v60  ;;  %v14488_v38 = vpack.c.bf16 %v11401_v23, %v11400_v5  ;;  %v11404_v24 = vld [vmem:[%s21698_s2 + $0x4e0] sm:$0xff]  ;;  %v11434_v32 = vld [vmem:[%s21698_s2 + $0x5d0] sm:$0xff] }
 0x5ad   :  { %7446 = vst [vmem:[#allocation4 + $0xd1] sm:$0xff] %v20247_v9  ;;  %7447 = vst [vmem:[#allocation4 + $0xe1] sm:$0xff] %v20249_v7  ;;  %14479 = vmatpush3.bf16.msra.mxu1 %v20165_v61  ;;  %13086 = vmatprep.mubr.f32.mxu1 %v20215_v2  ;;  %v7419_v28 = vadd.f32 %v20183_v12, %v7399_v48  ;;  %v14492_v59 = vpack.c.bf16 %v11403_v31, %v11402_v57  ;;  %v11405_v61 = vld [vmem:[%s21698_s2 + $0x4e8] sm:$0xff]  ;;  %v20328_v12 = vld [vmem:[#allocation4] sm:$0xff] }
 0x5ae   :  { %7448 = vst [vmem:[#allocation4 + $0xf1] sm:$0xff] %v20257_v46  ;;  %7449 = vst [vmem:[#allocation4 + $0x101] sm:$0xff] %v20259_v45  ;;  %v20273_v4 = vmax.f32 %v7411_v30, 0.0  ;;  %14481 = vmatprep.subr.bf16.mxu1 %v20167_v39  ;;  %v14500_v21 = vpack.c.bf16 %v11407_v40, %v11406_v3  ;;  %v14504_v8 = vpack.c.bf16 %v11425_v26, %v11424_v17  ;;  %v11435_v63 = vld [vmem:[%s21698_s2 + $0x5d8] sm:$0xff]  ;;  %v11436_v27 = vld [vmem:[%s21698_s2 + $0x5e0] sm:$0xff] }
 0x5af   :  { %v20285_v54 = vmax.f32 %v7419_v28, 0.0  ;;  %v14508_v47 = vpack.c.bf16 %v11427_v36, %v11426_v55  ;;  %v20331_v49 = vld [vmem:[#allocation4 + $0x10] sm:$0xff]  ;;  %v14512_v1 = vpack.c.bf16 %v11429_v29, %v11428_v37  ;;  %v14516_v43 = vpack.c.bf16 %v11431_v19, %v11430_v11  ;;  %v11439_v28 = vld [vmem:[%s21698_s2 + $0x5f8] sm:$0xff]  ;;  %v11441_v57 = vld [vmem:[%s21698_s2 + $0x608] sm:$0xff] }
 0x5b0   :  { %7443 = vst [vmem:[#allocation4 + $0x81] sm:$0xff] %v20273_v4  ;;  %13087 = vmatmul.mubr.f32.gmra.mrb[60].mxu1 %v20217_v41  ;;  %v20340_v25 = vld [vmem:[#allocation4 + $0x20] sm:$0xff]  ;;  %v20343_v13 = vld [vmem:[#allocation4 + $0x30] sm:$0xff]  ;;  %v14520_v6 = vpack.c.bf16 %v11433_v62, %v11432_v52  ;;  %v14524_v51 = vpack.c.bf16 %v11435_v63, %v11434_v32  ;;  %v14528_v30 = vpack.c.bf16 %v11437_v34, %v11436_v27  ;;  %v11443_v3 = vld [vmem:[%s21698_s2 + $0x618] sm:$0xff] }
 0x5b1   :  { %14483 = vmatpush3.bf16.msra.mxu1 %v20167_v39  ;;  %13089 = vmatprep.mubr.f32.mxu1 %v20219_v56  ;;  %7451 = vst [vmem:[#allocation4 + $0x121] sm:$0xff] %v20285_v54  ;;  %v14496_v39 = vpack.c.bf16 %v11405_v61, %v11404_v24  ;;  %v20352_v42 = vld [vmem:[#allocation4 + $0x40] sm:$0xff]  ;;  %v20355_v33 = vld [vmem:[#allocation4 + $0x50] sm:$0xff]  ;;  %v11445_v26 = vld [vmem:[%s21698_s2 + $0x628] sm:$0xff] }
 0x5b2   :  { %14485 = vmatprep.subr.bf16.mxu1 %v14484_v16  ;;  %v20364_v44 = vld [vmem:[#allocation4 + $0x60] sm:$0xff]  ;;  %v20367_v10 = vld [vmem:[#allocation4 + $0x70] sm:$0xff]  ;;  %v11447_v37 = vld [vmem:[%s21698_s2 + $0x638] sm:$0xff] }
 0x5b3   :  { %v20377_v35 = vld [vmem:[#allocation4 + $0xb0] sm:$0xff]  ;;  %v20386_v18 = vld [vmem:[#allocation4 + $0xc0] sm:$0xff] }
 0x5b4   :  { %13090 = vmatmul.mubr.f32.gmra.mrb[62].mxu1 %v20221_v58  ;;  %v20389_v48 = vld [vmem:[#allocation4 + $0xd0] sm:$0xff]  ;;  %v20398_v5 = vld [vmem:[#allocation4 + $0xe0] sm:$0xff] }
 0x5b5   :  { %14487 = vmatpush3.bf16.msra.mxu1 %v14484_v16  ;;  %13092 = vmatprep.mubr.f32.mxu1 %v7493_v15  ;;  %v11438_v16 = vld [vmem:[%s21698_s2 + $0x5f0] sm:$0xff]  ;;  %v20401_v15 = vld [vmem:[#allocation4 + $0xf0] sm:$0xff] }
 0x5b6   :  { %14489 = vmatprep.subr.bf16.mxu1 %v14488_v38  ;;  %v14532_v23 = vpack.c.bf16 %v11439_v28, %v11438_v16  ;;  %v20410_v31 = vld [vmem:[#allocation4 + $0x100] sm:$0xff]  ;;  %v20413_v61 = vld [vmem:[#allocation4 + $0x110] sm:$0xff]  ;;  %v11453_v16 = vld [vmem:[%s21698_s2 + $0x668] sm:$0xff] }
 0x5b7   :  { %v11444_v17 = vld [vmem:[%s21698_s2 + $0x620] sm:$0xff]  ;;  %v20443_v29 = vld [vmem:[#allocation4 + $0x42] sm:$0xff] }
 0x5b8   :  { %13093 = vmatmul.mubr.f32.gmra.mrb[64].mxu1 %v20243_v20  ;;  %v14544_v55 = vpack.c.bf16 %v11445_v26, %v11444_v17  ;;  %v20434_v36 = vld [vmem:[#allocation4 + $0x32] sm:$0xff]  ;;  %v20455_v52 = vld [vmem:[#allocation4 + $0x62] sm:$0xff] }
 0x5b9   :  { %14491 = vmatpush3.bf16.msra.mxu1 %v14488_v38  ;;  %13095 = vmatprep.mubr.f32.mxu1 %v20245_v60  ;;  %v11440_v38 = vld [vmem:[%s21698_s2 + $0x600] sm:$0xff]  ;;  %v7816_v62 = vld [vmem:[#allocation4 + $0xa2] sm:$0xff]  ;;  %v11457_v17 = vld [vmem:[%s21698_s2 + $0x688] sm:$0xff] }
 0x5ba   :  { %14493 = vmatprep.subr.bf16.mxu1 %v14492_v59  ;;  %v14536_v24 = vpack.c.bf16 %v11441_v57, %v11440_v38  ;;  %v20446_v11 = vld [vmem:[#allocation4 + $0x52] sm:$0xff]  ;;  %v11450_v63 = vld [vmem:[%s21698_s2 + $0x650] sm:$0xff] }
 0x5bb   :  { %v11448_v19 = vld [vmem:[%s21698_s2 + $0x640] sm:$0xff]  ;;  %v20476_v28 = vld [vmem:[#allocation4 + $0xc2] sm:$0xff] }
 0x5bc   :  { %13096 = vmatmul.mubr.f32.gmra.mrb[66].mxu1 %v20247_v9  ;;  %v20458_v32 = vld [vmem:[#allocation4 + $0x72] sm:$0xff]  ;;  %v11454_v57 = vld [vmem:[%s21698_s2 + $0x670] sm:$0xff] }
 0x5bd   :  { %14495 = vmatpush3.bf16.msra.mxu1 %v14492_v59  ;;  %13098 = vmatprep.mubr.f32.mxu1 %v20249_v7  ;;  %v7808_v59 = vld [vmem:[#allocation4 + $0x2] sm:$0xff]  ;;  %v20467_v34 = vld [vmem:[#allocation4 + $0xb2] sm:$0xff] }
 0x5be   :  { %14497 = vmatprep.subr.bf16.mxu1 %v14496_v39  ;;  %v20479_v38 = vld [vmem:[#allocation4 + $0xd2] sm:$0xff]  ;;  %v20500_v26 = vld [vmem:[#allocation4 + $0x102] sm:$0xff] }
 0x5c0   :  { %13099 = vmatmul.mubr.f32.gmra.mrb[68].mxu1 %v20257_v46 }
 0x5c1   :  { %14499 = vmatpush3.bf16.msra.mxu1 %v14496_v39  ;;  %13101 = vmatprep.mubr.f32.mxu1 %v20259_v45  ;;  %v11442_v39 = vld [vmem:[%s21698_s2 + $0x610] sm:$0xff] }
 0x5c2   :  { %14501 = vmatprep.subr.bf16.mxu1 %v14500_v21  ;;  %v14540_v40 = vpack.c.bf16 %v11443_v3, %v11442_v39  ;;  %v20491_v3 = vld [vmem:[#allocation4 + $0xf2] sm:$0xff] }
 0x5c4   :  { %13102 = vmatmul.mubr.f32.gmra.mrb[70].mxu1 %v20207_v22 }
 0x5c5   :  { %14503 = vmatpush3.bf16.msra.mxu1 %v14500_v21  ;;  %13136 = vmatprep.mubr.f32.mxu1 %v20328_v12  ;;  %v20422_v21 = vld [vmem:[#allocation4 + $0x12] sm:$0xff] }
 0x5c6   :  { %14505 = vmatprep.subr.bf16.mxu1 %v14504_v8 }
 0x5c8   :  { %13137 = vmatmul.mubr.f32.vlgmr.msra.gmra.mrb[56].mxu1 %v20331_v49 }
 0x5c9   :  { %14507 = vmatpush3.bf16.msra.mxu1 %v14504_v8  ;;  %13139 = vmatprep.mubr.f32.mxu1 %v20340_v25  ;;  %v20431_v8 = vld [vmem:[#allocation4 + $0x22] sm:$0xff] }
 0x5ca   :  { %14509 = vmatprep.subr.bf16.mxu1 %v14508_v47 }
 0x5cc   :  { %13140 = vmatmul.mubr.f32.gmra.mrb[58].mxu1 %v20343_v13 }
 0x5cd   :  { %14511 = vmatpush3.bf16.msra.mxu1 %v14508_v47  ;;  %13142 = vmatprep.mubr.f32.mxu1 %v20352_v42  ;;  %v11446_v47 = vld [vmem:[%s21698_s2 + $0x630] sm:$0xff] }
 0x5ce   :  { %14513 = vmatprep.subr.bf16.mxu1 %v14512_v1 }
 0x5d0   :  { %13143 = vmatmul.mubr.f32.gmra.mrb[60].mxu1 %v20355_v33 }
 0x5d1   :  { %14515 = vmatpush3.bf16.msra.mxu1 %v14512_v1  ;;  %13145 = vmatprep.mubr.f32.mxu1 %v20364_v44  ;;  %v14548_v1 = vpack.c.bf16 %v11447_v37, %v11446_v47  ;;  %v20503_v47 = vld [vmem:[#allocation4 + $0x112] sm:$0xff]  ;;  %v11458_v37 = vld [vmem:[%s21698_s2 + $0x690] sm:$0xff] }
 0x5d2   :  { %14517 = vmatprep.subr.bf16.mxu1 %v14516_v43 }
 0x5d4   :  { %13146 = vmatmul.mubr.f32.gmra.mrb[62].mxu1 %v20367_v10 }
 0x5d5   :  { %14519 = vmatpush3.bf16.msra.mxu1 %v14516_v43  ;;  %13148 = vmatprep.mubr.f32.mxu1 %v20328_v12  ;;  %v11449_v43 = vld [vmem:[%s21698_s2 + $0x648] sm:$0xff] }
 0x5d6   :  { %14521 = vmatprep.subr.bf16.mxu1 %v14520_v6 }
 0x5d8   :  { %13149 = vmatmul.mubr.f32.gmra.mrb[64].mxu1 %v20377_v35 }
 0x5d9   :  { %14523 = vmatpush3.bf16.msra.mxu1 %v14520_v6  ;;  %13151 = vmatprep.mubr.f32.mxu1 %v20386_v18  ;;  %v14552_v6 = vpack.c.bf16 %v11449_v43, %v11448_v19  ;;  %v11460_v43 = vld [vmem:[%s21698_s2 + $0x6a0] sm:$0xff] }
 0x5da   :  { %14525 = vmatprep.subr.bf16.mxu1 %v14524_v51 }
 0x5dc   :  { %13152 = vmatmul.mubr.f32.gmra.mrb[66].mxu1 %v20389_v48 }
 0x5dd   :  { %14527 = vmatpush3.bf16.msra.mxu1 %v14524_v51  ;;  %13154 = vmatprep.mubr.f32.mxu1 %v20398_v5  ;;  %v11451_v51 = vld [vmem:[%s21698_s2 + $0x658] sm:$0xff] }
 0x5de   :  { %14529 = vmatprep.subr.bf16.mxu1 %v14528_v30  ;;  %v14556_v27 = vpack.c.bf16 %v11451_v51, %v11450_v63  ;;  %v11463_v63 = vld [vmem:[%s21698_s2 + $0x6b8] sm:$0xff] }
 0x5e0   :  { %13155 = vmatmul.mubr.f32.gmra.mrb[68].mxu1 %v20401_v15 }
 0x5e1   :  { %14531 = vmatpush3.bf16.msra.mxu1 %v14528_v30  ;;  %13157 = vmatprep.mubr.f32.mxu1 %v20410_v31  ;;  %v11452_v30 = vld [vmem:[%s21698_s2 + $0x660] sm:$0xff] }
 0x5e2   :  { %14533 = vmatprep.subr.bf16.mxu1 %v14532_v23 }
 0x5e4   :  { %13158 = vmatmul.mubr.f32.gmra.mrb[70].mxu1 %v20413_v61 }
 0x5e5   :  { %14535 = vmatpush3.bf16.msra.mxu1 %v14532_v23  ;;  %13192 = vmatprep.mubr.f32.mxu1 %v7808_v59  ;;  %v14560_v23 = vpack.c.bf16 %v11453_v16, %v11452_v30  ;;  %v11455_v59 = vld [vmem:[%s21698_s2 + $0x678] sm:$0xff]  ;;  %v11465_v30 = vld [vmem:[%s21698_s2 + $0x6c8] sm:$0xff] }
 0x5e6   :  { %14537 = vmatprep.subr.bf16.mxu1 %v14536_v24  ;;  %v14564_v39 = vpack.c.bf16 %v11455_v59, %v11454_v57  ;;  %v11466_v57 = vld [vmem:[%s21698_s2 + $0x6d0] sm:$0xff]  ;;  %v11467_v59 = vld [vmem:[%s21698_s2 + $0x6d8] sm:$0xff] }
 0x5e8   :  { %13193 = vmatmul.mubr.f32.vlgmr.msra.gmra.mrb[56].mxu1 %v20422_v21 }
 0x5e9   :  { %14539 = vmatpush3.bf16.msra.mxu1 %v14536_v24  ;;  %13195 = vmatprep.mubr.f32.mxu1 %v20431_v8  ;;  %v20488_v24 = vld [vmem:[#allocation4 + $0xe2] sm:$0xff] }
 0x5ea   :  { %14541 = vmatprep.subr.bf16.mxu1 %v14540_v40 }
 0x5ec   :  { %13196 = vmatmul.mubr.f32.gmra.mrb[58].mxu1 %v20434_v36 }
 0x5ed   :  { %14543 = vmatpush3.bf16.msra.mxu1 %v14540_v40  ;;  %13198 = vmatprep.mubr.f32.mxu1 %v20443_v29  ;;  %v11456_v40 = vld [vmem:[%s21698_s2 + $0x680] sm:$0xff] }
 0x5ee   :  { %14545 = vmatprep.subr.bf16.mxu1 %v14544_v55 }
 0x5f0   :  { %13199 = vmatmul.mubr.f32.gmra.mrb[60].mxu1 %v20446_v11 }
 0x5f1   :  { %14547 = vmatpush3.bf16.msra.mxu1 %v14544_v55  ;;  %13201 = vmatprep.mubr.f32.mxu1 %v20455_v52  ;;  %v14568_v55 = vpack.c.bf16 %v11457_v17, %v11456_v40  ;;  %v11468_v40 = vld [vmem:[%s21698_s2 + $0x6e0] sm:$0xff]  ;;  %v11469_v17 = vld [vmem:[%s21698_s2 + $0x6e8] sm:$0xff] }
 0x5f2   :  { %14549 = vmatprep.subr.bf16.mxu1 %v14548_v1 }
 0x5f4   :  { %13202 = vmatmul.mubr.f32.gmra.mrb[62].mxu1 %v20458_v32 }
 0x5f5   :  { %14551 = vmatpush3.bf16.msra.mxu1 %v14548_v1  ;;  %13204 = vmatprep.mubr.f32.mxu1 %v7816_v62  ;;  %v11459_v1 = vld [vmem:[%s21698_s2 + $0x698] sm:$0xff]  ;;  %v11461_v62 = vld [vmem:[%s21698_s2 + $0x6a8] sm:$0xff] }
 0x5f6   :  { %14553 = vmatprep.subr.bf16.mxu1 %v14552_v6  ;;  %v14572_v19 = vpack.c.bf16 %v11459_v1, %v11458_v37  ;;  %v11471_v37 = vld [vmem:[%s21698_s2 + $0x6f8] sm:$0xff] }
 0x5f8   :  { %13205 = vmatmul.mubr.f32.gmra.mrb[64].mxu1 %v20467_v34 }
 0x5f9   :  { %14555 = vmatpush3.bf16.msra.mxu1 %v14552_v6  ;;  %13207 = vmatprep.mubr.f32.mxu1 %v20476_v28  ;;  %v14576_v6 = vpack.c.bf16 %v11461_v62, %v11460_v43  ;;  %v11473_v43 = vld [vmem:[%s21698_s2 + $0x708] sm:$0xff] }
 0x5fa   :  { %14557 = vmatprep.subr.bf16.mxu1 %v14556_v27 }
 0x5fc   :  { %13208 = vmatmul.mubr.f32.gmra.mrb[66].mxu1 %v20479_v38 }
 0x5fd   :  { %14559 = vmatpush3.bf16.msra.mxu1 %v14556_v27  ;;  %13210 = vmatprep.mubr.f32.mxu1 %v20488_v24  ;;  %v11464_v27 = vld [vmem:[%s21698_s2 + $0x6c0] sm:$0xff] }
 0x5fe   :  { %14561 = vmatprep.subr.bf16.mxu1 %v14560_v23  ;;  %v14584_v16 = vpack.c.bf16 %v11465_v30, %v11464_v27  ;;  %v11476_v27 = vld [vmem:[%s21698_s2 + $0x720] sm:$0xff]  ;;  %v11477_v30 = vld [vmem:[%s21698_s2 + $0x728] sm:$0xff] }
 0x600   :  { %13211 = vmatmul.mubr.f32.gmra.mrb[68].mxu1 %v20491_v3 }
 0x601   :  { %14563 = vmatpush3.bf16.msra.mxu1 %v14560_v23  ;;  %13213 = vmatprep.mubr.f32.mxu1 %v20500_v26  ;;  %v20537_v23 = vld [vmem:[#allocation4 + $0x80] sm:$0xff] }
 0x602   :  { %14565 = vmatprep.subr.bf16.mxu1 %v14564_v39 }
 0x604   :  { %13214 = vmatmul.mubr.f32.gmra.mrb[70].mxu1 %v20503_v47 }
 0x605   :  { %14567 = vmatpush3.bf16.msra.mxu1 %v14564_v39  ;;  %13248 = vmatprep.mubr.f32.mxu1 %v20331_v49  ;;  %v11462_v49 = vld [vmem:[%s21698_s2 + $0x6b0] sm:$0xff]  ;;  %v14588_v39 = vpack.c.bf16 %v11467_v59, %v11466_v57  ;;  %v11479_v57 = vld [vmem:[%s21698_s2 + $0x738] sm:$0xff]  ;;  %v11481_v59 = vld [vmem:[%s21698_s2 + $0x748] sm:$0xff] }
 0x606   :  { %14569 = vmatprep.subr.bf16.mxu1 %v14568_v55  ;;  %v14580_v51 = vpack.c.bf16 %v11463_v63, %v11462_v49  ;;  %v11474_v49 = vld [vmem:[%s21698_s2 + $0x710] sm:$0xff]  ;;  %v11475_v63 = vld [vmem:[%s21698_s2 + $0x718] sm:$0xff] }
 0x608   :  { %13249 = vmatmul.mubr.f32.vlgmr.msra.gmra.mrb[56].mxu1 %v20340_v25 }
 0x609   :  { %14571 = vmatpush3.bf16.msra.mxu1 %v14568_v55  ;;  %13251 = vmatprep.mubr.f32.mxu1 %v20343_v13  ;;  %v14592_v55 = vpack.c.bf16 %v11469_v17, %v11468_v40  ;;  %v11485_v40 = vld [vmem:[%s21698_s2 + $0x768] sm:$0xff] }
 0x60a   :  { %14573 = vmatprep.subr.bf16.mxu1 %v14572_v19 }
 0x60c   :  { %13252 = vmatmul.mubr.f32.gmra.mrb[58].mxu1 %v20352_v42 }
 0x60d   :  { %14575 = vmatpush3.bf16.msra.mxu1 %v14572_v19  ;;  %13254 = vmatprep.mubr.f32.mxu1 %v20355_v33  ;;  %v11472_v19 = vld [vmem:[%s21698_s2 + $0x700] sm:$0xff] }
 0x60e   :  { %14577 = vmatprep.subr.bf16.mxu1 %v14576_v6  ;;  %v14600_v62 = vpack.c.bf16 %v11473_v43, %v11472_v19  ;;  %v11491_v19 = vld [vmem:[%s21698_s2 + $0x798] sm:$0xff] }
 0x610   :  { %13255 = vmatmul.mubr.f32.gmra.mrb[60].mxu1 %v20364_v44 }
 0x611   :  { %14579 = vmatpush3.bf16.msra.mxu1 %v14576_v6  ;;  %13257 = vmatprep.mubr.f32.mxu1 %v20367_v10  ;;  %v20571_v6 = vld [vmem:[#allocation4 + $0x120] sm:$0xff] }
 0x612   :  { %14581 = vmatprep.subr.bf16.mxu1 %v14580_v51 }
 0x614   :  { %13258 = vmatmul.mubr.f32.gmra.mrb[62].mxu1 %v20537_v23 }
 0x615   :  { %14583 = vmatpush3.bf16.msra.mxu1 %v14580_v51  ;;  %13260 = vmatprep.mubr.f32.mxu1 %v20377_v35  ;;  %v11470_v35 = vld [vmem:[%s21698_s2 + $0x6f0] sm:$0xff]  ;;  %v14604_v51 = vpack.c.bf16 %v11475_v63, %v11474_v49  ;;  %v11495_v63 = vld [vmem:[%s21698_s2 + $0x7b8] sm:$0xff] }
 0x616   :  { %14585 = vmatprep.subr.bf16.mxu1 %v14584_v16  ;;  %v14596_v1 = vpack.c.bf16 %v11471_v37, %v11470_v35  ;;  %v11489_v35 = vld [vmem:[%s21698_s2 + $0x788] sm:$0xff] }
 0x618   :  { %13261 = vmatmul.mubr.f32.gmra.mrb[64].mxu1 %v20386_v18 }
 0x619   :  { %14587 = vmatpush3.bf16.msra.mxu1 %v14584_v16  ;;  %13263 = vmatprep.mubr.f32.mxu1 %v20389_v48  ;;  %v14608_v16 = vpack.c.bf16 %v11477_v30, %v11476_v27  ;;  %v11496_v27 = vld [vmem:[%s21698_s2 + $0x7c0] sm:$0xff]  ;;  %v11497_v30 = vld [vmem:[%s21698_s2 + $0x7c8] sm:$0xff] }
 0x61a   :  { %14589 = vmatprep.subr.bf16.mxu1 %v14588_v39 }
 0x61c   :  { %13264 = vmatmul.mubr.f32.gmra.mrb[66].mxu1 %v20398_v5 }
 0x61d   :  { %14591 = vmatpush3.bf16.msra.mxu1 %v14588_v39  ;;  %13266 = vmatprep.mubr.f32.mxu1 %v20401_v15  ;;  %v11483_v39 = vld [vmem:[%s21698_s2 + $0x758] sm:$0xff] }
 0x61e   :  { %14593 = vmatprep.subr.bf16.mxu1 %v14592_v55 }
 0x620   :  { %13267 = vmatmul.mubr.f32.gmra.mrb[68].mxu1 %v20410_v31 }
 0x621   :  { %14595 = vmatpush3.bf16.msra.mxu1 %v14592_v55  ;;  %13269 = vmatprep.mubr.f32.mxu1 %v20413_v61  ;;  %v11487_v55 = vld [vmem:[%s21698_s2 + $0x778] sm:$0xff] }
 0x622   :  { %14597 = vmatprep.subr.bf16.mxu1 %v14596_v1 }
 0x624   :  { %13270 = vmatmul.mubr.f32.gmra.mrb[70].mxu1 %v20571_v6 }
 0x625   :  { %14599 = vmatpush3.bf16.msra.mxu1 %v14596_v1  ;;  %13304 = vmatprep.mubr.f32.mxu1 %v20209_v0  ;;  %v11478_v0 = vld [vmem:[%s21698_s2 + $0x730] sm:$0xff] }
 0x626   :  { %14601 = vmatprep.subr.bf16.mxu1 %v14600_v62  ;;  %v11490_v1 = vld [vmem:[%s21698_s2 + $0x790] sm:$0xff] }
 0x627   :  { %v14636_v43 = vpack.c.bf16 %v11491_v19, %v11490_v1  ;;  %v11511_v19 = vld [vmem:[%s21698_s2 + $0x838] sm:$0xff] }
 0x628   :  { %13305 = vmatmul.mubr.f32.vlgmr.msra.gmra.mrb[56].mxu1 %v20211_v50  ;;  %v14612_v50 = vpack.c.bf16 %v11479_v57, %v11478_v0  ;;  %v20669_v0 = vld [vmem:[#allocation4 + $0x82] sm:$0xff] }
 0x629   :  { %14603 = vmatpush3.bf16.msra.mxu1 %v14600_v62  ;;  %13307 = vmatprep.mubr.f32.mxu1 %v20213_v14  ;;  %v11480_v14 = vld [vmem:[%s21698_s2 + $0x740] sm:$0xff]  ;;  %v11493_v62 = vld [vmem:[%s21698_s2 + $0x7a8] sm:$0xff]  ;;  %v11498_v57 = vld [vmem:[%s21698_s2 + $0x7d0] sm:$0xff] }
 0x62a   :  { %14605 = vmatprep.subr.bf16.mxu1 %v14604_v51 }
 0x62c   :  { %13308 = vmatmul.mubr.f32.gmra.mrb[58].mxu1 %v20215_v2  ;;  %v14616_v2 = vpack.c.bf16 %v11481_v59, %v11480_v14  ;;  %v11500_v59 = vld [vmem:[%s21698_s2 + $0x7e0] sm:$0xff] }
 0x62d   :  { %14607 = vmatpush3.bf16.msra.mxu1 %v14604_v51  ;;  %13310 = vmatprep.mubr.f32.mxu1 %v20217_v41  ;;  %v11482_v41 = vld [vmem:[%s21698_s2 + $0x750] sm:$0xff] }
 0x62e   :  { %14609 = vmatprep.subr.bf16.mxu1 %v14608_v16 }
 0x630   :  { %13311 = vmatmul.mubr.f32.gmra.mrb[60].mxu1 %v20219_v56  ;;  %v14620_v56 = vpack.c.bf16 %v11483_v39, %v11482_v41  ;;  %v11503_v39 = vld [vmem:[%s21698_s2 + $0x7f8] sm:$0xff] }
 0x631   :  { %14611 = vmatpush3.bf16.msra.mxu1 %v14608_v16  ;;  %13313 = vmatprep.mubr.f32.mxu1 %v20221_v58  ;;  %v11484_v58 = vld [vmem:[%s21698_s2 + $0x760] sm:$0xff]  ;;  %v14648_v16 = vpack.c.bf16 %v11497_v30, %v11496_v27  ;;  %v8778_v27 = vld [vmem:[#allocation4 + $0x21] sm:$0xff] }
 0x632   :  { %14613 = vmatprep.subr.bf16.mxu1 %v14612_v50  ;;  %v14624_v17 = vpack.c.bf16 %v11485_v40, %v11484_v58  ;;  %v11504_v58 = vld [vmem:[%s21698_s2 + $0x800] sm:$0xff]  ;;  %v11505_v40 = vld [vmem:[%s21698_s2 + $0x808] sm:$0xff] }
 0x633   :  { %v8779_v30 = vld [vmem:[#allocation4 + $0x31] sm:$0xff] }
 0x634   :  { %13314 = vmatmul.mubr.f32.gmra.mrb[62].mxu1 %v20273_v4 }
 0x635   :  { %14615 = vmatpush3.bf16.msra.mxu1 %v14612_v50  ;;  %13316 = vmatprep.mubr.f32.mxu1 %v20243_v20  ;;  %v11486_v20 = vld [vmem:[%s21698_s2 + $0x770] sm:$0xff]  ;;  %v11499_v50 = vld [vmem:[%s21698_s2 + $0x7d8] sm:$0xff] }
 0x636   :  { %14617 = vmatprep.subr.bf16.mxu1 %v14616_v2  ;;  %v14652_v14 = vpack.c.bf16 %v11499_v50, %v11498_v57  ;;  %v8780_v57 = vld [vmem:[#allocation4 + $0x41] sm:$0xff]  ;;  %v8781_v50 = vld [vmem:[#allocation4 + $0x51] sm:$0xff] }
 0x638   :  { %13317 = vmatmul.mubr.f32.gmra.mrb[64].mxu1 %v20245_v60  ;;  %v14628_v60 = vpack.c.bf16 %v11487_v55, %v11486_v20  ;;  %v20703_v20 = vld [vmem:[#allocation4 + $0x122] sm:$0xff] }
 0x639   :  { %14619 = vmatpush3.bf16.msra.mxu1 %v14616_v2  ;;  %13319 = vmatprep.mubr.f32.mxu1 %v20247_v9  ;;  %v11488_v9 = vld [vmem:[%s21698_s2 + $0x780] sm:$0xff]  ;;  %v11501_v2 = vld [vmem:[%s21698_s2 + $0x7e8] sm:$0xff]  ;;  %v11506_v55 = vld [vmem:[%s21698_s2 + $0x810] sm:$0xff] }
 0x63a   :  { %14621 = vmatprep.subr.bf16.mxu1 %v14620_v56  ;;  %v14632_v37 = vpack.c.bf16 %v11489_v35, %v11488_v9  ;;  %v14656_v41 = vpack.c.bf16 %v11501_v2, %v11500_v59  ;;  %v11508_v35 = vld [vmem:[%s21698_s2 + $0x820] sm:$0xff]  ;;  %v11527_v59 = vld [vmem:[%s21698_s2 + $0x8b8] sm:$0xff] }
 0x63b   :  { %v8782_v2 = vld [vmem:[#allocation4 + $0x61] sm:$0xff] }
 0x63c   :  { %13320 = vmatmul.mubr.f32.gmra.mrb[66].mxu1 %v20249_v7 }
 0x63d   :  { %14623 = vmatpush3.bf16.msra.mxu1 %v14620_v56  ;;  %13322 = vmatprep.mubr.f32.mxu1 %v20257_v46 }
 0x63e   :  { %14625 = vmatprep.subr.bf16.mxu1 %v14624_v17 }
 0x640   :  { %13323 = vmatmul.mubr.f32.gmra.mrb[68].mxu1 %v20259_v45 }
 0x641   :  { %14627 = vmatpush3.bf16.msra.mxu1 %v14624_v17  ;;  %13325 = vmatprep.mubr.f32.mxu1 %v20207_v22  ;;  %v11492_v22 = vld [vmem:[%s21698_s2 + $0x7a0] sm:$0xff]  ;;  %v14664_v17 = vpack.c.bf16 %v11505_v40, %v11504_v58 }
 0x642   :  { %14629 = vmatprep.subr.bf16.mxu1 %v14628_v60  ;;  %v14640_v49 = vpack.c.bf16 %v11493_v62, %v11492_v22  ;;  %v11515_v22 = vld [vmem:[%s21698_s2 + $0x858] sm:$0xff]  ;;  %v11517_v62 = vld [vmem:[%s21698_s2 + $0x868] sm:$0xff] }
 0x643   :  { %v8785_v58 = vld [vmem:[#allocation4 + $0x91] sm:$0xff] }
 0x644   :  { %13326 = vmatmul.mubr.f32.gmra.mrb[70].mxu1 %v20285_v54 }
 0x645   :  { %14631 = vmatpush3.bf16.msra.mxu1 %v14628_v60  ;;  %13360 = vmatprep.mubr.f32.mxu1 %v20422_v21  ;;  %v11494_v21 = vld [vmem:[%s21698_s2 + $0x7b0] sm:$0xff]  ;;  %v11507_v60 = vld [vmem:[%s21698_s2 + $0x818] sm:$0xff] }
 0x646   :  { %14633 = vmatprep.subr.bf16.mxu1 %v14632_v37  ;;  %v14644_v51 = vpack.c.bf16 %v11495_v63, %v11494_v21  ;;  %v14668_v9 = vpack.c.bf16 %v11507_v60, %v11506_v55  ;;  %v11519_v21 = vld [vmem:[%s21698_s2 + $0x878] sm:$0xff]  ;;  %v11521_v63 = vld [vmem:[%s21698_s2 + $0x888] sm:$0xff] }
 0x647   :  { %v11531_v55 = vld [vmem:[%s21698_s2 + $0x8d8] sm:$0xff] }
 0x648   :  { %13361 = vmatmul.mubr.f32.vlgmr.msra.gmra.mrb[56].mxu1 %v20431_v8  ;;  %v8786_v60 = vld [vmem:[#allocation4 + $0xc1] sm:$0xff] }
 0x649   :  { %14635 = vmatpush3.bf16.msra.mxu1 %v14632_v37  ;;  %13363 = vmatprep.mubr.f32.mxu1 %v20434_v36  ;;  %v11509_v37 = vld [vmem:[%s21698_s2 + $0x828] sm:$0xff] }
 0x64a   :  { %14637 = vmatprep.subr.bf16.mxu1 %v14636_v43  ;;  %v14672_v1 = vpack.c.bf16 %v11509_v37, %v11508_v35  ;;  %v8787_v35 = vld [vmem:[#allocation4 + $0xd1] sm:$0xff] }
 0x64b   :  { %v11533_v37 = vld [vmem:[%s21698_s2 + $0x8e8] sm:$0xff] }
 0x64c   :  { %13364 = vmatmul.mubr.f32.gmra.mrb[58].mxu1 %v20443_v29 }
 0x64d   :  { %14639 = vmatpush3.bf16.msra.mxu1 %v14636_v43  ;;  %13366 = vmatprep.mubr.f32.mxu1 %v20446_v11  ;;  %v11513_v43 = vld [vmem:[%s21698_s2 + $0x848] sm:$0xff] }
 0x64e   :  { %14641 = vmatprep.subr.bf16.mxu1 %v14640_v49 }
 0x650   :  { %13367 = vmatmul.mubr.f32.gmra.mrb[60].mxu1 %v20455_v52 }
 0x651   :  { %14643 = vmatpush3.bf16.msra.mxu1 %v14640_v49  ;;  %13369 = vmatprep.mubr.f32.mxu1 %v20458_v32 }
 0x652   :  { %14645 = vmatprep.subr.bf16.mxu1 %v14644_v51 }
 0x654   :  { %13370 = vmatmul.mubr.f32.gmra.mrb[62].mxu1 %v20669_v0 }
 0x655   :  { %14647 = vmatpush3.bf16.msra.mxu1 %v14644_v51  ;;  %13372 = vmatprep.mubr.f32.mxu1 %v20467_v34  ;;  %v11502_v34 = vld [vmem:[%s21698_s2 + $0x7f0] sm:$0xff]  ;;  %v11523_v51 = vld [vmem:[%s21698_s2 + $0x898] sm:$0xff] }
 0x656   :  { %14649 = vmatprep.subr.bf16.mxu1 %v14648_v16  ;;  %v14660_v56 = vpack.c.bf16 %v11503_v39, %v11502_v34  ;;  %v8783_v34 = vld [vmem:[#allocation4 + $0x71] sm:$0xff] }
 0x657   :  { %v11528_v39 = vld [vmem:[%s21698_s2 + $0x8c0] sm:$0xff] }
 0x658   :  { %13373 = vmatmul.mubr.f32.gmra.mrb[64].mxu1 %v20476_v28 }
 0x659   :  { %14651 = vmatpush3.bf16.msra.mxu1 %v14648_v16  ;;  %13375 = vmatprep.mubr.f32.mxu1 %v20479_v38  ;;  %v11525_v16 = vld [vmem:[%s21698_s2 + $0x8a8] sm:$0xff] }
 0x65a   :  { %14653 = vmatprep.subr.bf16.mxu1 %v14652_v14 }
 0x65c   :  { %13376 = vmatmul.mubr.f32.gmra.mrb[66].mxu1 %v20488_v24 }
 0x65d   :  { %14655 = vmatpush3.bf16.msra.mxu1 %v14652_v14  ;;  %13378 = vmatprep.mubr.f32.mxu1 %v20491_v3  ;;  %v11526_v14 = vld [vmem:[%s21698_s2 + $0x8b0] sm:$0xff] }
 0x65e   :  { %14657 = vmatprep.subr.bf16.mxu1 %v14656_v41 }
 0x660   :  { %13379 = vmatmul.mubr.f32.gmra.mrb[68].mxu1 %v20500_v26 }
 0x661   :  { %14659 = vmatpush3.bf16.msra.mxu1 %v14656_v41  ;;  %13381 = vmatprep.mubr.f32.mxu1 %v20503_v47  ;;  %v14708_v41 = vpack.c.bf16 %v11527_v59, %v11526_v14 }
 0x662   :  { %14661 = vmatprep.subr.bf16.mxu1 %v14660_v56 }
 0x664   :  { %13382 = vmatmul.mubr.f32.gmra.mrb[70].mxu1 %v20703_v20 }
 0x665   :  { %14663 = vmatpush3.bf16.msra.mxu1 %v14660_v56  ;;  %13416 = vmatprep.mubr.f32.mxu1 %v20340_v25  ;;  %v11510_v25 = vld [vmem:[%s21698_s2 + $0x830] sm:$0xff]  ;;  %v11529_v56 = vld [vmem:[%s21698_s2 + $0x8c8] sm:$0xff] }
 0x666   :  { %14665 = vmatprep.subr.bf16.mxu1 %v14664_v17  ;;  %v14712_v40 = vpack.c.bf16 %v11529_v56, %v11528_v39 }
 0x668   :  { %13417 = vmatmul.mubr.f32.vlgmr.msra.gmra.mrb[56].mxu1 %v20343_v13  ;;  %v14676_v13 = vpack.c.bf16 %v11511_v19, %v11510_v25  ;;  %v11534_v25 = vld [vmem:[%s21698_s2 + $0x8f0] sm:$0xff]  ;;  %v11535_v19 = vld [vmem:[%s21698_s2 + $0x8f8] sm:$0xff] }
 0x669   :  { %14667 = vmatpush3.bf16.msra.mxu1 %v14664_v17  ;;  %13419 = vmatprep.mubr.f32.mxu1 %v20352_v42  ;;  %v11512_v42 = vld [vmem:[%s21698_s2 + $0x840] sm:$0xff]  ;;  %v11530_v17 = vld [vmem:[%s21698_s2 + $0x8d0] sm:$0xff] }
 0x66a   :  { %14669 = vmatprep.subr.bf16.mxu1 %v14668_v9 }
 0x66c   :  { %13420 = vmatmul.mubr.f32.gmra.mrb[58].mxu1 %v20355_v33  ;;  %v14680_v33 = vpack.c.bf16 %v11513_v43, %v11512_v42  ;;  %v8791_v42 = vld [vmem:[#allocation4 + $0x111] sm:$0xff]  ;;  %v11562_v43 = vld [vmem:[%s21698_s2 + $0x9d0] sm:$0xff] }
 0x66d   :  { %14671 = vmatpush3.bf16.msra.mxu1 %v14668_v9  ;;  %13422 = vmatprep.mubr.f32.mxu1 %v20364_v44  ;;  %v11514_v44 = vld [vmem:[%s21698_s2 + $0x850] sm:$0xff]  ;;  %v14716_v9 = vpack.c.bf16 %v11531_v55, %v11530_v17 }
 0x66e   :  { %14673 = vmatprep.subr.bf16.mxu1 %v14672_v1 }
 0x670   :  { %13423 = vmatmul.mubr.f32.gmra.mrb[60].mxu1 %v20367_v10  ;;  %v14684_v10 = vpack.c.bf16 %v11515_v22, %v11514_v44  ;;  %v11564_v22 = vld [vmem:[%s21698_s2 + $0x9e0] sm:$0xff] }
 0x671   :  { %14675 = vmatpush3.bf16.msra.mxu1 %v14672_v1  ;;  %13425 = vmatprep.mubr.f32.mxu1 %v20537_v23  ;;  %v11516_v23 = vld [vmem:[%s21698_s2 + $0x860] sm:$0xff] }
 0x672   :  { %14677 = vmatprep.subr.bf16.mxu1 %v14676_v13  ;;  %v14688_v49 = vpack.c.bf16 %v11517_v62, %v11516_v23  ;;  %v11566_v23 = vld [vmem:[%s21698_s2 + $0x9f0] sm:$0xff] }
 0x674   :  { %13426 = vmatmul.mubr.f32.gmra.mrb[62].mxu1 %v20328_v12 }
 0x675   :  { %14679 = vmatpush3.bf16.msra.mxu1 %v14676_v13  ;;  %13428 = vmatprep.mubr.f32.mxu1 %v20386_v18  ;;  %v11518_v18 = vld [vmem:[%s21698_s2 + $0x870] sm:$0xff]  ;;  %v14724_v13 = vpack.c.bf16 %v11535_v19, %v11534_v25 }
 0x676   :  { %14681 = vmatprep.subr.bf16.mxu1 %v14680_v33 }
 0x678   :  { %13429 = vmatmul.mubr.f32.gmra.mrb[64].mxu1 %v20389_v48  ;;  %v14692_v48 = vpack.c.bf16 %v11519_v21, %v11518_v18  ;;  %v9341_v18 = vld [vmem:[#allocation4 + $0x1] sm:$0xff] }
 0x679   :  { %14683 = vmatpush3.bf16.msra.mxu1 %v14680_v33  ;;  %13431 = vmatprep.mubr.f32.mxu1 %v20398_v5  ;;  %v11520_v5 = vld [vmem:[%s21698_s2 + $0x880] sm:$0xff]  ;;  %v11563_v33 = vld [vmem:[%s21698_s2 + $0x9d8] sm:$0xff] }
 0x67a   :  { %14685 = vmatprep.subr.bf16.mxu1 %v14684_v10  ;;  %v14748_v44 = vpack.c.bf16 %v11563_v33, %v11562_v43  ;;  %13584 = vmatprep.mubr.f32.mxu0 %v9341_v18 }
 0x67c   :  { %13432 = vmatmul.mubr.f32.gmra.mrb[66].mxu1 %v20401_v15  ;;  %v14696_v15 = vpack.c.bf16 %v11521_v63, %v11520_v5  ;;  %v11537_v5 = vld [vmem:[%s21698_s2 + $0x908] sm:$0xff] }
 0x67d   :  { %14687 = vmatpush3.bf16.msra.mxu1 %v14684_v10  ;;  %13434 = vmatprep.mubr.f32.mxu1 %v20410_v31  ;;  %v11522_v31 = vld [vmem:[%s21698_s2 + $0x890] sm:$0xff]  ;;  %v11565_v10 = vld [vmem:[%s21698_s2 + $0x9e8] sm:$0xff] }
 0x67e   :  { %14689 = vmatprep.subr.bf16.mxu1 %v14688_v49  ;;  %v14752_v62 = vpack.c.bf16 %v11565_v10, %v11564_v22 }
 0x680   :  { %13435 = vmatmul.mubr.f32.gmra.mrb[68].mxu1 %v20413_v61  ;;  %v14700_v61 = vpack.c.bf16 %v11523_v51, %v11522_v31 }
 0x681   :  { %14691 = vmatpush3.bf16.msra.mxu1 %v14688_v49  ;;  %13437 = vmatprep.mubr.f32.mxu1 %v20571_v6  ;;  %v11524_v6 = vld [vmem:[%s21698_s2 + $0x8a0] sm:$0xff]  ;;  %v11567_v49 = vld [vmem:[%s21698_s2 + $0x9f8] sm:$0xff] }
 0x682   :  { %14693 = vmatprep.subr.bf16.mxu1 %v14692_v48  ;;  %v14756_v21 = vpack.c.bf16 %v11567_v49, %v11566_v23 }
 0x684   :  { %13438 = vmatmul.mubr.f32.gmra.mrb[70].mxu1 %v20328_v12  ;;  %v14704_v12 = vpack.c.bf16 %v11525_v16, %v11524_v6 }
 0x685   :  { %14695 = vmatpush3.bf16.msra.mxu1 %v14692_v48  ;;  %13472 = vmatprep.mubr.f32.mxu1 %v8778_v27  ;;  %v11536_v48 = vld [vmem:[%s21698_s2 + $0x900] sm:$0xff] }
 0x686   :  { %14697 = vmatprep.subr.bf16.mxu1 %v14696_v15  ;;  %v20885_v63 = vpack.c.bf16 %v11537_v5, %v11536_v48 }
 0x688   :  { %13473 = vmatmul.mubr.f32.vlgmr.msra.gmra.mrb[56].mxu1 %v8779_v30 }
 0x689   :  { %14699 = vmatpush3.bf16.msra.mxu1 %v14696_v15  ;;  %13475 = vmatprep.mubr.f32.mxu1 %v8780_v57 }
 0x68a   :  { %14701 = vmatprep.subr.bf16.mxu1 %v14700_v61 }
 0x68c   :  { %13476 = vmatmul.mubr.f32.gmra.mrb[58].mxu1 %v8781_v50 }
 0x68d   :  { %14703 = vmatpush3.bf16.msra.mxu1 %v14700_v61  ;;  %13478 = vmatprep.mubr.f32.mxu1 %v8782_v2 }
 0x68e   :  { %14705 = vmatprep.subr.bf16.mxu1 %v14704_v12 }
 0x690   :  { %13479 = vmatmul.mubr.f32.gmra.mrb[60].mxu1 %v8783_v34 }
 0x691   :  { %14707 = vmatpush3.bf16.msra.mxu1 %v14704_v12  ;;  %13481 = vmatprep.mubr.f32.mxu1 %v20273_v4  ;;  %v11532_v4 = vld [vmem:[%s21698_s2 + $0x8e0] sm:$0xff] }
 0x692   :  { %14709 = vmatprep.subr.bf16.mxu1 %v14708_v41  ;;  %v14720_v1 = vpack.c.bf16 %v11533_v37, %v11532_v4 }
 0x694   :  { %13482 = vmatmul.mubr.f32.gmra.mrb[62].mxu1 %v8785_v58 }
 0x695   :  { %14711 = vmatpush3.bf16.msra.mxu1 %v14708_v41  ;;  %13484 = vmatprep.mubr.f32.mxu1 %v8786_v60 }
 0x696   :  { %14713 = vmatprep.subr.bf16.mxu1 %v14712_v40 }
 0x698   :  { %13485 = vmatmul.mubr.f32.gmra.mrb[64].mxu1 %v8787_v35 }
 0x699   :  { %14715 = vmatpush3.bf16.msra.mxu1 %v14712_v40  ;;  %13487 = vmatprep.mubr.f32.mxu1 %v20249_v7  ;;  %v8793_v7 = vld [vmem:[#allocation4 + $0x131] sm:$0xff] }
 0x69a   :  { %14717 = vmatprep.subr.bf16.mxu1 %v14716_v9 }
 0x69c   :  { %13488 = vmatmul.mubr.f32.gmra.mrb[66].mxu1 %v20257_v46  ;;  %v8979_v46 = vld [vmem:[#allocation4 + $0x92] sm:$0xff] }
 0x69d   :  { %14719 = vmatpush3.bf16.msra.mxu1 %v14716_v9  ;;  %13490 = vmatprep.mubr.f32.mxu1 %v20259_v45  ;;  %v8987_v45 = vld [vmem:[#allocation4 + $0x132] sm:$0xff] }
 0x69e   :  { %14721 = vmatprep.subr.bf16.mxu1 %v14720_v1 }
 0x6a0   :  { %13491 = vmatmul.mubr.f32.gmra.mrb[68].mxu1 %v8791_v42 }
 0x6a1   :  { %14723 = vmatpush3.bf16.msra.mxu1 %v14720_v1  ;;  %13493 = vmatprep.mubr.f32.mxu1 %v20285_v54  ;;  %v11552_v54 = vld [vmem:[%s21698_s2 + $0x980] sm:$0xff] }
 0x6a2   :  { %14725 = vmatprep.subr.bf16.mxu1 %v14724_v13 }
 0x6a4   :  { %13494 = vmatmul.mubr.f32.gmra.mrb[70].mxu1 %v8793_v7 }
 0x6a5   :  { %14727 = vmatpush3.bf16.msra.mxu1 %v14724_v13  ;;  %13528 = vmatprep.mubr.f32.mxu1 %v20431_v8  ;;  %v11553_v8 = vld [vmem:[%s21698_s2 + $0x988] sm:$0xff] }
 0x6a8   :  { %13529 = vmatmul.mubr.f32.vlgmr.msra.gmra.mrb[56].mxu1 %v20434_v36  ;;  %v14728_v36 = vpack.c.bf16 %v11553_v8, %v11552_v54 }
 0x6a9   :  { %13531 = vmatprep.mubr.f32.mxu1 %v20443_v29  ;;  %v11554_v29 = vld [vmem:[%s21698_s2 + $0x990] sm:$0xff] }
 0x6aa   :  { %14729 = vmatprep.subr.bf16.mxu0 %v14728_v36 }
 0x6ab   :  { %14731 = vmatpush3.bf16.msra.mxu0 %v14728_v36 }
 0x6ac   :  { %13532 = vmatmul.mubr.f32.gmra.mrb[58].mxu1 %v20446_v11  ;;  %v11555_v11 = vld [vmem:[%s21698_s2 + $0x998] sm:$0xff] }
 0x6ad   :  { %13534 = vmatprep.mubr.f32.mxu1 %v20455_v52  ;;  %v14732_v52 = vpack.c.bf16 %v11555_v11, %v11554_v29 }
 0x6af   :  { %14733 = vmatprep.subr.bf16.mxu0 %v14732_v52 }
 0x6b0   :  { %13535 = vmatmul.mubr.f32.gmra.mrb[60].mxu1 %v20458_v32  ;;  %14735 = vmatpush3.bf16.msra.mxu0 %v14732_v52  ;;  %v11556_v32 = vld [vmem:[%s21698_s2 + $0x9a0] sm:$0xff] }
 0x6b1   :  { %13537 = vmatprep.mubr.f32.mxu1 %v20669_v0  ;;  %v11561_v0 = vld [vmem:[%s21698_s2 + $0x9c8] sm:$0xff] }
 0x6b4   :  { %13538 = vmatmul.mubr.f32.gmra.mrb[62].mxu1 %v8979_v46 }
 0x6b5   :  { %13540 = vmatprep.mubr.f32.mxu1 %v20476_v28  ;;  %v11557_v28 = vld [vmem:[%s21698_s2 + $0x9a8] sm:$0xff] }
 0x6b8   :  { %13541 = vmatmul.mubr.f32.gmra.mrb[64].mxu1 %v20479_v38  ;;  %v14736_v38 = vpack.c.bf16 %v11557_v28, %v11556_v32 }
 0x6b9   :  { %13543 = vmatprep.mubr.f32.mxu1 %v20488_v24  ;;  %v11558_v24 = vld [vmem:[%s21698_s2 + $0x9b0] sm:$0xff] }
 0x6ba   :  { %14737 = vmatprep.subr.bf16.mxu0 %v14736_v38 }
 0x6bb   :  { %14739 = vmatpush3.bf16.msra.mxu0 %v14736_v38 }
 0x6bc   :  { %13544 = vmatmul.mubr.f32.gmra.mrb[66].mxu1 %v20491_v3  ;;  %v11559_v3 = vld [vmem:[%s21698_s2 + $0x9b8] sm:$0xff] }
 0x6bd   :  { %13546 = vmatprep.mubr.f32.mxu1 %v20500_v26  ;;  %v14740_v26 = vpack.c.bf16 %v11559_v3, %v11558_v24 }
 0x6bf   :  { %14741 = vmatprep.subr.bf16.mxu0 %v14740_v26 }
 0x6c0   :  { %13547 = vmatmul.mubr.f32.gmra.mrb[68].mxu1 %v20503_v47  ;;  %14743 = vmatpush3.bf16.msra.mxu0 %v14740_v26  ;;  %v11560_v47 = vld [vmem:[%s21698_s2 + $0x9c0] sm:$0xff] }
 0x6c1   :  { %13549 = vmatprep.mubr.f32.mxu1 %v20703_v20  ;;  %v14744_v20 = vpack.c.bf16 %v11561_v0, %v11560_v47 }
 0x6c3   :  { %14745 = vmatprep.subr.bf16.mxu0 %v14744_v20 }
 0x6c4   :  { %13550 = vmatmul.mubr.f32.gmra.mrb[70].mxu1 %v8987_v45  ;;  %14747 = vmatpush3.bf16.msra.mxu0 %v14744_v20 }
 0x6c5   :  { %14749 = vmatprep.subr.bf16.mxu0 %v14748_v44 }
 0x6c8   :  { %14751 = vmatpush3.bf16.msra.mxu0 %v14748_v44 }
 0x6c9   :  { %14753 = vmatprep.subr.bf16.mxu0 %v14752_v62 }
 0x6cc   :  { %14755 = vmatpush3.bf16.msra.mxu0 %v14752_v62 }
 0x6cd   :  { %14757 = vmatprep.subr.bf16.mxu0 %v14756_v21 }
 0x6d0   :  { %14759 = vmatpush3.bf16.msra.mxu0 %v14756_v21 }
 0x6d1   :  { %14761 = vmatprep.subr.bf16.mxu0 %v20885_v63 }
 0x77b   :  { %v20888_v15 = vpop.f32.mrb[56].mxu1 }
 0x77c   :  { %v9188_v31 = vmul.f32 %v20888_v15, %v20888_v15  ;;  %v20892_v51 = vpop.f32.mrb[57].mxu1 }
 0x77d   :  { %v9166_v27 = vadd.f32 %v20888_v15, %v20892_v51  ;;  %v9187_v61 = vmul.f32 %v20892_v51, %v20892_v51 }
 0x77f   :  { %v9203_v30 = vadd.f32 %v9188_v31, %v9187_v61  ;;  %v20898_v6 = vpop.f32.mrb[58].mxu1 }
 0x780   :  { %v20900_v16 = vpop.f32.mrb[59].mxu1  ;;  %v9190_v50 = vmul.f32 %v20898_v6, %v20898_v6 }
 0x781   :  { %v9167_v57 = vadd.f32 %v9166_v27, %v20900_v16  ;;  %v9189_v12 = vmul.f32 %v20900_v16, %v20900_v16 }
 0x783   :  { %v9204_v14 = vadd.f32 %v9203_v30, %v9189_v12  ;;  %v20907_v59 = vpop.f32.mrb[60].mxu1  ;;  %v9168_v2 = vadd.f32 %v20898_v6, %v9167_v57 }
 0x784   :  { %v20910_v41 = vpop.f32.mrb[61].mxu1  ;;  %v9192_v58 = vmul.f32 %v20907_v59, %v20907_v59 }
 0x785   :  { %v9169_v34 = vadd.f32 %v9168_v2, %v20910_v41  ;;  %v9191_v39 = vmul.f32 %v20910_v41, %v20910_v41  ;;  %v9205_v56 = vadd.f32 %v9204_v14, %v9190_v50 }
 0x787   :  { %v9206_v40 = vadd.f32 %v9205_v56, %v9191_v39  ;;  %v20917_v17 = vpop.f32.mrb[62].mxu1  ;;  %v9170_v55 = vadd.f32 %v20907_v59, %v9169_v34 }
 0x788   :  { %v20920_v60 = vpop.f32.mrb[63].mxu1  ;;  %v9194_v37 = vmul.f32 %v20917_v17, %v20917_v17 }
 0x789   :  { %v9171_v9 = vadd.f32 %v9170_v55, %v20920_v60  ;;  %v9193_v35 = vmul.f32 %v20920_v60, %v20920_v60  ;;  %v9207_v4 = vadd.f32 %v9206_v40, %v9192_v58 }
 0x78b   :  { %v9208_v1 = vadd.f32 %v9207_v4, %v9193_v35  ;;  %v20927_v25 = vpop.f32.mrb[64].mxu1  ;;  %v9172_v19 = vadd.f32 %v20917_v17, %v9171_v9 }
 0x78c   :  { %v20930_v13 = vpop.f32.mrb[65].mxu1  ;;  %v9196_v45 = vmul.f32 %v20927_v25, %v20927_v25 }
 0x78d   :  { %v9173_v42 = vadd.f32 %v9172_v19, %v20930_v13  ;;  %v9195_v7 = vmul.f32 %v20930_v13, %v20930_v13  ;;  %v9209_v46 = vadd.f32 %v9208_v1, %v9194_v37  ;;  %v9229_v37 = vld [vmem:[%s21697_s3 + $0x4] sm:$0x1] }
 0x78f   :  { %v9210_v54 = vadd.f32 %v9209_v46, %v9195_v7  ;;  %v13545_v8 = vpop.f32.mrb[66].mxu1  ;;  %v9174_v36 = vadd.f32 %v20927_v25, %v9173_v42  ;;  %v9230_v42 = vld [vmem:[%s21697_s3 + $0x5] sm:$0x1] }
 0x790   :  { %v9121_v29 = vpop.f32.mrb[67].mxu1  ;;  %v9198_v28 = vmul.f32 %v13545_v8, %v13545_v8 }
 0x791   :  { %v9175_v11 = vadd.f32 %v9174_v36, %v9121_v29  ;;  %v9197_v52 = vmul.f32 %v9121_v29, %v9121_v29  ;;  %v9211_v32 = vadd.f32 %v9210_v54, %v9196_v45 }
 0x793   :  { %v9212_v38 = vadd.f32 %v9211_v32, %v9197_v52  ;;  %v13548_v24 = vpop.f32.mrb[68].mxu1  ;;  %v9176_v3 = vadd.f32 %v13545_v8, %v9175_v11 }
 0x794   :  { %v9131_v26 = vpop.f32.mrb[69].mxu1  ;;  %v9200_v43 = vmul.f32 %v13548_v24, %v13548_v24 }
 0x795   :  { %v9177_v47 = vadd.f32 %v9176_v3, %v9131_v26  ;;  %v9199_v0 = vmul.f32 %v9131_v26, %v9131_v26  ;;  %v9213_v20 = vadd.f32 %v9212_v38, %v9198_v28 }
 0x797   :  { %v9214_v33 = vadd.f32 %v9213_v20, %v9199_v0  ;;  %v13551_v44 = vpop.f32.mrb[70].mxu1  ;;  %v9178_v22 = vadd.f32 %v13548_v24, %v9177_v47 }
 0x798   :  { %v9141_v10 = vpop.f32.mrb[71].mxu1  ;;  %v9202_v18 = vmul.f32 %v13551_v44, %v13551_v44 }
 0x799   :  { %v9179_v23 = vadd.f32 %v9178_v22, %v9141_v10  ;;  %v9201_v62 = vmul.f32 %v9141_v10, %v9141_v10  ;;  %v9215_v49 = vadd.f32 %v9214_v33, %v9200_v43 }
 0x79b   :  { %v9180_v21 = vadd.f32 %v13551_v44, %v9179_v23  ;;  %v9216_v48 = vadd.f32 %v9215_v49, %v9201_v62 }
 0x79d   :  { %v9181_v5 = vrot.slane %v9180_v21, 4  ;;  %v9217_v31 = vadd.f32 %v9216_v48, %v9202_v18 }
 0x79f   :  { %v9182_v27 = vadd.f32 %v9181_v5, %v9180_v21  ;;  %v9218_v61 = vrot.slane %v9217_v31, 4 }
 0x7a1   :  { %v9183_v30 = vrot.slane %v9182_v27, 2  ;;  %v9219_v57 = vadd.f32 %v9218_v61, %v9217_v31 }
 0x7a3   :  { %v9184_v12 = vadd.f32 %v9183_v30, %v9182_v27  ;;  %v9220_v50 = vrot.slane %v9219_v57, 2 }
 0x7a5   :  { %v9185_v14 = vrot.slane %v9184_v12, 1  ;;  %v9221_v2 = vadd.f32 %v9220_v50, %v9219_v57  ;;  %v11538_v57 = vld [vmem:[%s21698_s2 + $0x910] sm:$0xff] }
 0x7a7   :  { %v9186_v34 = vadd.f32 %v9185_v14, %v9184_v12  ;;  %v9222_v39 = vrot.slane %v9221_v2, 1  ;;  %v11539_v12 = vld [vmem:[%s21698_s2 + $0x918] sm:$0xff] }
 0x7a9   :  { %v9223_v56 = vadd.f32 %v9222_v39, %v9221_v2  ;;  %v9224_v58 = vmul.f32 0.0078125, %v9186_v34 }
 0x7ab   :  { %v9225_v40 = vmul.f32 0.0078125, %v9223_v56  ;;  %v9226_v55 = vmul.f32 %v9224_v58, %v9224_v58  ;;  %v14764_v56 = vpack.c.bf16 %v11539_v12, %v11538_v57 }
 0x7ad   :  { %v9227_v9 = vsub.f32 %v9225_v40, %v9226_v55  ;;  %v11540_v55 = vld [vmem:[%s21698_s2 + $0x920] sm:$0xff] }
 0x7af   :  { %v9228_v35 = vmax.f32 %v9227_v9, 0.0  ;;  %v11541_v9 = vld [vmem:[%s21698_s2 + $0x928] sm:$0xff] }
 0x7b1   :  { %v9231_v4 = vadd.f32 1e-05, %v9228_v35 }
 0x7b3   :  { %15409 = vrsqrt.f32 %v9231_v4  ;;  %v14768_v4 = vpack.c.bf16 %v11541_v9, %v11540_v55  ;;  %v11581_v55 = vld [vmem:[%s21698_s2 + $0xa68] sm:$0xff] }
 0x7bd   :  { %v15410_v1 = vpop.eup %15409 }
 0x7be   :  { %v9233_v19 = vmul.f32 %v15410_v1, %v9229_v37  ;;  %v11542_v37 = vld [vmem:[%s21698_s2 + $0x930] sm:$0xff]  ;;  %v11543_v1 = vld [vmem:[%s21698_s2 + $0x938] sm:$0xff] }
 0x7c0   :  { %v9234_v7 = vmul.f32 %v9233_v19, %v9224_v58  ;;  %v9239_v46 = vrot.slane %v9233_v19, %v22299_v53  ;;  %v11544_v19 = vld [vmem:[%s21698_s2 + $0x940] sm:$0xff] }
 0x7c2   :  { %v9235_v45 = vsub.f32 %v9230_v42, %v9234_v7  ;;  %v9241_v54 = vmul.f32 %v20888_v15, %v9239_v46  ;;  %v9242_v36 = vmul.f32 %v9239_v46, %v20900_v16  ;;  %v9243_v11 = vmul.f32 %v20898_v6, %v9239_v46  ;;  %v11545_v42 = vld [vmem:[%s21698_s2 + $0x948] sm:$0xff]  ;;  %v9349_v7 = vld [vmem:[#allocation4 + $0xa1] sm:$0xff] }
 0x7c3   :  { %v9244_v52 = vmul.f32 %v9239_v46, %v20910_v41  ;;  %v9245_v32 = vmul.f32 %v20907_v59, %v9239_v46  ;;  %v9246_v28 = vmul.f32 %v9239_v46, %v20920_v60  ;;  %v9249_v38 = vmul.f32 %v20927_v25, %v9239_v46 }
 0x7c4   :  { %v9250_v3 = vmul.f32 %v9239_v46, %v9121_v29  ;;  %v9251_v47 = vmul.f32 %v13545_v8, %v9239_v46  ;;  %v9252_v0 = vmul.f32 %v9239_v46, %v9131_v26  ;;  %v9253_v20 = vmul.f32 %v13548_v24, %v9239_v46 }
 0x7c5   :  { %v9254_v43 = vmul.f32 %v9239_v46, %v9141_v10  ;;  %v9259_v33 = vrot.slane %v9235_v45, %v22299_v53  ;;  %v9240_v15 = vmul.f32 %v9239_v46, %v20892_v51  ;;  %v9248_v16 = vmul.f32 %v9239_v46, %v20930_v13  ;;  %v11546_v45 = vld [vmem:[%s21698_s2 + $0x950] sm:$0xff] }
 0x7c6   :  { %v9247_v6 = vmul.f32 %v20917_v17, %v9239_v46  ;;  %v9255_v41 = vmul.f32 %v13551_v44, %v9239_v46  ;;  %v14776_v46 = vpack.c.bf16 %v11545_v42, %v11544_v19 }
 0x7c7   :  { %v9261_v22 = vadd.f32 %v9259_v33, %v9241_v54  ;;  %v9262_v59 = vadd.f32 %v9259_v33, %v9242_v36  ;;  %v9263_v23 = vadd.f32 %v9259_v33, %v9243_v11  ;;  %v9264_v60 = vadd.f32 %v9259_v33, %v9244_v52  ;;  %v11547_v54 = vld [vmem:[%s21698_s2 + $0x958] sm:$0xff]  ;;  %v11548_v11 = vld [vmem:[%s21698_s2 + $0x960] sm:$0xff]  ;;  %v11549_v52 = vld [vmem:[%s21698_s2 + $0x968] sm:$0xff] }
 0x7c8   :  { %v9265_v62 = vadd.f32 %v9259_v33, %v9245_v32  ;;  %v9266_v25 = vadd.f32 %v9259_v33, %v9246_v28  ;;  %v9269_v29 = vadd.f32 %v9259_v33, %v9249_v38  ;;  %v9270_v8 = vadd.f32 %v9259_v33, %v9250_v3  ;;  %v11550_v28 = vld [vmem:[%s21698_s2 + $0x970] sm:$0xff]  ;;  %v11551_v38 = vld [vmem:[%s21698_s2 + $0x978] sm:$0xff] }
 0x7c9   :  { %v9271_v26 = vadd.f32 %v9259_v33, %v9251_v47  ;;  %v9272_v24 = vadd.f32 %v9259_v33, %v9252_v0  ;;  %v9273_v10 = vadd.f32 %v9259_v33, %v9253_v20  ;;  %v9274_v49 = vadd.f32 %v9259_v33, %v9254_v43  ;;  %v11568_v47 = vld [vmem:[%s21698_s2 + $0xa00] sm:$0xff]  ;;  %v11569_v0 = vld [vmem:[%s21698_s2 + $0xa08] sm:$0xff]  ;;  %v11570_v43 = vld [vmem:[%s21698_s2 + $0xa10] sm:$0xff] }
 0x7ca   :  { %v20956_v18 = vmax.f32 %v9261_v22, 0.0  ;;  %v20958_v51 = vmax.f32 %v9262_v59, 0.0  ;;  %v20960_v13 = vmax.f32 %v9263_v23, 0.0  ;;  %v20962_v17 = vmax.f32 %v9264_v60, 0.0  ;;  %v11573_v22 = vld [vmem:[%s21698_s2 + $0xa28] sm:$0xff] }
 0x7cb   :  { %v20964_v44 = vmax.f32 %v9265_v62, 0.0  ;;  %v20966_v21 = vmax.f32 %v9266_v25, 0.0  ;;  %v20968_v48 = vmax.f32 %v9269_v29, 0.0  ;;  %v20970_v5 = vmax.f32 %v9270_v8, 0.0  ;;  %v11574_v62 = vld [vmem:[%s21698_s2 + $0xa30] sm:$0xff]  ;;  %v11575_v25 = vld [vmem:[%s21698_s2 + $0xa38] sm:$0xff] }
 0x7cc   :  { %v20972_v31 = vmax.f32 %v9271_v26, 0.0  ;;  %v20974_v27 = vmax.f32 %v9272_v24, 0.0  ;;  %v20976_v61 = vmax.f32 %v9273_v10, 0.0  ;;  %v20978_v30 = vmax.f32 %v9274_v49, 0.0  ;;  %9293 = vst [vmem:[#allocation4 + $0x21] sm:$0xff] %v20956_v18  ;;  %9294 = vst [vmem:[#allocation4 + $0x31] sm:$0xff] %v20958_v51 }
 0x7cd   :  { %9295 = vst [vmem:[#allocation4 + $0x41] sm:$0xff] %v20960_v13  ;;  %9296 = vst [vmem:[#allocation4 + $0x51] sm:$0xff] %v20962_v17  ;;  %v9260_v50 = vadd.f32 %v9259_v33, %v9240_v15  ;;  %v9268_v14 = vadd.f32 %v9259_v33, %v9248_v16  ;;  %v9267_v2 = vadd.f32 %v9259_v33, %v9247_v6  ;;  %v21073_v15 = vld [vmem:[#allocation4] sm:$0xff]  ;;  %v11576_v24 = vld [vmem:[%s21698_s2 + $0xa40] sm:$0xff] }
 0x7ce   :  { %9297 = vst [vmem:[#allocation4 + $0x61] sm:$0xff] %v20964_v44  ;;  %9298 = vst [vmem:[#allocation4 + $0x71] sm:$0xff] %v20966_v21  ;;  %v9275_v34 = vadd.f32 %v9259_v33, %v9255_v41  ;;  %v14780_v36 = vpack.c.bf16 %v11547_v54, %v11546_v45  ;;  %v14784_v32 = vpack.c.bf16 %v11549_v52, %v11548_v11  ;;  %v11571_v33 = vld [vmem:[%s21698_s2 + $0xa18] sm:$0xff]  ;;  %v11572_v41 = vld [vmem:[%s21698_s2 + $0xa20] sm:$0xff] }
 0x7cf   :  { %9301 = vst [vmem:[#allocation4 + $0xc1] sm:$0xff] %v20968_v48  ;;  %9302 = vst [vmem:[#allocation4 + $0xd1] sm:$0xff] %v20970_v5  ;;  %v20998_v39 = vmax.f32 %v9260_v50, 0.0  ;;  %v21000_v58 = vmax.f32 %v9268_v14, 0.0  ;;  %v21002_v40 = vmax.f32 %v9267_v2, 0.0  ;;  %v14788_v3 = vpack.c.bf16 %v11551_v38, %v11550_v28  ;;  %v11577_v10 = vld [vmem:[%s21698_s2 + $0xa48] sm:$0xff] }
 0x7d0   :  { %9303 = vst [vmem:[#allocation4 + $0xe1] sm:$0xff] %v20972_v31  ;;  %9304 = vst [vmem:[#allocation4 + $0xf1] sm:$0xff] %v20974_v27  ;;  %v21010_v35 = vmax.f32 %v9275_v34, 0.0  ;;  %v14792_v20 = vpack.c.bf16 %v11569_v0, %v11568_v47  ;;  %v14796_v16 = vpack.c.bf16 %v11571_v33, %v11570_v43  ;;  %v14800_v23 = vpack.c.bf16 %v11573_v22, %v11572_v41  ;;  %v11578_v50 = vld [vmem:[%s21698_s2 + $0xa50] sm:$0xff]  ;;  %v11579_v14 = vld [vmem:[%s21698_s2 + $0xa58] sm:$0xff] }
 0x7d1   :  { %9305 = vst [vmem:[#allocation4 + $0x101] sm:$0xff] %v20976_v61  ;;  %9306 = vst [vmem:[#allocation4 + $0x111] sm:$0xff] %v20978_v30  ;;  %13585 = vmatmul.mubr.f32.vlgmr.msra.gmra.mrb[40].mxu0 %v20998_v39  ;;  %v14804_v8 = vpack.c.bf16 %v11575_v25, %v11574_v62  ;;  %v14808_v57 = vpack.c.bf16 %v11577_v10, %v11576_v24  ;;  %v14812_v2 = vpack.c.bf16 %v11579_v14, %v11578_v50  ;;  %v11585_v45 = vld [vmem:[%s21698_s2 + $0xa88] sm:$0xff]  ;;  %v11587_v28 = vld [vmem:[%s21698_s2 + $0xa98] sm:$0xff] }
 0x7d2   :  { %9292 = vst [vmem:[#allocation4 + $0x11] sm:$0xff] %v20998_v39  ;;  %9300 = vst [vmem:[#allocation4 + $0xb1] sm:$0xff] %v21000_v58  ;;  %14763 = vmatpush3.bf16.msra.mxu0 %v20885_v63  ;;  %13587 = vmatprep.mubr.f32.mxu0 %v20956_v18  ;;  %v14772_v63 = vpack.c.bf16 %v11543_v1, %v11542_v37  ;;  %v11582_v1 = vld [vmem:[%s21698_s2 + $0xa70] sm:$0xff]  ;;  %v11588_v47 = vld [vmem:[%s21698_s2 + $0xaa0] sm:$0xff] }
 0x7d3   :  { %9299 = vst [vmem:[#allocation4 + $0x81] sm:$0xff] %v21002_v40  ;;  %9307 = vst [vmem:[#allocation4 + $0x121] sm:$0xff] %v21010_v35  ;;  %14765 = vmatprep.subr.bf16.mxu0 %v14764_v56  ;;  %v21085_v59 = vld [vmem:[#allocation4 + $0x20] sm:$0xff]  ;;  %v21088_v60 = vld [vmem:[#allocation4 + $0x30] sm:$0xff] }
 0x7d4   :  { %v21097_v29 = vld [vmem:[#allocation4 + $0x40] sm:$0xff]  ;;  %v21100_v26 = vld [vmem:[#allocation4 + $0x50] sm:$0xff]  ;;  %v11589_v0 = vld [vmem:[%s21698_s2 + $0xaa8] sm:$0xff] }
 0x7d5   :  { %13588 = vmatmul.mubr.f32.gmra.mrb[42].mxu0 %v20958_v51  ;;  %v21109_v49 = vld [vmem:[#allocation4 + $0x60] sm:$0xff]  ;;  %v21112_v12 = vld [vmem:[#allocation4 + $0x70] sm:$0xff]  ;;  %v14832_v43 = vpack.c.bf16 %v11589_v0, %v11588_v47  ;;  %v11591_v41 = vld [vmem:[%s21698_s2 + $0xab8] sm:$0xff] }
 0x7d6   :  { %14767 = vmatpush3.bf16.msra.mxu0 %v14764_v56  ;;  %13590 = vmatprep.mubr.f32.mxu0 %v20960_v13  ;;  %v11580_v56 = vld [vmem:[%s21698_s2 + $0xa60] sm:$0xff]  ;;  %v21131_v9 = vld [vmem:[#allocation4 + $0xc0] sm:$0xff]  ;;  %v11601_v47 = vld [vmem:[%s21698_s2 + $0xb08] sm:$0xff] }
 0x7d7   :  { %14769 = vmatprep.subr.bf16.mxu0 %v14768_v4  ;;  %v21134_v37 = vld [vmem:[#allocation4 + $0xd0] sm:$0xff]  ;;  %v21143_v19 = vld [vmem:[#allocation4 + $0xe0] sm:$0xff] }
 0x7d8   :  { %v21155_v54 = vld [vmem:[#allocation4 + $0x100] sm:$0xff]  ;;  %v21158_v52 = vld [vmem:[#allocation4 + $0x110] sm:$0xff] }
 0x7d9   :  { %13591 = vmatmul.mubr.f32.gmra.mrb[44].mxu0 %v20962_v17  ;;  %v21076_v6 = vld [vmem:[#allocation4 + $0x10] sm:$0xff]  ;;  %v21188_v22 = vld [vmem:[#allocation4 + $0x42] sm:$0xff] }
 0x7da   :  { %14771 = vmatpush3.bf16.msra.mxu0 %v14768_v4  ;;  %13593 = vmatprep.mubr.f32.mxu0 %v20964_v44  ;;  %v21122_v34 = vld [vmem:[#allocation4 + $0xb0] sm:$0xff]  ;;  %v14816_v4 = vpack.c.bf16 %v11581_v55, %v11580_v56  ;;  %v21200_v24 = vld [vmem:[#allocation4 + $0x62] sm:$0xff] }
 0x7db   :  { %14773 = vmatprep.subr.bf16.mxu0 %v14772_v63  ;;  %v21179_v33 = vld [vmem:[#allocation4 + $0x32] sm:$0xff]  ;;  %v9672_v10 = vld [vmem:[#allocation4 + $0xa2] sm:$0xff] }
 0x7dc   :  { %v21191_v62 = vld [vmem:[#allocation4 + $0x52] sm:$0xff]  ;;  %v11594_v14 = vld [vmem:[%s21698_s2 + $0xad0] sm:$0xff] }
 0x7dd   :  { %13594 = vmatmul.mubr.f32.gmra.mrb[46].mxu0 %v20966_v21  ;;  %v11592_v25 = vld [vmem:[%s21698_s2 + $0xac0] sm:$0xff]  ;;  %v21245_v0 = vld [vmem:[#allocation4 + $0x102] sm:$0xff] }
 0x7de   :  { %14775 = vmatpush3.bf16.msra.mxu0 %v14772_v63  ;;  %13596 = vmatprep.mubr.f32.mxu0 %v9349_v7  ;;  %v11583_v63 = vld [vmem:[%s21698_s2 + $0xa78] sm:$0xff]  ;;  %v21146_v7 = vld [vmem:[#allocation4 + $0xf0] sm:$0xff] }
 0x7df   :  { %14777 = vmatprep.subr.bf16.mxu0 %v14776_v46  ;;  %v14820_v42 = vpack.c.bf16 %v11583_v63, %v11582_v1  ;;  %v21203_v50 = vld [vmem:[#allocation4 + $0x72] sm:$0xff]  ;;  %v21221_v63 = vld [vmem:[#allocation4 + $0xc2] sm:$0xff] }
 0x7e0   :  { %v21212_v55 = vld [vmem:[#allocation4 + $0xb2] sm:$0xff] }
 0x7e1   :  { %13597 = vmatmul.mubr.f32.gmra.mrb[48].mxu0 %v21000_v58  ;;  %v11597_v1 = vld [vmem:[%s21698_s2 + $0xae8] sm:$0xff] }
 0x7e2   :  { %14779 = vmatpush3.bf16.msra.mxu0 %v14776_v46  ;;  %13599 = vmatprep.mubr.f32.mxu0 %v20968_v48  ;;  %v11584_v46 = vld [vmem:[%s21698_s2 + $0xa80] sm:$0xff] }
 0x7e3   :  { %14781 = vmatprep.subr.bf16.mxu0 %v14780_v36  ;;  %v14824_v11 = vpack.c.bf16 %v11585_v45, %v11584_v46  ;;  %v21224_v46 = vld [vmem:[#allocation4 + $0xd2] sm:$0xff]  ;;  %v11598_v45 = vld [vmem:[%s21698_s2 + $0xaf0] sm:$0xff] }
 0x7e5   :  { %13600 = vmatmul.mubr.f32.gmra.mrb[50].mxu0 %v20970_v5 }
 0x7e6   :  { %14783 = vmatpush3.bf16.msra.mxu0 %v14780_v36  ;;  %13602 = vmatprep.mubr.f32.mxu0 %v20972_v31  ;;  %v9664_v36 = vld [vmem:[#allocation4 + $0x2] sm:$0xff] }
 0x7e7   :  { %14785 = vmatprep.subr.bf16.mxu0 %v14784_v32 }
 0x7e9   :  { %13603 = vmatmul.mubr.f32.gmra.mrb[52].mxu0 %v20974_v27 }
 0x7ea   :  { %14787 = vmatpush3.bf16.msra.mxu0 %v14784_v32  ;;  %13605 = vmatprep.mubr.f32.mxu0 %v20976_v61  ;;  %v11586_v32 = vld [vmem:[%s21698_s2 + $0xa90] sm:$0xff] }
 0x7eb   :  { %14789 = vmatprep.subr.bf16.mxu0 %v14788_v3  ;;  %v14828_v38 = vpack.c.bf16 %v11587_v28, %v11586_v32  ;;  %v21236_v28 = vld [vmem:[#allocation4 + $0xf2] sm:$0xff] }
 0x7ed   :  { %13606 = vmatmul.mubr.f32.gmra.mrb[54].mxu0 %v20978_v30 }
 0x7ee   :  { %14791 = vmatpush3.bf16.msra.mxu0 %v14788_v3  ;;  %13640 = vmatprep.mubr.f32.mxu0 %v21073_v15  ;;  %v21167_v3 = vld [vmem:[#allocation4 + $0x12] sm:$0xff] }
 0x7ef   :  { %14793 = vmatprep.subr.bf16.mxu0 %v14792_v20 }
 0x7f1   :  { %13641 = vmatmul.mubr.f32.vlgmr.msra.gmra.mrb[40].mxu0 %v21076_v6 }
 0x7f2   :  { %14795 = vmatpush3.bf16.msra.mxu0 %v14792_v20  ;;  %13643 = vmatprep.mubr.f32.mxu0 %v21085_v59  ;;  %v21176_v20 = vld [vmem:[#allocation4 + $0x22] sm:$0xff] }
 0x7f3   :  { %14797 = vmatprep.subr.bf16.mxu0 %v14796_v16 }
 0x7f5   :  { %13644 = vmatmul.mubr.f32.gmra.mrb[42].mxu0 %v21088_v60 }
 0x7f6   :  { %14799 = vmatpush3.bf16.msra.mxu0 %v14796_v16  ;;  %13646 = vmatprep.mubr.f32.mxu0 %v21097_v29  ;;  %v11590_v16 = vld [vmem:[%s21698_s2 + $0xab0] sm:$0xff] }
 0x7f7   :  { %14801 = vmatprep.subr.bf16.mxu0 %v14800_v23 }
 0x7f9   :  { %13647 = vmatmul.mubr.f32.gmra.mrb[44].mxu0 %v21100_v26 }
 0x7fa   :  { %14803 = vmatpush3.bf16.msra.mxu0 %v14800_v23  ;;  %13649 = vmatprep.mubr.f32.mxu0 %v21109_v49  ;;  %v14836_v23 = vpack.c.bf16 %v11591_v41, %v11590_v16  ;;  %v21248_v16 = vld [vmem:[#allocation4 + $0x112] sm:$0xff]  ;;  %v11602_v41 = vld [vmem:[%s21698_s2 + $0xb10] sm:$0xff] }
 0x7fb   :  { %14805 = vmatprep.subr.bf16.mxu0 %v14804_v8 }
 0x7fd   :  { %13650 = vmatmul.mubr.f32.gmra.mrb[46].mxu0 %v21112_v12 }
 0x7fe   :  { %14807 = vmatpush3.bf16.msra.mxu0 %v14804_v8  ;;  %13652 = vmatprep.mubr.f32.mxu0 %v21073_v15  ;;  %v11593_v8 = vld [vmem:[%s21698_s2 + $0xac8] sm:$0xff] }
 0x7ff   :  { %14809 = vmatprep.subr.bf16.mxu0 %v14808_v57 }
 0x801   :  { %13653 = vmatmul.mubr.f32.gmra.mrb[48].mxu0 %v21122_v34 }
 0x802   :  { %14811 = vmatpush3.bf16.msra.mxu0 %v14808_v57  ;;  %13655 = vmatprep.mubr.f32.mxu0 %v21131_v9  ;;  %v14840_v57 = vpack.c.bf16 %v11593_v8, %v11592_v25  ;;  %v11604_v8 = vld [vmem:[%s21698_s2 + $0xb20] sm:$0xff] }
 0x803   :  { %14813 = vmatprep.subr.bf16.mxu0 %v14812_v2 }
 0x805   :  { %13656 = vmatmul.mubr.f32.gmra.mrb[50].mxu0 %v21134_v37 }
 0x806   :  { %14815 = vmatpush3.bf16.msra.mxu0 %v14812_v2  ;;  %13658 = vmatprep.mubr.f32.mxu0 %v21143_v19  ;;  %v11595_v2 = vld [vmem:[%s21698_s2 + $0xad8] sm:$0xff] }
 0x807   :  { %14817 = vmatprep.subr.bf16.mxu0 %v14816_v4  ;;  %v14844_v56 = vpack.c.bf16 %v11595_v2, %v11594_v14  ;;  %v11607_v14 = vld [vmem:[%s21698_s2 + $0xb38] sm:$0xff] }
 0x809   :  { %13659 = vmatmul.mubr.f32.gmra.mrb[52].mxu0 %v21146_v7 }
 0x80a   :  { %14819 = vmatpush3.bf16.msra.mxu0 %v14816_v4  ;;  %13661 = vmatprep.mubr.f32.mxu0 %v21155_v54  ;;  %v11596_v4 = vld [vmem:[%s21698_s2 + $0xae0] sm:$0xff] }
 0x80b   :  { %14821 = vmatprep.subr.bf16.mxu0 %v14820_v42 }
 0x80d   :  { %13662 = vmatmul.mubr.f32.gmra.mrb[54].mxu0 %v21158_v52 }
 0x80e   :  { %14823 = vmatpush3.bf16.msra.mxu0 %v14820_v42  ;;  %13696 = vmatprep.mubr.f32.mxu0 %v9664_v36  ;;  %v14848_v42 = vpack.c.bf16 %v11597_v1, %v11596_v4  ;;  %v11599_v36 = vld [vmem:[%s21698_s2 + $0xaf8] sm:$0xff]  ;;  %v11609_v4 = vld [vmem:[%s21698_s2 + $0xb48] sm:$0xff] }
 0x80f   :  { %14825 = vmatprep.subr.bf16.mxu0 %v14824_v11  ;;  %v14852_v32 = vpack.c.bf16 %v11599_v36, %v11598_v45  ;;  %v11610_v45 = vld [vmem:[%s21698_s2 + $0xb50] sm:$0xff]  ;;  %v11611_v36 = vld [vmem:[%s21698_s2 + $0xb58] sm:$0xff] }
 0x811   :  { %13697 = vmatmul.mubr.f32.vlgmr.msra.gmra.mrb[40].mxu0 %v21167_v3 }
 0x812   :  { %14827 = vmatpush3.bf16.msra.mxu0 %v14824_v11  ;;  %13699 = vmatprep.mubr.f32.mxu0 %v21176_v20  ;;  %v21233_v11 = vld [vmem:[#allocation4 + $0xe2] sm:$0xff] }
 0x813   :  { %14829 = vmatprep.subr.bf16.mxu0 %v14828_v38 }
 0x815   :  { %13700 = vmatmul.mubr.f32.gmra.mrb[42].mxu0 %v21179_v33 }
 0x816   :  { %14831 = vmatpush3.bf16.msra.mxu0 %v14828_v38  ;;  %13702 = vmatprep.mubr.f32.mxu0 %v21188_v22  ;;  %v11600_v38 = vld [vmem:[%s21698_s2 + $0xb00] sm:$0xff] }
 0x817   :  { %14833 = vmatprep.subr.bf16.mxu0 %v14832_v43 }
 0x819   :  { %13703 = vmatmul.mubr.f32.gmra.mrb[44].mxu0 %v21191_v62 }
 0x81a   :  { %14835 = vmatpush3.bf16.msra.mxu0 %v14832_v43  ;;  %13705 = vmatprep.mubr.f32.mxu0 %v21200_v24  ;;  %v14856_v43 = vpack.c.bf16 %v11601_v47, %v11600_v38  ;;  %v11612_v38 = vld [vmem:[%s21698_s2 + $0xb60] sm:$0xff]  ;;  %v11613_v47 = vld [vmem:[%s21698_s2 + $0xb68] sm:$0xff] }
 0x81b   :  { %14837 = vmatprep.subr.bf16.mxu0 %v14836_v23 }
 0x81d   :  { %13706 = vmatmul.mubr.f32.gmra.mrb[46].mxu0 %v21203_v50 }
 0x81e   :  { %14839 = vmatpush3.bf16.msra.mxu0 %v14836_v23  ;;  %13708 = vmatprep.mubr.f32.mxu0 %v9672_v10  ;;  %v11603_v23 = vld [vmem:[%s21698_s2 + $0xb18] sm:$0xff]  ;;  %v11605_v10 = vld [vmem:[%s21698_s2 + $0xb28] sm:$0xff] }
 0x81f   :  { %14841 = vmatprep.subr.bf16.mxu0 %v14840_v57  ;;  %v14860_v25 = vpack.c.bf16 %v11603_v23, %v11602_v41  ;;  %v11615_v41 = vld [vmem:[%s21698_s2 + $0xb78] sm:$0xff] }
 0x821   :  { %13709 = vmatmul.mubr.f32.gmra.mrb[48].mxu0 %v21212_v55 }
 0x822   :  { %14843 = vmatpush3.bf16.msra.mxu0 %v14840_v57  ;;  %13711 = vmatprep.mubr.f32.mxu0 %v21221_v63  ;;  %v14864_v57 = vpack.c.bf16 %v11605_v10, %v11604_v8  ;;  %v11617_v8 = vld [vmem:[%s21698_s2 + $0xb88] sm:$0xff] }
 0x823   :  { %14845 = vmatprep.subr.bf16.mxu0 %v14844_v56 }
 0x825   :  { %13712 = vmatmul.mubr.f32.gmra.mrb[50].mxu0 %v21224_v46 }
 0x826   :  { %14847 = vmatpush3.bf16.msra.mxu0 %v14844_v56  ;;  %13714 = vmatprep.mubr.f32.mxu0 %v21233_v11  ;;  %v11608_v56 = vld [vmem:[%s21698_s2 + $0xb40] sm:$0xff] }
 0x827   :  { %14849 = vmatprep.subr.bf16.mxu0 %v14848_v42  ;;  %v14872_v1 = vpack.c.bf16 %v11609_v4, %v11608_v56  ;;  %v11620_v56 = vld [vmem:[%s21698_s2 + $0xba0] sm:$0xff]  ;;  %v11621_v4 = vld [vmem:[%s21698_s2 + $0xba8] sm:$0xff] }
 0x829   :  { %13715 = vmatmul.mubr.f32.gmra.mrb[52].mxu0 %v21236_v28 }
 0x82a   :  { %14851 = vmatpush3.bf16.msra.mxu0 %v14848_v42  ;;  %13717 = vmatprep.mubr.f32.mxu0 %v21245_v0  ;;  %v21282_v42 = vld [vmem:[#allocation4 + $0x80] sm:$0xff] }
 0x82b   :  { %14853 = vmatprep.subr.bf16.mxu0 %v14852_v32 }
 0x82d   :  { %13718 = vmatmul.mubr.f32.gmra.mrb[54].mxu0 %v21248_v16 }
 0x82e   :  { %14855 = vmatpush3.bf16.msra.mxu0 %v14852_v32  ;;  %13752 = vmatprep.mubr.f32.mxu0 %v21076_v6  ;;  %v11606_v6 = vld [vmem:[%s21698_s2 + $0xb30] sm:$0xff]  ;;  %v14876_v32 = vpack.c.bf16 %v11611_v36, %v11610_v45  ;;  %v11623_v45 = vld [vmem:[%s21698_s2 + $0xbb8] sm:$0xff]  ;;  %v11625_v36 = vld [vmem:[%s21698_s2 + $0xbc8] sm:$0xff] }
 0x82f   :  { %14857 = vmatprep.subr.bf16.mxu0 %v14856_v43  ;;  %v14868_v2 = vpack.c.bf16 %v11607_v14, %v11606_v6  ;;  %v11618_v6 = vld [vmem:[%s21698_s2 + $0xb90] sm:$0xff]  ;;  %v11619_v14 = vld [vmem:[%s21698_s2 + $0xb98] sm:$0xff] }
 0x831   :  { %13753 = vmatmul.mubr.f32.vlgmr.msra.gmra.mrb[40].mxu0 %v21085_v59 }
 0x832   :  { %14859 = vmatpush3.bf16.msra.mxu0 %v14856_v43  ;;  %13755 = vmatprep.mubr.f32.mxu0 %v21088_v60  ;;  %v14880_v43 = vpack.c.bf16 %v11613_v47, %v11612_v38  ;;  %v11629_v38 = vld [vmem:[%s21698_s2 + $0xbe8] sm:$0xff] }
 0x833   :  { %14861 = vmatprep.subr.bf16.mxu0 %v14860_v25 }
 0x835   :  { %13756 = vmatmul.mubr.f32.gmra.mrb[42].mxu0 %v21097_v29 }
 0x836   :  { %14863 = vmatpush3.bf16.msra.mxu0 %v14860_v25  ;;  %13758 = vmatprep.mubr.f32.mxu0 %v21100_v26  ;;  %v11616_v25 = vld [vmem:[%s21698_s2 + $0xb80] sm:$0xff] }
 0x837   :  { %14865 = vmatprep.subr.bf16.mxu0 %v14864_v57  ;;  %v14888_v10 = vpack.c.bf16 %v11617_v8, %v11616_v25  ;;  %v11639_v8 = vld [vmem:[%s21698_s2 + $0xc38] sm:$0xff] }
 0x839   :  { %13759 = vmatmul.mubr.f32.gmra.mrb[44].mxu0 %v21109_v49 }
 0x83a   :  { %14867 = vmatpush3.bf16.msra.mxu0 %v14864_v57  ;;  %13761 = vmatprep.mubr.f32.mxu0 %v21112_v12  ;;  %v21316_v57 = vld [vmem:[#allocation4 + $0x120] sm:$0xff] }
 0x83b   :  { %14869 = vmatprep.subr.bf16.mxu0 %v14868_v2 }
 0x83d   :  { %13762 = vmatmul.mubr.f32.gmra.mrb[46].mxu0 %v21282_v42 }
 0x83e   :  { %14871 = vmatpush3.bf16.msra.mxu0 %v14868_v2  ;;  %13764 = vmatprep.mubr.f32.mxu0 %v21122_v34  ;;  %v11614_v34 = vld [vmem:[%s21698_s2 + $0xb70] sm:$0xff]  ;;  %v14892_v2 = vpack.c.bf16 %v11619_v14, %v11618_v6  ;;  %v11640_v6 = vld [vmem:[%s21698_s2 + $0xc40] sm:$0xff]  ;;  %v11641_v14 = vld [vmem:[%s21698_s2 + $0xc48] sm:$0xff] }
 0x83f   :  { %14873 = vmatprep.subr.bf16.mxu0 %v14872_v1  ;;  %v14884_v23 = vpack.c.bf16 %v11615_v41, %v11614_v34  ;;  %v11633_v34 = vld [vmem:[%s21698_s2 + $0xc08] sm:$0xff]  ;;  %v11635_v41 = vld [vmem:[%s21698_s2 + $0xc18] sm:$0xff] }
 0x841   :  { %13765 = vmatmul.mubr.f32.gmra.mrb[48].mxu0 %v21131_v9 }
 0x842   :  { %14875 = vmatpush3.bf16.msra.mxu0 %v14872_v1  ;;  %13767 = vmatprep.mubr.f32.mxu0 %v21134_v37  ;;  %v14896_v1 = vpack.c.bf16 %v11621_v4, %v11620_v56  ;;  %v21414_v56 = vld [vmem:[#allocation4 + $0x82] sm:$0xff] }
 0x843   :  { %14877 = vmatprep.subr.bf16.mxu0 %v14876_v32  ;;  %v11642_v4 = vld [vmem:[%s21698_s2 + $0xc50] sm:$0xff] }
 0x845   :  { %13768 = vmatmul.mubr.f32.gmra.mrb[50].mxu0 %v21143_v19 }
 0x846   :  { %14879 = vmatpush3.bf16.msra.mxu0 %v14876_v32  ;;  %13770 = vmatprep.mubr.f32.mxu0 %v21146_v7  ;;  %v11627_v32 = vld [vmem:[%s21698_s2 + $0xbd8] sm:$0xff] }
 0x847   :  { %14881 = vmatprep.subr.bf16.mxu0 %v14880_v43 }
 0x849   :  { %13771 = vmatmul.mubr.f32.gmra.mrb[52].mxu0 %v21155_v54 }
 0x84a   :  { %14883 = vmatpush3.bf16.msra.mxu0 %v14880_v43  ;;  %13773 = vmatprep.mubr.f32.mxu0 %v21158_v52  ;;  %v11631_v43 = vld [vmem:[%s21698_s2 + $0xbf8] sm:$0xff] }
 0x84b   :  { %14885 = vmatprep.subr.bf16.mxu0 %v14884_v23 }
 0x84d   :  { %13774 = vmatmul.mubr.f32.gmra.mrb[54].mxu0 %v21316_v57 }
 0x84e   :  { %14887 = vmatpush3.bf16.msra.mxu0 %v14884_v23  ;;  %13808 = vmatprep.mubr.f32.mxu0 %v20998_v39  ;;  %v11622_v39 = vld [vmem:[%s21698_s2 + $0xbb0] sm:$0xff]  ;;  %v11637_v23 = vld [vmem:[%s21698_s2 + $0xc28] sm:$0xff] }
 0x84f   :  { %14889 = vmatprep.subr.bf16.mxu0 %v14888_v10 }
 0x851   :  { %13809 = vmatmul.mubr.f32.vlgmr.msra.gmra.mrb[40].mxu0 %v20956_v18  ;;  %v14900_v18 = vpack.c.bf16 %v11623_v45, %v11622_v39  ;;  %v11644_v45 = vld [vmem:[%s21698_s2 + $0xc60] sm:$0xff] }
 0x852   :  { %14891 = vmatpush3.bf16.msra.mxu0 %v14888_v10  ;;  %13811 = vmatprep.mubr.f32.mxu0 %v20958_v51  ;;  %v11624_v51 = vld [vmem:[%s21698_s2 + $0xbc0] sm:$0xff] }
 0x853   :  { %14893 = vmatprep.subr.bf16.mxu0 %v14892_v2 }
 0x855   :  { %13812 = vmatmul.mubr.f32.gmra.mrb[42].mxu0 %v20960_v13  ;;  %v14904_v13 = vpack.c.bf16 %v11625_v36, %v11624_v51  ;;  %v11647_v36 = vld [vmem:[%s21698_s2 + $0xc78] sm:$0xff] }
 0x856   :  { %14895 = vmatpush3.bf16.msra.mxu0 %v14892_v2  ;;  %13814 = vmatprep.mubr.f32.mxu0 %v20962_v17  ;;  %v11626_v17 = vld [vmem:[%s21698_s2 + $0xbd0] sm:$0xff]  ;;  %v14936_v2 = vpack.c.bf16 %v11641_v14, %v11640_v6  ;;  %v10637_v14 = vld [vmem:[#allocation4 + $0x51] sm:$0xff] }
 0x857   :  { %14897 = vmatprep.subr.bf16.mxu0 %v14896_v1  ;;  %v10636_v6 = vld [vmem:[#allocation4 + $0x41] sm:$0xff] }
 0x859   :  { %13815 = vmatmul.mubr.f32.gmra.mrb[44].mxu0 %v20964_v44  ;;  %v14908_v44 = vpack.c.bf16 %v11627_v32, %v11626_v17  ;;  %v11648_v17 = vld [vmem:[%s21698_s2 + $0xc80] sm:$0xff]  ;;  %v11649_v32 = vld [vmem:[%s21698_s2 + $0xc88] sm:$0xff] }
 0x85a   :  { %14899 = vmatpush3.bf16.msra.mxu0 %v14896_v1  ;;  %13817 = vmatprep.mubr.f32.mxu0 %v20966_v21  ;;  %v11628_v21 = vld [vmem:[%s21698_s2 + $0xbe0] sm:$0xff]  ;;  %v11643_v1 = vld [vmem:[%s21698_s2 + $0xc58] sm:$0xff] }
 0x85b   :  { %14901 = vmatprep.subr.bf16.mxu0 %v14900_v18  ;;  %v14912_v47 = vpack.c.bf16 %v11629_v38, %v11628_v21  ;;  %v14940_v39 = vpack.c.bf16 %v11643_v1, %v11642_v4  ;;  %v21448_v21 = vld [vmem:[#allocation4 + $0x122] sm:$0xff] }
 0x85c   :  { %v11650_v38 = vld [vmem:[%s21698_s2 + $0xc90] sm:$0xff]  ;;  %v11671_v4 = vld [vmem:[%s21698_s2 + $0xd38] sm:$0xff] }
 0x85d   :  { %13818 = vmatmul.mubr.f32.gmra.mrb[46].mxu0 %v21002_v40  ;;  %v10638_v1 = vld [vmem:[#allocation4 + $0x61] sm:$0xff] }
 0x85e   :  { %14903 = vmatpush3.bf16.msra.mxu0 %v14900_v18  ;;  %13820 = vmatprep.mubr.f32.mxu0 %v21000_v58  ;;  %v11630_v58 = vld [vmem:[%s21698_s2 + $0xbf0] sm:$0xff]  ;;  %v11645_v18 = vld [vmem:[%s21698_s2 + $0xc68] sm:$0xff] }
 0x85f   :  { %14905 = vmatprep.subr.bf16.mxu0 %v14904_v13  ;;  %v14944_v51 = vpack.c.bf16 %v11645_v18, %v11644_v45  ;;  %v10639_v45 = vld [vmem:[#allocation4 + $0x71] sm:$0xff] }
 0x860   :  { %v11672_v18 = vld [vmem:[%s21698_s2 + $0xd40] sm:$0xff] }
 0x861   :  { %13821 = vmatmul.mubr.f32.gmra.mrb[48].mxu0 %v20968_v48  ;;  %v14916_v48 = vpack.c.bf16 %v11631_v43, %v11630_v58  ;;  %v11652_v43 = vld [vmem:[%s21698_s2 + $0xca0] sm:$0xff] }
 0x862   :  { %14907 = vmatpush3.bf16.msra.mxu0 %v14904_v13  ;;  %13823 = vmatprep.mubr.f32.mxu0 %v20970_v5  ;;  %v11632_v5 = vld [vmem:[%s21698_s2 + $0xc00] sm:$0xff] }
 0x863   :  { %14909 = vmatprep.subr.bf16.mxu0 %v14908_v44 }
 0x865   :  { %13824 = vmatmul.mubr.f32.gmra.mrb[50].mxu0 %v20972_v31  ;;  %v14920_v31 = vpack.c.bf16 %v11633_v34, %v11632_v5  ;;  %v11655_v34 = vld [vmem:[%s21698_s2 + $0xcb8] sm:$0xff] }
 0x866   :  { %14911 = vmatpush3.bf16.msra.mxu0 %v14908_v44  ;;  %13826 = vmatprep.mubr.f32.mxu0 %v20974_v27  ;;  %v11634_v27 = vld [vmem:[%s21698_s2 + $0xc10] sm:$0xff]  ;;  %v14952_v44 = vpack.c.bf16 %v11649_v32, %v11648_v17  ;;  %v11675_v17 = vld [vmem:[%s21698_s2 + $0xd58] sm:$0xff] }
 0x867   :  { %14913 = vmatprep.subr.bf16.mxu0 %v14912_v47  ;;  %v10642_v32 = vld [vmem:[#allocation4 + $0xc1] sm:$0xff] }
 0x869   :  { %13827 = vmatmul.mubr.f32.gmra.mrb[52].mxu0 %v20976_v61  ;;  %v14924_v61 = vpack.c.bf16 %v11635_v41, %v11634_v27  ;;  %v11659_v27 = vld [vmem:[%s21698_s2 + $0xcd8] sm:$0xff]  ;;  %v11661_v41 = vld [vmem:[%s21698_s2 + $0xce8] sm:$0xff] }
 0x86a   :  { %14915 = vmatpush3.bf16.msra.mxu0 %v14912_v47  ;;  %13829 = vmatprep.mubr.f32.mxu0 %v20978_v30  ;;  %v11636_v30 = vld [vmem:[%s21698_s2 + $0xc20] sm:$0xff]  ;;  %v11651_v47 = vld [vmem:[%s21698_s2 + $0xc98] sm:$0xff] }
 0x86b   :  { %14917 = vmatprep.subr.bf16.mxu0 %v14916_v48  ;;  %v14928_v25 = vpack.c.bf16 %v11637_v23, %v11636_v30  ;;  %v14956_v58 = vpack.c.bf16 %v11651_v47, %v11650_v38  ;;  %v11663_v30 = vld [vmem:[%s21698_s2 + $0xcf8] sm:$0xff]  ;;  %v11665_v23 = vld [vmem:[%s21698_s2 + $0xd08] sm:$0xff] }
 0x86c   :  { %v10643_v38 = vld [vmem:[#allocation4 + $0xd1] sm:$0xff] }
 0x86d   :  { %13830 = vmatmul.mubr.f32.gmra.mrb[54].mxu0 %v21010_v35  ;;  %v11677_v47 = vld [vmem:[%s21698_s2 + $0xd68] sm:$0xff] }
 0x86e   :  { %14919 = vmatpush3.bf16.msra.mxu0 %v14916_v48  ;;  %13864 = vmatprep.mubr.f32.mxu0 %v21167_v3  ;;  %v11638_v3 = vld [vmem:[%s21698_s2 + $0xc30] sm:$0xff]  ;;  %v11653_v48 = vld [vmem:[%s21698_s2 + $0xca8] sm:$0xff] }
 0x86f   :  { %14921 = vmatprep.subr.bf16.mxu0 %v14920_v31  ;;  %v14932_v10 = vpack.c.bf16 %v11639_v8, %v11638_v3  ;;  %v14960_v5 = vpack.c.bf16 %v11653_v48, %v11652_v43  ;;  %v10634_v3 = vld [vmem:[#allocation4 + $0x21] sm:$0xff]  ;;  %v10635_v8 = vld [vmem:[#allocation4 + $0x31] sm:$0xff] }
 0x870   :  { %v10645_v48 = vld [vmem:[#allocation4 + $0xf1] sm:$0xff] }
 0x871   :  { %13865 = vmatmul.mubr.f32.vlgmr.msra.gmra.mrb[40].mxu0 %v21176_v20 }
 0x872   :  { %14923 = vmatpush3.bf16.msra.mxu0 %v14920_v31  ;;  %13867 = vmatprep.mubr.f32.mxu0 %v21179_v33  ;;  %v11657_v31 = vld [vmem:[%s21698_s2 + $0xcc8] sm:$0xff] }
 0x873   :  { %14925 = vmatprep.subr.bf16.mxu0 %v14924_v61 }
 0x875   :  { %13868 = vmatmul.mubr.f32.gmra.mrb[42].mxu0 %v21188_v22 }
 0x876   :  { %14927 = vmatpush3.bf16.msra.mxu0 %v14924_v61  ;;  %13870 = vmatprep.mubr.f32.mxu0 %v21191_v62 }
 0x877   :  { %14929 = vmatprep.subr.bf16.mxu0 %v14928_v25 }
 0x879   :  { %13871 = vmatmul.mubr.f32.gmra.mrb[44].mxu0 %v21200_v24 }
 0x87a   :  { %14931 = vmatpush3.bf16.msra.mxu0 %v14928_v25  ;;  %13873 = vmatprep.mubr.f32.mxu0 %v21203_v50  ;;  %v11667_v25 = vld [vmem:[%s21698_s2 + $0xd18] sm:$0xff] }
 0x87b   :  { %14933 = vmatprep.subr.bf16.mxu0 %v14932_v10 }
 0x87d   :  { %13874 = vmatmul.mubr.f32.gmra.mrb[46].mxu0 %v21414_v56 }
 0x87e   :  { %14935 = vmatpush3.bf16.msra.mxu0 %v14932_v10  ;;  %13876 = vmatprep.mubr.f32.mxu0 %v21212_v55  ;;  %v11646_v55 = vld [vmem:[%s21698_s2 + $0xc70] sm:$0xff]  ;;  %v11669_v10 = vld [vmem:[%s21698_s2 + $0xd28] sm:$0xff] }
 0x87f   :  { %14937 = vmatprep.subr.bf16.mxu0 %v14936_v2  ;;  %v14948_v13 = vpack.c.bf16 %v11647_v36, %v11646_v55  ;;  %v10641_v55 = vld [vmem:[#allocation4 + $0x91] sm:$0xff] }
 0x881   :  { %13877 = vmatmul.mubr.f32.gmra.mrb[48].mxu0 %v21221_v63 }
 0x882   :  { %14939 = vmatpush3.bf16.msra.mxu0 %v14936_v2  ;;  %13879 = vmatprep.mubr.f32.mxu0 %v21224_v46  ;;  %v11670_v2 = vld [vmem:[%s21698_s2 + $0xd30] sm:$0xff] }
 0x883   :  { %14941 = vmatprep.subr.bf16.mxu0 %v14940_v39 }
 0x885   :  { %13880 = vmatmul.mubr.f32.gmra.mrb[50].mxu0 %v21233_v11 }
 0x886   :  { %14943 = vmatpush3.bf16.msra.mxu0 %v14940_v39  ;;  %13882 = vmatprep.mubr.f32.mxu0 %v21236_v28  ;;  %v14996_v39 = vpack.c.bf16 %v11671_v4, %v11670_v2 }
 0x887   :  { %14945 = vmatprep.subr.bf16.mxu0 %v14944_v51 }
 0x889   :  { %13883 = vmatmul.mubr.f32.gmra.mrb[52].mxu0 %v21245_v0 }
 0x88a   :  { %14947 = vmatpush3.bf16.msra.mxu0 %v14944_v51  ;;  %13885 = vmatprep.mubr.f32.mxu0 %v21248_v16  ;;  %v11673_v51 = vld [vmem:[%s21698_s2 + $0xd48] sm:$0xff] }
 0x88b   :  { %14949 = vmatprep.subr.bf16.mxu0 %v14948_v13  ;;  %v15000_v36 = vpack.c.bf16 %v11673_v51, %v11672_v18 }
 0x88d   :  { %13886 = vmatmul.mubr.f32.gmra.mrb[54].mxu0 %v21448_v21 }
 0x88e   :  { %14951 = vmatpush3.bf16.msra.mxu0 %v14948_v13  ;;  %13920 = vmatprep.mubr.f32.mxu0 %v21085_v59  ;;  %v11654_v59 = vld [vmem:[%s21698_s2 + $0xcb0] sm:$0xff] }
 0x88f   :  { %14953 = vmatprep.subr.bf16.mxu0 %v14952_v44  ;;  %v11674_v13 = vld [vmem:[%s21698_s2 + $0xd50] sm:$0xff] }
 0x891   :  { %13921 = vmatmul.mubr.f32.vlgmr.msra.gmra.mrb[40].mxu0 %v21088_v60  ;;  %v14964_v60 = vpack.c.bf16 %v11655_v34, %v11654_v59  ;;  %v11679_v59 = vld [vmem:[%s21698_s2 + $0xd78] sm:$0xff] }
 0x892   :  { %14955 = vmatpush3.bf16.msra.mxu0 %v14952_v44  ;;  %13923 = vmatprep.mubr.f32.mxu0 %v21097_v29  ;;  %v11656_v29 = vld [vmem:[%s21698_s2 + $0xcc0] sm:$0xff]  ;;  %v15004_v44 = vpack.c.bf16 %v11675_v17, %v11674_v13  ;;  %v10646_v34 = vld [vmem:[#allocation4 + $0x101] sm:$0xff] }
 0x893   :  { %14957 = vmatprep.subr.bf16.mxu0 %v14956_v58 }
 0x895   :  { %13924 = vmatmul.mubr.f32.gmra.mrb[42].mxu0 %v21100_v26  ;;  %v14968_v26 = vpack.c.bf16 %v11657_v31, %v11656_v29  ;;  %v10647_v29 = vld [vmem:[#allocation4 + $0x111] sm:$0xff] }
 0x896   :  { %14959 = vmatpush3.bf16.msra.mxu0 %v14956_v58  ;;  %13926 = vmatprep.mubr.f32.mxu0 %v21109_v49  ;;  %v11658_v49 = vld [vmem:[%s21698_s2 + $0xcd0] sm:$0xff]  ;;  %v10649_v31 = vld [vmem:[#allocation4 + $0x131] sm:$0xff] }
 0x897   :  { %14961 = vmatprep.subr.bf16.mxu0 %v14960_v5  ;;  %v10644_v58 = vld [vmem:[#allocation4 + $0xe1] sm:$0xff] }
 0x899   :  { %13927 = vmatmul.mubr.f32.gmra.mrb[44].mxu0 %v21112_v12  ;;  %v14972_v12 = vpack.c.bf16 %v11659_v27, %v11658_v49 }
 0x89a   :  { %14963 = vmatpush3.bf16.msra.mxu0 %v14960_v5  ;;  %13929 = vmatprep.mubr.f32.mxu0 %v21282_v42  ;;  %v11660_v42 = vld [vmem:[%s21698_s2 + $0xce0] sm:$0xff]  ;;  %v11678_v5 = vld [vmem:[%s21698_s2 + $0xd70] sm:$0xff] }
 0x89b   :  { %14965 = vmatprep.subr.bf16.mxu0 %v14964_v60  ;;  %v14976_v61 = vpack.c.bf16 %v11661_v41, %v11660_v42 }
 0x89d   :  { %13930 = vmatmul.mubr.f32.gmra.mrb[46].mxu0 %v21073_v15 }
 0x89e   :  { %14967 = vmatpush3.bf16.msra.mxu0 %v14964_v60  ;;  %13932 = vmatprep.mubr.f32.mxu0 %v21131_v9  ;;  %v11662_v9 = vld [vmem:[%s21698_s2 + $0xcf0] sm:$0xff]  ;;  %v15012_v60 = vpack.c.bf16 %v11679_v59, %v11678_v5 }
 0x89f   :  { %14969 = vmatprep.subr.bf16.mxu0 %v14968_v26 }
 0x8a1   :  { %13933 = vmatmul.mubr.f32.gmra.mrb[48].mxu0 %v21134_v37  ;;  %v14980_v37 = vpack.c.bf16 %v11663_v30, %v11662_v9 }
 0x8a2   :  { %14971 = vmatpush3.bf16.msra.mxu0 %v14968_v26  ;;  %13935 = vmatprep.mubr.f32.mxu0 %v21143_v19  ;;  %v11664_v19 = vld [vmem:[%s21698_s2 + $0xd00] sm:$0xff] }
 0x8a3   :  { %14973 = vmatprep.subr.bf16.mxu0 %v14972_v12  ;;  %v10835_v26 = vld [vmem:[#allocation4 + $0x92] sm:$0xff] }
 0x8a5   :  { %13936 = vmatmul.mubr.f32.gmra.mrb[50].mxu0 %v21146_v7  ;;  %v14984_v7 = vpack.c.bf16 %v11665_v23, %v11664_v19 }
 0x8a6   :  { %14975 = vmatpush3.bf16.msra.mxu0 %v14972_v12  ;;  %13938 = vmatprep.mubr.f32.mxu0 %v21155_v54  ;;  %v11666_v54 = vld [vmem:[%s21698_s2 + $0xd10] sm:$0xff] }
 0x8a7   :  { %14977 = vmatprep.subr.bf16.mxu0 %v14976_v61 }
 0x8a9   :  { %13939 = vmatmul.mubr.f32.gmra.mrb[52].mxu0 %v21158_v52  ;;  %v14988_v52 = vpack.c.bf16 %v11667_v25, %v11666_v54 }
 0x8aa   :  { %14979 = vmatpush3.bf16.msra.mxu0 %v14976_v61  ;;  %13941 = vmatprep.mubr.f32.mxu0 %v21316_v57  ;;  %v11668_v57 = vld [vmem:[%s21698_s2 + $0xd20] sm:$0xff] }
 0x8ab   :  { %14981 = vmatprep.subr.bf16.mxu0 %v14980_v37 }
 0x8ad   :  { %13942 = vmatmul.mubr.f32.gmra.mrb[54].mxu0 %v21073_v15  ;;  %v14992_v15 = vpack.c.bf16 %v11669_v10, %v11668_v57 }
 0x8ae   :  { %14983 = vmatpush3.bf16.msra.mxu0 %v14980_v37  ;;  %13976 = vmatprep.mubr.f32.mxu0 %v10634_v3 }
 0x8af   :  { %14985 = vmatprep.subr.bf16.mxu0 %v14984_v7 }
 0x8b1   :  { %13977 = vmatmul.mubr.f32.vlgmr.msra.gmra.mrb[40].mxu0 %v10635_v8 }
 0x8b2   :  { %14987 = vmatpush3.bf16.msra.mxu0 %v14984_v7  ;;  %13979 = vmatprep.mubr.f32.mxu0 %v10636_v6 }
 0x8b3   :  { %14989 = vmatprep.subr.bf16.mxu0 %v14988_v52 }
 0x8b5   :  { %13980 = vmatmul.mubr.f32.gmra.mrb[42].mxu0 %v10637_v14 }
 0x8b6   :  { %14991 = vmatpush3.bf16.msra.mxu0 %v14988_v52  ;;  %13982 = vmatprep.mubr.f32.mxu0 %v10638_v1 }
 0x8b7   :  { %14993 = vmatprep.subr.bf16.mxu0 %v14992_v15 }
 0x8b9   :  { %13983 = vmatmul.mubr.f32.gmra.mrb[44].mxu0 %v10639_v45 }
 0x8ba   :  { %14995 = vmatpush3.bf16.msra.mxu0 %v14992_v15  ;;  %13985 = vmatprep.mubr.f32.mxu0 %v21002_v40  ;;  %v11676_v40 = vld [vmem:[%s21698_s2 + $0xd60] sm:$0xff] }
 0x8bb   :  { %14997 = vmatprep.subr.bf16.mxu0 %v14996_v39  ;;  %v15008_v43 = vpack.c.bf16 %v11677_v47, %v11676_v40 }
 0x8bd   :  { %13986 = vmatmul.mubr.f32.gmra.mrb[46].mxu0 %v10641_v55 }
 0x8be   :  { %14999 = vmatpush3.bf16.msra.mxu0 %v14996_v39  ;;  %13988 = vmatprep.mubr.f32.mxu0 %v10642_v32 }
 0x8bf   :  { %15001 = vmatprep.subr.bf16.mxu0 %v15000_v36 }
 0x8c1   :  { %13989 = vmatmul.mubr.f32.gmra.mrb[48].mxu0 %v10643_v38 }
 0x8c2   :  { %15003 = vmatpush3.bf16.msra.mxu0 %v15000_v36  ;;  %13991 = vmatprep.mubr.f32.mxu0 %v10644_v58 }
 0x8c3   :  { %15005 = vmatprep.subr.bf16.mxu0 %v15004_v44 }
 0x8c5   :  { %13992 = vmatmul.mubr.f32.gmra.mrb[50].mxu0 %v10645_v48 }
 0x8c6   :  { %15007 = vmatpush3.bf16.msra.mxu0 %v15004_v44  ;;  %13994 = vmatprep.mubr.f32.mxu0 %v10646_v34 }
 0x8c7   :  { %15009 = vmatprep.subr.bf16.mxu0 %v15008_v43 }
 0x8c9   :  { %13995 = vmatmul.mubr.f32.gmra.mrb[52].mxu0 %v10647_v29 }
 0x8ca   :  { %15011 = vmatpush3.bf16.msra.mxu0 %v15008_v43  ;;  %13997 = vmatprep.mubr.f32.mxu0 %v21010_v35  ;;  %v10843_v35 = vld [vmem:[#allocation4 + $0x132] sm:$0xff] }
 0x8cb   :  { %15013 = vmatprep.subr.bf16.mxu0 %v15012_v60 }
 0x8cd   :  { %13998 = vmatmul.mubr.f32.gmra.mrb[54].mxu0 %v10649_v31 }
 0x8ce   :  { %15015 = vmatpush3.bf16.msra.mxu0 %v15012_v60  ;;  %14032 = vmatprep.mubr.f32.mxu0 %v21176_v20 }
 0x8d1   :  { %14033 = vmatmul.mubr.f32.vlgmr.msra.gmra.mrb[40].mxu0 %v21179_v33 }
 0x8d2   :  { %14035 = vmatprep.mubr.f32.mxu0 %v21188_v22 }
 0x8d5   :  { %14036 = vmatmul.mubr.f32.gmra.mrb[42].mxu0 %v21191_v62 }
 0x8d6   :  { %14038 = vmatprep.mubr.f32.mxu0 %v21200_v24 }
 0x8d9   :  { %14039 = vmatmul.mubr.f32.gmra.mrb[44].mxu0 %v21203_v50 }
 0x8da   :  { %14041 = vmatprep.mubr.f32.mxu0 %v21414_v56 }
 0x8dd   :  { %14042 = vmatmul.mubr.f32.gmra.mrb[46].mxu0 %v10835_v26 }
 0x8de   :  { %14044 = vmatprep.mubr.f32.mxu0 %v21221_v63 }
 0x8e1   :  { %14045 = vmatmul.mubr.f32.gmra.mrb[48].mxu0 %v21224_v46 }
 0x8e2   :  { %14047 = vmatprep.mubr.f32.mxu0 %v21233_v11 }
 0x8e5   :  { %14048 = vmatmul.mubr.f32.gmra.mrb[50].mxu0 %v21236_v28 }
 0x8e6   :  { %14050 = vmatprep.mubr.f32.mxu0 %v21245_v0 }
 0x8e9   :  { %14051 = vmatmul.mubr.f32.gmra.mrb[52].mxu0 %v21248_v16 }
 0x8ea   :  { %14053 = vmatprep.mubr.f32.mxu0 %v21448_v21 }
 0x8ed   :  { %14054 = vmatmul.mubr.f32.gmra.mrb[54].mxu0 %v10843_v35 }
 0x9a4   :  { %v21573_v20 = vpop.f32.mrb[40].mxu0 }
 0x9a5   :  { %v11044_v33 = vmul.f32 %v21573_v20, %v21573_v20  ;;  %v21577_v22 = vpop.f32.mrb[41].mxu0 }
 0x9a6   :  { %v11022_v62 = vadd.f32 %v21573_v20, %v21577_v22  ;;  %v11043_v24 = vmul.f32 %v21577_v22, %v21577_v22 }
 0x9a8   :  { %v11059_v50 = vadd.f32 %v11044_v33, %v11043_v24  ;;  %v21583_v63 = vpop.f32.mrb[42].mxu0 }
 0x9a9   :  { %v21585_v46 = vpop.f32.mrb[43].mxu0  ;;  %v11046_v0 = vmul.f32 %v21583_v63, %v21583_v63 }
 0x9aa   :  { %v11023_v11 = vadd.f32 %v11022_v62, %v21585_v46  ;;  %v11045_v28 = vmul.f32 %v21585_v46, %v21585_v46 }
 0x9ac   :  { %v11060_v16 = vadd.f32 %v11059_v50, %v11045_v28  ;;  %v21592_v56 = vpop.f32.mrb[44].mxu0  ;;  %v11024_v21 = vadd.f32 %v21583_v63, %v11023_v11 }
 0x9ad   :  { %v21595_v49 = vpop.f32.mrb[45].mxu0  ;;  %v11048_v41 = vmul.f32 %v21592_v56, %v21592_v56 }
 0x9ae   :  { %v11025_v27 = vadd.f32 %v11024_v21, %v21595_v49  ;;  %v11047_v12 = vmul.f32 %v21595_v49, %v21595_v49  ;;  %v11061_v42 = vadd.f32 %v11060_v16, %v11046_v0 }
 0x9b0   :  { %v11062_v61 = vadd.f32 %v11061_v42, %v11047_v12  ;;  %v21602_v9 = vpop.f32.mrb[46].mxu0  ;;  %v11026_v30 = vadd.f32 %v21592_v56, %v11025_v27 }
 0x9b1   :  { %v21605_v37 = vpop.f32.mrb[47].mxu0  ;;  %v11050_v54 = vmul.f32 %v21602_v9, %v21602_v9 }
 0x9b2   :  { %v11027_v19 = vadd.f32 %v11026_v30, %v21605_v37  ;;  %v11049_v23 = vmul.f32 %v21605_v37, %v21605_v37  ;;  %v11063_v7 = vadd.f32 %v11062_v61, %v11048_v41 }
 0x9b4   :  { %v11064_v25 = vadd.f32 %v11063_v7, %v11049_v23  ;;  %v21612_v3 = vpop.f32.mrb[48].mxu0  ;;  %v11028_v52 = vadd.f32 %v21602_v9, %v11027_v19  ;;  %v11085_v7 = vld [vmem:[%s21697_s3 + $0x6] sm:$0x1] }
 0x9b5   :  { %v21615_v8 = vpop.f32.mrb[49].mxu0  ;;  %v11052_v15 = vmul.f32 %v21612_v3, %v21612_v3 }
 0x9b6   :  { %v11029_v57 = vadd.f32 %v11028_v52, %v21615_v8  ;;  %v11051_v10 = vmul.f32 %v21615_v8, %v21615_v8  ;;  %v11065_v6 = vadd.f32 %v11064_v25, %v11050_v54  ;;  %v11086_v52 = vld [vmem:[%s21697_s3 + $0x7] sm:$0x1] }
 0x9b8   :  { %v11066_v14 = vadd.f32 %v11065_v6, %v11051_v10  ;;  %v21622_v2 = vpop.f32.mrb[50].mxu0  ;;  %v11030_v4 = vadd.f32 %v21612_v3, %v11029_v57 }
 0x9b9   :  { %v10977_v1 = vpop.f32.mrb[51].mxu0  ;;  %v11054_v51 = vmul.f32 %v21622_v2, %v21622_v2 }
 0x9ba   :  { %v11031_v39 = vadd.f32 %v11030_v4, %v10977_v1  ;;  %v11053_v45 = vmul.f32 %v10977_v1, %v10977_v1  ;;  %v11067_v18 = vadd.f32 %v11066_v14, %v11052_v15 }
 0x9bc   :  { %v11068_v55 = vadd.f32 %v11067_v18, %v11053_v45  ;;  %v14052_v36 = vpop.f32.mrb[52].mxu0  ;;  %v11032_v13 = vadd.f32 %v21622_v2, %v11031_v39 }
 0x9bd   :  { %v10987_v17 = vpop.f32.mrb[53].mxu0  ;;  %v11056_v40 = vmul.f32 %v14052_v36, %v14052_v36 }
 0x9be   :  { %v11033_v32 = vadd.f32 %v11032_v13, %v10987_v17  ;;  %v11055_v44 = vmul.f32 %v10987_v17, %v10987_v17  ;;  %v11069_v38 = vadd.f32 %v11068_v55, %v11054_v51 }
 0x9c0   :  { %v11070_v47 = vadd.f32 %v11069_v38, %v11055_v44  ;;  %v14055_v58 = vpop.f32.mrb[54].mxu0  ;;  %v11034_v43 = vadd.f32 %v14052_v36, %v11033_v32 }
 0x9c1   :  { %v10997_v48 = vpop.f32.mrb[55].mxu0  ;;  %v11058_v60 = vmul.f32 %v14055_v58, %v14055_v58 }
 0x9c2   :  { %v11035_v5 = vadd.f32 %v11034_v43, %v10997_v48  ;;  %v11057_v59 = vmul.f32 %v10997_v48, %v10997_v48  ;;  %v11071_v34 = vadd.f32 %v11070_v47, %v11056_v40 }
 0x9c4   :  { %v11036_v29 = vadd.f32 %v14055_v58, %v11035_v5  ;;  %v11072_v31 = vadd.f32 %v11071_v34, %v11057_v59 }
 0x9c6   :  { %v11037_v26 = vrot.slane %v11036_v29, 4  ;;  %v11073_v35 = vadd.f32 %v11072_v31, %v11058_v60 }
 0x9c8   :  { %v11038_v33 = vadd.f32 %v11037_v26, %v11036_v29  ;;  %v11074_v62 = vrot.slane %v11073_v35, 4 }
 0x9ca   :  { %v11039_v24 = vrot.slane %v11038_v33, 2  ;;  %v11075_v50 = vadd.f32 %v11074_v62, %v11073_v35 }
 0x9cc   :  { %v11040_v11 = vadd.f32 %v11039_v24, %v11038_v33  ;;  %v11076_v28 = vrot.slane %v11075_v50, 2 }
 0x9ce   :  { %v11041_v0 = vrot.slane %v11040_v11, 1  ;;  %v11077_v16 = vadd.f32 %v11076_v28, %v11075_v50 }
 0x9d0   :  { %v11042_v21 = vadd.f32 %v11041_v0, %v11040_v11  ;;  %v11078_v27 = vrot.slane %v11077_v16, 1 }
 0x9d2   :  { %v11079_v12 = vadd.f32 %v11078_v27, %v11077_v16  ;;  %v11080_v42 = vmul.f32 0.0078125, %v11042_v21 }
 0x9d4   :  { %v11081_v41 = vmul.f32 0.0078125, %v11079_v12  ;;  %v11082_v61 = vmul.f32 %v11080_v42, %v11080_v42 }
 0x9d6   :  { %v11083_v30 = vsub.f32 %v11081_v41, %v11082_v61 }
 0x9d8   :  { %v11084_v19 = vmax.f32 %v11083_v30, 0.0 }
 0x9da   :  { %v11087_v23 = vadd.f32 1e-05, %v11084_v19 }
 0x9dc   :  { %15411 = vrsqrt.f32 %v11087_v23 }
 0x9e6   :  { %v15412_v54 = vpop.eup %15411 }
 0x9e7   :  { %v11089_v25 = vmul.f32 %v15412_v54, %v11085_v7 }
 0x9e9   :  { %v11090_v57 = vmul.f32 %v11089_v25, %v11080_v42  ;;  %v11095_v10 = vrot.slane %v11089_v25, %v22299_v53 }
 0x9eb   :  { %v11091_v6 = vsub.f32 %v11086_v52, %v11090_v57  ;;  %v11096_v15 = vmul.f32 %v11095_v10, %v21577_v22  ;;  %v11097_v14 = vmul.f32 %v21573_v20, %v11095_v10  ;;  %v11098_v4 = vmul.f32 %v11095_v10, %v21585_v46 }
 0x9ec   :  { %v11099_v39 = vmul.f32 %v21583_v63, %v11095_v10  ;;  %v11100_v45 = vmul.f32 %v11095_v10, %v21595_v49  ;;  %v11101_v18 = vmul.f32 %v21592_v56, %v11095_v10  ;;  %v11102_v51 = vmul.f32 %v11095_v10, %v21605_v37 }
 0x9ed   :  { %v11103_v55 = vmul.f32 %v21602_v9, %v11095_v10  ;;  %v11104_v13 = vmul.f32 %v11095_v10, %v21615_v8  ;;  %v11105_v32 = vmul.f32 %v21612_v3, %v11095_v10  ;;  %v11106_v44 = vmul.f32 %v11095_v10, %v10977_v1 }
 0x9ee   :  { %v11107_v22 = vmul.f32 %v21622_v2, %v11095_v10  ;;  %v11108_v20 = vmul.f32 %v11095_v10, %v10987_v17  ;;  %v11109_v38 = vmul.f32 %v14052_v36, %v11095_v10  ;;  %v11110_v46 = vmul.f32 %v11095_v10, %v10997_v48 }
 0x9ef   :  { %v11111_v40 = vmul.f32 %v14055_v58, %v11095_v10  ;;  %v11115_v63 = vrot.slane %v11091_v6, %v22299_v53 }
 0x9f1   :  { %v11116_v49 = vadd.f32 %v11115_v63, %v11096_v15  ;;  %v11117_v47 = vadd.f32 %v11115_v63, %v11097_v14  ;;  %v11118_v56 = vadd.f32 %v11115_v63, %v11098_v4  ;;  %v11119_v43 = vadd.f32 %v11115_v63, %v11099_v39 }
 0x9f2   :  { %v11120_v37 = vadd.f32 %v11115_v63, %v11100_v45  ;;  %v11121_v5 = vadd.f32 %v11115_v63, %v11101_v18  ;;  %v11122_v9 = vadd.f32 %v11115_v63, %v11102_v51  ;;  %v11123_v59 = vadd.f32 %v11115_v63, %v11103_v55 }
 0x9f3   :  { %v11124_v8 = vadd.f32 %v11115_v63, %v11104_v13  ;;  %v11125_v34 = vadd.f32 %v11115_v63, %v11105_v32  ;;  %v11126_v3 = vadd.f32 %v11115_v63, %v11106_v44  ;;  %v11127_v1 = vadd.f32 %v11115_v63, %v11107_v22 }
 0x9f4   :  { %v11128_v60 = vadd.f32 %v11115_v63, %v11108_v20  ;;  %v11129_v2 = vadd.f32 %v11115_v63, %v11109_v38  ;;  %v11130_v17 = vadd.f32 %v11115_v63, %v11110_v46  ;;  %v11131_v36 = vadd.f32 %v11115_v63, %v11111_v40 }
 0x9f5   :  { %v11132_v48 = vmax.f32 %v11116_v49, 0.0  ;;  %v11133_v58 = vmax.f32 %v11117_v47, 0.0  ;;  %v11134_v29 = vmax.f32 %v11118_v56, 0.0  ;;  %v11135_v53 = vmax.f32 %v11119_v43, 0.0 }
 0x9f6   :  { %v11136_v31 = vmax.f32 %v11120_v37, 0.0  ;;  %v11137_v26 = vmax.f32 %v11121_v5, 0.0  ;;  %v11138_v35 = vmax.f32 %v11122_v9, 0.0  ;;  %v11139_v33 = vmax.f32 %v11123_v59, 0.0 }
 0x9f7   :  { %v11140_v62 = vmax.f32 %v11124_v8, 0.0  ;;  %v11141_v24 = vmax.f32 %v11125_v34, 0.0  ;;  %v11142_v50 = vmax.f32 %v11126_v3, 0.0  ;;  %v11143_v11 = vmax.f32 %v11127_v1, 0.0  ;;  %11148 = vst [vmem:[%s21699_s4] sm:$0xff] %v11132_v48  ;;  %11149 = vst [vmem:[%s21699_s4 + $0x8] sm:$0xff] %v11133_v58 }
 0x9f8   :  { %11150 = vst [vmem:[%s21699_s4 + $0x10] sm:$0xff] %v11134_v29  ;;  %11151 = vst [vmem:[%s21699_s4 + $0x18] sm:$0xff] %v11135_v53  ;;  %v11144_v28 = vmax.f32 %v11128_v60, 0.0  ;;  %v11145_v0 = vmax.f32 %v11129_v2, 0.0  ;;  %v11146_v16 = vmax.f32 %v11130_v17, 0.0  ;;  %v11147_v21 = vmax.f32 %v11131_v36, 0.0 }
 0x9f9   :  { %11152 = vst [vmem:[%s21699_s4 + $0x20] sm:$0xff] %v11136_v31  ;;  %11153 = vst [vmem:[%s21699_s4 + $0x28] sm:$0xff] %v11137_v26 }
 0x9fa   :  { %11154 = vst [vmem:[%s21699_s4 + $0x30] sm:$0xff] %v11138_v35  ;;  %11155 = vst [vmem:[%s21699_s4 + $0x38] sm:$0xff] %v11139_v33 }
 0x9fb   :  { %11156 = vst [vmem:[%s21699_s4 + $0x40] sm:$0xff] %v11140_v62  ;;  %11157 = vst [vmem:[%s21699_s4 + $0x48] sm:$0xff] %v11141_v24 }
 0x9fc   :  { %11158 = vst [vmem:[%s21699_s4 + $0x50] sm:$0xff] %v11142_v50  ;;  %11159 = vst [vmem:[%s21699_s4 + $0x58] sm:$0xff] %v11143_v11 }
 0x9fd   :  { %11160 = vst [vmem:[%s21699_s4 + $0x60] sm:$0xff] %v11144_v28  ;;  %11161 = vst [vmem:[%s21699_s4 + $0x68] sm:$0xff] %v11145_v0 }
 0x9fe   :  { %11162 = vst [vmem:[%s21699_s4 + $0x70] sm:$0xff] %v11146_v16  ;;  %11163 = vst [vmem:[%s21699_s4 + $0x78] sm:$0xff] %v11147_v21 }

</bundles_post_ra>
